<compile_context>
chip_gen: v7x
topology: tpu7x:2x2x1
jax: 0.10.0
libtpu: 0.0.40
codegen_flags: <defaults>
</compile_context>

<pallas_src>
import jax
import jax.numpy as jnp
from jax.experimental import pallas as pl
from jax.experimental.pallas import tpu as pltpu


def _round_up(x: int, m: int) -> int:
    return ((x + m - 1) // m) * m


def _make_gather_kernel(pts_per_batch: int, unroll: int):
    """Builds the per-tile gather kernel for a fixed points-per-batch."""

    def _gather_kernel(idx_ref, w_ref, grid_ref, out_ref):
        # idx_ref : (4 * n_pad,) int32 SMEM -- fused corner-pair base indices
        # w_ref   : (tile_n, 8) f32 VMEM    -- trilinear weights (per-tile block)
        # grid_ref: (v_pad, c_pad) f32 VMEM -- flattened volume (resident)
        # out_ref : (tile_n, c_pad) f32 VMEM
        tile_n, c_pad = out_ref.shape
        base = pl.program_id(0) * (tile_n * 4)   # tile offset into the flat idx

        # One-hot sublane masks: assemble per-point rows into a full
        # (pts_per_batch, c_pad) tile using only VPU ops (always lowerable).
        row_ids = jax.lax.broadcasted_iota(jnp.int32, (pts_per_batch, c_pad), 0)
        masks = [(row_ids == j).astype(jnp.float32) for j in range(pts_per_batch)]

        def batch_body(b, carry):
            block = jnp.zeros((pts_per_batch, c_pad), jnp.float32)
            for j in range(pts_per_batch):        # static unroll over the batch
                n = b * pts_per_batch + j          # point index within the tile
                ioff = base + n * 4
                wrow = w_ref[pl.ds(n, 1), :]       # (1, 8) weights, VMEM
                acc = None
                for c in range(4):                 # 4 fused (x0, x0+1) pairs
                    pair = grid_ref[pl.ds(idx_ref[ioff + c], 2), :]   # (2, c_pad)
                    contrib = (wrow[:, 2 * c:2 * c + 1] * pair[0:1, :]
                               + wrow[:, 2 * c + 1:2 * c + 2] * pair[1:2, :])
                    acc = contrib if acc is None else acc + contrib
                block = block + acc * masks[j]     # place row j (VPU broadcast)
            row0 = pl.multiple_of(b * pts_per_batch, pts_per_batch)
            out_ref[pl.ds(row0, pts_per_batch), :] = block   # one aligned store
            return carry

        jax.lax.fori_loop(0, tile_n // pts_per_batch, batch_body, 0,
                          unroll=unroll)

    return _gather_kernel


def interpolate_grid_pallas(grid, coords, min_coord, max_coord):
    """grid: (C, D, H, W) f32, coords: (N, 3) f32 -> (N, C) f32."""
    C, D, H, W = grid.shape
    N = coords.shape[0]
    V = D * H * W

    grid = grid.astype(jnp.float32)
    coords = coords.astype(jnp.float32)

    # ---- corner base indices + weights (O(N) VPU work, plain XLA). ----------
    pts = (coords - min_coord) / (max_coord - min_coord) * 2.0 - 1.0

    def src_index(p, size):
        # grid_sample unnormalize (align_corners=False) + border clamping.
        return jnp.clip(((p + 1.0) * size - 1.0) * 0.5, 0.0, float(size - 1))

    # After the [2,1,0] permutation: x <- col 2 (W), y <- col 1 (H), z <- col 0 (D).
    ix = src_index(pts[:, 2], W)
    iy = src_index(pts[:, 1], H)
    iz = src_index(pts[:, 0], D)
    x0f, y0f, z0f = jnp.floor(ix), jnp.floor(iy), jnp.floor(iz)
    tx, ty, tz = ix - x0f, iy - y0f, iz - z0f
    x0 = jnp.clip(x0f.astype(jnp.int32), 0, W - 1)
    y0 = jnp.clip(y0f.astype(jnp.int32), 0, H - 1)
    z0 = jnp.clip(z0f.astype(jnp.int32), 0, D - 1)
    y1 = jnp.minimum(y0 + 1, H - 1)
    z1 = jnp.minimum(z0 + 1, D - 1)

    # Fused x-pairs: 4 base indices (row = base is x0, row = base+1 is x0+1)
    # and 8 weights per point.  When x0 == W-1, tx == 0 exactly, so the
    # neighbor row (possibly the zero pad row V) contributes nothing.
    base_list, w_list = [], []
    for zi, wz in ((z0, 1.0 - tz), (z1, tz)):
        for yi, wy in ((y0, 1.0 - ty), (y1, ty)):
            base_list.append((zi * H + yi) * W + x0)
            w_list.append(wz * wy * (1.0 - tx))   # weight for row base   (x0)
            w_list.append(wz * wy * tx)           # weight for row base+1 (x0+1)
    idx = jnp.stack(base_list, axis=1).astype(jnp.int32)   # (N, 4)
    wts = jnp.stack(w_list, axis=1).astype(jnp.float32)    # (N, 8)

    # ---- TPU-friendly padding / tiling. --------------------------------------
    c_pad = _round_up(max(C, 1), 128)        # lane-dense output / gather rows
    v_pad = _round_up(V + 1, 8)              # +1: fused pair may touch row V (w=0)

    pts_per_batch = max(1, min(8, 1024 // c_pad))          # 8@128, 4@256, 2@512
    unroll = 2 if pts_per_batch * c_pad <= 2048 else 1
    tile_cap = max(pts_per_batch, ((1 << 17) // c_pad) // 8 * 8)  # ~512 KiB tile
    tile_n = min(_round_up(max(N, 1), 8), tile_cap)
    n_pad = _round_up(max(N, 1), tile_n)

    # ---- VMEM budget (generation-aware). --------------------------------------
    try:
        vmem_cap = int(pltpu.get_tpu_info().vmem_capacity_bytes)
    except Exception:
        vmem_cap = 64 << 20                  # assume the smallest (v7x) if unknown
    vmem_limit = (vmem_cap // 4) * 3         # leave 25% headroom for the compiler

    single_buffer = hasattr(pl, "Buffered")
    vol_bytes = v_pad * c_pad * 4 * (1 if single_buffer else 2)
    tile_bytes = 2 * tile_n * c_pad * 4 + 2 * tile_n * 128 * 4   # out + weights
    assert vol_bytes + tile_bytes <= vmem_limit - (2 << 20), (
        "volume too large for the VMEM-resident gather path")
    # TODO(synk): HBM-resident volume (memory_space=pl.ANY) + manual DMA row
    # gather for volumes that exceed VMEM.

    # (C, D, H, W) -> (V, C) (d,h,w)-major, channels last, zero-padded.
    # TODO(synk): hoist/cache this flatten+pad when the same volume is queried
    # repeatedly (or store grids channel-last upstream).
    grid_flat = jnp.transpose(grid, (1, 2, 3, 0)).reshape(V, C)
    grid_flat = jnp.pad(grid_flat, ((0, v_pad - V), (0, c_pad - C)))

    # Padded tail points: index 0, weight 0 -> zero output rows (sliced off).
    # TODO(synk): for very large N (>~64K points) move idx to a per-tile SMEM
    # block instead of one SMEM-resident array (16 bytes/point here).
    idx = jnp.pad(idx, ((0, n_pad - N), (0, 0))).reshape(-1)    # (4 * n_pad,)
    wts = jnp.pad(wts, ((0, n_pad - N), (0, 0)))                # (n_pad, 8)

    kernel = _make_gather_kernel(pts_per_batch, unroll)

    def build(single_buf):
        if single_buf:
            vol_spec = pl.BlockSpec((v_pad, c_pad), lambda i: (0, 0),
                                    pipeline_mode=pl.Buffered(1))
        else:
            vol_spec = pl.BlockSpec((v_pad, c_pad), lambda i: (0, 0))
        return pl.pallas_call(
            kernel,
            out_shape=jax.ShapeDtypeStruct((n_pad, c_pad), jnp.float32),
            grid=(n_pad // tile_n,),
            in_specs=[
                pl.BlockSpec(memory_space=pltpu.MemorySpace.SMEM),  # corner idx
                pl.BlockSpec((tile_n, 8), lambda i: (i, 0)),        # weights
                vol_spec,                                           # volume
            ],
            out_specs=pl.BlockSpec((tile_n, c_pad), lambda i: (i, 0)),
            compiler_params=pltpu.CompilerParams(
                dimension_semantics=("parallel",),   # N tiles shard across cores
                vmem_limit_bytes=vmem_limit,
            ),
        )

    if single_buffer:
        try:
            out = build(True)(idx, wts, grid_flat)
        except Exception:
            # pipeline_mode / Buffered(1) not supported here -> double-buffered
            # constant volume block (same math, 2x volume VMEM footprint).
            out = build(False)(idx, wts, grid_flat)
    else:
        out = build(False)(idx, wts, grid_flat)

    return out[:N, :C]


class DenseVolumeInterpolator:
    """JAX/Pallas port of the PyTorch DenseVolumeInterpolator module."""

    def __init__(self, min_coord: float, max_coord: float):
        self.min_coord = min_coord
        self.max_coord = max_coord

    def __call__(self, coordinates, grids, method: str = "bilinear"):
        # TODO(synk): only mode='bilinear' (trilinear for volumes) is implemented.
        assert method == "bilinear"
        # TODO(synk): torch.jit.fork parallelism -> sequential loop; same-shaped
        # (coords, grid) pairs could be stacked into one batched pallas_call to
        # amortize launch + flatten overhead.
        return [
            interpolate_grid_pallas(g, c, self.min_coord, self.max_coord)
            for c, g in zip(coordinates, grids)
        ]


def _reference_interpolate(grid, coords, min_coord, max_coord):
    """Pure-JAX reference mirroring F.grid_sample(align_corners=False, border)."""
    C, D, H, W = grid.shape
    pts = (coords - min_coord) / (max_coord - min_coord) * 2.0 - 1.0

    def src_index(p, size):
        return jnp.clip(((p + 1.0) * size - 1.0) * 0.5, 0.0, float(size - 1))

    ix = src_index(pts[:, 2], W)
    iy = src_index(pts[:, 1], H)
    iz = src_index(pts[:, 0], D)
    x0f, y0f, z0f = jnp.floor(ix), jnp.floor(iy), jnp.floor(iz)
    tx, ty, tz = ix - x0f, iy - y0f, iz - z0f
    x0 = jnp.clip(x0f.astype(jnp.int32), 0, W - 1)
    y0 = jnp.clip(y0f.astype(jnp.int32), 0, H - 1)
    z0 = jnp.clip(z0f.astype(jnp.int32), 0, D - 1)
    x1 = jnp.minimum(x0 + 1, W - 1)
    y1 = jnp.minimum(y0 + 1, H - 1)
    z1 = jnp.minimum(z0 + 1, D - 1)

    out = jnp.zeros((coords.shape[0], C), jnp.float32)
    for zi, wz in ((z0, 1.0 - tz), (z1, tz)):
        for yi, wy in ((y0, 1.0 - ty), (y1, ty)):
            for xi, wx in ((x0, 1.0 - tx), (x1, tx)):
                vals = grid[:, zi, yi, xi].T        # (N, C)
                out = out + (wz * wy * wx)[:, None] * vals
    return out


if __name__ == "__main__":
    key = jax.random.PRNGKey(0)
    k1, k2, k3, k4 = jax.random.split(key, 4)

    min_coord, max_coord = -0.5, 0.5

    # Two list items with small shapes: (C, D, H, W) volumes and (N, 3) coords.
    grid_a = jax.random.normal(k1, (4, 8, 8, 8), dtype=jnp.float32)
    grid_b = jax.random.normal(k2, (6, 8, 8, 8), dtype=jnp.float32)
    # Sample coords slightly outside [min, max] to exercise border padding.
    coords_a = jax.random.uniform(k3, (16, 3), minval=-0.7, maxval=0.7)
    coords_b = jax.random.uniform(k4, (8, 3), minval=-0.7, maxval=0.7)

    interp = DenseVolumeInterpolator(min_coord, max_coord)
    outs = interp([coords_a, coords_b], [grid_a, grid_b])
    outs = [jax.block_until_ready(o) for o in outs]

    # Sanity check against a pure-JAX reference of the same math (gathers from
    # the original (C,D,H,W) layout, so it independently checks the kernel's
    # flattening + fused-pair gather path).
    for (c, g, o) in zip([coords_a, coords_b], [grid_a, grid_b], outs):
        ref = _reference_interpolate(g, c, min_coord, max_coord)
        assert o.shape == ref.shape
        assert jnp.max(jnp.abs(o - ref)) < 1e-4, "mismatch vs reference"

    print("KERNEL_OK")
</pallas_src>

<mosaic_0001>
module attributes {stable_mosaic.version = 11 : i64} {
  func.func @_gather_kernel(%arg0: i32, %arg1: memref<64xi32, #tpu.memory_space<smem>>, %arg2: memref<16x8xf32, #tpu.memory_space<vmem>>, %arg3: memref<520x128xf32, #tpu.memory_space<vmem>>, %arg4: memref<16x128xf32, #tpu.memory_space<vmem>>) attributes {dimension_semantics = [#tpu.dimension_semantics<parallel>], iteration_bounds = array<i64: 1>, scalar_prefetch = 0 : i64, scratch_operands = 0 : i64, tpu.core_type = #tpu.core_type<tc>, window_params = [{transform_indices = @transform_0, window_bounds = array<i64: 64>}, {transform_indices = @transform_1, window_bounds = array<i64: 16, 8>}, {pipeline_mode = #tpu.pipeline_mode<synchronous>, transform_indices = @transform_2, window_bounds = array<i64: 520, 128>}, {transform_indices = @transform_3, window_bounds = array<i64: 16, 128>}]} {
    %c64_i32 = arith.constant 64 : i32
    %0 = arith.muli %arg0, %c64_i32 : i32
    %1 = tpu.iota {dimensions = array<i32: 0>} : vector<8x128xi32>
    %c0_i32 = arith.constant 0 : i32
    %2 = vector.broadcast %c0_i32 : i32 to vector<8x128xi32>
    %3 = arith.cmpi eq, %1, %2 : vector<8x128xi32>
    %4 = arith.extui %3 : vector<8x128xi1> to vector<8x128xi32>
    %5 = arith.sitofp %4 : vector<8x128xi32> to vector<8x128xf32>
    %c1_i32 = arith.constant 1 : i32
    %6 = vector.broadcast %c1_i32 : i32 to vector<8x128xi32>
    %7 = arith.cmpi eq, %1, %6 : vector<8x128xi32>
    %8 = arith.extui %7 : vector<8x128xi1> to vector<8x128xi32>
    %9 = arith.sitofp %8 : vector<8x128xi32> to vector<8x128xf32>
    %c2_i32 = arith.constant 2 : i32
    %10 = vector.broadcast %c2_i32 : i32 to vector<8x128xi32>
    %11 = arith.cmpi eq, %1, %10 : vector<8x128xi32>
    %12 = arith.extui %11 : vector<8x128xi1> to vector<8x128xi32>
    %13 = arith.sitofp %12 : vector<8x128xi32> to vector<8x128xf32>
    %c3_i32 = arith.constant 3 : i32
    %14 = vector.broadcast %c3_i32 : i32 to vector<8x128xi32>
    %15 = arith.cmpi eq, %1, %14 : vector<8x128xi32>
    %16 = arith.extui %15 : vector<8x128xi1> to vector<8x128xi32>
    %17 = arith.sitofp %16 : vector<8x128xi32> to vector<8x128xf32>
    %c4_i32 = arith.constant 4 : i32
    %18 = vector.broadcast %c4_i32 : i32 to vector<8x128xi32>
    %19 = arith.cmpi eq, %1, %18 : vector<8x128xi32>
    %20 = arith.extui %19 : vector<8x128xi1> to vector<8x128xi32>
    %21 = arith.sitofp %20 : vector<8x128xi32> to vector<8x128xf32>
    %c5_i32 = arith.constant 5 : i32
    %22 = vector.broadcast %c5_i32 : i32 to vector<8x128xi32>
    %23 = arith.cmpi eq, %1, %22 : vector<8x128xi32>
    %24 = arith.extui %23 : vector<8x128xi1> to vector<8x128xi32>
    %25 = arith.sitofp %24 : vector<8x128xi32> to vector<8x128xf32>
    %c6_i32 = arith.constant 6 : i32
    %26 = vector.broadcast %c6_i32 : i32 to vector<8x128xi32>
    %27 = arith.cmpi eq, %1, %26 : vector<8x128xi32>
    %28 = arith.extui %27 : vector<8x128xi1> to vector<8x128xi32>
    %29 = arith.sitofp %28 : vector<8x128xi32> to vector<8x128xf32>
    %c7_i32 = arith.constant 7 : i32
    %30 = vector.broadcast %c7_i32 : i32 to vector<8x128xi32>
    %31 = arith.cmpi eq, %1, %30 : vector<8x128xi32>
    %32 = arith.extui %31 : vector<8x128xi1> to vector<8x128xi32>
    %33 = arith.sitofp %32 : vector<8x128xi32> to vector<8x128xf32>
    %c0_i32_0 = arith.constant 0 : i32
    %cst = arith.constant 0.000000e+00 : f32
    %34 = vector.broadcast %cst : f32 to vector<8x128xf32>
    %c8_i32 = arith.constant 8 : i32
    %35 = arith.muli %c0_i32_0, %c8_i32 : i32
    %c0_i32_1 = arith.constant 0 : i32
    %36 = arith.addi %35, %c0_i32_1 : i32
    %c4_i32_2 = arith.constant 4 : i32
    %37 = arith.muli %36, %c4_i32_2 : i32
    %38 = arith.addi %0, %37 : i32
    %39 = arith.index_cast %36 : i32 to index
    %c0 = arith.constant 0 : index
    %40 = vector.load %arg2[%39, %c0] : memref<16x8xf32, #tpu.memory_space<vmem>>, vector<1x8xf32>
    %c0_i32_3 = arith.constant 0 : i32
    %41 = arith.addi %38, %c0_i32_3 : i32
    %42 = arith.index_cast %41 : i32 to index
    %43 = memref.load %arg1[%42] : memref<64xi32, #tpu.memory_space<smem>>
    %44 = arith.index_cast %43 : i32 to index
    %c0_4 = arith.constant 0 : index
    %45 = vector.load %arg3[%44, %c0_4] : memref<520x128xf32, #tpu.memory_space<vmem>>, vector<2x128xf32>
    %46 = vector.extract_strided_slice %40 {offsets = [0, 0], sizes = [1, 1], strides = [1, 1]} : vector<1x8xf32> to vector<1x1xf32>
    %47 = vector.extract_strided_slice %45 {offsets = [0, 0], sizes = [1, 128], strides = [1, 1]} : vector<2x128xf32> to vector<1x128xf32>
    %48 = vector.broadcast %46 : vector<1x1xf32> to vector<1x128xf32>
    %49 = arith.mulf %48, %47 : vector<1x128xf32>
    %50 = vector.extract_strided_slice %40 {offsets = [0, 1], sizes = [1, 1], strides = [1, 1]} : vector<1x8xf32> to vector<1x1xf32>
    %51 = vector.extract_strided_slice %45 {offsets = [1, 0], sizes = [1, 128], strides = [1, 1]} : vector<2x128xf32> to vector<1x128xf32>
    %52 = vector.broadcast %50 : vector<1x1xf32> to vector<1x128xf32>
    %53 = arith.mulf %52, %51 : vector<1x128xf32>
    %54 = arith.addf %49, %53 : vector<1x128xf32>
    %c1_i32_5 = arith.constant 1 : i32
    %55 = arith.addi %38, %c1_i32_5 : i32
    %56 = arith.index_cast %55 : i32 to index
    %57 = memref.load %arg1[%56] : memref<64xi32, #tpu.memory_space<smem>>
    %58 = arith.index_cast %57 : i32 to index
    %c0_6 = arith.constant 0 : index
    %59 = vector.load %arg3[%58, %c0_6] : memref<520x128xf32, #tpu.memory_space<vmem>>, vector<2x128xf32>
    %60 = vector.extract_strided_slice %40 {offsets = [0, 2], sizes = [1, 1], strides = [1, 1]} : vector<1x8xf32> to vector<1x1xf32>
    %61 = vector.extract_strided_slice %59 {offsets = [0, 0], sizes = [1, 128], strides = [1, 1]} : vector<2x128xf32> to vector<1x128xf32>
    %62 = vector.broadcast %60 : vector<1x1xf32> to vector<1x128xf32>
    %63 = arith.mulf %62, %61 : vector<1x128xf32>
    %64 = vector.extract_strided_slice %40 {offsets = [0, 3], sizes = [1, 1], strides = [1, 1]} : vector<1x8xf32> to vector<1x1xf32>
    %65 = vector.extract_strided_slice %59 {offsets = [1, 0], sizes = [1, 128], strides = [1, 1]} : vector<2x128xf32> to vector<1x128xf32>
    %66 = vector.broadcast %64 : vector<1x1xf32> to vector<1x128xf32>
    %67 = arith.mulf %66, %65 : vector<1x128xf32>
    %68 = arith.addf %63, %67 : vector<1x128xf32>
    %69 = arith.addf %54, %68 : vector<1x128xf32>
    %c2_i32_7 = arith.constant 2 : i32
    %70 = arith.addi %38, %c2_i32_7 : i32
    %71 = arith.index_cast %70 : i32 to index
    %72 = memref.load %arg1[%71] : memref<64xi32, #tpu.memory_space<smem>>
    %73 = arith.index_cast %72 : i32 to index
    %c0_8 = arith.constant 0 : index
    %74 = vector.load %arg3[%73, %c0_8] : memref<520x128xf32, #tpu.memory_space<vmem>>, vector<2x128xf32>
    %75 = vector.extract_strided_slice %40 {offsets = [0, 4], sizes = [1, 1], strides = [1, 1]} : vector<1x8xf32> to vector<1x1xf32>
    %76 = vector.extract_strided_slice %74 {offsets = [0, 0], sizes = [1, 128], strides = [1, 1]} : vector<2x128xf32> to vector<1x128xf32>
    %77 = vector.broadcast %75 : vector<1x1xf32> to vector<1x128xf32>
    %78 = arith.mulf %77, %76 : vector<1x128xf32>
    %79 = vector.extract_strided_slice %40 {offsets = [0, 5], sizes = [1, 1], strides = [1, 1]} : vector<1x8xf32> to vector<1x1xf32>
    %80 = vector.extract_strided_slice %74 {offsets = [1, 0], sizes = [1, 128], strides = [1, 1]} : vector<2x128xf32> to vector<1x128xf32>
    %81 = vector.broadcast %79 : vector<1x1xf32> to vector<1x128xf32>
    %82 = arith.mulf %81, %80 : vector<1x128xf32>
    %83 = arith.addf %78, %82 : vector<1x128xf32>
    %84 = arith.addf %69, %83 : vector<1x128xf32>
    %c3_i32_9 = arith.constant 3 : i32
    %85 = arith.addi %38, %c3_i32_9 : i32
    %86 = arith.index_cast %85 : i32 to index
    %87 = memref.load %arg1[%86] : memref<64xi32, #tpu.memory_space<smem>>
    %88 = arith.index_cast %87 : i32 to index
    %c0_10 = arith.constant 0 : index
    %89 = vector.load %arg3[%88, %c0_10] : memref<520x128xf32, #tpu.memory_space<vmem>>, vector<2x128xf32>
    %90 = vector.extract_strided_slice %40 {offsets = [0, 6], sizes = [1, 1], strides = [1, 1]} : vector<1x8xf32> to vector<1x1xf32>
    %91 = vector.extract_strided_slice %89 {offsets = [0, 0], sizes = [1, 128], strides = [1, 1]} : vector<2x128xf32> to vector<1x128xf32>
    %92 = vector.broadcast %90 : vector<1x1xf32> to vector<1x128xf32>
    %93 = arith.mulf %92, %91 : vector<1x128xf32>
    %94 = vector.extract_strided_slice %40 {offsets = [0, 7], sizes = [1, 1], strides = [1, 1]} : vector<1x8xf32> to vector<1x1xf32>
    %95 = vector.extract_strided_slice %89 {offsets = [1, 0], sizes = [1, 128], strides = [1, 1]} : vector<2x128xf32> to vector<1x128xf32>
    %96 = vector.broadcast %94 : vector<1x1xf32> to vector<1x128xf32>
    %97 = arith.mulf %96, %95 : vector<1x128xf32>
    %98 = arith.addf %93, %97 : vector<1x128xf32>
    %99 = arith.addf %84, %98 : vector<1x128xf32>
    %100 = vector.broadcast %99 : vector<1x128xf32> to vector<8x128xf32>
    %101 = arith.mulf %100, %5 : vector<8x128xf32>
    %102 = arith.addf %34, %101 : vector<8x128xf32>
    %c8_i32_11 = arith.constant 8 : i32
    %103 = arith.muli %c0_i32_0, %c8_i32_11 : i32
    %c1_i32_12 = arith.constant 1 : i32
    %104 = arith.addi %103, %c1_i32_12 : i32
    %c4_i32_13 = arith.constant 4 : i32
    %105 = arith.muli %104, %c4_i32_13 : i32
    %106 = arith.addi %0, %105 : i32
    %107 = arith.index_cast %104 : i32 to index
    %c0_14 = arith.constant 0 : index
    %108 = vector.load %arg2[%107, %c0_14] : memref<16x8xf32, #tpu.memory_space<vmem>>, vector<1x8xf32>
    %c0_i32_15 = arith.constant 0 : i32
    %109 = arith.addi %106, %c0_i32_15 : i32
    %110 = arith.index_cast %109 : i32 to index
    %111 = memref.load %arg1[%110] : memref<64xi32, #tpu.memory_space<smem>>
    %112 = arith.index_cast %111 : i32 to index
    %c0_16 = arith.constant 0 : index
    %113 = vector.load %arg3[%112, %c0_16] : memref<520x128xf32, #tpu.memory_space<vmem>>, vector<2x128xf32>
    %114 = vector.extract_strided_slice %108 {offsets = [0, 0], sizes = [1, 1], strides = [1, 1]} : vector<1x8xf32> to vector<1x1xf32>
    %115 = vector.extract_strided_slice %113 {offsets = [0, 0], sizes = [1, 128], strides = [1, 1]} : vector<2x128xf32> to vector<1x128xf32>
    %116 = vector.broadcast %114 : vector<1x1xf32> to vector<1x128xf32>
    %117 = arith.mulf %116, %115 : vector<1x128xf32>
    %118 = vector.extract_strided_slice %108 {offsets = [0, 1], sizes = [1, 1], strides = [1, 1]} : vector<1x8xf32> to vector<1x1xf32>
    %119 = vector.extract_strided_slice %113 {offsets = [1, 0], sizes = [1, 128], strides = [1, 1]} : vector<2x128xf32> to vector<1x128xf32>
    %120 = vector.broadcast %118 : vector<1x1xf32> to vector<1x128xf32>
    %121 = arith.mulf %120, %119 : vector<1x128xf32>
    %122 = arith.addf %117, %121 : vector<1x128xf32>
    %c1_i32_17 = arith.constant 1 : i32
    %123 = arith.addi %106, %c1_i32_17 : i32
    %124 = arith.index_cast %123 : i32 to index
    %125 = memref.load %arg1[%124] : memref<64xi32, #tpu.memory_space<smem>>
    %126 = arith.index_cast %125 : i32 to index
    %c0_18 = arith.constant 0 : index
    %127 = vector.load %arg3[%126, %c0_18] : memref<520x128xf32, #tpu.memory_space<vmem>>, vector<2x128xf32>
    %128 = vector.extract_strided_slice %108 {offsets = [0, 2], sizes = [1, 1], strides = [1, 1]} : vector<1x8xf32> to vector<1x1xf32>
    %129 = vector.extract_strided_slice %127 {offsets = [0, 0], sizes = [1, 128], strides = [1, 1]} : vector<2x128xf32> to vector<1x128xf32>
    %130 = vector.broadcast %128 : vector<1x1xf32> to vector<1x128xf32>
    %131 = arith.mulf %130, %129 : vector<1x128xf32>
    %132 = vector.extract_strided_slice %108 {offsets = [0, 3], sizes = [1, 1], strides = [1, 1]} : vector<1x8xf32> to vector<1x1xf32>
    %133 = vector.extract_strided_slice %127 {offsets = [1, 0], sizes = [1, 128], strides = [1, 1]} : vector<2x128xf32> to vector<1x128xf32>
    %134 = vector.broadcast %132 : vector<1x1xf32> to vector<1x128xf32>
    %135 = arith.mulf %134, %133 : vector<1x128xf32>
    %136 = arith.addf %131, %135 : vector<1x128xf32>
    %137 = arith.addf %122, %136 : vector<1x128xf32>
    %c2_i32_19 = arith.constant 2 : i32
    %138 = arith.addi %106, %c2_i32_19 : i32
    %139 = arith.index_cast %138 : i32 to index
    %140 = memref.load %arg1[%139] : memref<64xi32, #tpu.memory_space<smem>>
    %141 = arith.index_cast %140 : i32 to index
    %c0_20 = arith.constant 0 : index
    %142 = vector.load %arg3[%141, %c0_20] : memref<520x128xf32, #tpu.memory_space<vmem>>, vector<2x128xf32>
    %143 = vector.extract_strided_slice %108 {offsets = [0, 4], sizes = [1, 1], strides = [1, 1]} : vector<1x8xf32> to vector<1x1xf32>
    %144 = vector.extract_strided_slice %142 {offsets = [0, 0], sizes = [1, 128], strides = [1, 1]} : vector<2x128xf32> to vector<1x128xf32>
    %145 = vector.broadcast %143 : vector<1x1xf32> to vector<1x128xf32>
    %146 = arith.mulf %145, %144 : vector<1x128xf32>
    %147 = vector.extract_strided_slice %108 {offsets = [0, 5], sizes = [1, 1], strides = [1, 1]} : vector<1x8xf32> to vector<1x1xf32>
    %148 = vector.extract_strided_slice %142 {offsets = [1, 0], sizes = [1, 128], strides = [1, 1]} : vector<2x128xf32> to vector<1x128xf32>
    %149 = vector.broadcast %147 : vector<1x1xf32> to vector<1x128xf32>
    %150 = arith.mulf %149, %148 : vector<1x128xf32>
    %151 = arith.addf %146, %150 : vector<1x128xf32>
    %152 = arith.addf %137, %151 : vector<1x128xf32>
    %c3_i32_21 = arith.constant 3 : i32
    %153 = arith.addi %106, %c3_i32_21 : i32
    %154 = arith.index_cast %153 : i32 to index
    %155 = memref.load %arg1[%154] : memref<64xi32, #tpu.memory_space<smem>>
    %156 = arith.index_cast %155 : i32 to index
    %c0_22 = arith.constant 0 : index
    %157 = vector.load %arg3[%156, %c0_22] : memref<520x128xf32, #tpu.memory_space<vmem>>, vector<2x128xf32>
    %158 = vector.extract_strided_slice %108 {offsets = [0, 6], sizes = [1, 1], strides = [1, 1]} : vector<1x8xf32> to vector<1x1xf32>
    %159 = vector.extract_strided_slice %157 {offsets = [0, 0], sizes = [1, 128], strides = [1, 1]} : vector<2x128xf32> to vector<1x128xf32>
    %160 = vector.broadcast %158 : vector<1x1xf32> to vector<1x128xf32>
    %161 = arith.mulf %160, %159 : vector<1x128xf32>
    %162 = vector.extract_strided_slice %108 {offsets = [0, 7], sizes = [1, 1], strides = [1, 1]} : vector<1x8xf32> to vector<1x1xf32>
    %163 = vector.extract_strided_slice %157 {offsets = [1, 0], sizes = [1, 128], strides = [1, 1]} : vector<2x128xf32> to vector<1x128xf32>
    %164 = vector.broadcast %162 : vector<1x1xf32> to vector<1x128xf32>
    %165 = arith.mulf %164, %163 : vector<1x128xf32>
    %166 = arith.addf %161, %165 : vector<1x128xf32>
    %167 = arith.addf %152, %166 : vector<1x128xf32>
    %168 = vector.broadcast %167 : vector<1x128xf32> to vector<8x128xf32>
    %169 = arith.mulf %168, %9 : vector<8x128xf32>
    %170 = arith.addf %102, %169 : vector<8x128xf32>
    %c8_i32_23 = arith.constant 8 : i32
    %171 = arith.muli %c0_i32_0, %c8_i32_23 : i32
    %c2_i32_24 = arith.constant 2 : i32
    %172 = arith.addi %171, %c2_i32_24 : i32
    %c4_i32_25 = arith.constant 4 : i32
    %173 = arith.muli %172, %c4_i32_25 : i32
    %174 = arith.addi %0, %173 : i32
    %175 = arith.index_cast %172 : i32 to index
    %c0_26 = arith.constant 0 : index
    %176 = vector.load %arg2[%175, %c0_26] : memref<16x8xf32, #tpu.memory_space<vmem>>, vector<1x8xf32>
    %c0_i32_27 = arith.constant 0 : i32
    %177 = arith.addi %174, %c0_i32_27 : i32
    %178 = arith.index_cast %177 : i32 to index
    %179 = memref.load %arg1[%178] : memref<64xi32, #tpu.memory_space<smem>>
    %180 = arith.index_cast %179 : i32 to index
    %c0_28 = arith.constant 0 : index
    %181 = vector.load %arg3[%180, %c0_28] : memref<520x128xf32, #tpu.memory_space<vmem>>, vector<2x128xf32>
    %182 = vector.extract_strided_slice %176 {offsets = [0, 0], sizes = [1, 1], strides = [1, 1]} : vector<1x8xf32> to vector<1x1xf32>
    %183 = vector.extract_strided_slice %181 {offsets = [0, 0], sizes = [1, 128], strides = [1, 1]} : vector<2x128xf32> to vector<1x128xf32>
    %184 = vector.broadcast %182 : vector<1x1xf32> to vector<1x128xf32>
    %185 = arith.mulf %184, %183 : vector<1x128xf32>
    %186 = vector.extract_strided_slice %176 {offsets = [0, 1], sizes = [1, 1], strides = [1, 1]} : vector<1x8xf32> to vector<1x1xf32>
    %187 = vector.extract_strided_slice %181 {offsets = [1, 0], sizes = [1, 128], strides = [1, 1]} : vector<2x128xf32> to vector<1x128xf32>
    %188 = vector.broadcast %186 : vector<1x1xf32> to vector<1x128xf32>
    %189 = arith.mulf %188, %187 : vector<1x128xf32>
    %190 = arith.addf %185, %189 : vector<1x128xf32>
    %c1_i32_29 = arith.constant 1 : i32
    %191 = arith.addi %174, %c1_i32_29 : i32
    %192 = arith.index_cast %191 : i32 to index
    %193 = memref.load %arg1[%192] : memref<64xi32, #tpu.memory_space<smem>>
    %194 = arith.index_cast %193 : i32 to index
    %c0_30 = arith.constant 0 : index
    %195 = vector.load %arg3[%194, %c0_30] : memref<520x128xf32, #tpu.memory_space<vmem>>, vector<2x128xf32>
    %196 = vector.extract_strided_slice %176 {offsets = [0, 2], sizes = [1, 1], strides = [1, 1]} : vector<1x8xf32> to vector<1x1xf32>
    %197 = vector.extract_strided_slice %195 {offsets = [0, 0], sizes = [1, 128], strides = [1, 1]} : vector<2x128xf32> to vector<1x128xf32>
    %198 = vector.broadcast %196 : vector<1x1xf32> to vector<1x128xf32>
    %199 = arith.mulf %198, %197 : vector<1x128xf32>
    %200 = vector.extract_strided_slice %176 {offsets = [0, 3], sizes = [1, 1], strides = [1, 1]} : vector<1x8xf32> to vector<1x1xf32>
    %201 = vector.extract_strided_slice %195 {offsets = [1, 0], sizes = [1, 128], strides = [1, 1]} : vector<2x128xf32> to vector<1x128xf32>
    %202 = vector.broadcast %200 : vector<1x1xf32> to vector<1x128xf32>
    %203 = arith.mulf %202, %201 : vector<1x128xf32>
    %204 = arith.addf %199, %203 : vector<1x128xf32>
    %205 = arith.addf %190, %204 : vector<1x128xf32>
    %c2_i32_31 = arith.constant 2 : i32
    %206 = arith.addi %174, %c2_i32_31 : i32
    %207 = arith.index_cast %206 : i32 to index
    %208 = memref.load %arg1[%207] : memref<64xi32, #tpu.memory_space<smem>>
    %209 = arith.index_cast %208 : i32 to index
    %c0_32 = arith.constant 0 : index
    %210 = vector.load %arg3[%209, %c0_32] : memref<520x128xf32, #tpu.memory_space<vmem>>, vector<2x128xf32>
    %211 = vector.extract_strided_slice %176 {offsets = [0, 4], sizes = [1, 1], strides = [1, 1]} : vector<1x8xf32> to vector<1x1xf32>
    %212 = vector.extract_strided_slice %210 {offsets = [0, 0], sizes = [1, 128], strides = [1, 1]} : vector<2x128xf32> to vector<1x128xf32>
    %213 = vector.broadcast %211 : vector<1x1xf32> to vector<1x128xf32>
    %214 = arith.mulf %213, %212 : vector<1x128xf32>
    %215 = vector.extract_strided_slice %176 {offsets = [0, 5], sizes = [1, 1], strides = [1, 1]} : vector<1x8xf32> to vector<1x1xf32>
    %216 = vector.extract_strided_slice %210 {offsets = [1, 0], sizes = [1, 128], strides = [1, 1]} : vector<2x128xf32> to vector<1x128xf32>
    %217 = vector.broadcast %215 : vector<1x1xf32> to vector<1x128xf32>
    %218 = arith.mulf %217, %216 : vector<1x128xf32>
    %219 = arith.addf %214, %218 : vector<1x128xf32>
    %220 = arith.addf %205, %219 : vector<1x128xf32>
    %c3_i32_33 = arith.constant 3 : i32
    %221 = arith.addi %174, %c3_i32_33 : i32
    %222 = arith.index_cast %221 : i32 to index
    %223 = memref.load %arg1[%222] : memref<64xi32, #tpu.memory_space<smem>>
    %224 = arith.index_cast %223 : i32 to index
    %c0_34 = arith.constant 0 : index
    %225 = vector.load %arg3[%224, %c0_34] : memref<520x128xf32, #tpu.memory_space<vmem>>, vector<2x128xf32>
    %226 = vector.extract_strided_slice %176 {offsets = [0, 6], sizes = [1, 1], strides = [1, 1]} : vector<1x8xf32> to vector<1x1xf32>
    %227 = vector.extract_strided_slice %225 {offsets = [0, 0], sizes = [1, 128], strides = [1, 1]} : vector<2x128xf32> to vector<1x128xf32>
    %228 = vector.broadcast %226 : vector<1x1xf32> to vector<1x128xf32>
    %229 = arith.mulf %228, %227 : vector<1x128xf32>
    %230 = vector.extract_strided_slice %176 {offsets = [0, 7], sizes = [1, 1], strides = [1, 1]} : vector<1x8xf32> to vector<1x1xf32>
    %231 = vector.extract_strided_slice %225 {offsets = [1, 0], sizes = [1, 128], strides = [1, 1]} : vector<2x128xf32> to vector<1x128xf32>
    %232 = vector.broadcast %230 : vector<1x1xf32> to vector<1x128xf32>
    %233 = arith.mulf %232, %231 : vector<1x128xf32>
    %234 = arith.addf %229, %233 : vector<1x128xf32>
    %235 = arith.addf %220, %234 : vector<1x128xf32>
    %236 = vector.broadcast %235 : vector<1x128xf32> to vector<8x128xf32>
    %237 = arith.mulf %236, %13 : vector<8x128xf32>
    %238 = arith.addf %170, %237 : vector<8x128xf32>
    %c8_i32_35 = arith.constant 8 : i32
    %239 = arith.muli %c0_i32_0, %c8_i32_35 : i32
    %c3_i32_36 = arith.constant 3 : i32
    %240 = arith.addi %239, %c3_i32_36 : i32
    %c4_i32_37 = arith.constant 4 : i32
    %241 = arith.muli %240, %c4_i32_37 : i32
    %242 = arith.addi %0, %241 : i32
    %243 = arith.index_cast %240 : i32 to index
    %c0_38 = arith.constant 0 : index
    %244 = vector.load %arg2[%243, %c0_38] : memref<16x8xf32, #tpu.memory_space<vmem>>, vector<1x8xf32>
    %c0_i32_39 = arith.constant 0 : i32
    %245 = arith.addi %242, %c0_i32_39 : i32
    %246 = arith.index_cast %245 : i32 to index
    %247 = memref.load %arg1[%246] : memref<64xi32, #tpu.memory_space<smem>>
    %248 = arith.index_cast %247 : i32 to index
    %c0_40 = arith.constant 0 : index
    %249 = vector.load %arg3[%248, %c0_40] : memref<520x128xf32, #tpu.memory_space<vmem>>, vector<2x128xf32>
    %250 = vector.extract_strided_slice %244 {offsets = [0, 0], sizes = [1, 1], strides = [1, 1]} : vector<1x8xf32> to vector<1x1xf32>
    %251 = vector.extract_strided_slice %249 {offsets = [0, 0], sizes = [1, 128], strides = [1, 1]} : vector<2x128xf32> to vector<1x128xf32>
    %252 = vector.broadcast %250 : vector<1x1xf32> to vector<1x128xf32>
    %253 = arith.mulf %252, %251 : vector<1x128xf32>
    %254 = vector.extract_strided_slice %244 {offsets = [0, 1], sizes = [1, 1], strides = [1, 1]} : vector<1x8xf32> to vector<1x1xf32>
    %255 = vector.extract_strided_slice %249 {offsets = [1, 0], sizes = [1, 128], strides = [1, 1]} : vector<2x128xf32> to vector<1x128xf32>
    %256 = vector.broadcast %254 : vector<1x1xf32> to vector<1x128xf32>
    %257 = arith.mulf %256, %255 : vector<1x128xf32>
    %258 = arith.addf %253, %257 : vector<1x128xf32>
    %c1_i32_41 = arith.constant 1 : i32
    %259 = arith.addi %242, %c1_i32_41 : i32
    %260 = arith.index_cast %259 : i32 to index
    %261 = memref.load %arg1[%260] : memref<64xi32, #tpu.memory_space<smem>>
    %262 = arith.index_cast %261 : i32 to index
    %c0_42 = arith.constant 0 : index
    %263 = vector.load %arg3[%262, %c0_42] : memref<520x128xf32, #tpu.memory_space<vmem>>, vector<2x128xf32>
    %264 = vector.extract_strided_slice %244 {offsets = [0, 2], sizes = [1, 1], strides = [1, 1]} : vector<1x8xf32> to vector<1x1xf32>
    %265 = vector.extract_strided_slice %263 {offsets = [0, 0], sizes = [1, 128], strides = [1, 1]} : vector<2x128xf32> to vector<1x128xf32>
    %266 = vector.broadcast %264 : vector<1x1xf32> to vector<1x128xf32>
    %267 = arith.mulf %266, %265 : vector<1x128xf32>
    %268 = vector.extract_strided_slice %244 {offsets = [0, 3], sizes = [1, 1], strides = [1, 1]} : vector<1x8xf32> to vector<1x1xf32>
    %269 = vector.extract_strided_slice %263 {offsets = [1, 0], sizes = [1, 128], strides = [1, 1]} : vector<2x128xf32> to vector<1x128xf32>
    %270 = vector.broadcast %268 : vector<1x1xf32> to vector<1x128xf32>
    %271 = arith.mulf %270, %269 : vector<1x128xf32>
    %272 = arith.addf %267, %271 : vector<1x128xf32>
    %273 = arith.addf %258, %272 : vector<1x128xf32>
    %c2_i32_43 = arith.constant 2 : i32
    %274 = arith.addi %242, %c2_i32_43 : i32
    %275 = arith.index_cast %274 : i32 to index
    %276 = memref.load %arg1[%275] : memref<64xi32, #tpu.memory_space<smem>>
    %277 = arith.index_cast %276 : i32 to index
    %c0_44 = arith.constant 0 : index
    %278 = vector.load %arg3[%277, %c0_44] : memref<520x128xf32, #tpu.memory_space<vmem>>, vector<2x128xf32>
    %279 = vector.extract_strided_slice %244 {offsets = [0, 4], sizes = [1, 1], strides = [1, 1]} : vector<1x8xf32> to vector<1x1xf32>
    %280 = vector.extract_strided_slice %278 {offsets = [0, 0], sizes = [1, 128], strides = [1, 1]} : vector<2x128xf32> to vector<1x128xf32>
    %281 = vector.broadcast %279 : vector<1x1xf32> to vector<1x128xf32>
    %282 = arith.mulf %281, %280 : vector<1x128xf32>
    %283 = vector.extract_strided_slice %244 {offsets = [0, 5], sizes = [1, 1], strides = [1, 1]} : vector<1x8xf32> to vector<1x1xf32>
    %284 = vector.extract_strided_slice %278 {offsets = [1, 0], sizes = [1, 128], strides = [1, 1]} : vector<2x128xf32> to vector<1x128xf32>
    %285 = vector.broadcast %283 : vector<1x1xf32> to vector<1x128xf32>
    %286 = arith.mulf %285, %284 : vector<1x128xf32>
    %287 = arith.addf %282, %286 : vector<1x128xf32>
    %288 = arith.addf %273, %287 : vector<1x128xf32>
    %c3_i32_45 = arith.constant 3 : i32
    %289 = arith.addi %242, %c3_i32_45 : i32
    %290 = arith.index_cast %289 : i32 to index
    %291 = memref.load %arg1[%290] : memref<64xi32, #tpu.memory_space<smem>>
    %292 = arith.index_cast %291 : i32 to index
    %c0_46 = arith.constant 0 : index
    %293 = vector.load %arg3[%292, %c0_46] : memref<520x128xf32, #tpu.memory_space<vmem>>, vector<2x128xf32>
    %294 = vector.extract_strided_slice %244 {offsets = [0, 6], sizes = [1, 1], strides = [1, 1]} : vector<1x8xf32> to vector<1x1xf32>
    %295 = vector.extract_strided_slice %293 {offsets = [0, 0], sizes = [1, 128], strides = [1, 1]} : vector<2x128xf32> to vector<1x128xf32>
    %296 = vector.broadcast %294 : vector<1x1xf32> to vector<1x128xf32>
    %297 = arith.mulf %296, %295 : vector<1x128xf32>
    %298 = vector.extract_strided_slice %244 {offsets = [0, 7], sizes = [1, 1], strides = [1, 1]} : vector<1x8xf32> to vector<1x1xf32>
    %299 = vector.extract_strided_slice %293 {offsets = [1, 0], sizes = [1, 128], strides = [1, 1]} : vector<2x128xf32> to vector<1x128xf32>
    %300 = vector.broadcast %298 : vector<1x1xf32> to vector<1x128xf32>
    %301 = arith.mulf %300, %299 : vector<1x128xf32>
    %302 = arith.addf %297, %301 : vector<1x128xf32>
    %303 = arith.addf %288, %302 : vector<1x128xf32>
    %304 = vector.broadcast %303 : vector<1x128xf32> to vector<8x128xf32>
    %305 = arith.mulf %304, %17 : vector<8x128xf32>
    %306 = arith.addf %238, %305 : vector<8x128xf32>
    %c8_i32_47 = arith.constant 8 : i32
    %307 = arith.muli %c0_i32_0, %c8_i32_47 : i32
    %c4_i32_48 = arith.constant 4 : i32
    %308 = arith.addi %307, %c4_i32_48 : i32
    %c4_i32_49 = arith.constant 4 : i32
    %309 = arith.muli %308, %c4_i32_49 : i32
    %310 = arith.addi %0, %309 : i32
    %311 = arith.index_cast %308 : i32 to index
    %c0_50 = arith.constant 0 : index
    %312 = vector.load %arg2[%311, %c0_50] : memref<16x8xf32, #tpu.memory_space<vmem>>, vector<1x8xf32>
    %c0_i32_51 = arith.constant 0 : i32
    %313 = arith.addi %310, %c0_i32_51 : i32
    %314 = arith.index_cast %313 : i32 to index
    %315 = memref.load %arg1[%314] : memref<64xi32, #tpu.memory_space<smem>>
    %316 = arith.index_cast %315 : i32 to index
    %c0_52 = arith.constant 0 : index
    %317 = vector.load %arg3[%316, %c0_52] : memref<520x128xf32, #tpu.memory_space<vmem>>, vector<2x128xf32>
    %318 = vector.extract_strided_slice %312 {offsets = [0, 0], sizes = [1, 1], strides = [1, 1]} : vector<1x8xf32> to vector<1x1xf32>
    %319 = vector.extract_strided_slice %317 {offsets = [0, 0], sizes = [1, 128], strides = [1, 1]} : vector<2x128xf32> to vector<1x128xf32>
    %320 = vector.broadcast %318 : vector<1x1xf32> to vector<1x128xf32>
    %321 = arith.mulf %320, %319 : vector<1x128xf32>
    %322 = vector.extract_strided_slice %312 {offsets = [0, 1], sizes = [1, 1], strides = [1, 1]} : vector<1x8xf32> to vector<1x1xf32>
    %323 = vector.extract_strided_slice %317 {offsets = [1, 0], sizes = [1, 128], strides = [1, 1]} : vector<2x128xf32> to vector<1x128xf32>
    %324 = vector.broadcast %322 : vector<1x1xf32> to vector<1x128xf32>
    %325 = arith.mulf %324, %323 : vector<1x128xf32>
    %326 = arith.addf %321, %325 : vector<1x128xf32>
    %c1_i32_53 = arith.constant 1 : i32
    %327 = arith.addi %310, %c1_i32_53 : i32
    %328 = arith.index_cast %327 : i32 to index
    %329 = memref.load %arg1[%328] : memref<64xi32, #tpu.memory_space<smem>>
    %330 = arith.index_cast %329 : i32 to index
    %c0_54 = arith.constant 0 : index
    %331 = vector.load %arg3[%330, %c0_54] : memref<520x128xf32, #tpu.memory_space<vmem>>, vector<2x128xf32>
    %332 = vector.extract_strided_slice %312 {offsets = [0, 2], sizes = [1, 1], strides = [1, 1]} : vector<1x8xf32> to vector<1x1xf32>
    %333 = vector.extract_strided_slice %331 {offsets = [0, 0], sizes = [1, 128], strides = [1, 1]} : vector<2x128xf32> to vector<1x128xf32>
    %334 = vector.broadcast %332 : vector<1x1xf32> to vector<1x128xf32>
    %335 = arith.mulf %334, %333 : vector<1x128xf32>
    %336 = vector.extract_strided_slice %312 {offsets = [0, 3], sizes = [1, 1], strides = [1, 1]} : vector<1x8xf32> to vector<1x1xf32>
    %337 = vector.extract_strided_slice %331 {offsets = [1, 0], sizes = [1, 128], strides = [1, 1]} : vector<2x128xf32> to vector<1x128xf32>
    %338 = vector.broadcast %336 : vector<1x1xf32> to vector<1x128xf32>
    %339 = arith.mulf %338, %337 : vector<1x128xf32>
    %340 = arith.addf %335, %339 : vector<1x128xf32>
    %341 = arith.addf %326, %340 : vector<1x128xf32>
    %c2_i32_55 = arith.constant 2 : i32
    %342 = arith.addi %310, %c2_i32_55 : i32
    %343 = arith.index_cast %342 : i32 to index
    %344 = memref.load %arg1[%343] : memref<64xi32, #tpu.memory_space<smem>>
    %345 = arith.index_cast %344 : i32 to index
    %c0_56 = arith.constant 0 : index
    %346 = vector.load %arg3[%345, %c0_56] : memref<520x128xf32, #tpu.memory_space<vmem>>, vector<2x128xf32>
    %347 = vector.extract_strided_slice %312 {offsets = [0, 4], sizes = [1, 1], strides = [1, 1]} : vector<1x8xf32> to vector<1x1xf32>
    %348 = vector.extract_strided_slice %346 {offsets = [0, 0], sizes = [1, 128], strides = [1, 1]} : vector<2x128xf32> to vector<1x128xf32>
    %349 = vector.broadcast %347 : vector<1x1xf32> to vector<1x128xf32>
    %350 = arith.mulf %349, %348 : vector<1x128xf32>
    %351 = vector.extract_strided_slice %312 {offsets = [0, 5], sizes = [1, 1], strides = [1, 1]} : vector<1x8xf32> to vector<1x1xf32>
    %352 = vector.extract_strided_slice %346 {offsets = [1, 0], sizes = [1, 128], strides = [1, 1]} : vector<2x128xf32> to vector<1x128xf32>
    %353 = vector.broadcast %351 : vector<1x1xf32> to vector<1x128xf32>
    %354 = arith.mulf %353, %352 : vector<1x128xf32>
    %355 = arith.addf %350, %354 : vector<1x128xf32>
    %356 = arith.addf %341, %355 : vector<1x128xf32>
    %c3_i32_57 = arith.constant 3 : i32
    %357 = arith.addi %310, %c3_i32_57 : i32
    %358 = arith.index_cast %357 : i32 to index
    %359 = memref.load %arg1[%358] : memref<64xi32, #tpu.memory_space<smem>>
    %360 = arith.index_cast %359 : i32 to index
    %c0_58 = arith.constant 0 : index
    %361 = vector.load %arg3[%360, %c0_58] : memref<520x128xf32, #tpu.memory_space<vmem>>, vector<2x128xf32>
    %362 = vector.extract_strided_slice %312 {offsets = [0, 6], sizes = [1, 1], strides = [1, 1]} : vector<1x8xf32> to vector<1x1xf32>
    %363 = vector.extract_strided_slice %361 {offsets = [0, 0], sizes = [1, 128], strides = [1, 1]} : vector<2x128xf32> to vector<1x128xf32>
    %364 = vector.broadcast %362 : vector<1x1xf32> to vector<1x128xf32>
    %365 = arith.mulf %364, %363 : vector<1x128xf32>
    %366 = vector.extract_strided_slice %312 {offsets = [0, 7], sizes = [1, 1], strides = [1, 1]} : vector<1x8xf32> to vector<1x1xf32>
    %367 = vector.extract_strided_slice %361 {offsets = [1, 0], sizes = [1, 128], strides = [1, 1]} : vector<2x128xf32> to vector<1x128xf32>
    %368 = vector.broadcast %366 : vector<1x1xf32> to vector<1x128xf32>
    %369 = arith.mulf %368, %367 : vector<1x128xf32>
    %370 = arith.addf %365, %369 : vector<1x128xf32>
    %371 = arith.addf %356, %370 : vector<1x128xf32>
    %372 = vector.broadcast %371 : vector<1x128xf32> to vector<8x128xf32>
    %373 = arith.mulf %372, %21 : vector<8x128xf32>
    %374 = arith.addf %306, %373 : vector<8x128xf32>
    %c8_i32_59 = arith.constant 8 : i32
    %375 = arith.muli %c0_i32_0, %c8_i32_59 : i32
    %c5_i32_60 = arith.constant 5 : i32
    %376 = arith.addi %375, %c5_i32_60 : i32
    %c4_i32_61 = arith.constant 4 : i32
    %377 = arith.muli %376, %c4_i32_61 : i32
    %378 = arith.addi %0, %377 : i32
    %379 = arith.index_cast %376 : i32 to index
    %c0_62 = arith.constant 0 : index
    %380 = vector.load %arg2[%379, %c0_62] : memref<16x8xf32, #tpu.memory_space<vmem>>, vector<1x8xf32>
    %c0_i32_63 = arith.constant 0 : i32
    %381 = arith.addi %378, %c0_i32_63 : i32
    %382 = arith.index_cast %381 : i32 to index
    %383 = memref.load %arg1[%382] : memref<64xi32, #tpu.memory_space<smem>>
    %384 = arith.index_cast %383 : i32 to index
    %c0_64 = arith.constant 0 : index
    %385 = vector.load %arg3[%384, %c0_64] : memref<520x128xf32, #tpu.memory_space<vmem>>, vector<2x128xf32>
    %386 = vector.extract_strided_slice %380 {offsets = [0, 0], sizes = [1, 1], strides = [1, 1]} : vector<1x8xf32> to vector<1x1xf32>
    %387 = vector.extract_strided_slice %385 {offsets = [0, 0], sizes = [1, 128], strides = [1, 1]} : vector<2x128xf32> to vector<1x128xf32>
    %388 = vector.broadcast %386 : vector<1x1xf32> to vector<1x128xf32>
    %389 = arith.mulf %388, %387 : vector<1x128xf32>
    %390 = vector.extract_strided_slice %380 {offsets = [0, 1], sizes = [1, 1], strides = [1, 1]} : vector<1x8xf32> to vector<1x1xf32>
    %391 = vector.extract_strided_slice %385 {offsets = [1, 0], sizes = [1, 128], strides = [1, 1]} : vector<2x128xf32> to vector<1x128xf32>
    %392 = vector.broadcast %390 : vector<1x1xf32> to vector<1x128xf32>
    %393 = arith.mulf %392, %391 : vector<1x128xf32>
    %394 = arith.addf %389, %393 : vector<1x128xf32>
    %c1_i32_65 = arith.constant 1 : i32
    %395 = arith.addi %378, %c1_i32_65 : i32
    %396 = arith.index_cast %395 : i32 to index
    %397 = memref.load %arg1[%396] : memref<64xi32, #tpu.memory_space<smem>>
    %398 = arith.index_cast %397 : i32 to index
    %c0_66 = arith.constant 0 : index
    %399 = vector.load %arg3[%398, %c0_66] : memref<520x128xf32, #tpu.memory_space<vmem>>, vector<2x128xf32>
    %400 = vector.extract_strided_slice %380 {offsets = [0, 2], sizes = [1, 1], strides = [1, 1]} : vector<1x8xf32> to vector<1x1xf32>
    %401 = vector.extract_strided_slice %399 {offsets = [0, 0], sizes = [1, 128], strides = [1, 1]} : vector<2x128xf32> to vector<1x128xf32>
    %402 = vector.broadcast %400 : vector<1x1xf32> to vector<1x128xf32>
    %403 = arith.mulf %402, %401 : vector<1x128xf32>
    %404 = vector.extract_strided_slice %380 {offsets = [0, 3], sizes = [1, 1], strides = [1, 1]} : vector<1x8xf32> to vector<1x1xf32>
    %405 = vector.extract_strided_slice %399 {offsets = [1, 0], sizes = [1, 128], strides = [1, 1]} : vector<2x128xf32> to vector<1x128xf32>
    %406 = vector.broadcast %404 : vector<1x1xf32> to vector<1x128xf32>
    %407 = arith.mulf %406, %405 : vector<1x128xf32>
    %408 = arith.addf %403, %407 : vector<1x128xf32>
    %409 = arith.addf %394, %408 : vector<1x128xf32>
    %c2_i32_67 = arith.constant 2 : i32
    %410 = arith.addi %378, %c2_i32_67 : i32
    %411 = arith.index_cast %410 : i32 to index
    %412 = memref.load %arg1[%411] : memref<64xi32, #tpu.memory_space<smem>>
    %413 = arith.index_cast %412 : i32 to index
    %c0_68 = arith.constant 0 : index
    %414 = vector.load %arg3[%413, %c0_68] : memref<520x128xf32, #tpu.memory_space<vmem>>, vector<2x128xf32>
    %415 = vector.extract_strided_slice %380 {offsets = [0, 4], sizes = [1, 1], strides = [1, 1]} : vector<1x8xf32> to vector<1x1xf32>
    %416 = vector.extract_strided_slice %414 {offsets = [0, 0], sizes = [1, 128], strides = [1, 1]} : vector<2x128xf32> to vector<1x128xf32>
    %417 = vector.broadcast %415 : vector<1x1xf32> to vector<1x128xf32>
    %418 = arith.mulf %417, %416 : vector<1x128xf32>
    %419 = vector.extract_strided_slice %380 {offsets = [0, 5], sizes = [1, 1], strides = [1, 1]} : vector<1x8xf32> to vector<1x1xf32>
    %420 = vector.extract_strided_slice %414 {offsets = [1, 0], sizes = [1, 128], strides = [1, 1]} : vector<2x128xf32> to vector<1x128xf32>
    %421 = vector.broadcast %419 : vector<1x1xf32> to vector<1x128xf32>
    %422 = arith.mulf %421, %420 : vector<1x128xf32>
    %423 = arith.addf %418, %422 : vector<1x128xf32>
    %424 = arith.addf %409, %423 : vector<1x128xf32>
    %c3_i32_69 = arith.constant 3 : i32
    %425 = arith.addi %378, %c3_i32_69 : i32
    %426 = arith.index_cast %425 : i32 to index
    %427 = memref.load %arg1[%426] : memref<64xi32, #tpu.memory_space<smem>>
    %428 = arith.index_cast %427 : i32 to index
    %c0_70 = arith.constant 0 : index
    %429 = vector.load %arg3[%428, %c0_70] : memref<520x128xf32, #tpu.memory_space<vmem>>, vector<2x128xf32>
    %430 = vector.extract_strided_slice %380 {offsets = [0, 6], sizes = [1, 1], strides = [1, 1]} : vector<1x8xf32> to vector<1x1xf32>
    %431 = vector.extract_strided_slice %429 {offsets = [0, 0], sizes = [1, 128], strides = [1, 1]} : vector<2x128xf32> to vector<1x128xf32>
    %432 = vector.broadcast %430 : vector<1x1xf32> to vector<1x128xf32>
    %433 = arith.mulf %432, %431 : vector<1x128xf32>
    %434 = vector.extract_strided_slice %380 {offsets = [0, 7], sizes = [1, 1], strides = [1, 1]} : vector<1x8xf32> to vector<1x1xf32>
    %435 = vector.extract_strided_slice %429 {offsets = [1, 0], sizes = [1, 128], strides = [1, 1]} : vector<2x128xf32> to vector<1x128xf32>
    %436 = vector.broadcast %434 : vector<1x1xf32> to vector<1x128xf32>
    %437 = arith.mulf %436, %435 : vector<1x128xf32>
    %438 = arith.addf %433, %437 : vector<1x128xf32>
    %439 = arith.addf %424, %438 : vector<1x128xf32>
    %440 = vector.broadcast %439 : vector<1x128xf32> to vector<8x128xf32>
    %441 = arith.mulf %440, %25 : vector<8x128xf32>
    %442 = arith.addf %374, %441 : vector<8x128xf32>
    %c8_i32_71 = arith.constant 8 : i32
    %443 = arith.muli %c0_i32_0, %c8_i32_71 : i32
    %c6_i32_72 = arith.constant 6 : i32
    %444 = arith.addi %443, %c6_i32_72 : i32
    %c4_i32_73 = arith.constant 4 : i32
    %445 = arith.muli %444, %c4_i32_73 : i32
    %446 = arith.addi %0, %445 : i32
    %447 = arith.index_cast %444 : i32 to index
    %c0_74 = arith.constant 0 : index
    %448 = vector.load %arg2[%447, %c0_74] : memref<16x8xf32, #tpu.memory_space<vmem>>, vector<1x8xf32>
    %c0_i32_75 = arith.constant 0 : i32
    %449 = arith.addi %446, %c0_i32_75 : i32
    %450 = arith.index_cast %449 : i32 to index
    %451 = memref.load %arg1[%450] : memref<64xi32, #tpu.memory_space<smem>>
    %452 = arith.index_cast %451 : i32 to index
    %c0_76 = arith.constant 0 : index
    %453 = vector.load %arg3[%452, %c0_76] : memref<520x128xf32, #tpu.memory_space<vmem>>, vector<2x128xf32>
    %454 = vector.extract_strided_slice %448 {offsets = [0, 0], sizes = [1, 1], strides = [1, 1]} : vector<1x8xf32> to vector<1x1xf32>
    %455 = vector.extract_strided_slice %453 {offsets = [0, 0], sizes = [1, 128], strides = [1, 1]} : vector<2x128xf32> to vector<1x128xf32>
    %456 = vector.broadcast %454 : vector<1x1xf32> to vector<1x128xf32>
    %457 = arith.mulf %456, %455 : vector<1x128xf32>
    %458 = vector.extract_strided_slice %448 {offsets = [0, 1], sizes = [1, 1], strides = [1, 1]} : vector<1x8xf32> to vector<1x1xf32>
    %459 = vector.extract_strided_slice %453 {offsets = [1, 0], sizes = [1, 128], strides = [1, 1]} : vector<2x128xf32> to vector<1x128xf32>
    %460 = vector.broadcast %458 : vector<1x1xf32> to vector<1x128xf32>
    %461 = arith.mulf %460, %459 : vector<1x128xf32>
    %462 = arith.addf %457, %461 : vector<1x128xf32>
    %c1_i32_77 = arith.constant 1 : i32
    %463 = arith.addi %446, %c1_i32_77 : i32
    %464 = arith.index_cast %463 : i32 to index
    %465 = memref.load %arg1[%464] : memref<64xi32, #tpu.memory_space<smem>>
    %466 = arith.index_cast %465 : i32 to index
    %c0_78 = arith.constant 0 : index
    %467 = vector.load %arg3[%466, %c0_78] : memref<520x128xf32, #tpu.memory_space<vmem>>, vector<2x128xf32>
    %468 = vector.extract_strided_slice %448 {offsets = [0, 2], sizes = [1, 1], strides = [1, 1]} : vector<1x8xf32> to vector<1x1xf32>
    %469 = vector.extract_strided_slice %467 {offsets = [0, 0], sizes = [1, 128], strides = [1, 1]} : vector<2x128xf32> to vector<1x128xf32>
    %470 = vector.broadcast %468 : vector<1x1xf32> to vector<1x128xf32>
    %471 = arith.mulf %470, %469 : vector<1x128xf32>
    %472 = vector.extract_strided_slice %448 {offsets = [0, 3], sizes = [1, 1], strides = [1, 1]} : vector<1x8xf32> to vector<1x1xf32>
    %473 = vector.extract_strided_slice %467 {offsets = [1, 0], sizes = [1, 128], strides = [1, 1]} : vector<2x128xf32> to vector<1x128xf32>
    %474 = vector.broadcast %472 : vector<1x1xf32> to vector<1x128xf32>
    %475 = arith.mulf %474, %473 : vector<1x128xf32>
    %476 = arith.addf %471, %475 : vector<1x128xf32>
    %477 = arith.addf %462, %476 : vector<1x128xf32>
    %c2_i32_79 = arith.constant 2 : i32
    %478 = arith.addi %446, %c2_i32_79 : i32
    %479 = arith.index_cast %478 : i32 to index
    %480 = memref.load %arg1[%479] : memref<64xi32, #tpu.memory_space<smem>>
    %481 = arith.index_cast %480 : i32 to index
    %c0_80 = arith.constant 0 : index
    %482 = vector.load %arg3[%481, %c0_80] : memref<520x128xf32, #tpu.memory_space<vmem>>, vector<2x128xf32>
    %483 = vector.extract_strided_slice %448 {offsets = [0, 4], sizes = [1, 1], strides = [1, 1]} : vector<1x8xf32> to vector<1x1xf32>
    %484 = vector.extract_strided_slice %482 {offsets = [0, 0], sizes = [1, 128], strides = [1, 1]} : vector<2x128xf32> to vector<1x128xf32>
    %485 = vector.broadcast %483 : vector<1x1xf32> to vector<1x128xf32>
    %486 = arith.mulf %485, %484 : vector<1x128xf32>
    %487 = vector.extract_strided_slice %448 {offsets = [0, 5], sizes = [1, 1], strides = [1, 1]} : vector<1x8xf32> to vector<1x1xf32>
    %488 = vector.extract_strided_slice %482 {offsets = [1, 0], sizes = [1, 128], strides = [1, 1]} : vector<2x128xf32> to vector<1x128xf32>
    %489 = vector.broadcast %487 : vector<1x1xf32> to vector<1x128xf32>
    %490 = arith.mulf %489, %488 : vector<1x128xf32>
    %491 = arith.addf %486, %490 : vector<1x128xf32>
    %492 = arith.addf %477, %491 : vector<1x128xf32>
    %c3_i32_81 = arith.constant 3 : i32
    %493 = arith.addi %446, %c3_i32_81 : i32
    %494 = arith.index_cast %493 : i32 to index
    %495 = memref.load %arg1[%494] : memref<64xi32, #tpu.memory_space<smem>>
    %496 = arith.index_cast %495 : i32 to index
    %c0_82 = arith.constant 0 : index
    %497 = vector.load %arg3[%496, %c0_82] : memref<520x128xf32, #tpu.memory_space<vmem>>, vector<2x128xf32>
    %498 = vector.extract_strided_slice %448 {offsets = [0, 6], sizes = [1, 1], strides = [1, 1]} : vector<1x8xf32> to vector<1x1xf32>
    %499 = vector.extract_strided_slice %497 {offsets = [0, 0], sizes = [1, 128], strides = [1, 1]} : vector<2x128xf32> to vector<1x128xf32>
    %500 = vector.broadcast %498 : vector<1x1xf32> to vector<1x128xf32>
    %501 = arith.mulf %500, %499 : vector<1x128xf32>
    %502 = vector.extract_strided_slice %448 {offsets = [0, 7], sizes = [1, 1], strides = [1, 1]} : vector<1x8xf32> to vector<1x1xf32>
    %503 = vector.extract_strided_slice %497 {offsets = [1, 0], sizes = [1, 128], strides = [1, 1]} : vector<2x128xf32> to vector<1x128xf32>
    %504 = vector.broadcast %502 : vector<1x1xf32> to vector<1x128xf32>
    %505 = arith.mulf %504, %503 : vector<1x128xf32>
    %506 = arith.addf %501, %505 : vector<1x128xf32>
    %507 = arith.addf %492, %506 : vector<1x128xf32>
    %508 = vector.broadcast %507 : vector<1x128xf32> to vector<8x128xf32>
    %509 = arith.mulf %508, %29 : vector<8x128xf32>
    %510 = arith.addf %442, %509 : vector<8x128xf32>
    %c8_i32_83 = arith.constant 8 : i32
    %511 = arith.muli %c0_i32_0, %c8_i32_83 : i32
    %c7_i32_84 = arith.constant 7 : i32
    %512 = arith.addi %511, %c7_i32_84 : i32
    %c4_i32_85 = arith.constant 4 : i32
    %513 = arith.muli %512, %c4_i32_85 : i32
    %514 = arith.addi %0, %513 : i32
    %515 = arith.index_cast %512 : i32 to index
    %c0_86 = arith.constant 0 : index
    %516 = vector.load %arg2[%515, %c0_86] : memref<16x8xf32, #tpu.memory_space<vmem>>, vector<1x8xf32>
    %c0_i32_87 = arith.constant 0 : i32
    %517 = arith.addi %514, %c0_i32_87 : i32
    %518 = arith.index_cast %517 : i32 to index
    %519 = memref.load %arg1[%518] : memref<64xi32, #tpu.memory_space<smem>>
    %520 = arith.index_cast %519 : i32 to index
    %c0_88 = arith.constant 0 : index
    %521 = vector.load %arg3[%520, %c0_88] : memref<520x128xf32, #tpu.memory_space<vmem>>, vector<2x128xf32>
    %522 = vector.extract_strided_slice %516 {offsets = [0, 0], sizes = [1, 1], strides = [1, 1]} : vector<1x8xf32> to vector<1x1xf32>
    %523 = vector.extract_strided_slice %521 {offsets = [0, 0], sizes = [1, 128], strides = [1, 1]} : vector<2x128xf32> to vector<1x128xf32>
    %524 = vector.broadcast %522 : vector<1x1xf32> to vector<1x128xf32>
    %525 = arith.mulf %524, %523 : vector<1x128xf32>
    %526 = vector.extract_strided_slice %516 {offsets = [0, 1], sizes = [1, 1], strides = [1, 1]} : vector<1x8xf32> to vector<1x1xf32>
    %527 = vector.extract_strided_slice %521 {offsets = [1, 0], sizes = [1, 128], strides = [1, 1]} : vector<2x128xf32> to vector<1x128xf32>
    %528 = vector.broadcast %526 : vector<1x1xf32> to vector<1x128xf32>
    %529 = arith.mulf %528, %527 : vector<1x128xf32>
    %530 = arith.addf %525, %529 : vector<1x128xf32>
    %c1_i32_89 = arith.constant 1 : i32
    %531 = arith.addi %514, %c1_i32_89 : i32
    %532 = arith.index_cast %531 : i32 to index
    %533 = memref.load %arg1[%532] : memref<64xi32, #tpu.memory_space<smem>>
    %534 = arith.index_cast %533 : i32 to index
    %c0_90 = arith.constant 0 : index
    %535 = vector.load %arg3[%534, %c0_90] : memref<520x128xf32, #tpu.memory_space<vmem>>, vector<2x128xf32>
    %536 = vector.extract_strided_slice %516 {offsets = [0, 2], sizes = [1, 1], strides = [1, 1]} : vector<1x8xf32> to vector<1x1xf32>
    %537 = vector.extract_strided_slice %535 {offsets = [0, 0], sizes = [1, 128], strides = [1, 1]} : vector<2x128xf32> to vector<1x128xf32>
    %538 = vector.broadcast %536 : vector<1x1xf32> to vector<1x128xf32>
    %539 = arith.mulf %538, %537 : vector<1x128xf32>
    %540 = vector.extract_strided_slice %516 {offsets = [0, 3], sizes = [1, 1], strides = [1, 1]} : vector<1x8xf32> to vector<1x1xf32>
    %541 = vector.extract_strided_slice %535 {offsets = [1, 0], sizes = [1, 128], strides = [1, 1]} : vector<2x128xf32> to vector<1x128xf32>
    %542 = vector.broadcast %540 : vector<1x1xf32> to vector<1x128xf32>
    %543 = arith.mulf %542, %541 : vector<1x128xf32>
    %544 = arith.addf %539, %543 : vector<1x128xf32>
    %545 = arith.addf %530, %544 : vector<1x128xf32>
    %c2_i32_91 = arith.constant 2 : i32
    %546 = arith.addi %514, %c2_i32_91 : i32
    %547 = arith.index_cast %546 : i32 to index
    %548 = memref.load %arg1[%547] : memref<64xi32, #tpu.memory_space<smem>>
    %549 = arith.index_cast %548 : i32 to index
    %c0_92 = arith.constant 0 : index
    %550 = vector.load %arg3[%549, %c0_92] : memref<520x128xf32, #tpu.memory_space<vmem>>, vector<2x128xf32>
    %551 = vector.extract_strided_slice %516 {offsets = [0, 4], sizes = [1, 1], strides = [1, 1]} : vector<1x8xf32> to vector<1x1xf32>
    %552 = vector.extract_strided_slice %550 {offsets = [0, 0], sizes = [1, 128], strides = [1, 1]} : vector<2x128xf32> to vector<1x128xf32>
    %553 = vector.broadcast %551 : vector<1x1xf32> to vector<1x128xf32>
    %554 = arith.mulf %553, %552 : vector<1x128xf32>
    %555 = vector.extract_strided_slice %516 {offsets = [0, 5], sizes = [1, 1], strides = [1, 1]} : vector<1x8xf32> to vector<1x1xf32>
    %556 = vector.extract_strided_slice %550 {offsets = [1, 0], sizes = [1, 128], strides = [1, 1]} : vector<2x128xf32> to vector<1x128xf32>
    %557 = vector.broadcast %555 : vector<1x1xf32> to vector<1x128xf32>
    %558 = arith.mulf %557, %556 : vector<1x128xf32>
    %559 = arith.addf %554, %558 : vector<1x128xf32>
    %560 = arith.addf %545, %559 : vector<1x128xf32>
    %c3_i32_93 = arith.constant 3 : i32
    %561 = arith.addi %514, %c3_i32_93 : i32
    %562 = arith.index_cast %561 : i32 to index
    %563 = memref.load %arg1[%562] : memref<64xi32, #tpu.memory_space<smem>>
    %564 = arith.index_cast %563 : i32 to index
    %c0_94 = arith.constant 0 : index
    %565 = vector.load %arg3[%564, %c0_94] : memref<520x128xf32, #tpu.memory_space<vmem>>, vector<2x128xf32>
    %566 = vector.extract_strided_slice %516 {offsets = [0, 6], sizes = [1, 1], strides = [1, 1]} : vector<1x8xf32> to vector<1x1xf32>
    %567 = vector.extract_strided_slice %565 {offsets = [0, 0], sizes = [1, 128], strides = [1, 1]} : vector<2x128xf32> to vector<1x128xf32>
    %568 = vector.broadcast %566 : vector<1x1xf32> to vector<1x128xf32>
    %569 = arith.mulf %568, %567 : vector<1x128xf32>
    %570 = vector.extract_strided_slice %516 {offsets = [0, 7], sizes = [1, 1], strides = [1, 1]} : vector<1x8xf32> to vector<1x1xf32>
    %571 = vector.extract_strided_slice %565 {offsets = [1, 0], sizes = [1, 128], strides = [1, 1]} : vector<2x128xf32> to vector<1x128xf32>
    %572 = vector.broadcast %570 : vector<1x1xf32> to vector<1x128xf32>
    %573 = arith.mulf %572, %571 : vector<1x128xf32>
    %574 = arith.addf %569, %573 : vector<1x128xf32>
    %575 = arith.addf %560, %574 : vector<1x128xf32>
    %576 = vector.broadcast %575 : vector<1x128xf32> to vector<8x128xf32>
    %577 = arith.mulf %576, %33 : vector<8x128xf32>
    %578 = arith.addf %510, %577 : vector<8x128xf32>
    %c8_i32_95 = arith.constant 8 : i32
    %579 = arith.muli %c0_i32_0, %c8_i32_95 : i32
    %580 = tpu.assume_multiple %579, 8 : i32
    %581 = arith.index_cast %580 : i32 to index
    %c0_96 = arith.constant 0 : index
    %582 = vector.load %arg4[%581, %c0_96] : memref<16x128xf32, #tpu.memory_space<vmem>>, vector<8x128xf32>
    tpu.vector_store %arg4[%581, %c0_96], %578 {strides = array<i32>} : memref<16x128xf32, #tpu.memory_space<vmem>>, vector<8x128xf32>,
    %c1_i32_97 = arith.constant 1 : i32
    %cst_98 = arith.constant 0.000000e+00 : f32
    %583 = vector.broadcast %cst_98 : f32 to vector<8x128xf32>
    %c8_i32_99 = arith.constant 8 : i32
    %584 = arith.muli %c1_i32_97, %c8_i32_99 : i32
    %c0_i32_100 = arith.constant 0 : i32
    %585 = arith.addi %584, %c0_i32_100 : i32
    %c4_i32_101 = arith.constant 4 : i32
    %586 = arith.muli %585, %c4_i32_101 : i32
    %587 = arith.addi %0, %586 : i32
    %588 = arith.index_cast %585 : i32 to index
    %c0_102 = arith.constant 0 : index
    %589 = vector.load %arg2[%588, %c0_102] : memref<16x8xf32, #tpu.memory_space<vmem>>, vector<1x8xf32>
    %c0_i32_103 = arith.constant 0 : i32
    %590 = arith.addi %587, %c0_i32_103 : i32
    %591 = arith.index_cast %590 : i32 to index
    %592 = memref.load %arg1[%591] : memref<64xi32, #tpu.memory_space<smem>>
    %593 = arith.index_cast %592 : i32 to index
    %c0_104 = arith.constant 0 : index
    %594 = vector.load %arg3[%593, %c0_104] : memref<520x128xf32, #tpu.memory_space<vmem>>, vector<2x128xf32>
    %595 = vector.extract_strided_slice %589 {offsets = [0, 0], sizes = [1, 1], strides = [1, 1]} : vector<1x8xf32> to vector<1x1xf32>
    %596 = vector.extract_strided_slice %594 {offsets = [0, 0], sizes = [1, 128], strides = [1, 1]} : vector<2x128xf32> to vector<1x128xf32>
    %597 = vector.broadcast %595 : vector<1x1xf32> to vector<1x128xf32>
    %598 = arith.mulf %597, %596 : vector<1x128xf32>
    %599 = vector.extract_strided_slice %589 {offsets = [0, 1], sizes = [1, 1], strides = [1, 1]} : vector<1x8xf32> to vector<1x1xf32>
    %600 = vector.extract_strided_slice %594 {offsets = [1, 0], sizes = [1, 128], strides = [1, 1]} : vector<2x128xf32> to vector<1x128xf32>
    %601 = vector.broadcast %599 : vector<1x1xf32> to vector<1x128xf32>
    %602 = arith.mulf %601, %600 : vector<1x128xf32>
    %603 = arith.addf %598, %602 : vector<1x128xf32>
    %c1_i32_105 = arith.constant 1 : i32
    %604 = arith.addi %587, %c1_i32_105 : i32
    %605 = arith.index_cast %604 : i32 to index
    %606 = memref.load %arg1[%605] : memref<64xi32, #tpu.memory_space<smem>>
    %607 = arith.index_cast %606 : i32 to index
    %c0_106 = arith.constant 0 : index
    %608 = vector.load %arg3[%607, %c0_106] : memref<520x128xf32, #tpu.memory_space<vmem>>, vector<2x128xf32>
    %609 = vector.extract_strided_slice %589 {offsets = [0, 2], sizes = [1, 1], strides = [1, 1]} : vector<1x8xf32> to vector<1x1xf32>
    %610 = vector.extract_strided_slice %608 {offsets = [0, 0], sizes = [1, 128], strides = [1, 1]} : vector<2x128xf32> to vector<1x128xf32>
    %611 = vector.broadcast %609 : vector<1x1xf32> to vector<1x128xf32>
    %612 = arith.mulf %611, %610 : vector<1x128xf32>
    %613 = vector.extract_strided_slice %589 {offsets = [0, 3], sizes = [1, 1], strides = [1, 1]} : vector<1x8xf32> to vector<1x1xf32>
    %614 = vector.extract_strided_slice %608 {offsets = [1, 0], sizes = [1, 128], strides = [1, 1]} : vector<2x128xf32> to vector<1x128xf32>
    %615 = vector.broadcast %613 : vector<1x1xf32> to vector<1x128xf32>
    %616 = arith.mulf %615, %614 : vector<1x128xf32>
    %617 = arith.addf %612, %616 : vector<1x128xf32>
    %618 = arith.addf %603, %617 : vector<1x128xf32>
    %c2_i32_107 = arith.constant 2 : i32
    %619 = arith.addi %587, %c2_i32_107 : i32
    %620 = arith.index_cast %619 : i32 to index
    %621 = memref.load %arg1[%620] : memref<64xi32, #tpu.memory_space<smem>>
    %622 = arith.index_cast %621 : i32 to index
    %c0_108 = arith.constant 0 : index
    %623 = vector.load %arg3[%622, %c0_108] : memref<520x128xf32, #tpu.memory_space<vmem>>, vector<2x128xf32>
    %624 = vector.extract_strided_slice %589 {offsets = [0, 4], sizes = [1, 1], strides = [1, 1]} : vector<1x8xf32> to vector<1x1xf32>
    %625 = vector.extract_strided_slice %623 {offsets = [0, 0], sizes = [1, 128], strides = [1, 1]} : vector<2x128xf32> to vector<1x128xf32>
    %626 = vector.broadcast %624 : vector<1x1xf32> to vector<1x128xf32>
    %627 = arith.mulf %626, %625 : vector<1x128xf32>
    %628 = vector.extract_strided_slice %589 {offsets = [0, 5], sizes = [1, 1], strides = [1, 1]} : vector<1x8xf32> to vector<1x1xf32>
    %629 = vector.extract_strided_slice %623 {offsets = [1, 0], sizes = [1, 128], strides = [1, 1]} : vector<2x128xf32> to vector<1x128xf32>
    %630 = vector.broadcast %628 : vector<1x1xf32> to vector<1x128xf32>
    %631 = arith.mulf %630, %629 : vector<1x128xf32>
    %632 = arith.addf %627, %631 : vector<1x128xf32>
    %633 = arith.addf %618, %632 : vector<1x128xf32>
    %c3_i32_109 = arith.constant 3 : i32
    %634 = arith.addi %587, %c3_i32_109 : i32
    %635 = arith.index_cast %634 : i32 to index
    %636 = memref.load %arg1[%635] : memref<64xi32, #tpu.memory_space<smem>>
    %637 = arith.index_cast %636 : i32 to index
    %c0_110 = arith.constant 0 : index
    %638 = vector.load %arg3[%637, %c0_110] : memref<520x128xf32, #tpu.memory_space<vmem>>, vector<2x128xf32>
    %639 = vector.extract_strided_slice %589 {offsets = [0, 6], sizes = [1, 1], strides = [1, 1]} : vector<1x8xf32> to vector<1x1xf32>
    %640 = vector.extract_strided_slice %638 {offsets = [0, 0], sizes = [1, 128], strides = [1, 1]} : vector<2x128xf32> to vector<1x128xf32>
    %641 = vector.broadcast %639 : vector<1x1xf32> to vector<1x128xf32>
    %642 = arith.mulf %641, %640 : vector<1x128xf32>
    %643 = vector.extract_strided_slice %589 {offsets = [0, 7], sizes = [1, 1], strides = [1, 1]} : vector<1x8xf32> to vector<1x1xf32>
    %644 = vector.extract_strided_slice %638 {offsets = [1, 0], sizes = [1, 128], strides = [1, 1]} : vector<2x128xf32> to vector<1x128xf32>
    %645 = vector.broadcast %643 : vector<1x1xf32> to vector<1x128xf32>
    %646 = arith.mulf %645, %644 : vector<1x128xf32>
    %647 = arith.addf %642, %646 : vector<1x128xf32>
    %648 = arith.addf %633, %647 : vector<1x128xf32>
    %649 = vector.broadcast %648 : vector<1x128xf32> to vector<8x128xf32>
    %650 = arith.mulf %649, %5 : vector<8x128xf32>
    %651 = arith.addf %583, %650 : vector<8x128xf32>
    %c8_i32_111 = arith.constant 8 : i32
    %652 = arith.muli %c1_i32_97, %c8_i32_111 : i32
    %c1_i32_112 = arith.constant 1 : i32
    %653 = arith.addi %652, %c1_i32_112 : i32
    %c4_i32_113 = arith.constant 4 : i32
    %654 = arith.muli %653, %c4_i32_113 : i32
    %655 = arith.addi %0, %654 : i32
    %656 = arith.index_cast %653 : i32 to index
    %c0_114 = arith.constant 0 : index
    %657 = vector.load %arg2[%656, %c0_114] : memref<16x8xf32, #tpu.memory_space<vmem>>, vector<1x8xf32>
    %c0_i32_115 = arith.constant 0 : i32
    %658 = arith.addi %655, %c0_i32_115 : i32
    %659 = arith.index_cast %658 : i32 to index
    %660 = memref.load %arg1[%659] : memref<64xi32, #tpu.memory_space<smem>>
    %661 = arith.index_cast %660 : i32 to index
    %c0_116 = arith.constant 0 : index
    %662 = vector.load %arg3[%661, %c0_116] : memref<520x128xf32, #tpu.memory_space<vmem>>, vector<2x128xf32>
    %663 = vector.extract_strided_slice %657 {offsets = [0, 0], sizes = [1, 1], strides = [1, 1]} : vector<1x8xf32> to vector<1x1xf32>
    %664 = vector.extract_strided_slice %662 {offsets = [0, 0], sizes = [1, 128], strides = [1, 1]} : vector<2x128xf32> to vector<1x128xf32>
    %665 = vector.broadcast %663 : vector<1x1xf32> to vector<1x128xf32>
    %666 = arith.mulf %665, %664 : vector<1x128xf32>
    %667 = vector.extract_strided_slice %657 {offsets = [0, 1], sizes = [1, 1], strides = [1, 1]} : vector<1x8xf32> to vector<1x1xf32>
    %668 = vector.extract_strided_slice %662 {offsets = [1, 0], sizes = [1, 128], strides = [1, 1]} : vector<2x128xf32> to vector<1x128xf32>
    %669 = vector.broadcast %667 : vector<1x1xf32> to vector<1x128xf32>
    %670 = arith.mulf %669, %668 : vector<1x128xf32>
    %671 = arith.addf %666, %670 : vector<1x128xf32>
    %c1_i32_117 = arith.constant 1 : i32
    %672 = arith.addi %655, %c1_i32_117 : i32
    %673 = arith.index_cast %672 : i32 to index
    %674 = memref.load %arg1[%673] : memref<64xi32, #tpu.memory_space<smem>>
    %675 = arith.index_cast %674 : i32 to index
    %c0_118 = arith.constant 0 : index
    %676 = vector.load %arg3[%675, %c0_118] : memref<520x128xf32, #tpu.memory_space<vmem>>, vector<2x128xf32>
    %677 = vector.extract_strided_slice %657 {offsets = [0, 2], sizes = [1, 1], strides = [1, 1]} : vector<1x8xf32> to vector<1x1xf32>
    %678 = vector.extract_strided_slice %676 {offsets = [0, 0], sizes = [1, 128], strides = [1, 1]} : vector<2x128xf32> to vector<1x128xf32>
    %679 = vector.broadcast %677 : vector<1x1xf32> to vector<1x128xf32>
    %680 = arith.mulf %679, %678 : vector<1x128xf32>
    %681 = vector.extract_strided_slice %657 {offsets = [0, 3], sizes = [1, 1], strides = [1, 1]} : vector<1x8xf32> to vector<1x1xf32>
    %682 = vector.extract_strided_slice %676 {offsets = [1, 0], sizes = [1, 128], strides = [1, 1]} : vector<2x128xf32> to vector<1x128xf32>
    %683 = vector.broadcast %681 : vector<1x1xf32> to vector<1x128xf32>
    %684 = arith.mulf %683, %682 : vector<1x128xf32>
    %685 = arith.addf %680, %684 : vector<1x128xf32>
    %686 = arith.addf %671, %685 : vector<1x128xf32>
    %c2_i32_119 = arith.constant 2 : i32
    %687 = arith.addi %655, %c2_i32_119 : i32
    %688 = arith.index_cast %687 : i32 to index
    %689 = memref.load %arg1[%688] : memref<64xi32, #tpu.memory_space<smem>>
    %690 = arith.index_cast %689 : i32 to index
    %c0_120 = arith.constant 0 : index
    %691 = vector.load %arg3[%690, %c0_120] : memref<520x128xf32, #tpu.memory_space<vmem>>, vector<2x128xf32>
    %692 = vector.extract_strided_slice %657 {offsets = [0, 4], sizes = [1, 1], strides = [1, 1]} : vector<1x8xf32> to vector<1x1xf32>
    %693 = vector.extract_strided_slice %691 {offsets = [0, 0], sizes = [1, 128], strides = [1, 1]} : vector<2x128xf32> to vector<1x128xf32>
    %694 = vector.broadcast %692 : vector<1x1xf32> to vector<1x128xf32>
    %695 = arith.mulf %694, %693 : vector<1x128xf32>
    %696 = vector.extract_strided_slice %657 {offsets = [0, 5], sizes = [1, 1], strides = [1, 1]} : vector<1x8xf32> to vector<1x1xf32>
    %697 = vector.extract_strided_slice %691 {offsets = [1, 0], sizes = [1, 128], strides = [1, 1]} : vector<2x128xf32> to vector<1x128xf32>
    %698 = vector.broadcast %696 : vector<1x1xf32> to vector<1x128xf32>
    %699 = arith.mulf %698, %697 : vector<1x128xf32>
    %700 = arith.addf %695, %699 : vector<1x128xf32>
    %701 = arith.addf %686, %700 : vector<1x128xf32>
    %c3_i32_121 = arith.constant 3 : i32
    %702 = arith.addi %655, %c3_i32_121 : i32
    %703 = arith.index_cast %702 : i32 to index
    %704 = memref.load %arg1[%703] : memref<64xi32, #tpu.memory_space<smem>>
    %705 = arith.index_cast %704 : i32 to index
    %c0_122 = arith.constant 0 : index
    %706 = vector.load %arg3[%705, %c0_122] : memref<520x128xf32, #tpu.memory_space<vmem>>, vector<2x128xf32>
    %707 = vector.extract_strided_slice %657 {offsets = [0, 6], sizes = [1, 1], strides = [1, 1]} : vector<1x8xf32> to vector<1x1xf32>
    %708 = vector.extract_strided_slice %706 {offsets = [0, 0], sizes = [1, 128], strides = [1, 1]} : vector<2x128xf32> to vector<1x128xf32>
    %709 = vector.broadcast %707 : vector<1x1xf32> to vector<1x128xf32>
    %710 = arith.mulf %709, %708 : vector<1x128xf32>
    %711 = vector.extract_strided_slice %657 {offsets = [0, 7], sizes = [1, 1], strides = [1, 1]} : vector<1x8xf32> to vector<1x1xf32>
    %712 = vector.extract_strided_slice %706 {offsets = [1, 0], sizes = [1, 128], strides = [1, 1]} : vector<2x128xf32> to vector<1x128xf32>
    %713 = vector.broadcast %711 : vector<1x1xf32> to vector<1x128xf32>
    %714 = arith.mulf %713, %712 : vector<1x128xf32>
    %715 = arith.addf %710, %714 : vector<1x128xf32>
    %716 = arith.addf %701, %715 : vector<1x128xf32>
    %717 = vector.broadcast %716 : vector<1x128xf32> to vector<8x128xf32>
    %718 = arith.mulf %717, %9 : vector<8x128xf32>
    %719 = arith.addf %651, %718 : vector<8x128xf32>
    %c8_i32_123 = arith.constant 8 : i32
    %720 = arith.muli %c1_i32_97, %c8_i32_123 : i32
    %c2_i32_124 = arith.constant 2 : i32
    %721 = arith.addi %720, %c2_i32_124 : i32
    %c4_i32_125 = arith.constant 4 : i32
    %722 = arith.muli %721, %c4_i32_125 : i32
    %723 = arith.addi %0, %722 : i32
    %724 = arith.index_cast %721 : i32 to index
    %c0_126 = arith.constant 0 : index
    %725 = vector.load %arg2[%724, %c0_126] : memref<16x8xf32, #tpu.memory_space<vmem>>, vector<1x8xf32>
    %c0_i32_127 = arith.constant 0 : i32
    %726 = arith.addi %723, %c0_i32_127 : i32
    %727 = arith.index_cast %726 : i32 to index
    %728 = memref.load %arg1[%727] : memref<64xi32, #tpu.memory_space<smem>>
    %729 = arith.index_cast %728 : i32 to index
    %c0_128 = arith.constant 0 : index
    %730 = vector.load %arg3[%729, %c0_128] : memref<520x128xf32, #tpu.memory_space<vmem>>, vector<2x128xf32>
    %731 = vector.extract_strided_slice %725 {offsets = [0, 0], sizes = [1, 1], strides = [1, 1]} : vector<1x8xf32> to vector<1x1xf32>
    %732 = vector.extract_strided_slice %730 {offsets = [0, 0], sizes = [1, 128], strides = [1, 1]} : vector<2x128xf32> to vector<1x128xf32>
    %733 = vector.broadcast %731 : vector<1x1xf32> to vector<1x128xf32>
    %734 = arith.mulf %733, %732 : vector<1x128xf32>
    %735 = vector.extract_strided_slice %725 {offsets = [0, 1], sizes = [1, 1], strides = [1, 1]} : vector<1x8xf32> to vector<1x1xf32>
    %736 = vector.extract_strided_slice %730 {offsets = [1, 0], sizes = [1, 128], strides = [1, 1]} : vector<2x128xf32> to vector<1x128xf32>
    %737 = vector.broadcast %735 : vector<1x1xf32> to vector<1x128xf32>
    %738 = arith.mulf %737, %736 : vector<1x128xf32>
    %739 = arith.addf %734, %738 : vector<1x128xf32>
    %c1_i32_129 = arith.constant 1 : i32
    %740 = arith.addi %723, %c1_i32_129 : i32
    %741 = arith.index_cast %740 : i32 to index
    %742 = memref.load %arg1[%741] : memref<64xi32, #tpu.memory_space<smem>>
    %743 = arith.index_cast %742 : i32 to index
    %c0_130 = arith.constant 0 : index
    %744 = vector.load %arg3[%743, %c0_130] : memref<520x128xf32, #tpu.memory_space<vmem>>, vector<2x128xf32>
    %745 = vector.extract_strided_slice %725 {offsets = [0, 2], sizes = [1, 1], strides = [1, 1]} : vector<1x8xf32> to vector<1x1xf32>
    %746 = vector.extract_strided_slice %744 {offsets = [0, 0], sizes = [1, 128], strides = [1, 1]} : vector<2x128xf32> to vector<1x128xf32>
    %747 = vector.broadcast %745 : vector<1x1xf32> to vector<1x128xf32>
    %748 = arith.mulf %747, %746 : vector<1x128xf32>
    %749 = vector.extract_strided_slice %725 {offsets = [0, 3], sizes = [1, 1], strides = [1, 1]} : vector<1x8xf32> to vector<1x1xf32>
    %750 = vector.extract_strided_slice %744 {offsets = [1, 0], sizes = [1, 128], strides = [1, 1]} : vector<2x128xf32> to vector<1x128xf32>
    %751 = vector.broadcast %749 : vector<1x1xf32> to vector<1x128xf32>
    %752 = arith.mulf %751, %750 : vector<1x128xf32>
    %753 = arith.addf %748, %752 : vector<1x128xf32>
    %754 = arith.addf %739, %753 : vector<1x128xf32>
    %c2_i32_131 = arith.constant 2 : i32
    %755 = arith.addi %723, %c2_i32_131 : i32
    %756 = arith.index_cast %755 : i32 to index
    %757 = memref.load %arg1[%756] : memref<64xi32, #tpu.memory_space<smem>>
    %758 = arith.index_cast %757 : i32 to index
    %c0_132 = arith.constant 0 : index
    %759 = vector.load %arg3[%758, %c0_132] : memref<520x128xf32, #tpu.memory_space<vmem>>, vector<2x128xf32>
    %760 = vector.extract_strided_slice %725 {offsets = [0, 4], sizes = [1, 1], strides = [1, 1]} : vector<1x8xf32> to vector<1x1xf32>
    %761 = vector.extract_strided_slice %759 {offsets = [0, 0], sizes = [1, 128], strides = [1, 1]} : vector<2x128xf32> to vector<1x128xf32>
    %762 = vector.broadcast %760 : vector<1x1xf32> to vector<1x128xf32>
    %763 = arith.mulf %762, %761 : vector<1x128xf32>
    %764 = vector.extract_strided_slice %725 {offsets = [0, 5], sizes = [1, 1], strides = [1, 1]} : vector<1x8xf32> to vector<1x1xf32>
    %765 = vector.extract_strided_slice %759 {offsets = [1, 0], sizes = [1, 128], strides = [1, 1]} : vector<2x128xf32> to vector<1x128xf32>
    %766 = vector.broadcast %764 : vector<1x1xf32> to vector<1x128xf32>
    %767 = arith.mulf %766, %765 : vector<1x128xf32>
    %768 = arith.addf %763, %767 : vector<1x128xf32>
    %769 = arith.addf %754, %768 : vector<1x128xf32>
    %c3_i32_133 = arith.constant 3 : i32
    %770 = arith.addi %723, %c3_i32_133 : i32
    %771 = arith.index_cast %770 : i32 to index
    %772 = memref.load %arg1[%771] : memref<64xi32, #tpu.memory_space<smem>>
    %773 = arith.index_cast %772 : i32 to index
    %c0_134 = arith.constant 0 : index
    %774 = vector.load %arg3[%773, %c0_134] : memref<520x128xf32, #tpu.memory_space<vmem>>, vector<2x128xf32>
    %775 = vector.extract_strided_slice %725 {offsets = [0, 6], sizes = [1, 1], strides = [1, 1]} : vector<1x8xf32> to vector<1x1xf32>
    %776 = vector.extract_strided_slice %774 {offsets = [0, 0], sizes = [1, 128], strides = [1, 1]} : vector<2x128xf32> to vector<1x128xf32>
    %777 = vector.broadcast %775 : vector<1x1xf32> to vector<1x128xf32>
    %778 = arith.mulf %777, %776 : vector<1x128xf32>
    %779 = vector.extract_strided_slice %725 {offsets = [0, 7], sizes = [1, 1], strides = [1, 1]} : vector<1x8xf32> to vector<1x1xf32>
    %780 = vector.extract_strided_slice %774 {offsets = [1, 0], sizes = [1, 128], strides = [1, 1]} : vector<2x128xf32> to vector<1x128xf32>
    %781 = vector.broadcast %779 : vector<1x1xf32> to vector<1x128xf32>
    %782 = arith.mulf %781, %780 : vector<1x128xf32>
    %783 = arith.addf %778, %782 : vector<1x128xf32>
    %784 = arith.addf %769, %783 : vector<1x128xf32>
    %785 = vector.broadcast %784 : vector<1x128xf32> to vector<8x128xf32>
    %786 = arith.mulf %785, %13 : vector<8x128xf32>
    %787 = arith.addf %719, %786 : vector<8x128xf32>
    %c8_i32_135 = arith.constant 8 : i32
    %788 = arith.muli %c1_i32_97, %c8_i32_135 : i32
    %c3_i32_136 = arith.constant 3 : i32
    %789 = arith.addi %788, %c3_i32_136 : i32
    %c4_i32_137 = arith.constant 4 : i32
    %790 = arith.muli %789, %c4_i32_137 : i32
    %791 = arith.addi %0, %790 : i32
    %792 = arith.index_cast %789 : i32 to index
    %c0_138 = arith.constant 0 : index
    %793 = vector.load %arg2[%792, %c0_138] : memref<16x8xf32, #tpu.memory_space<vmem>>, vector<1x8xf32>
    %c0_i32_139 = arith.constant 0 : i32
    %794 = arith.addi %791, %c0_i32_139 : i32
    %795 = arith.index_cast %794 : i32 to index
    %796 = memref.load %arg1[%795] : memref<64xi32, #tpu.memory_space<smem>>
    %797 = arith.index_cast %796 : i32 to index
    %c0_140 = arith.constant 0 : index
    %798 = vector.load %arg3[%797, %c0_140] : memref<520x128xf32, #tpu.memory_space<vmem>>, vector<2x128xf32>
    %799 = vector.extract_strided_slice %793 {offsets = [0, 0], sizes = [1, 1], strides = [1, 1]} : vector<1x8xf32> to vector<1x1xf32>
    %800 = vector.extract_strided_slice %798 {offsets = [0, 0], sizes = [1, 128], strides = [1, 1]} : vector<2x128xf32> to vector<1x128xf32>
    %801 = vector.broadcast %799 : vector<1x1xf32> to vector<1x128xf32>
    %802 = arith.mulf %801, %800 : vector<1x128xf32>
    %803 = vector.extract_strided_slice %793 {offsets = [0, 1], sizes = [1, 1], strides = [1, 1]} : vector<1x8xf32> to vector<1x1xf32>
    %804 = vector.extract_strided_slice %798 {offsets = [1, 0], sizes = [1, 128], strides = [1, 1]} : vector<2x128xf32> to vector<1x128xf32>
    %805 = vector.broadcast %803 : vector<1x1xf32> to vector<1x128xf32>
    %806 = arith.mulf %805, %804 : vector<1x128xf32>
    %807 = arith.addf %802, %806 : vector<1x128xf32>
    %c1_i32_141 = arith.constant 1 : i32
    %808 = arith.addi %791, %c1_i32_141 : i32
    %809 = arith.index_cast %808 : i32 to index
    %810 = memref.load %arg1[%809] : memref<64xi32, #tpu.memory_space<smem>>
    %811 = arith.index_cast %810 : i32 to index
    %c0_142 = arith.constant 0 : index
    %812 = vector.load %arg3[%811, %c0_142] : memref<520x128xf32, #tpu.memory_space<vmem>>, vector<2x128xf32>
    %813 = vector.extract_strided_slice %793 {offsets = [0, 2], sizes = [1, 1], strides = [1, 1]} : vector<1x8xf32> to vector<1x1xf32>
    %814 = vector.extract_strided_slice %812 {offsets = [0, 0], sizes = [1, 128], strides = [1, 1]} : vector<2x128xf32> to vector<1x128xf32>
    %815 = vector.broadcast %813 : vector<1x1xf32> to vector<1x128xf32>
    %816 = arith.mulf %815, %814 : vector<1x128xf32>
    %817 = vector.extract_strided_slice %793 {offsets = [0, 3], sizes = [1, 1], strides = [1, 1]} : vector<1x8xf32> to vector<1x1xf32>
    %818 = vector.extract_strided_slice %812 {offsets = [1, 0], sizes = [1, 128], strides = [1, 1]} : vector<2x128xf32> to vector<1x128xf32>
    %819 = vector.broadcast %817 : vector<1x1xf32> to vector<1x128xf32>
    %820 = arith.mulf %819, %818 : vector<1x128xf32>
    %821 = arith.addf %816, %820 : vector<1x128xf32>
    %822 = arith.addf %807, %821 : vector<1x128xf32>
    %c2_i32_143 = arith.constant 2 : i32
    %823 = arith.addi %791, %c2_i32_143 : i32
    %824 = arith.index_cast %823 : i32 to index
    %825 = memref.load %arg1[%824] : memref<64xi32, #tpu.memory_space<smem>>
    %826 = arith.index_cast %825 : i32 to index
    %c0_144 = arith.constant 0 : index
    %827 = vector.load %arg3[%826, %c0_144] : memref<520x128xf32, #tpu.memory_space<vmem>>, vector<2x128xf32>
    %828 = vector.extract_strided_slice %793 {offsets = [0, 4], sizes = [1, 1], strides = [1, 1]} : vector<1x8xf32> to vector<1x1xf32>
    %829 = vector.extract_strided_slice %827 {offsets = [0, 0], sizes = [1, 128], strides = [1, 1]} : vector<2x128xf32> to vector<1x128xf32>
    %830 = vector.broadcast %828 : vector<1x1xf32> to vector<1x128xf32>
    %831 = arith.mulf %830, %829 : vector<1x128xf32>
    %832 = vector.extract_strided_slice %793 {offsets = [0, 5], sizes = [1, 1], strides = [1, 1]} : vector<1x8xf32> to vector<1x1xf32>
    %833 = vector.extract_strided_slice %827 {offsets = [1, 0], sizes = [1, 128], strides = [1, 1]} : vector<2x128xf32> to vector<1x128xf32>
    %834 = vector.broadcast %832 : vector<1x1xf32> to vector<1x128xf32>
    %835 = arith.mulf %834, %833 : vector<1x128xf32>
    %836 = arith.addf %831, %835 : vector<1x128xf32>
    %837 = arith.addf %822, %836 : vector<1x128xf32>
    %c3_i32_145 = arith.constant 3 : i32
    %838 = arith.addi %791, %c3_i32_145 : i32
    %839 = arith.index_cast %838 : i32 to index
    %840 = memref.load %arg1[%839] : memref<64xi32, #tpu.memory_space<smem>>
    %841 = arith.index_cast %840 : i32 to index
    %c0_146 = arith.constant 0 : index
    %842 = vector.load %arg3[%841, %c0_146] : memref<520x128xf32, #tpu.memory_space<vmem>>, vector<2x128xf32>
    %843 = vector.extract_strided_slice %793 {offsets = [0, 6], sizes = [1, 1], strides = [1, 1]} : vector<1x8xf32> to vector<1x1xf32>
    %844 = vector.extract_strided_slice %842 {offsets = [0, 0], sizes = [1, 128], strides = [1, 1]} : vector<2x128xf32> to vector<1x128xf32>
    %845 = vector.broadcast %843 : vector<1x1xf32> to vector<1x128xf32>
    %846 = arith.mulf %845, %844 : vector<1x128xf32>
    %847 = vector.extract_strided_slice %793 {offsets = [0, 7], sizes = [1, 1], strides = [1, 1]} : vector<1x8xf32> to vector<1x1xf32>
    %848 = vector.extract_strided_slice %842 {offsets = [1, 0], sizes = [1, 128], strides = [1, 1]} : vector<2x128xf32> to vector<1x128xf32>
    %849 = vector.broadcast %847 : vector<1x1xf32> to vector<1x128xf32>
    %850 = arith.mulf %849, %848 : vector<1x128xf32>
    %851 = arith.addf %846, %850 : vector<1x128xf32>
    %852 = arith.addf %837, %851 : vector<1x128xf32>
    %853 = vector.broadcast %852 : vector<1x128xf32> to vector<8x128xf32>
    %854 = arith.mulf %853, %17 : vector<8x128xf32>
    %855 = arith.addf %787, %854 : vector<8x128xf32>
    %c8_i32_147 = arith.constant 8 : i32
    %856 = arith.muli %c1_i32_97, %c8_i32_147 : i32
    %c4_i32_148 = arith.constant 4 : i32
    %857 = arith.addi %856, %c4_i32_148 : i32
    %c4_i32_149 = arith.constant 4 : i32
    %858 = arith.muli %857, %c4_i32_149 : i32
    %859 = arith.addi %0, %858 : i32
    %860 = arith.index_cast %857 : i32 to index
    %c0_150 = arith.constant 0 : index
    %861 = vector.load %arg2[%860, %c0_150] : memref<16x8xf32, #tpu.memory_space<vmem>>, vector<1x8xf32>
    %c0_i32_151 = arith.constant 0 : i32
    %862 = arith.addi %859, %c0_i32_151 : i32
    %863 = arith.index_cast %862 : i32 to index
    %864 = memref.load %arg1[%863] : memref<64xi32, #tpu.memory_space<smem>>
    %865 = arith.index_cast %864 : i32 to index
    %c0_152 = arith.constant 0 : index
    %866 = vector.load %arg3[%865, %c0_152] : memref<520x128xf32, #tpu.memory_space<vmem>>, vector<2x128xf32>
    %867 = vector.extract_strided_slice %861 {offsets = [0, 0], sizes = [1, 1], strides = [1, 1]} : vector<1x8xf32> to vector<1x1xf32>
    %868 = vector.extract_strided_slice %866 {offsets = [0, 0], sizes = [1, 128], strides = [1, 1]} : vector<2x128xf32> to vector<1x128xf32>
    %869 = vector.broadcast %867 : vector<1x1xf32> to vector<1x128xf32>
    %870 = arith.mulf %869, %868 : vector<1x128xf32>
    %871 = vector.extract_strided_slice %861 {offsets = [0, 1], sizes = [1, 1], strides = [1, 1]} : vector<1x8xf32> to vector<1x1xf32>
    %872 = vector.extract_strided_slice %866 {offsets = [1, 0], sizes = [1, 128], strides = [1, 1]} : vector<2x128xf32> to vector<1x128xf32>
    %873 = vector.broadcast %871 : vector<1x1xf32> to vector<1x128xf32>
    %874 = arith.mulf %873, %872 : vector<1x128xf32>
    %875 = arith.addf %870, %874 : vector<1x128xf32>
    %c1_i32_153 = arith.constant 1 : i32
    %876 = arith.addi %859, %c1_i32_153 : i32
    %877 = arith.index_cast %876 : i32 to index
    %878 = memref.load %arg1[%877] : memref<64xi32, #tpu.memory_space<smem>>
    %879 = arith.index_cast %878 : i32 to index
    %c0_154 = arith.constant 0 : index
    %880 = vector.load %arg3[%879, %c0_154] : memref<520x128xf32, #tpu.memory_space<vmem>>, vector<2x128xf32>
    %881 = vector.extract_strided_slice %861 {offsets = [0, 2], sizes = [1, 1], strides = [1, 1]} : vector<1x8xf32> to vector<1x1xf32>
    %882 = vector.extract_strided_slice %880 {offsets = [0, 0], sizes = [1, 128], strides = [1, 1]} : vector<2x128xf32> to vector<1x128xf32>
    %883 = vector.broadcast %881 : vector<1x1xf32> to vector<1x128xf32>
    %884 = arith.mulf %883, %882 : vector<1x128xf32>
    %885 = vector.extract_strided_slice %861 {offsets = [0, 3], sizes = [1, 1], strides = [1, 1]} : vector<1x8xf32> to vector<1x1xf32>
    %886 = vector.extract_strided_slice %880 {offsets = [1, 0], sizes = [1, 128], strides = [1, 1]} : vector<2x128xf32> to vector<1x128xf32>
    %887 = vector.broadcast %885 : vector<1x1xf32> to vector<1x128xf32>
    %888 = arith.mulf %887, %886 : vector<1x128xf32>
    %889 = arith.addf %884, %888 : vector<1x128xf32>
    %890 = arith.addf %875, %889 : vector<1x128xf32>
    %c2_i32_155 = arith.constant 2 : i32
    %891 = arith.addi %859, %c2_i32_155 : i32
    %892 = arith.index_cast %891 : i32 to index
    %893 = memref.load %arg1[%892] : memref<64xi32, #tpu.memory_space<smem>>
    %894 = arith.index_cast %893 : i32 to index
    %c0_156 = arith.constant 0 : index
    %895 = vector.load %arg3[%894, %c0_156] : memref<520x128xf32, #tpu.memory_space<vmem>>, vector<2x128xf32>
    %896 = vector.extract_strided_slice %861 {offsets = [0, 4], sizes = [1, 1], strides = [1, 1]} : vector<1x8xf32> to vector<1x1xf32>
    %897 = vector.extract_strided_slice %895 {offsets = [0, 0], sizes = [1, 128], strides = [1, 1]} : vector<2x128xf32> to vector<1x128xf32>
    %898 = vector.broadcast %896 : vector<1x1xf32> to vector<1x128xf32>
    %899 = arith.mulf %898, %897 : vector<1x128xf32>
    %900 = vector.extract_strided_slice %861 {offsets = [0, 5], sizes = [1, 1], strides = [1, 1]} : vector<1x8xf32> to vector<1x1xf32>
    %901 = vector.extract_strided_slice %895 {offsets = [1, 0], sizes = [1, 128], strides = [1, 1]} : vector<2x128xf32> to vector<1x128xf32>
    %902 = vector.broadcast %900 : vector<1x1xf32> to vector<1x128xf32>
    %903 = arith.mulf %902, %901 : vector<1x128xf32>
    %904 = arith.addf %899, %903 : vector<1x128xf32>
    %905 = arith.addf %890, %904 : vector<1x128xf32>
    %c3_i32_157 = arith.constant 3 : i32
    %906 = arith.addi %859, %c3_i32_157 : i32
    %907 = arith.index_cast %906 : i32 to index
    %908 = memref.load %arg1[%907] : memref<64xi32, #tpu.memory_space<smem>>
    %909 = arith.index_cast %908 : i32 to index
    %c0_158 = arith.constant 0 : index
    %910 = vector.load %arg3[%909, %c0_158] : memref<520x128xf32, #tpu.memory_space<vmem>>, vector<2x128xf32>
    %911 = vector.extract_strided_slice %861 {offsets = [0, 6], sizes = [1, 1], strides = [1, 1]} : vector<1x8xf32> to vector<1x1xf32>
    %912 = vector.extract_strided_slice %910 {offsets = [0, 0], sizes = [1, 128], strides = [1, 1]} : vector<2x128xf32> to vector<1x128xf32>
    %913 = vector.broadcast %911 : vector<1x1xf32> to vector<1x128xf32>
    %914 = arith.mulf %913, %912 : vector<1x128xf32>
    %915 = vector.extract_strided_slice %861 {offsets = [0, 7], sizes = [1, 1], strides = [1, 1]} : vector<1x8xf32> to vector<1x1xf32>
    %916 = vector.extract_strided_slice %910 {offsets = [1, 0], sizes = [1, 128], strides = [1, 1]} : vector<2x128xf32> to vector<1x128xf32>
    %917 = vector.broadcast %915 : vector<1x1xf32> to vector<1x128xf32>
    %918 = arith.mulf %917, %916 : vector<1x128xf32>
    %919 = arith.addf %914, %918 : vector<1x128xf32>
    %920 = arith.addf %905, %919 : vector<1x128xf32>
    %921 = vector.broadcast %920 : vector<1x128xf32> to vector<8x128xf32>
    %922 = arith.mulf %921, %21 : vector<8x128xf32>
    %923 = arith.addf %855, %922 : vector<8x128xf32>
    %c8_i32_159 = arith.constant 8 : i32
    %924 = arith.muli %c1_i32_97, %c8_i32_159 : i32
    %c5_i32_160 = arith.constant 5 : i32
    %925 = arith.addi %924, %c5_i32_160 : i32
    %c4_i32_161 = arith.constant 4 : i32
    %926 = arith.muli %925, %c4_i32_161 : i32
    %927 = arith.addi %0, %926 : i32
    %928 = arith.index_cast %925 : i32 to index
    %c0_162 = arith.constant 0 : index
    %929 = vector.load %arg2[%928, %c0_162] : memref<16x8xf32, #tpu.memory_space<vmem>>, vector<1x8xf32>
    %c0_i32_163 = arith.constant 0 : i32
    %930 = arith.addi %927, %c0_i32_163 : i32
    %931 = arith.index_cast %930 : i32 to index
    %932 = memref.load %arg1[%931] : memref<64xi32, #tpu.memory_space<smem>>
    %933 = arith.index_cast %932 : i32 to index
    %c0_164 = arith.constant 0 : index
    %934 = vector.load %arg3[%933, %c0_164] : memref<520x128xf32, #tpu.memory_space<vmem>>, vector<2x128xf32>
    %935 = vector.extract_strided_slice %929 {offsets = [0, 0], sizes = [1, 1], strides = [1, 1]} : vector<1x8xf32> to vector<1x1xf32>
    %936 = vector.extract_strided_slice %934 {offsets = [0, 0], sizes = [1, 128], strides = [1, 1]} : vector<2x128xf32> to vector<1x128xf32>
    %937 = vector.broadcast %935 : vector<1x1xf32> to vector<1x128xf32>
    %938 = arith.mulf %937, %936 : vector<1x128xf32>
    %939 = vector.extract_strided_slice %929 {offsets = [0, 1], sizes = [1, 1], strides = [1, 1]} : vector<1x8xf32> to vector<1x1xf32>
    %940 = vector.extract_strided_slice %934 {offsets = [1, 0], sizes = [1, 128], strides = [1, 1]} : vector<2x128xf32> to vector<1x128xf32>
    %941 = vector.broadcast %939 : vector<1x1xf32> to vector<1x128xf32>
    %942 = arith.mulf %941, %940 : vector<1x128xf32>
    %943 = arith.addf %938, %942 : vector<1x128xf32>
    %c1_i32_165 = arith.constant 1 : i32
    %944 = arith.addi %927, %c1_i32_165 : i32
    %945 = arith.index_cast %944 : i32 to index
    %946 = memref.load %arg1[%945] : memref<64xi32, #tpu.memory_space<smem>>
    %947 = arith.index_cast %946 : i32 to index
    %c0_166 = arith.constant 0 : index
    %948 = vector.load %arg3[%947, %c0_166] : memref<520x128xf32, #tpu.memory_space<vmem>>, vector<2x128xf32>
    %949 = vector.extract_strided_slice %929 {offsets = [0, 2], sizes = [1, 1], strides = [1, 1]} : vector<1x8xf32> to vector<1x1xf32>
    %950 = vector.extract_strided_slice %948 {offsets = [0, 0], sizes = [1, 128], strides = [1, 1]} : vector<2x128xf32> to vector<1x128xf32>
    %951 = vector.broadcast %949 : vector<1x1xf32> to vector<1x128xf32>
    %952 = arith.mulf %951, %950 : vector<1x128xf32>
    %953 = vector.extract_strided_slice %929 {offsets = [0, 3], sizes = [1, 1], strides = [1, 1]} : vector<1x8xf32> to vector<1x1xf32>
    %954 = vector.extract_strided_slice %948 {offsets = [1, 0], sizes = [1, 128], strides = [1, 1]} : vector<2x128xf32> to vector<1x128xf32>
    %955 = vector.broadcast %953 : vector<1x1xf32> to vector<1x128xf32>
    %956 = arith.mulf %955, %954 : vector<1x128xf32>
    %957 = arith.addf %952, %956 : vector<1x128xf32>
    %958 = arith.addf %943, %957 : vector<1x128xf32>
    %c2_i32_167 = arith.constant 2 : i32
    %959 = arith.addi %927, %c2_i32_167 : i32
    %960 = arith.index_cast %959 : i32 to index
    %961 = memref.load %arg1[%960] : memref<64xi32, #tpu.memory_space<smem>>
    %962 = arith.index_cast %961 : i32 to index
    %c0_168 = arith.constant 0 : index
    %963 = vector.load %arg3[%962, %c0_168] : memref<520x128xf32, #tpu.memory_space<vmem>>, vector<2x128xf32>
    %964 = vector.extract_strided_slice %929 {offsets = [0, 4], sizes = [1, 1], strides = [1, 1]} : vector<1x8xf32> to vector<1x1xf32>
    %965 = vector.extract_strided_slice %963 {offsets = [0, 0], sizes = [1, 128], strides = [1, 1]} : vector<2x128xf32> to vector<1x128xf32>
    %966 = vector.broadcast %964 : vector<1x1xf32> to vector<1x128xf32>
    %967 = arith.mulf %966, %965 : vector<1x128xf32>
    %968 = vector.extract_strided_slice %929 {offsets = [0, 5], sizes = [1, 1], strides = [1, 1]} : vector<1x8xf32> to vector<1x1xf32>
    %969 = vector.extract_strided_slice %963 {offsets = [1, 0], sizes = [1, 128], strides = [1, 1]} : vector<2x128xf32> to vector<1x128xf32>
    %970 = vector.broadcast %968 : vector<1x1xf32> to vector<1x128xf32>
    %971 = arith.mulf %970, %969 : vector<1x128xf32>
    %972 = arith.addf %967, %971 : vector<1x128xf32>
    %973 = arith.addf %958, %972 : vector<1x128xf32>
    %c3_i32_169 = arith.constant 3 : i32
    %974 = arith.addi %927, %c3_i32_169 : i32
    %975 = arith.index_cast %974 : i32 to index
    %976 = memref.load %arg1[%975] : memref<64xi32, #tpu.memory_space<smem>>
    %977 = arith.index_cast %976 : i32 to index
    %c0_170 = arith.constant 0 : index
    %978 = vector.load %arg3[%977, %c0_170] : memref<520x128xf32, #tpu.memory_space<vmem>>, vector<2x128xf32>
    %979 = vector.extract_strided_slice %929 {offsets = [0, 6], sizes = [1, 1], strides = [1, 1]} : vector<1x8xf32> to vector<1x1xf32>
    %980 = vector.extract_strided_slice %978 {offsets = [0, 0], sizes = [1, 128], strides = [1, 1]} : vector<2x128xf32> to vector<1x128xf32>
    %981 = vector.broadcast %979 : vector<1x1xf32> to vector<1x128xf32>
    %982 = arith.mulf %981, %980 : vector<1x128xf32>
    %983 = vector.extract_strided_slice %929 {offsets = [0, 7], sizes = [1, 1], strides = [1, 1]} : vector<1x8xf32> to vector<1x1xf32>
    %984 = vector.extract_strided_slice %978 {offsets = [1, 0], sizes = [1, 128], strides = [1, 1]} : vector<2x128xf32> to vector<1x128xf32>
    %985 = vector.broadcast %983 : vector<1x1xf32> to vector<1x128xf32>
    %986 = arith.mulf %985, %984 : vector<1x128xf32>
    %987 = arith.addf %982, %986 : vector<1x128xf32>
    %988 = arith.addf %973, %987 : vector<1x128xf32>
    %989 = vector.broadcast %988 : vector<1x128xf32> to vector<8x128xf32>
    %990 = arith.mulf %989, %25 : vector<8x128xf32>
    %991 = arith.addf %923, %990 : vector<8x128xf32>
    %c8_i32_171 = arith.constant 8 : i32
    %992 = arith.muli %c1_i32_97, %c8_i32_171 : i32
    %c6_i32_172 = arith.constant 6 : i32
    %993 = arith.addi %992, %c6_i32_172 : i32
    %c4_i32_173 = arith.constant 4 : i32
    %994 = arith.muli %993, %c4_i32_173 : i32
    %995 = arith.addi %0, %994 : i32
    %996 = arith.index_cast %993 : i32 to index
    %c0_174 = arith.constant 0 : index
    %997 = vector.load %arg2[%996, %c0_174] : memref<16x8xf32, #tpu.memory_space<vmem>>, vector<1x8xf32>
    %c0_i32_175 = arith.constant 0 : i32
    %998 = arith.addi %995, %c0_i32_175 : i32
    %999 = arith.index_cast %998 : i32 to index
    %1000 = memref.load %arg1[%999] : memref<64xi32, #tpu.memory_space<smem>>
    %1001 = arith.index_cast %1000 : i32 to index
    %c0_176 = arith.constant 0 : index
    %1002 = vector.load %arg3[%1001, %c0_176] : memref<520x128xf32, #tpu.memory_space<vmem>>, vector<2x128xf32>
    %1003 = vector.extract_strided_slice %997 {offsets = [0, 0], sizes = [1, 1], strides = [1, 1]} : vector<1x8xf32> to vector<1x1xf32>
    %1004 = vector.extract_strided_slice %1002 {offsets = [0, 0], sizes = [1, 128], strides = [1, 1]} : vector<2x128xf32> to vector<1x128xf32>
    %1005 = vector.broadcast %1003 : vector<1x1xf32> to vector<1x128xf32>
    %1006 = arith.mulf %1005, %1004 : vector<1x128xf32>
    %1007 = vector.extract_strided_slice %997 {offsets = [0, 1], sizes = [1, 1], strides = [1, 1]} : vector<1x8xf32> to vector<1x1xf32>
    %1008 = vector.extract_strided_slice %1002 {offsets = [1, 0], sizes = [1, 128], strides = [1, 1]} : vector<2x128xf32> to vector<1x128xf32>
    %1009 = vector.broadcast %1007 : vector<1x1xf32> to vector<1x128xf32>
    %1010 = arith.mulf %1009, %1008 : vector<1x128xf32>
    %1011 = arith.addf %1006, %1010 : vector<1x128xf32>
    %c1_i32_177 = arith.constant 1 : i32
    %1012 = arith.addi %995, %c1_i32_177 : i32
    %1013 = arith.index_cast %1012 : i32 to index
    %1014 = memref.load %arg1[%1013] : memref<64xi32, #tpu.memory_space<smem>>
    %1015 = arith.index_cast %1014 : i32 to index
    %c0_178 = arith.constant 0 : index
    %1016 = vector.load %arg3[%1015, %c0_178] : memref<520x128xf32, #tpu.memory_space<vmem>>, vector<2x128xf32>
    %1017 = vector.extract_strided_slice %997 {offsets = [0, 2], sizes = [1, 1], strides = [1, 1]} : vector<1x8xf32> to vector<1x1xf32>
    %1018 = vector.extract_strided_slice %1016 {offsets = [0, 0], sizes = [1, 128], strides = [1, 1]} : vector<2x128xf32> to vector<1x128xf32>
    %1019 = vector.broadcast %1017 : vector<1x1xf32> to vector<1x128xf32>
    %1020 = arith.mulf %1019, %1018 : vector<1x128xf32>
    %1021 = vector.extract_strided_slice %997 {offsets = [0, 3], sizes = [1, 1], strides = [1, 1]} : vector<1x8xf32> to vector<1x1xf32>
    %1022 = vector.extract_strided_slice %1016 {offsets = [1, 0], sizes = [1, 128], strides = [1, 1]} : vector<2x128xf32> to vector<1x128xf32>
    %1023 = vector.broadcast %1021 : vector<1x1xf32> to vector<1x128xf32>
    %1024 = arith.mulf %1023, %1022 : vector<1x128xf32>
    %1025 = arith.addf %1020, %1024 : vector<1x128xf32>
    %1026 = arith.addf %1011, %1025 : vector<1x128xf32>
    %c2_i32_179 = arith.constant 2 : i32
    %1027 = arith.addi %995, %c2_i32_179 : i32
    %1028 = arith.index_cast %1027 : i32 to index
    %1029 = memref.load %arg1[%1028] : memref<64xi32, #tpu.memory_space<smem>>
    %1030 = arith.index_cast %1029 : i32 to index
    %c0_180 = arith.constant 0 : index
    %1031 = vector.load %arg3[%1030, %c0_180] : memref<520x128xf32, #tpu.memory_space<vmem>>, vector<2x128xf32>
    %1032 = vector.extract_strided_slice %997 {offsets = [0, 4], sizes = [1, 1], strides = [1, 1]} : vector<1x8xf32> to vector<1x1xf32>
    %1033 = vector.extract_strided_slice %1031 {offsets = [0, 0], sizes = [1, 128], strides = [1, 1]} : vector<2x128xf32> to vector<1x128xf32>
    %1034 = vector.broadcast %1032 : vector<1x1xf32> to vector<1x128xf32>
    %1035 = arith.mulf %1034, %1033 : vector<1x128xf32>
    %1036 = vector.extract_strided_slice %997 {offsets = [0, 5], sizes = [1, 1], strides = [1, 1]} : vector<1x8xf32> to vector<1x1xf32>
    %1037 = vector.extract_strided_slice %1031 {offsets = [1, 0], sizes = [1, 128], strides = [1, 1]} : vector<2x128xf32> to vector<1x128xf32>
    %1038 = vector.broadcast %1036 : vector<1x1xf32> to vector<1x128xf32>
    %1039 = arith.mulf %1038, %1037 : vector<1x128xf32>
    %1040 = arith.addf %1035, %1039 : vector<1x128xf32>
    %1041 = arith.addf %1026, %1040 : vector<1x128xf32>
    %c3_i32_181 = arith.constant 3 : i32
    %1042 = arith.addi %995, %c3_i32_181 : i32
    %1043 = arith.index_cast %1042 : i32 to index
    %1044 = memref.load %arg1[%1043] : memref<64xi32, #tpu.memory_space<smem>>
    %1045 = arith.index_cast %1044 : i32 to index
    %c0_182 = arith.constant 0 : index
    %1046 = vector.load %arg3[%1045, %c0_182] : memref<520x128xf32, #tpu.memory_space<vmem>>, vector<2x128xf32>
    %1047 = vector.extract_strided_slice %997 {offsets = [0, 6], sizes = [1, 1], strides = [1, 1]} : vector<1x8xf32> to vector<1x1xf32>
    %1048 = vector.extract_strided_slice %1046 {offsets = [0, 0], sizes = [1, 128], strides = [1, 1]} : vector<2x128xf32> to vector<1x128xf32>
    %1049 = vector.broadcast %1047 : vector<1x1xf32> to vector<1x128xf32>
    %1050 = arith.mulf %1049, %1048 : vector<1x128xf32>
    %1051 = vector.extract_strided_slice %997 {offsets = [0, 7], sizes = [1, 1], strides = [1, 1]} : vector<1x8xf32> to vector<1x1xf32>
    %1052 = vector.extract_strided_slice %1046 {offsets = [1, 0], sizes = [1, 128], strides = [1, 1]} : vector<2x128xf32> to vector<1x128xf32>
    %1053 = vector.broadcast %1051 : vector<1x1xf32> to vector<1x128xf32>
    %1054 = arith.mulf %1053, %1052 : vector<1x128xf32>
    %1055 = arith.addf %1050, %1054 : vector<1x128xf32>
    %1056 = arith.addf %1041, %1055 : vector<1x128xf32>
    %1057 = vector.broadcast %1056 : vector<1x128xf32> to vector<8x128xf32>
    %1058 = arith.mulf %1057, %29 : vector<8x128xf32>
    %1059 = arith.addf %991, %1058 : vector<8x128xf32>
    %c8_i32_183 = arith.constant 8 : i32
    %1060 = arith.muli %c1_i32_97, %c8_i32_183 : i32
    %c7_i32_184 = arith.constant 7 : i32
    %1061 = arith.addi %1060, %c7_i32_184 : i32
    %c4_i32_185 = arith.constant 4 : i32
    %1062 = arith.muli %1061, %c4_i32_185 : i32
    %1063 = arith.addi %0, %1062 : i32
    %1064 = arith.index_cast %1061 : i32 to index
    %c0_186 = arith.constant 0 : index
    %1065 = vector.load %arg2[%1064, %c0_186] : memref<16x8xf32, #tpu.memory_space<vmem>>, vector<1x8xf32>
    %c0_i32_187 = arith.constant 0 : i32
    %1066 = arith.addi %1063, %c0_i32_187 : i32
    %1067 = arith.index_cast %1066 : i32 to index
    %1068 = memref.load %arg1[%1067] : memref<64xi32, #tpu.memory_space<smem>>
    %1069 = arith.index_cast %1068 : i32 to index
    %c0_188 = arith.constant 0 : index
    %1070 = vector.load %arg3[%1069, %c0_188] : memref<520x128xf32, #tpu.memory_space<vmem>>, vector<2x128xf32>
    %1071 = vector.extract_strided_slice %1065 {offsets = [0, 0], sizes = [1, 1], strides = [1, 1]} : vector<1x8xf32> to vector<1x1xf32>
    %1072 = vector.extract_strided_slice %1070 {offsets = [0, 0], sizes = [1, 128], strides = [1, 1]} : vector<2x128xf32> to vector<1x128xf32>
    %1073 = vector.broadcast %1071 : vector<1x1xf32> to vector<1x128xf32>
    %1074 = arith.mulf %1073, %1072 : vector<1x128xf32>
    %1075 = vector.extract_strided_slice %1065 {offsets = [0, 1], sizes = [1, 1], strides = [1, 1]} : vector<1x8xf32> to vector<1x1xf32>
    %1076 = vector.extract_strided_slice %1070 {offsets = [1, 0], sizes = [1, 128], strides = [1, 1]} : vector<2x128xf32> to vector<1x128xf32>
    %1077 = vector.broadcast %1075 : vector<1x1xf32> to vector<1x128xf32>
    %1078 = arith.mulf %1077, %1076 : vector<1x128xf32>
    %1079 = arith.addf %1074, %1078 : vector<1x128xf32>
    %c1_i32_189 = arith.constant 1 : i32
    %1080 = arith.addi %1063, %c1_i32_189 : i32
    %1081 = arith.index_cast %1080 : i32 to index
    %1082 = memref.load %arg1[%1081] : memref<64xi32, #tpu.memory_space<smem>>
    %1083 = arith.index_cast %1082 : i32 to index
    %c0_190 = arith.constant 0 : index
    %1084 = vector.load %arg3[%1083, %c0_190] : memref<520x128xf32, #tpu.memory_space<vmem>>, vector<2x128xf32>
    %1085 = vector.extract_strided_slice %1065 {offsets = [0, 2], sizes = [1, 1], strides = [1, 1]} : vector<1x8xf32> to vector<1x1xf32>
    %1086 = vector.extract_strided_slice %1084 {offsets = [0, 0], sizes = [1, 128], strides = [1, 1]} : vector<2x128xf32> to vector<1x128xf32>
    %1087 = vector.broadcast %1085 : vector<1x1xf32> to vector<1x128xf32>
    %1088 = arith.mulf %1087, %1086 : vector<1x128xf32>
    %1089 = vector.extract_strided_slice %1065 {offsets = [0, 3], sizes = [1, 1], strides = [1, 1]} : vector<1x8xf32> to vector<1x1xf32>
    %1090 = vector.extract_strided_slice %1084 {offsets = [1, 0], sizes = [1, 128], strides = [1, 1]} : vector<2x128xf32> to vector<1x128xf32>
    %1091 = vector.broadcast %1089 : vector<1x1xf32> to vector<1x128xf32>
    %1092 = arith.mulf %1091, %1090 : vector<1x128xf32>
    %1093 = arith.addf %1088, %1092 : vector<1x128xf32>
    %1094 = arith.addf %1079, %1093 : vector<1x128xf32>
    %c2_i32_191 = arith.constant 2 : i32
    %1095 = arith.addi %1063, %c2_i32_191 : i32
    %1096 = arith.index_cast %1095 : i32 to index
    %1097 = memref.load %arg1[%1096] : memref<64xi32, #tpu.memory_space<smem>>
    %1098 = arith.index_cast %1097 : i32 to index
    %c0_192 = arith.constant 0 : index
    %1099 = vector.load %arg3[%1098, %c0_192] : memref<520x128xf32, #tpu.memory_space<vmem>>, vector<2x128xf32>
    %1100 = vector.extract_strided_slice %1065 {offsets = [0, 4], sizes = [1, 1], strides = [1, 1]} : vector<1x8xf32> to vector<1x1xf32>
    %1101 = vector.extract_strided_slice %1099 {offsets = [0, 0], sizes = [1, 128], strides = [1, 1]} : vector<2x128xf32> to vector<1x128xf32>
    %1102 = vector.broadcast %1100 : vector<1x1xf32> to vector<1x128xf32>
    %1103 = arith.mulf %1102, %1101 : vector<1x128xf32>
    %1104 = vector.extract_strided_slice %1065 {offsets = [0, 5], sizes = [1, 1], strides = [1, 1]} : vector<1x8xf32> to vector<1x1xf32>
    %1105 = vector.extract_strided_slice %1099 {offsets = [1, 0], sizes = [1, 128], strides = [1, 1]} : vector<2x128xf32> to vector<1x128xf32>
    %1106 = vector.broadcast %1104 : vector<1x1xf32> to vector<1x128xf32>
    %1107 = arith.mulf %1106, %1105 : vector<1x128xf32>
    %1108 = arith.addf %1103, %1107 : vector<1x128xf32>
    %1109 = arith.addf %1094, %1108 : vector<1x128xf32>
    %c3_i32_193 = arith.constant 3 : i32
    %1110 = arith.addi %1063, %c3_i32_193 : i32
    %1111 = arith.index_cast %1110 : i32 to index
    %1112 = memref.load %arg1[%1111] : memref<64xi32, #tpu.memory_space<smem>>
    %1113 = arith.index_cast %1112 : i32 to index
    %c0_194 = arith.constant 0 : index
    %1114 = vector.load %arg3[%1113, %c0_194] : memref<520x128xf32, #tpu.memory_space<vmem>>, vector<2x128xf32>
    %1115 = vector.extract_strided_slice %1065 {offsets = [0, 6], sizes = [1, 1], strides = [1, 1]} : vector<1x8xf32> to vector<1x1xf32>
    %1116 = vector.extract_strided_slice %1114 {offsets = [0, 0], sizes = [1, 128], strides = [1, 1]} : vector<2x128xf32> to vector<1x128xf32>
    %1117 = vector.broadcast %1115 : vector<1x1xf32> to vector<1x128xf32>
    %1118 = arith.mulf %1117, %1116 : vector<1x128xf32>
    %1119 = vector.extract_strided_slice %1065 {offsets = [0, 7], sizes = [1, 1], strides = [1, 1]} : vector<1x8xf32> to vector<1x1xf32>
    %1120 = vector.extract_strided_slice %1114 {offsets = [1, 0], sizes = [1, 128], strides = [1, 1]} : vector<2x128xf32> to vector<1x128xf32>
    %1121 = vector.broadcast %1119 : vector<1x1xf32> to vector<1x128xf32>
    %1122 = arith.mulf %1121, %1120 : vector<1x128xf32>
    %1123 = arith.addf %1118, %1122 : vector<1x128xf32>
    %1124 = arith.addf %1109, %1123 : vector<1x128xf32>
    %1125 = vector.broadcast %1124 : vector<1x128xf32> to vector<8x128xf32>
    %1126 = arith.mulf %1125, %33 : vector<8x128xf32>
    %1127 = arith.addf %1059, %1126 : vector<8x128xf32>
    %c8_i32_195 = arith.constant 8 : i32
    %1128 = arith.muli %c1_i32_97, %c8_i32_195 : i32
    %1129 = tpu.assume_multiple %1128, 8 : i32
    %1130 = arith.index_cast %1129 : i32 to index
    %c0_196 = arith.constant 0 : index
    %1131 = vector.load %arg4[%1130, %c0_196] : memref<16x128xf32, #tpu.memory_space<vmem>>, vector<8x128xf32>
    tpu.vector_store %arg4[%1130, %c0_196], %1127 {strides = array<i32>} : memref<16x128xf32, #tpu.memory_space<vmem>>, vector<8x128xf32>,
    %c2_i32_197 = arith.constant 2 : i32
    return
  }
  func.func @transform_0(%arg0: i32) -> i32 {
    %c0_i32 = arith.constant 0 : i32
    %c0_i32_0 = arith.constant 0 : i32
    return %c0_i32 : i32
  }
  func.func @transform_1(%arg0: i32) -> (i32, i32) {
    %c0_i32 = arith.constant 0 : i32
    %c0_i32_0 = arith.constant 0 : i32
    return %arg0, %c0_i32 : i32, i32
  }
  func.func @transform_2(%arg0: i32) -> (i32, i32) {
    %c0_i32 = arith.constant 0 : i32
    %c0_i32_0 = arith.constant 0 : i32
    %c0_i32_1 = arith.constant 0 : i32
    return %c0_i32, %c0_i32_0 : i32, i32
  }
  func.func @transform_3(%arg0: i32) -> (i32, i32) {
    %c0_i32 = arith.constant 0 : i32
    %c0_i32_0 = arith.constant 0 : i32
    return %arg0, %c0_i32 : i32, i32
  }
}

module attributes {stable_mosaic.version = 11 : i64} {
  func.func @_gather_kernel(%arg0: i32, %arg1: memref<64xi32, #tpu.memory_space<smem>>, %arg2: memref<16x8xf32, #tpu.memory_space<vmem>>, %arg3: memref<520x128xf32, #tpu.memory_space<vmem>>, %arg4: memref<16x128xf32, #tpu.memory_space<vmem>>) attributes {dimension_semantics = [#tpu.dimension_semantics<parallel>], iteration_bounds = array<i64: 1>, scalar_prefetch = 0 : i64, scratch_operands = 0 : i64, tpu.core_type = #tpu.core_type<tc>, window_params = [{transform_indices = @transform_0, window_bounds = array<i64: 64>}, {transform_indices = @transform_1, window_bounds = array<i64: 16, 8>}, {pipeline_mode = #tpu.pipeline_mode<synchronous>, transform_indices = @transform_2, window_bounds = array<i64: 520, 128>}, {transform_indices = @transform_3, window_bounds = array<i64: 16, 128>}]} {
    %c64_i32 = arith.constant 64 : i32
    %0 = arith.muli %arg0, %c64_i32 : i32
    %1 = tpu.iota {dimensions = array<i32: 0>} : vector<8x128xi32>
    %c0_i32 = arith.constant 0 : i32
    %2 = vector.broadcast %c0_i32 : i32 to vector<8x128xi32>
    %3 = arith.cmpi eq, %1, %2 : vector<8x128xi32>
    %4 = arith.extui %3 : vector<8x128xi1> to vector<8x128xi32>
    %5 = arith.sitofp %4 : vector<8x128xi32> to vector<8x128xf32>
    %c1_i32 = arith.constant 1 : i32
    %6 = vector.broadcast %c1_i32 : i32 to vector<8x128xi32>
    %7 = arith.cmpi eq, %1, %6 : vector<8x128xi32>
    %8 = arith.extui %7 : vector<8x128xi1> to vector<8x128xi32>
    %9 = arith.sitofp %8 : vector<8x128xi32> to vector<8x128xf32>
    %c2_i32 = arith.constant 2 : i32
    %10 = vector.broadcast %c2_i32 : i32 to vector<8x128xi32>
    %11 = arith.cmpi eq, %1, %10 : vector<8x128xi32>
    %12 = arith.extui %11 : vector<8x128xi1> to vector<8x128xi32>
    %13 = arith.sitofp %12 : vector<8x128xi32> to vector<8x128xf32>
    %c3_i32 = arith.constant 3 : i32
    %14 = vector.broadcast %c3_i32 : i32 to vector<8x128xi32>
    %15 = arith.cmpi eq, %1, %14 : vector<8x128xi32>
    %16 = arith.extui %15 : vector<8x128xi1> to vector<8x128xi32>
    %17 = arith.sitofp %16 : vector<8x128xi32> to vector<8x128xf32>
    %c4_i32 = arith.constant 4 : i32
    %18 = vector.broadcast %c4_i32 : i32 to vector<8x128xi32>
    %19 = arith.cmpi eq, %1, %18 : vector<8x128xi32>
    %20 = arith.extui %19 : vector<8x128xi1> to vector<8x128xi32>
    %21 = arith.sitofp %20 : vector<8x128xi32> to vector<8x128xf32>
    %c5_i32 = arith.constant 5 : i32
    %22 = vector.broadcast %c5_i32 : i32 to vector<8x128xi32>
    %23 = arith.cmpi eq, %1, %22 : vector<8x128xi32>
    %24 = arith.extui %23 : vector<8x128xi1> to vector<8x128xi32>
    %25 = arith.sitofp %24 : vector<8x128xi32> to vector<8x128xf32>
    %c6_i32 = arith.constant 6 : i32
    %26 = vector.broadcast %c6_i32 : i32 to vector<8x128xi32>
    %27 = arith.cmpi eq, %1, %26 : vector<8x128xi32>
    %28 = arith.extui %27 : vector<8x128xi1> to vector<8x128xi32>
    %29 = arith.sitofp %28 : vector<8x128xi32> to vector<8x128xf32>
    %c7_i32 = arith.constant 7 : i32
    %30 = vector.broadcast %c7_i32 : i32 to vector<8x128xi32>
    %31 = arith.cmpi eq, %1, %30 : vector<8x128xi32>
    %32 = arith.extui %31 : vector<8x128xi1> to vector<8x128xi32>
    %33 = arith.sitofp %32 : vector<8x128xi32> to vector<8x128xf32>
    %c0_i32_0 = arith.constant 0 : i32
    %cst = arith.constant 0.000000e+00 : f32
    %34 = vector.broadcast %cst : f32 to vector<8x128xf32>
    %c8_i32 = arith.constant 8 : i32
    %35 = arith.muli %c0_i32_0, %c8_i32 : i32
    %c0_i32_1 = arith.constant 0 : i32
    %36 = arith.addi %35, %c0_i32_1 : i32
    %c4_i32_2 = arith.constant 4 : i32
    %37 = arith.muli %36, %c4_i32_2 : i32
    %38 = arith.addi %0, %37 : i32
    %39 = arith.index_cast %36 : i32 to index
    %c0 = arith.constant 0 : index
    %40 = vector.load %arg2[%39, %c0] : memref<16x8xf32, #tpu.memory_space<vmem>>, vector<1x8xf32>
    %c0_i32_3 = arith.constant 0 : i32
    %41 = arith.addi %38, %c0_i32_3 : i32
    %42 = arith.index_cast %41 : i32 to index
    %43 = memref.load %arg1[%42] : memref<64xi32, #tpu.memory_space<smem>>
    %44 = arith.index_cast %43 : i32 to index
    %c0_4 = arith.constant 0 : index
    %45 = vector.load %arg3[%44, %c0_4] : memref<520x128xf32, #tpu.memory_space<vmem>>, vector<2x128xf32>
    %46 = vector.extract_strided_slice %40 {offsets = [0, 0], sizes = [1, 1], strides = [1, 1]} : vector<1x8xf32> to vector<1x1xf32>
    %47 = vector.extract_strided_slice %45 {offsets = [0, 0], sizes = [1, 128], strides = [1, 1]} : vector<2x128xf32> to vector<1x128xf32>
    %48 = vector.broadcast %46 : vector<1x1xf32> to vector<1x128xf32>
    %49 = arith.mulf %48, %47 : vector<1x128xf32>
    %50 = vector.extract_strided_slice %40 {offsets = [0, 1], sizes = [1, 1], strides = [1, 1]} : vector<1x8xf32> to vector<1x1xf32>
    %51 = vector.extract_strided_slice %45 {offsets = [1, 0], sizes = [1, 128], strides = [1, 1]} : vector<2x128xf32> to vector<1x128xf32>
    %52 = vector.broadcast %50 : vector<1x1xf32> to vector<1x128xf32>
    %53 = arith.mulf %52, %51 : vector<1x128xf32>
    %54 = arith.addf %49, %53 : vector<1x128xf32>
    %c1_i32_5 = arith.constant 1 : i32
    %55 = arith.addi %38, %c1_i32_5 : i32
    %56 = arith.index_cast %55 : i32 to index
    %57 = memref.load %arg1[%56] : memref<64xi32, #tpu.memory_space<smem>>
    %58 = arith.index_cast %57 : i32 to index
    %c0_6 = arith.constant 0 : index
    %59 = vector.load %arg3[%58, %c0_6] : memref<520x128xf32, #tpu.memory_space<vmem>>, vector<2x128xf32>
    %60 = vector.extract_strided_slice %40 {offsets = [0, 2], sizes = [1, 1], strides = [1, 1]} : vector<1x8xf32> to vector<1x1xf32>
    %61 = vector.extract_strided_slice %59 {offsets = [0, 0], sizes = [1, 128], strides = [1, 1]} : vector<2x128xf32> to vector<1x128xf32>
    %62 = vector.broadcast %60 : vector<1x1xf32> to vector<1x128xf32>
    %63 = arith.mulf %62, %61 : vector<1x128xf32>
    %64 = vector.extract_strided_slice %40 {offsets = [0, 3], sizes = [1, 1], strides = [1, 1]} : vector<1x8xf32> to vector<1x1xf32>
    %65 = vector.extract_strided_slice %59 {offsets = [1, 0], sizes = [1, 128], strides = [1, 1]} : vector<2x128xf32> to vector<1x128xf32>
    %66 = vector.broadcast %64 : vector<1x1xf32> to vector<1x128xf32>
    %67 = arith.mulf %66, %65 : vector<1x128xf32>
    %68 = arith.addf %63, %67 : vector<1x128xf32>
    %69 = arith.addf %54, %68 : vector<1x128xf32>
    %c2_i32_7 = arith.constant 2 : i32
    %70 = arith.addi %38, %c2_i32_7 : i32
    %71 = arith.index_cast %70 : i32 to index
    %72 = memref.load %arg1[%71] : memref<64xi32, #tpu.memory_space<smem>>
    %73 = arith.index_cast %72 : i32 to index
    %c0_8 = arith.constant 0 : index
    %74 = vector.load %arg3[%73, %c0_8] : memref<520x128xf32, #tpu.memory_space<vmem>>, vector<2x128xf32>
    %75 = vector.extract_strided_slice %40 {offsets = [0, 4], sizes = [1, 1], strides = [1, 1]} : vector<1x8xf32> to vector<1x1xf32>
    %76 = vector.extract_strided_slice %74 {offsets = [0, 0], sizes = [1, 128], strides = [1, 1]} : vector<2x128xf32> to vector<1x128xf32>
    %77 = vector.broadcast %75 : vector<1x1xf32> to vector<1x128xf32>
    %78 = arith.mulf %77, %76 : vector<1x128xf32>
    %79 = vector.extract_strided_slice %40 {offsets = [0, 5], sizes = [1, 1], strides = [1, 1]} : vector<1x8xf32> to vector<1x1xf32>
    %80 = vector.extract_strided_slice %74 {offsets = [1, 0], sizes = [1, 128], strides = [1, 1]} : vector<2x128xf32> to vector<1x128xf32>
    %81 = vector.broadcast %79 : vector<1x1xf32> to vector<1x128xf32>
    %82 = arith.mulf %81, %80 : vector<1x128xf32>
    %83 = arith.addf %78, %82 : vector<1x128xf32>
    %84 = arith.addf %69, %83 : vector<1x128xf32>
    %c3_i32_9 = arith.constant 3 : i32
    %85 = arith.addi %38, %c3_i32_9 : i32
    %86 = arith.index_cast %85 : i32 to index
    %87 = memref.load %arg1[%86] : memref<64xi32, #tpu.memory_space<smem>>
    %88 = arith.index_cast %87 : i32 to index
    %c0_10 = arith.constant 0 : index
    %89 = vector.load %arg3[%88, %c0_10] : memref<520x128xf32, #tpu.memory_space<vmem>>, vector<2x128xf32>
    %90 = vector.extract_strided_slice %40 {offsets = [0, 6], sizes = [1, 1], strides = [1, 1]} : vector<1x8xf32> to vector<1x1xf32>
    %91 = vector.extract_strided_slice %89 {offsets = [0, 0], sizes = [1, 128], strides = [1, 1]} : vector<2x128xf32> to vector<1x128xf32>
    %92 = vector.broadcast %90 : vector<1x1xf32> to vector<1x128xf32>
    %93 = arith.mulf %92, %91 : vector<1x128xf32>
    %94 = vector.extract_strided_slice %40 {offsets = [0, 7], sizes = [1, 1], strides = [1, 1]} : vector<1x8xf32> to vector<1x1xf32>
    %95 = vector.extract_strided_slice %89 {offsets = [1, 0], sizes = [1, 128], strides = [1, 1]} : vector<2x128xf32> to vector<1x128xf32>
    %96 = vector.broadcast %94 : vector<1x1xf32> to vector<1x128xf32>
    %97 = arith.mulf %96, %95 : vector<1x128xf32>
    %98 = arith.addf %93, %97 : vector<1x128xf32>
    %99 = arith.addf %84, %98 : vector<1x128xf32>
    %100 = vector.broadcast %99 : vector<1x128xf32> to vector<8x128xf32>
    %101 = arith.mulf %100, %5 : vector<8x128xf32>
    %102 = arith.addf %34, %101 : vector<8x128xf32>
    %c8_i32_11 = arith.constant 8 : i32
    %103 = arith.muli %c0_i32_0, %c8_i32_11 : i32
    %c1_i32_12 = arith.constant 1 : i32
    %104 = arith.addi %103, %c1_i32_12 : i32
    %c4_i32_13 = arith.constant 4 : i32
    %105 = arith.muli %104, %c4_i32_13 : i32
    %106 = arith.addi %0, %105 : i32
    %107 = arith.index_cast %104 : i32 to index
    %c0_14 = arith.constant 0 : index
    %108 = vector.load %arg2[%107, %c0_14] : memref<16x8xf32, #tpu.memory_space<vmem>>, vector<1x8xf32>
    %c0_i32_15 = arith.constant 0 : i32
    %109 = arith.addi %106, %c0_i32_15 : i32
    %110 = arith.index_cast %109 : i32 to index
    %111 = memref.load %arg1[%110] : memref<64xi32, #tpu.memory_space<smem>>
    %112 = arith.index_cast %111 : i32 to index
    %c0_16 = arith.constant 0 : index
    %113 = vector.load %arg3[%112, %c0_16] : memref<520x128xf32, #tpu.memory_space<vmem>>, vector<2x128xf32>
    %114 = vector.extract_strided_slice %108 {offsets = [0, 0], sizes = [1, 1], strides = [1, 1]} : vector<1x8xf32> to vector<1x1xf32>
    %115 = vector.extract_strided_slice %113 {offsets = [0, 0], sizes = [1, 128], strides = [1, 1]} : vector<2x128xf32> to vector<1x128xf32>
    %116 = vector.broadcast %114 : vector<1x1xf32> to vector<1x128xf32>
    %117 = arith.mulf %116, %115 : vector<1x128xf32>
    %118 = vector.extract_strided_slice %108 {offsets = [0, 1], sizes = [1, 1], strides = [1, 1]} : vector<1x8xf32> to vector<1x1xf32>
    %119 = vector.extract_strided_slice %113 {offsets = [1, 0], sizes = [1, 128], strides = [1, 1]} : vector<2x128xf32> to vector<1x128xf32>
    %120 = vector.broadcast %118 : vector<1x1xf32> to vector<1x128xf32>
    %121 = arith.mulf %120, %119 : vector<1x128xf32>
    %122 = arith.addf %117, %121 : vector<1x128xf32>
    %c1_i32_17 = arith.constant 1 : i32
    %123 = arith.addi %106, %c1_i32_17 : i32
    %124 = arith.index_cast %123 : i32 to index
    %125 = memref.load %arg1[%124] : memref<64xi32, #tpu.memory_space<smem>>
    %126 = arith.index_cast %125 : i32 to index
    %c0_18 = arith.constant 0 : index
    %127 = vector.load %arg3[%126, %c0_18] : memref<520x128xf32, #tpu.memory_space<vmem>>, vector<2x128xf32>
    %128 = vector.extract_strided_slice %108 {offsets = [0, 2], sizes = [1, 1], strides = [1, 1]} : vector<1x8xf32> to vector<1x1xf32>
    %129 = vector.extract_strided_slice %127 {offsets = [0, 0], sizes = [1, 128], strides = [1, 1]} : vector<2x128xf32> to vector<1x128xf32>
    %130 = vector.broadcast %128 : vector<1x1xf32> to vector<1x128xf32>
    %131 = arith.mulf %130, %129 : vector<1x128xf32>
    %132 = vector.extract_strided_slice %108 {offsets = [0, 3], sizes = [1, 1], strides = [1, 1]} : vector<1x8xf32> to vector<1x1xf32>
    %133 = vector.extract_strided_slice %127 {offsets = [1, 0], sizes = [1, 128], strides = [1, 1]} : vector<2x128xf32> to vector<1x128xf32>
    %134 = vector.broadcast %132 : vector<1x1xf32> to vector<1x128xf32>
    %135 = arith.mulf %134, %133 : vector<1x128xf32>
    %136 = arith.addf %131, %135 : vector<1x128xf32>
    %137 = arith.addf %122, %136 : vector<1x128xf32>
    %c2_i32_19 = arith.constant 2 : i32
    %138 = arith.addi %106, %c2_i32_19 : i32
    %139 = arith.index_cast %138 : i32 to index
    %140 = memref.load %arg1[%139] : memref<64xi32, #tpu.memory_space<smem>>
    %141 = arith.index_cast %140 : i32 to index
    %c0_20 = arith.constant 0 : index
    %142 = vector.load %arg3[%141, %c0_20] : memref<520x128xf32, #tpu.memory_space<vmem>>, vector<2x128xf32>
    %143 = vector.extract_strided_slice %108 {offsets = [0, 4], sizes = [1, 1], strides = [1, 1]} : vector<1x8xf32> to vector<1x1xf32>
    %144 = vector.extract_strided_slice %142 {offsets = [0, 0], sizes = [1, 128], strides = [1, 1]} : vector<2x128xf32> to vector<1x128xf32>
    %145 = vector.broadcast %143 : vector<1x1xf32> to vector<1x128xf32>
    %146 = arith.mulf %145, %144 : vector<1x128xf32>
    %147 = vector.extract_strided_slice %108 {offsets = [0, 5], sizes = [1, 1], strides = [1, 1]} : vector<1x8xf32> to vector<1x1xf32>
    %148 = vector.extract_strided_slice %142 {offsets = [1, 0], sizes = [1, 128], strides = [1, 1]} : vector<2x128xf32> to vector<1x128xf32>
    %149 = vector.broadcast %147 : vector<1x1xf32> to vector<1x128xf32>
    %150 = arith.mulf %149, %148 : vector<1x128xf32>
    %151 = arith.addf %146, %150 : vector<1x128xf32>
    %152 = arith.addf %137, %151 : vector<1x128xf32>
    %c3_i32_21 = arith.constant 3 : i32
    %153 = arith.addi %106, %c3_i32_21 : i32
    %154 = arith.index_cast %153 : i32 to index
    %155 = memref.load %arg1[%154] : memref<64xi32, #tpu.memory_space<smem>>
    %156 = arith.index_cast %155 : i32 to index
    %c0_22 = arith.constant 0 : index
    %157 = vector.load %arg3[%156, %c0_22] : memref<520x128xf32, #tpu.memory_space<vmem>>, vector<2x128xf32>
    %158 = vector.extract_strided_slice %108 {offsets = [0, 6], sizes = [1, 1], strides = [1, 1]} : vector<1x8xf32> to vector<1x1xf32>
    %159 = vector.extract_strided_slice %157 {offsets = [0, 0], sizes = [1, 128], strides = [1, 1]} : vector<2x128xf32> to vector<1x128xf32>
    %160 = vector.broadcast %158 : vector<1x1xf32> to vector<1x128xf32>
    %161 = arith.mulf %160, %159 : vector<1x128xf32>
    %162 = vector.extract_strided_slice %108 {offsets = [0, 7], sizes = [1, 1], strides = [1, 1]} : vector<1x8xf32> to vector<1x1xf32>
    %163 = vector.extract_strided_slice %157 {offsets = [1, 0], sizes = [1, 128], strides = [1, 1]} : vector<2x128xf32> to vector<1x128xf32>
    %164 = vector.broadcast %162 : vector<1x1xf32> to vector<1x128xf32>
    %165 = arith.mulf %164, %163 : vector<1x128xf32>
    %166 = arith.addf %161, %165 : vector<1x128xf32>
    %167 = arith.addf %152, %166 : vector<1x128xf32>
    %168 = vector.broadcast %167 : vector<1x128xf32> to vector<8x128xf32>
    %169 = arith.mulf %168, %9 : vector<8x128xf32>
    %170 = arith.addf %102, %169 : vector<8x128xf32>
    %c8_i32_23 = arith.constant 8 : i32
    %171 = arith.muli %c0_i32_0, %c8_i32_23 : i32
    %c2_i32_24 = arith.constant 2 : i32
    %172 = arith.addi %171, %c2_i32_24 : i32
    %c4_i32_25 = arith.constant 4 : i32
    %173 = arith.muli %172, %c4_i32_25 : i32
    %174 = arith.addi %0, %173 : i32
    %175 = arith.index_cast %172 : i32 to index
    %c0_26 = arith.constant 0 : index
    %176 = vector.load %arg2[%175, %c0_26] : memref<16x8xf32, #tpu.memory_space<vmem>>, vector<1x8xf32>
    %c0_i32_27 = arith.constant 0 : i32
    %177 = arith.addi %174, %c0_i32_27 : i32
    %178 = arith.index_cast %177 : i32 to index
    %179 = memref.load %arg1[%178] : memref<64xi32, #tpu.memory_space<smem>>
    %180 = arith.index_cast %179 : i32 to index
    %c0_28 = arith.constant 0 : index
    %181 = vector.load %arg3[%180, %c0_28] : memref<520x128xf32, #tpu.memory_space<vmem>>, vector<2x128xf32>
    %182 = vector.extract_strided_slice %176 {offsets = [0, 0], sizes = [1, 1], strides = [1, 1]} : vector<1x8xf32> to vector<1x1xf32>
    %183 = vector.extract_strided_slice %181 {offsets = [0, 0], sizes = [1, 128], strides = [1, 1]} : vector<2x128xf32> to vector<1x128xf32>
    %184 = vector.broadcast %182 : vector<1x1xf32> to vector<1x128xf32>
    %185 = arith.mulf %184, %183 : vector<1x128xf32>
    %186 = vector.extract_strided_slice %176 {offsets = [0, 1], sizes = [1, 1], strides = [1, 1]} : vector<1x8xf32> to vector<1x1xf32>
    %187 = vector.extract_strided_slice %181 {offsets = [1, 0], sizes = [1, 128], strides = [1, 1]} : vector<2x128xf32> to vector<1x128xf32>
    %188 = vector.broadcast %186 : vector<1x1xf32> to vector<1x128xf32>
    %189 = arith.mulf %188, %187 : vector<1x128xf32>
    %190 = arith.addf %185, %189 : vector<1x128xf32>
    %c1_i32_29 = arith.constant 1 : i32
    %191 = arith.addi %174, %c1_i32_29 : i32
    %192 = arith.index_cast %191 : i32 to index
    %193 = memref.load %arg1[%192] : memref<64xi32, #tpu.memory_space<smem>>
    %194 = arith.index_cast %193 : i32 to index
    %c0_30 = arith.constant 0 : index
    %195 = vector.load %arg3[%194, %c0_30] : memref<520x128xf32, #tpu.memory_space<vmem>>, vector<2x128xf32>
    %196 = vector.extract_strided_slice %176 {offsets = [0, 2], sizes = [1, 1], strides = [1, 1]} : vector<1x8xf32> to vector<1x1xf32>
    %197 = vector.extract_strided_slice %195 {offsets = [0, 0], sizes = [1, 128], strides = [1, 1]} : vector<2x128xf32> to vector<1x128xf32>
    %198 = vector.broadcast %196 : vector<1x1xf32> to vector<1x128xf32>
    %199 = arith.mulf %198, %197 : vector<1x128xf32>
    %200 = vector.extract_strided_slice %176 {offsets = [0, 3], sizes = [1, 1], strides = [1, 1]} : vector<1x8xf32> to vector<1x1xf32>
    %201 = vector.extract_strided_slice %195 {offsets = [1, 0], sizes = [1, 128], strides = [1, 1]} : vector<2x128xf32> to vector<1x128xf32>
    %202 = vector.broadcast %200 : vector<1x1xf32> to vector<1x128xf32>
    %203 = arith.mulf %202, %201 : vector<1x128xf32>
    %204 = arith.addf %199, %203 : vector<1x128xf32>
    %205 = arith.addf %190, %204 : vector<1x128xf32>
    %c2_i32_31 = arith.constant 2 : i32
    %206 = arith.addi %174, %c2_i32_31 : i32
    %207 = arith.index_cast %206 : i32 to index
    %208 = memref.load %arg1[%207] : memref<64xi32, #tpu.memory_space<smem>>
    %209 = arith.index_cast %208 : i32 to index
    %c0_32 = arith.constant 0 : index
    %210 = vector.load %arg3[%209, %c0_32] : memref<520x128xf32, #tpu.memory_space<vmem>>, vector<2x128xf32>
    %211 = vector.extract_strided_slice %176 {offsets = [0, 4], sizes = [1, 1], strides = [1, 1]} : vector<1x8xf32> to vector<1x1xf32>
    %212 = vector.extract_strided_slice %210 {offsets = [0, 0], sizes = [1, 128], strides = [1, 1]} : vector<2x128xf32> to vector<1x128xf32>
    %213 = vector.broadcast %211 : vector<1x1xf32> to vector<1x128xf32>
    %214 = arith.mulf %213, %212 : vector<1x128xf32>
    %215 = vector.extract_strided_slice %176 {offsets = [0, 5], sizes = [1, 1], strides = [1, 1]} : vector<1x8xf32> to vector<1x1xf32>
    %216 = vector.extract_strided_slice %210 {offsets = [1, 0], sizes = [1, 128], strides = [1, 1]} : vector<2x128xf32> to vector<1x128xf32>
    %217 = vector.broadcast %215 : vector<1x1xf32> to vector<1x128xf32>
    %218 = arith.mulf %217, %216 : vector<1x128xf32>
    %219 = arith.addf %214, %218 : vector<1x128xf32>
    %220 = arith.addf %205, %219 : vector<1x128xf32>
    %c3_i32_33 = arith.constant 3 : i32
    %221 = arith.addi %174, %c3_i32_33 : i32
    %222 = arith.index_cast %221 : i32 to index
    %223 = memref.load %arg1[%222] : memref<64xi32, #tpu.memory_space<smem>>
    %224 = arith.index_cast %223 : i32 to index
    %c0_34 = arith.constant 0 : index
    %225 = vector.load %arg3[%224, %c0_34] : memref<520x128xf32, #tpu.memory_space<vmem>>, vector<2x128xf32>
    %226 = vector.extract_strided_slice %176 {offsets = [0, 6], sizes = [1, 1], strides = [1, 1]} : vector<1x8xf32> to vector<1x1xf32>
    %227 = vector.extract_strided_slice %225 {offsets = [0, 0], sizes = [1, 128], strides = [1, 1]} : vector<2x128xf32> to vector<1x128xf32>
    %228 = vector.broadcast %226 : vector<1x1xf32> to vector<1x128xf32>
    %229 = arith.mulf %228, %227 : vector<1x128xf32>
    %230 = vector.extract_strided_slice %176 {offsets = [0, 7], sizes = [1, 1], strides = [1, 1]} : vector<1x8xf32> to vector<1x1xf32>
    %231 = vector.extract_strided_slice %225 {offsets = [1, 0], sizes = [1, 128], strides = [1, 1]} : vector<2x128xf32> to vector<1x128xf32>
    %232 = vector.broadcast %230 : vector<1x1xf32> to vector<1x128xf32>
    %233 = arith.mulf %232, %231 : vector<1x128xf32>
    %234 = arith.addf %229, %233 : vector<1x128xf32>
    %235 = arith.addf %220, %234 : vector<1x128xf32>
    %236 = vector.broadcast %235 : vector<1x128xf32> to vector<8x128xf32>
    %237 = arith.mulf %236, %13 : vector<8x128xf32>
    %238 = arith.addf %170, %237 : vector<8x128xf32>
    %c8_i32_35 = arith.constant 8 : i32
    %239 = arith.muli %c0_i32_0, %c8_i32_35 : i32
    %c3_i32_36 = arith.constant 3 : i32
    %240 = arith.addi %239, %c3_i32_36 : i32
    %c4_i32_37 = arith.constant 4 : i32
    %241 = arith.muli %240, %c4_i32_37 : i32
    %242 = arith.addi %0, %241 : i32
    %243 = arith.index_cast %240 : i32 to index
    %c0_38 = arith.constant 0 : index
    %244 = vector.load %arg2[%243, %c0_38] : memref<16x8xf32, #tpu.memory_space<vmem>>, vector<1x8xf32>
    %c0_i32_39 = arith.constant 0 : i32
    %245 = arith.addi %242, %c0_i32_39 : i32
    %246 = arith.index_cast %245 : i32 to index
    %247 = memref.load %arg1[%246] : memref<64xi32, #tpu.memory_space<smem>>
    %248 = arith.index_cast %247 : i32 to index
    %c0_40 = arith.constant 0 : index
    %249 = vector.load %arg3[%248, %c0_40] : memref<520x128xf32, #tpu.memory_space<vmem>>, vector<2x128xf32>
    %250 = vector.extract_strided_slice %244 {offsets = [0, 0], sizes = [1, 1], strides = [1, 1]} : vector<1x8xf32> to vector<1x1xf32>
    %251 = vector.extract_strided_slice %249 {offsets = [0, 0], sizes = [1, 128], strides = [1, 1]} : vector<2x128xf32> to vector<1x128xf32>
    %252 = vector.broadcast %250 : vector<1x1xf32> to vector<1x128xf32>
    %253 = arith.mulf %252, %251 : vector<1x128xf32>
    %254 = vector.extract_strided_slice %244 {offsets = [0, 1], sizes = [1, 1], strides = [1, 1]} : vector<1x8xf32> to vector<1x1xf32>
    %255 = vector.extract_strided_slice %249 {offsets = [1, 0], sizes = [1, 128], strides = [1, 1]} : vector<2x128xf32> to vector<1x128xf32>
    %256 = vector.broadcast %254 : vector<1x1xf32> to vector<1x128xf32>
    %257 = arith.mulf %256, %255 : vector<1x128xf32>
    %258 = arith.addf %253, %257 : vector<1x128xf32>
    %c1_i32_41 = arith.constant 1 : i32
    %259 = arith.addi %242, %c1_i32_41 : i32
    %260 = arith.index_cast %259 : i32 to index
    %261 = memref.load %arg1[%260] : memref<64xi32, #tpu.memory_space<smem>>
    %262 = arith.index_cast %261 : i32 to index
    %c0_42 = arith.constant 0 : index
    %263 = vector.load %arg3[%262, %c0_42] : memref<520x128xf32, #tpu.memory_space<vmem>>, vector<2x128xf32>
    %264 = vector.extract_strided_slice %244 {offsets = [0, 2], sizes = [1, 1], strides = [1, 1]} : vector<1x8xf32> to vector<1x1xf32>
    %265 = vector.extract_strided_slice %263 {offsets = [0, 0], sizes = [1, 128], strides = [1, 1]} : vector<2x128xf32> to vector<1x128xf32>
    %266 = vector.broadcast %264 : vector<1x1xf32> to vector<1x128xf32>
    %267 = arith.mulf %266, %265 : vector<1x128xf32>
    %268 = vector.extract_strided_slice %244 {offsets = [0, 3], sizes = [1, 1], strides = [1, 1]} : vector<1x8xf32> to vector<1x1xf32>
    %269 = vector.extract_strided_slice %263 {offsets = [1, 0], sizes = [1, 128], strides = [1, 1]} : vector<2x128xf32> to vector<1x128xf32>
    %270 = vector.broadcast %268 : vector<1x1xf32> to vector<1x128xf32>
    %271 = arith.mulf %270, %269 : vector<1x128xf32>
    %272 = arith.addf %267, %271 : vector<1x128xf32>
    %273 = arith.addf %258, %272 : vector<1x128xf32>
    %c2_i32_43 = arith.constant 2 : i32
    %274 = arith.addi %242, %c2_i32_43 : i32
    %275 = arith.index_cast %274 : i32 to index
    %276 = memref.load %arg1[%275] : memref<64xi32, #tpu.memory_space<smem>>
    %277 = arith.index_cast %276 : i32 to index
    %c0_44 = arith.constant 0 : index
    %278 = vector.load %arg3[%277, %c0_44] : memref<520x128xf32, #tpu.memory_space<vmem>>, vector<2x128xf32>
    %279 = vector.extract_strided_slice %244 {offsets = [0, 4], sizes = [1, 1], strides = [1, 1]} : vector<1x8xf32> to vector<1x1xf32>
    %280 = vector.extract_strided_slice %278 {offsets = [0, 0], sizes = [1, 128], strides = [1, 1]} : vector<2x128xf32> to vector<1x128xf32>
    %281 = vector.broadcast %279 : vector<1x1xf32> to vector<1x128xf32>
    %282 = arith.mulf %281, %280 : vector<1x128xf32>
    %283 = vector.extract_strided_slice %244 {offsets = [0, 5], sizes = [1, 1], strides = [1, 1]} : vector<1x8xf32> to vector<1x1xf32>
    %284 = vector.extract_strided_slice %278 {offsets = [1, 0], sizes = [1, 128], strides = [1, 1]} : vector<2x128xf32> to vector<1x128xf32>
    %285 = vector.broadcast %283 : vector<1x1xf32> to vector<1x128xf32>
    %286 = arith.mulf %285, %284 : vector<1x128xf32>
    %287 = arith.addf %282, %286 : vector<1x128xf32>
    %288 = arith.addf %273, %287 : vector<1x128xf32>
    %c3_i32_45 = arith.constant 3 : i32
    %289 = arith.addi %242, %c3_i32_45 : i32
    %290 = arith.index_cast %289 : i32 to index
    %291 = memref.load %arg1[%290] : memref<64xi32, #tpu.memory_space<smem>>
    %292 = arith.index_cast %291 : i32 to index
    %c0_46 = arith.constant 0 : index
    %293 = vector.load %arg3[%292, %c0_46] : memref<520x128xf32, #tpu.memory_space<vmem>>, vector<2x128xf32>
    %294 = vector.extract_strided_slice %244 {offsets = [0, 6], sizes = [1, 1], strides = [1, 1]} : vector<1x8xf32> to vector<1x1xf32>
    %295 = vector.extract_strided_slice %293 {offsets = [0, 0], sizes = [1, 128], strides = [1, 1]} : vector<2x128xf32> to vector<1x128xf32>
    %296 = vector.broadcast %294 : vector<1x1xf32> to vector<1x128xf32>
    %297 = arith.mulf %296, %295 : vector<1x128xf32>
    %298 = vector.extract_strided_slice %244 {offsets = [0, 7], sizes = [1, 1], strides = [1, 1]} : vector<1x8xf32> to vector<1x1xf32>
    %299 = vector.extract_strided_slice %293 {offsets = [1, 0], sizes = [1, 128], strides = [1, 1]} : vector<2x128xf32> to vector<1x128xf32>
    %300 = vector.broadcast %298 : vector<1x1xf32> to vector<1x128xf32>
    %301 = arith.mulf %300, %299 : vector<1x128xf32>
    %302 = arith.addf %297, %301 : vector<1x128xf32>
    %303 = arith.addf %288, %302 : vector<1x128xf32>
    %304 = vector.broadcast %303 : vector<1x128xf32> to vector<8x128xf32>
    %305 = arith.mulf %304, %17 : vector<8x128xf32>
    %306 = arith.addf %238, %305 : vector<8x128xf32>
    %c8_i32_47 = arith.constant 8 : i32
    %307 = arith.muli %c0_i32_0, %c8_i32_47 : i32
    %c4_i32_48 = arith.constant 4 : i32
    %308 = arith.addi %307, %c4_i32_48 : i32
    %c4_i32_49 = arith.constant 4 : i32
    %309 = arith.muli %308, %c4_i32_49 : i32
    %310 = arith.addi %0, %309 : i32
    %311 = arith.index_cast %308 : i32 to index
    %c0_50 = arith.constant 0 : index
    %312 = vector.load %arg2[%311, %c0_50] : memref<16x8xf32, #tpu.memory_space<vmem>>, vector<1x8xf32>
    %c0_i32_51 = arith.constant 0 : i32
    %313 = arith.addi %310, %c0_i32_51 : i32
    %314 = arith.index_cast %313 : i32 to index
    %315 = memref.load %arg1[%314] : memref<64xi32, #tpu.memory_space<smem>>
    %316 = arith.index_cast %315 : i32 to index
    %c0_52 = arith.constant 0 : index
    %317 = vector.load %arg3[%316, %c0_52] : memref<520x128xf32, #tpu.memory_space<vmem>>, vector<2x128xf32>
    %318 = vector.extract_strided_slice %312 {offsets = [0, 0], sizes = [1, 1], strides = [1, 1]} : vector<1x8xf32> to vector<1x1xf32>
    %319 = vector.extract_strided_slice %317 {offsets = [0, 0], sizes = [1, 128], strides = [1, 1]} : vector<2x128xf32> to vector<1x128xf32>
    %320 = vector.broadcast %318 : vector<1x1xf32> to vector<1x128xf32>
    %321 = arith.mulf %320, %319 : vector<1x128xf32>
    %322 = vector.extract_strided_slice %312 {offsets = [0, 1], sizes = [1, 1], strides = [1, 1]} : vector<1x8xf32> to vector<1x1xf32>
    %323 = vector.extract_strided_slice %317 {offsets = [1, 0], sizes = [1, 128], strides = [1, 1]} : vector<2x128xf32> to vector<1x128xf32>
    %324 = vector.broadcast %322 : vector<1x1xf32> to vector<1x128xf32>
    %325 = arith.mulf %324, %323 : vector<1x128xf32>
    %326 = arith.addf %321, %325 : vector<1x128xf32>
    %c1_i32_53 = arith.constant 1 : i32
    %327 = arith.addi %310, %c1_i32_53 : i32
    %328 = arith.index_cast %327 : i32 to index
    %329 = memref.load %arg1[%328] : memref<64xi32, #tpu.memory_space<smem>>
    %330 = arith.index_cast %329 : i32 to index
    %c0_54 = arith.constant 0 : index
    %331 = vector.load %arg3[%330, %c0_54] : memref<520x128xf32, #tpu.memory_space<vmem>>, vector<2x128xf32>
    %332 = vector.extract_strided_slice %312 {offsets = [0, 2], sizes = [1, 1], strides = [1, 1]} : vector<1x8xf32> to vector<1x1xf32>
    %333 = vector.extract_strided_slice %331 {offsets = [0, 0], sizes = [1, 128], strides = [1, 1]} : vector<2x128xf32> to vector<1x128xf32>
    %334 = vector.broadcast %332 : vector<1x1xf32> to vector<1x128xf32>
    %335 = arith.mulf %334, %333 : vector<1x128xf32>
    %336 = vector.extract_strided_slice %312 {offsets = [0, 3], sizes = [1, 1], strides = [1, 1]} : vector<1x8xf32> to vector<1x1xf32>
    %337 = vector.extract_strided_slice %331 {offsets = [1, 0], sizes = [1, 128], strides = [1, 1]} : vector<2x128xf32> to vector<1x128xf32>
    %338 = vector.broadcast %336 : vector<1x1xf32> to vector<1x128xf32>
    %339 = arith.mulf %338, %337 : vector<1x128xf32>
    %340 = arith.addf %335, %339 : vector<1x128xf32>
    %341 = arith.addf %326, %340 : vector<1x128xf32>
    %c2_i32_55 = arith.constant 2 : i32
    %342 = arith.addi %310, %c2_i32_55 : i32
    %343 = arith.index_cast %342 : i32 to index
    %344 = memref.load %arg1[%343] : memref<64xi32, #tpu.memory_space<smem>>
    %345 = arith.index_cast %344 : i32 to index
    %c0_56 = arith.constant 0 : index
    %346 = vector.load %arg3[%345, %c0_56] : memref<520x128xf32, #tpu.memory_space<vmem>>, vector<2x128xf32>
    %347 = vector.extract_strided_slice %312 {offsets = [0, 4], sizes = [1, 1], strides = [1, 1]} : vector<1x8xf32> to vector<1x1xf32>
    %348 = vector.extract_strided_slice %346 {offsets = [0, 0], sizes = [1, 128], strides = [1, 1]} : vector<2x128xf32> to vector<1x128xf32>
    %349 = vector.broadcast %347 : vector<1x1xf32> to vector<1x128xf32>
    %350 = arith.mulf %349, %348 : vector<1x128xf32>
    %351 = vector.extract_strided_slice %312 {offsets = [0, 5], sizes = [1, 1], strides = [1, 1]} : vector<1x8xf32> to vector<1x1xf32>
    %352 = vector.extract_strided_slice %346 {offsets = [1, 0], sizes = [1, 128], strides = [1, 1]} : vector<2x128xf32> to vector<1x128xf32>
    %353 = vector.broadcast %351 : vector<1x1xf32> to vector<1x128xf32>
    %354 = arith.mulf %353, %352 : vector<1x128xf32>
    %355 = arith.addf %350, %354 : vector<1x128xf32>
    %356 = arith.addf %341, %355 : vector<1x128xf32>
    %c3_i32_57 = arith.constant 3 : i32
    %357 = arith.addi %310, %c3_i32_57 : i32
    %358 = arith.index_cast %357 : i32 to index
    %359 = memref.load %arg1[%358] : memref<64xi32, #tpu.memory_space<smem>>
    %360 = arith.index_cast %359 : i32 to index
    %c0_58 = arith.constant 0 : index
    %361 = vector.load %arg3[%360, %c0_58] : memref<520x128xf32, #tpu.memory_space<vmem>>, vector<2x128xf32>
    %362 = vector.extract_strided_slice %312 {offsets = [0, 6], sizes = [1, 1], strides = [1, 1]} : vector<1x8xf32> to vector<1x1xf32>
    %363 = vector.extract_strided_slice %361 {offsets = [0, 0], sizes = [1, 128], strides = [1, 1]} : vector<2x128xf32> to vector<1x128xf32>
    %364 = vector.broadcast %362 : vector<1x1xf32> to vector<1x128xf32>
    %365 = arith.mulf %364, %363 : vector<1x128xf32>
    %366 = vector.extract_strided_slice %312 {offsets = [0, 7], sizes = [1, 1], strides = [1, 1]} : vector<1x8xf32> to vector<1x1xf32>
    %367 = vector.extract_strided_slice %361 {offsets = [1, 0], sizes = [1, 128], strides = [1, 1]} : vector<2x128xf32> to vector<1x128xf32>
    %368 = vector.broadcast %366 : vector<1x1xf32> to vector<1x128xf32>
    %369 = arith.mulf %368, %367 : vector<1x128xf32>
    %370 = arith.addf %365, %369 : vector<1x128xf32>
    %371 = arith.addf %356, %370 : vector<1x128xf32>
    %372 = vector.broadcast %371 : vector<1x128xf32> to vector<8x128xf32>
    %373 = arith.mulf %372, %21 : vector<8x128xf32>
    %374 = arith.addf %306, %373 : vector<8x128xf32>
    %c8_i32_59 = arith.constant 8 : i32
    %375 = arith.muli %c0_i32_0, %c8_i32_59 : i32
    %c5_i32_60 = arith.constant 5 : i32
    %376 = arith.addi %375, %c5_i32_60 : i32
    %c4_i32_61 = arith.constant 4 : i32
    %377 = arith.muli %376, %c4_i32_61 : i32
    %378 = arith.addi %0, %377 : i32
    %379 = arith.index_cast %376 : i32 to index
    %c0_62 = arith.constant 0 : index
    %380 = vector.load %arg2[%379, %c0_62] : memref<16x8xf32, #tpu.memory_space<vmem>>, vector<1x8xf32>
    %c0_i32_63 = arith.constant 0 : i32
    %381 = arith.addi %378, %c0_i32_63 : i32
    %382 = arith.index_cast %381 : i32 to index
    %383 = memref.load %arg1[%382] : memref<64xi32, #tpu.memory_space<smem>>
    %384 = arith.index_cast %383 : i32 to index
    %c0_64 = arith.constant 0 : index
    %385 = vector.load %arg3[%384, %c0_64] : memref<520x128xf32, #tpu.memory_space<vmem>>, vector<2x128xf32>
    %386 = vector.extract_strided_slice %380 {offsets = [0, 0], sizes = [1, 1], strides = [1, 1]} : vector<1x8xf32> to vector<1x1xf32>
    %387 = vector.extract_strided_slice %385 {offsets = [0, 0], sizes = [1, 128], strides = [1, 1]} : vector<2x128xf32> to vector<1x128xf32>
    %388 = vector.broadcast %386 : vector<1x1xf32> to vector<1x128xf32>
    %389 = arith.mulf %388, %387 : vector<1x128xf32>
    %390 = vector.extract_strided_slice %380 {offsets = [0, 1], sizes = [1, 1], strides = [1, 1]} : vector<1x8xf32> to vector<1x1xf32>
    %391 = vector.extract_strided_slice %385 {offsets = [1, 0], sizes = [1, 128], strides = [1, 1]} : vector<2x128xf32> to vector<1x128xf32>
    %392 = vector.broadcast %390 : vector<1x1xf32> to vector<1x128xf32>
    %393 = arith.mulf %392, %391 : vector<1x128xf32>
    %394 = arith.addf %389, %393 : vector<1x128xf32>
    %c1_i32_65 = arith.constant 1 : i32
    %395 = arith.addi %378, %c1_i32_65 : i32
    %396 = arith.index_cast %395 : i32 to index
    %397 = memref.load %arg1[%396] : memref<64xi32, #tpu.memory_space<smem>>
    %398 = arith.index_cast %397 : i32 to index
    %c0_66 = arith.constant 0 : index
    %399 = vector.load %arg3[%398, %c0_66] : memref<520x128xf32, #tpu.memory_space<vmem>>, vector<2x128xf32>
    %400 = vector.extract_strided_slice %380 {offsets = [0, 2], sizes = [1, 1], strides = [1, 1]} : vector<1x8xf32> to vector<1x1xf32>
    %401 = vector.extract_strided_slice %399 {offsets = [0, 0], sizes = [1, 128], strides = [1, 1]} : vector<2x128xf32> to vector<1x128xf32>
    %402 = vector.broadcast %400 : vector<1x1xf32> to vector<1x128xf32>
    %403 = arith.mulf %402, %401 : vector<1x128xf32>
    %404 = vector.extract_strided_slice %380 {offsets = [0, 3], sizes = [1, 1], strides = [1, 1]} : vector<1x8xf32> to vector<1x1xf32>
    %405 = vector.extract_strided_slice %399 {offsets = [1, 0], sizes = [1, 128], strides = [1, 1]} : vector<2x128xf32> to vector<1x128xf32>
    %406 = vector.broadcast %404 : vector<1x1xf32> to vector<1x128xf32>
    %407 = arith.mulf %406, %405 : vector<1x128xf32>
    %408 = arith.addf %403, %407 : vector<1x128xf32>
    %409 = arith.addf %394, %408 : vector<1x128xf32>
    %c2_i32_67 = arith.constant 2 : i32
    %410 = arith.addi %378, %c2_i32_67 : i32
    %411 = arith.index_cast %410 : i32 to index
    %412 = memref.load %arg1[%411] : memref<64xi32, #tpu.memory_space<smem>>
    %413 = arith.index_cast %412 : i32 to index
    %c0_68 = arith.constant 0 : index
    %414 = vector.load %arg3[%413, %c0_68] : memref<520x128xf32, #tpu.memory_space<vmem>>, vector<2x128xf32>
    %415 = vector.extract_strided_slice %380 {offsets = [0, 4], sizes = [1, 1], strides = [1, 1]} : vector<1x8xf32> to vector<1x1xf32>
    %416 = vector.extract_strided_slice %414 {offsets = [0, 0], sizes = [1, 128], strides = [1, 1]} : vector<2x128xf32> to vector<1x128xf32>
    %417 = vector.broadcast %415 : vector<1x1xf32> to vector<1x128xf32>
    %418 = arith.mulf %417, %416 : vector<1x128xf32>
    %419 = vector.extract_strided_slice %380 {offsets = [0, 5], sizes = [1, 1], strides = [1, 1]} : vector<1x8xf32> to vector<1x1xf32>
    %420 = vector.extract_strided_slice %414 {offsets = [1, 0], sizes = [1, 128], strides = [1, 1]} : vector<2x128xf32> to vector<1x128xf32>
    %421 = vector.broadcast %419 : vector<1x1xf32> to vector<1x128xf32>
    %422 = arith.mulf %421, %420 : vector<1x128xf32>
    %423 = arith.addf %418, %422 : vector<1x128xf32>
    %424 = arith.addf %409, %423 : vector<1x128xf32>
    %c3_i32_69 = arith.constant 3 : i32
    %425 = arith.addi %378, %c3_i32_69 : i32
    %426 = arith.index_cast %425 : i32 to index
    %427 = memref.load %arg1[%426] : memref<64xi32, #tpu.memory_space<smem>>
    %428 = arith.index_cast %427 : i32 to index
    %c0_70 = arith.constant 0 : index
    %429 = vector.load %arg3[%428, %c0_70] : memref<520x128xf32, #tpu.memory_space<vmem>>, vector<2x128xf32>
    %430 = vector.extract_strided_slice %380 {offsets = [0, 6], sizes = [1, 1], strides = [1, 1]} : vector<1x8xf32> to vector<1x1xf32>
    %431 = vector.extract_strided_slice %429 {offsets = [0, 0], sizes = [1, 128], strides = [1, 1]} : vector<2x128xf32> to vector<1x128xf32>
    %432 = vector.broadcast %430 : vector<1x1xf32> to vector<1x128xf32>
    %433 = arith.mulf %432, %431 : vector<1x128xf32>
    %434 = vector.extract_strided_slice %380 {offsets = [0, 7], sizes = [1, 1], strides = [1, 1]} : vector<1x8xf32> to vector<1x1xf32>
    %435 = vector.extract_strided_slice %429 {offsets = [1, 0], sizes = [1, 128], strides = [1, 1]} : vector<2x128xf32> to vector<1x128xf32>
    %436 = vector.broadcast %434 : vector<1x1xf32> to vector<1x128xf32>
    %437 = arith.mulf %436, %435 : vector<1x128xf32>
    %438 = arith.addf %433, %437 : vector<1x128xf32>
    %439 = arith.addf %424, %438 : vector<1x128xf32>
    %440 = vector.broadcast %439 : vector<1x128xf32> to vector<8x128xf32>
    %441 = arith.mulf %440, %25 : vector<8x128xf32>
    %442 = arith.addf %374, %441 : vector<8x128xf32>
    %c8_i32_71 = arith.constant 8 : i32
    %443 = arith.muli %c0_i32_0, %c8_i32_71 : i32
    %c6_i32_72 = arith.constant 6 : i32
    %444 = arith.addi %443, %c6_i32_72 : i32
    %c4_i32_73 = arith.constant 4 : i32
    %445 = arith.muli %444, %c4_i32_73 : i32
    %446 = arith.addi %0, %445 : i32
    %447 = arith.index_cast %444 : i32 to index
    %c0_74 = arith.constant 0 : index
    %448 = vector.load %arg2[%447, %c0_74] : memref<16x8xf32, #tpu.memory_space<vmem>>, vector<1x8xf32>
    %c0_i32_75 = arith.constant 0 : i32
    %449 = arith.addi %446, %c0_i32_75 : i32
    %450 = arith.index_cast %449 : i32 to index
    %451 = memref.load %arg1[%450] : memref<64xi32, #tpu.memory_space<smem>>
    %452 = arith.index_cast %451 : i32 to index
    %c0_76 = arith.constant 0 : index
    %453 = vector.load %arg3[%452, %c0_76] : memref<520x128xf32, #tpu.memory_space<vmem>>, vector<2x128xf32>
    %454 = vector.extract_strided_slice %448 {offsets = [0, 0], sizes = [1, 1], strides = [1, 1]} : vector<1x8xf32> to vector<1x1xf32>
    %455 = vector.extract_strided_slice %453 {offsets = [0, 0], sizes = [1, 128], strides = [1, 1]} : vector<2x128xf32> to vector<1x128xf32>
    %456 = vector.broadcast %454 : vector<1x1xf32> to vector<1x128xf32>
    %457 = arith.mulf %456, %455 : vector<1x128xf32>
    %458 = vector.extract_strided_slice %448 {offsets = [0, 1], sizes = [1, 1], strides = [1, 1]} : vector<1x8xf32> to vector<1x1xf32>
    %459 = vector.extract_strided_slice %453 {offsets = [1, 0], sizes = [1, 128], strides = [1, 1]} : vector<2x128xf32> to vector<1x128xf32>
    %460 = vector.broadcast %458 : vector<1x1xf32> to vector<1x128xf32>
    %461 = arith.mulf %460, %459 : vector<1x128xf32>
    %462 = arith.addf %457, %461 : vector<1x128xf32>
    %c1_i32_77 = arith.constant 1 : i32
    %463 = arith.addi %446, %c1_i32_77 : i32
    %464 = arith.index_cast %463 : i32 to index
    %465 = memref.load %arg1[%464] : memref<64xi32, #tpu.memory_space<smem>>
    %466 = arith.index_cast %465 : i32 to index
    %c0_78 = arith.constant 0 : index
    %467 = vector.load %arg3[%466, %c0_78] : memref<520x128xf32, #tpu.memory_space<vmem>>, vector<2x128xf32>
    %468 = vector.extract_strided_slice %448 {offsets = [0, 2], sizes = [1, 1], strides = [1, 1]} : vector<1x8xf32> to vector<1x1xf32>
    %469 = vector.extract_strided_slice %467 {offsets = [0, 0], sizes = [1, 128], strides = [1, 1]} : vector<2x128xf32> to vector<1x128xf32>
    %470 = vector.broadcast %468 : vector<1x1xf32> to vector<1x128xf32>
    %471 = arith.mulf %470, %469 : vector<1x128xf32>
    %472 = vector.extract_strided_slice %448 {offsets = [0, 3], sizes = [1, 1], strides = [1, 1]} : vector<1x8xf32> to vector<1x1xf32>
    %473 = vector.extract_strided_slice %467 {offsets = [1, 0], sizes = [1, 128], strides = [1, 1]} : vector<2x128xf32> to vector<1x128xf32>
    %474 = vector.broadcast %472 : vector<1x1xf32> to vector<1x128xf32>
    %475 = arith.mulf %474, %473 : vector<1x128xf32>
    %476 = arith.addf %471, %475 : vector<1x128xf32>
    %477 = arith.addf %462, %476 : vector<1x128xf32>
    %c2_i32_79 = arith.constant 2 : i32
    %478 = arith.addi %446, %c2_i32_79 : i32
    %479 = arith.index_cast %478 : i32 to index
    %480 = memref.load %arg1[%479] : memref<64xi32, #tpu.memory_space<smem>>
    %481 = arith.index_cast %480 : i32 to index
    %c0_80 = arith.constant 0 : index
    %482 = vector.load %arg3[%481, %c0_80] : memref<520x128xf32, #tpu.memory_space<vmem>>, vector<2x128xf32>
    %483 = vector.extract_strided_slice %448 {offsets = [0, 4], sizes = [1, 1], strides = [1, 1]} : vector<1x8xf32> to vector<1x1xf32>
    %484 = vector.extract_strided_slice %482 {offsets = [0, 0], sizes = [1, 128], strides = [1, 1]} : vector<2x128xf32> to vector<1x128xf32>
    %485 = vector.broadcast %483 : vector<1x1xf32> to vector<1x128xf32>
    %486 = arith.mulf %485, %484 : vector<1x128xf32>
    %487 = vector.extract_strided_slice %448 {offsets = [0, 5], sizes = [1, 1], strides = [1, 1]} : vector<1x8xf32> to vector<1x1xf32>
    %488 = vector.extract_strided_slice %482 {offsets = [1, 0], sizes = [1, 128], strides = [1, 1]} : vector<2x128xf32> to vector<1x128xf32>
    %489 = vector.broadcast %487 : vector<1x1xf32> to vector<1x128xf32>
    %490 = arith.mulf %489, %488 : vector<1x128xf32>
    %491 = arith.addf %486, %490 : vector<1x128xf32>
    %492 = arith.addf %477, %491 : vector<1x128xf32>
    %c3_i32_81 = arith.constant 3 : i32
    %493 = arith.addi %446, %c3_i32_81 : i32
    %494 = arith.index_cast %493 : i32 to index
    %495 = memref.load %arg1[%494] : memref<64xi32, #tpu.memory_space<smem>>
    %496 = arith.index_cast %495 : i32 to index
    %c0_82 = arith.constant 0 : index
    %497 = vector.load %arg3[%496, %c0_82] : memref<520x128xf32, #tpu.memory_space<vmem>>, vector<2x128xf32>
    %498 = vector.extract_strided_slice %448 {offsets = [0, 6], sizes = [1, 1], strides = [1, 1]} : vector<1x8xf32> to vector<1x1xf32>
    %499 = vector.extract_strided_slice %497 {offsets = [0, 0], sizes = [1, 128], strides = [1, 1]} : vector<2x128xf32> to vector<1x128xf32>
    %500 = vector.broadcast %498 : vector<1x1xf32> to vector<1x128xf32>
    %501 = arith.mulf %500, %499 : vector<1x128xf32>
    %502 = vector.extract_strided_slice %448 {offsets = [0, 7], sizes = [1, 1], strides = [1, 1]} : vector<1x8xf32> to vector<1x1xf32>
    %503 = vector.extract_strided_slice %497 {offsets = [1, 0], sizes = [1, 128], strides = [1, 1]} : vector<2x128xf32> to vector<1x128xf32>
    %504 = vector.broadcast %502 : vector<1x1xf32> to vector<1x128xf32>
    %505 = arith.mulf %504, %503 : vector<1x128xf32>
    %506 = arith.addf %501, %505 : vector<1x128xf32>
    %507 = arith.addf %492, %506 : vector<1x128xf32>
    %508 = vector.broadcast %507 : vector<1x128xf32> to vector<8x128xf32>
    %509 = arith.mulf %508, %29 : vector<8x128xf32>
    %510 = arith.addf %442, %509 : vector<8x128xf32>
    %c8_i32_83 = arith.constant 8 : i32
    %511 = arith.muli %c0_i32_0, %c8_i32_83 : i32
    %c7_i32_84 = arith.constant 7 : i32
    %512 = arith.addi %511, %c7_i32_84 : i32
    %c4_i32_85 = arith.constant 4 : i32
    %513 = arith.muli %512, %c4_i32_85 : i32
    %514 = arith.addi %0, %513 : i32
    %515 = arith.index_cast %512 : i32 to index
    %c0_86 = arith.constant 0 : index
    %516 = vector.load %arg2[%515, %c0_86] : memref<16x8xf32, #tpu.memory_space<vmem>>, vector<1x8xf32>
    %c0_i32_87 = arith.constant 0 : i32
    %517 = arith.addi %514, %c0_i32_87 : i32
    %518 = arith.index_cast %517 : i32 to index
    %519 = memref.load %arg1[%518] : memref<64xi32, #tpu.memory_space<smem>>
    %520 = arith.index_cast %519 : i32 to index
    %c0_88 = arith.constant 0 : index
    %521 = vector.load %arg3[%520, %c0_88] : memref<520x128xf32, #tpu.memory_space<vmem>>, vector<2x128xf32>
    %522 = vector.extract_strided_slice %516 {offsets = [0, 0], sizes = [1, 1], strides = [1, 1]} : vector<1x8xf32> to vector<1x1xf32>
    %523 = vector.extract_strided_slice %521 {offsets = [0, 0], sizes = [1, 128], strides = [1, 1]} : vector<2x128xf32> to vector<1x128xf32>
    %524 = vector.broadcast %522 : vector<1x1xf32> to vector<1x128xf32>
    %525 = arith.mulf %524, %523 : vector<1x128xf32>
    %526 = vector.extract_strided_slice %516 {offsets = [0, 1], sizes = [1, 1], strides = [1, 1]} : vector<1x8xf32> to vector<1x1xf32>
    %527 = vector.extract_strided_slice %521 {offsets = [1, 0], sizes = [1, 128], strides = [1, 1]} : vector<2x128xf32> to vector<1x128xf32>
    %528 = vector.broadcast %526 : vector<1x1xf32> to vector<1x128xf32>
    %529 = arith.mulf %528, %527 : vector<1x128xf32>
    %530 = arith.addf %525, %529 : vector<1x128xf32>
    %c1_i32_89 = arith.constant 1 : i32
    %531 = arith.addi %514, %c1_i32_89 : i32
    %532 = arith.index_cast %531 : i32 to index
    %533 = memref.load %arg1[%532] : memref<64xi32, #tpu.memory_space<smem>>
    %534 = arith.index_cast %533 : i32 to index
    %c0_90 = arith.constant 0 : index
    %535 = vector.load %arg3[%534, %c0_90] : memref<520x128xf32, #tpu.memory_space<vmem>>, vector<2x128xf32>
    %536 = vector.extract_strided_slice %516 {offsets = [0, 2], sizes = [1, 1], strides = [1, 1]} : vector<1x8xf32> to vector<1x1xf32>
    %537 = vector.extract_strided_slice %535 {offsets = [0, 0], sizes = [1, 128], strides = [1, 1]} : vector<2x128xf32> to vector<1x128xf32>
    %538 = vector.broadcast %536 : vector<1x1xf32> to vector<1x128xf32>
    %539 = arith.mulf %538, %537 : vector<1x128xf32>
    %540 = vector.extract_strided_slice %516 {offsets = [0, 3], sizes = [1, 1], strides = [1, 1]} : vector<1x8xf32> to vector<1x1xf32>
    %541 = vector.extract_strided_slice %535 {offsets = [1, 0], sizes = [1, 128], strides = [1, 1]} : vector<2x128xf32> to vector<1x128xf32>
    %542 = vector.broadcast %540 : vector<1x1xf32> to vector<1x128xf32>
    %543 = arith.mulf %542, %541 : vector<1x128xf32>
    %544 = arith.addf %539, %543 : vector<1x128xf32>
    %545 = arith.addf %530, %544 : vector<1x128xf32>
    %c2_i32_91 = arith.constant 2 : i32
    %546 = arith.addi %514, %c2_i32_91 : i32
    %547 = arith.index_cast %546 : i32 to index
    %548 = memref.load %arg1[%547] : memref<64xi32, #tpu.memory_space<smem>>
    %549 = arith.index_cast %548 : i32 to index
    %c0_92 = arith.constant 0 : index
    %550 = vector.load %arg3[%549, %c0_92] : memref<520x128xf32, #tpu.memory_space<vmem>>, vector<2x128xf32>
    %551 = vector.extract_strided_slice %516 {offsets = [0, 4], sizes = [1, 1], strides = [1, 1]} : vector<1x8xf32> to vector<1x1xf32>
    %552 = vector.extract_strided_slice %550 {offsets = [0, 0], sizes = [1, 128], strides = [1, 1]} : vector<2x128xf32> to vector<1x128xf32>
    %553 = vector.broadcast %551 : vector<1x1xf32> to vector<1x128xf32>
    %554 = arith.mulf %553, %552 : vector<1x128xf32>
    %555 = vector.extract_strided_slice %516 {offsets = [0, 5], sizes = [1, 1], strides = [1, 1]} : vector<1x8xf32> to vector<1x1xf32>
    %556 = vector.extract_strided_slice %550 {offsets = [1, 0], sizes = [1, 128], strides = [1, 1]} : vector<2x128xf32> to vector<1x128xf32>
    %557 = vector.broadcast %555 : vector<1x1xf32> to vector<1x128xf32>
    %558 = arith.mulf %557, %556 : vector<1x128xf32>
    %559 = arith.addf %554, %558 : vector<1x128xf32>
    %560 = arith.addf %545, %559 : vector<1x128xf32>
    %c3_i32_93 = arith.constant 3 : i32
    %561 = arith.addi %514, %c3_i32_93 : i32
    %562 = arith.index_cast %561 : i32 to index
    %563 = memref.load %arg1[%562] : memref<64xi32, #tpu.memory_space<smem>>
    %564 = arith.index_cast %563 : i32 to index
    %c0_94 = arith.constant 0 : index
    %565 = vector.load %arg3[%564, %c0_94] : memref<520x128xf32, #tpu.memory_space<vmem>>, vector<2x128xf32>
    %566 = vector.extract_strided_slice %516 {offsets = [0, 6], sizes = [1, 1], strides = [1, 1]} : vector<1x8xf32> to vector<1x1xf32>
    %567 = vector.extract_strided_slice %565 {offsets = [0, 0], sizes = [1, 128], strides = [1, 1]} : vector<2x128xf32> to vector<1x128xf32>
    %568 = vector.broadcast %566 : vector<1x1xf32> to vector<1x128xf32>
    %569 = arith.mulf %568, %567 : vector<1x128xf32>
    %570 = vector.extract_strided_slice %516 {offsets = [0, 7], sizes = [1, 1], strides = [1, 1]} : vector<1x8xf32> to vector<1x1xf32>
    %571 = vector.extract_strided_slice %565 {offsets = [1, 0], sizes = [1, 128], strides = [1, 1]} : vector<2x128xf32> to vector<1x128xf32>
    %572 = vector.broadcast %570 : vector<1x1xf32> to vector<1x128xf32>
    %573 = arith.mulf %572, %571 : vector<1x128xf32>
    %574 = arith.addf %569, %573 : vector<1x128xf32>
    %575 = arith.addf %560, %574 : vector<1x128xf32>
    %576 = vector.broadcast %575 : vector<1x128xf32> to vector<8x128xf32>
    %577 = arith.mulf %576, %33 : vector<8x128xf32>
    %578 = arith.addf %510, %577 : vector<8x128xf32>
    %c8_i32_95 = arith.constant 8 : i32
    %579 = arith.muli %c0_i32_0, %c8_i32_95 : i32
    %580 = tpu.assume_multiple %579, 8 : i32
    %581 = arith.index_cast %580 : i32 to index
    %c0_96 = arith.constant 0 : index
    %582 = vector.load %arg4[%581, %c0_96] : memref<16x128xf32, #tpu.memory_space<vmem>>, vector<8x128xf32>
    tpu.vector_store %arg4[%581, %c0_96], %578 {strides = array<i32>} : memref<16x128xf32, #tpu.memory_space<vmem>>, vector<8x128xf32>,
    %c1_i32_97 = arith.constant 1 : i32
    %cst_98 = arith.constant 0.000000e+00 : f32
    %583 = vector.broadcast %cst_98 : f32 to vector<8x128xf32>
    %c8_i32_99 = arith.constant 8 : i32
    %584 = arith.muli %c1_i32_97, %c8_i32_99 : i32
    %c0_i32_100 = arith.constant 0 : i32
    %585 = arith.addi %584, %c0_i32_100 : i32
    %c4_i32_101 = arith.constant 4 : i32
    %586 = arith.muli %585, %c4_i32_101 : i32
    %587 = arith.addi %0, %586 : i32
    %588 = arith.index_cast %585 : i32 to index
    %c0_102 = arith.constant 0 : index
    %589 = vector.load %arg2[%588, %c0_102] : memref<16x8xf32, #tpu.memory_space<vmem>>, vector<1x8xf32>
    %c0_i32_103 = arith.constant 0 : i32
    %590 = arith.addi %587, %c0_i32_103 : i32
    %591 = arith.index_cast %590 : i32 to index
    %592 = memref.load %arg1[%591] : memref<64xi32, #tpu.memory_space<smem>>
    %593 = arith.index_cast %592 : i32 to index
    %c0_104 = arith.constant 0 : index
    %594 = vector.load %arg3[%593, %c0_104] : memref<520x128xf32, #tpu.memory_space<vmem>>, vector<2x128xf32>
    %595 = vector.extract_strided_slice %589 {offsets = [0, 0], sizes = [1, 1], strides = [1, 1]} : vector<1x8xf32> to vector<1x1xf32>
    %596 = vector.extract_strided_slice %594 {offsets = [0, 0], sizes = [1, 128], strides = [1, 1]} : vector<2x128xf32> to vector<1x128xf32>
    %597 = vector.broadcast %595 : vector<1x1xf32> to vector<1x128xf32>
    %598 = arith.mulf %597, %596 : vector<1x128xf32>
    %599 = vector.extract_strided_slice %589 {offsets = [0, 1], sizes = [1, 1], strides = [1, 1]} : vector<1x8xf32> to vector<1x1xf32>
    %600 = vector.extract_strided_slice %594 {offsets = [1, 0], sizes = [1, 128], strides = [1, 1]} : vector<2x128xf32> to vector<1x128xf32>
    %601 = vector.broadcast %599 : vector<1x1xf32> to vector<1x128xf32>
    %602 = arith.mulf %601, %600 : vector<1x128xf32>
    %603 = arith.addf %598, %602 : vector<1x128xf32>
    %c1_i32_105 = arith.constant 1 : i32
    %604 = arith.addi %587, %c1_i32_105 : i32
    %605 = arith.index_cast %604 : i32 to index
    %606 = memref.load %arg1[%605] : memref<64xi32, #tpu.memory_space<smem>>
    %607 = arith.index_cast %606 : i32 to index
    %c0_106 = arith.constant 0 : index
    %608 = vector.load %arg3[%607, %c0_106] : memref<520x128xf32, #tpu.memory_space<vmem>>, vector<2x128xf32>
    %609 = vector.extract_strided_slice %589 {offsets = [0, 2], sizes = [1, 1], strides = [1, 1]} : vector<1x8xf32> to vector<1x1xf32>
    %610 = vector.extract_strided_slice %608 {offsets = [0, 0], sizes = [1, 128], strides = [1, 1]} : vector<2x128xf32> to vector<1x128xf32>
    %611 = vector.broadcast %609 : vector<1x1xf32> to vector<1x128xf32>
    %612 = arith.mulf %611, %610 : vector<1x128xf32>
    %613 = vector.extract_strided_slice %589 {offsets = [0, 3], sizes = [1, 1], strides = [1, 1]} : vector<1x8xf32> to vector<1x1xf32>
    %614 = vector.extract_strided_slice %608 {offsets = [1, 0], sizes = [1, 128], strides = [1, 1]} : vector<2x128xf32> to vector<1x128xf32>
    %615 = vector.broadcast %613 : vector<1x1xf32> to vector<1x128xf32>
    %616 = arith.mulf %615, %614 : vector<1x128xf32>
    %617 = arith.addf %612, %616 : vector<1x128xf32>
    %618 = arith.addf %603, %617 : vector<1x128xf32>
    %c2_i32_107 = arith.constant 2 : i32
    %619 = arith.addi %587, %c2_i32_107 : i32
    %620 = arith.index_cast %619 : i32 to index
    %621 = memref.load %arg1[%620] : memref<64xi32, #tpu.memory_space<smem>>
    %622 = arith.index_cast %621 : i32 to index
    %c0_108 = arith.constant 0 : index
    %623 = vector.load %arg3[%622, %c0_108] : memref<520x128xf32, #tpu.memory_space<vmem>>, vector<2x128xf32>
    %624 = vector.extract_strided_slice %589 {offsets = [0, 4], sizes = [1, 1], strides = [1, 1]} : vector<1x8xf32> to vector<1x1xf32>
    %625 = vector.extract_strided_slice %623 {offsets = [0, 0], sizes = [1, 128], strides = [1, 1]} : vector<2x128xf32> to vector<1x128xf32>
    %626 = vector.broadcast %624 : vector<1x1xf32> to vector<1x128xf32>
    %627 = arith.mulf %626, %625 : vector<1x128xf32>
    %628 = vector.extract_strided_slice %589 {offsets = [0, 5], sizes = [1, 1], strides = [1, 1]} : vector<1x8xf32> to vector<1x1xf32>
    %629 = vector.extract_strided_slice %623 {offsets = [1, 0], sizes = [1, 128], strides = [1, 1]} : vector<2x128xf32> to vector<1x128xf32>
    %630 = vector.broadcast %628 : vector<1x1xf32> to vector<1x128xf32>
    %631 = arith.mulf %630, %629 : vector<1x128xf32>
    %632 = arith.addf %627, %631 : vector<1x128xf32>
    %633 = arith.addf %618, %632 : vector<1x128xf32>
    %c3_i32_109 = arith.constant 3 : i32
    %634 = arith.addi %587, %c3_i32_109 : i32
    %635 = arith.index_cast %634 : i32 to index
    %636 = memref.load %arg1[%635] : memref<64xi32, #tpu.memory_space<smem>>
    %637 = arith.index_cast %636 : i32 to index
    %c0_110 = arith.constant 0 : index
    %638 = vector.load %arg3[%637, %c0_110] : memref<520x128xf32, #tpu.memory_space<vmem>>, vector<2x128xf32>
    %639 = vector.extract_strided_slice %589 {offsets = [0, 6], sizes = [1, 1], strides = [1, 1]} : vector<1x8xf32> to vector<1x1xf32>
    %640 = vector.extract_strided_slice %638 {offsets = [0, 0], sizes = [1, 128], strides = [1, 1]} : vector<2x128xf32> to vector<1x128xf32>
    %641 = vector.broadcast %639 : vector<1x1xf32> to vector<1x128xf32>
    %642 = arith.mulf %641, %640 : vector<1x128xf32>
    %643 = vector.extract_strided_slice %589 {offsets = [0, 7], sizes = [1, 1], strides = [1, 1]} : vector<1x8xf32> to vector<1x1xf32>
    %644 = vector.extract_strided_slice %638 {offsets = [1, 0], sizes = [1, 128], strides = [1, 1]} : vector<2x128xf32> to vector<1x128xf32>
    %645 = vector.broadcast %643 : vector<1x1xf32> to vector<1x128xf32>
    %646 = arith.mulf %645, %644 : vector<1x128xf32>
    %647 = arith.addf %642, %646 : vector<1x128xf32>
    %648 = arith.addf %633, %647 : vector<1x128xf32>
    %649 = vector.broadcast %648 : vector<1x128xf32> to vector<8x128xf32>
    %650 = arith.mulf %649, %5 : vector<8x128xf32>
    %651 = arith.addf %583, %650 : vector<8x128xf32>
    %c8_i32_111 = arith.constant 8 : i32
    %652 = arith.muli %c1_i32_97, %c8_i32_111 : i32
    %c1_i32_112 = arith.constant 1 : i32
    %653 = arith.addi %652, %c1_i32_112 : i32
    %c4_i32_113 = arith.constant 4 : i32
    %654 = arith.muli %653, %c4_i32_113 : i32
    %655 = arith.addi %0, %654 : i32
    %656 = arith.index_cast %653 : i32 to index
    %c0_114 = arith.constant 0 : index
    %657 = vector.load %arg2[%656, %c0_114] : memref<16x8xf32, #tpu.memory_space<vmem>>, vector<1x8xf32>
    %c0_i32_115 = arith.constant 0 : i32
    %658 = arith.addi %655, %c0_i32_115 : i32
    %659 = arith.index_cast %658 : i32 to index
    %660 = memref.load %arg1[%659] : memref<64xi32, #tpu.memory_space<smem>>
    %661 = arith.index_cast %660 : i32 to index
    %c0_116 = arith.constant 0 : index
    %662 = vector.load %arg3[%661, %c0_116] : memref<520x128xf32, #tpu.memory_space<vmem>>, vector<2x128xf32>
    %663 = vector.extract_strided_slice %657 {offsets = [0, 0], sizes = [1, 1], strides = [1, 1]} : vector<1x8xf32> to vector<1x1xf32>
    %664 = vector.extract_strided_slice %662 {offsets = [0, 0], sizes = [1, 128], strides = [1, 1]} : vector<2x128xf32> to vector<1x128xf32>
    %665 = vector.broadcast %663 : vector<1x1xf32> to vector<1x128xf32>
    %666 = arith.mulf %665, %664 : vector<1x128xf32>
    %667 = vector.extract_strided_slice %657 {offsets = [0, 1], sizes = [1, 1], strides = [1, 1]} : vector<1x8xf32> to vector<1x1xf32>
    %668 = vector.extract_strided_slice %662 {offsets = [1, 0], sizes = [1, 128], strides = [1, 1]} : vector<2x128xf32> to vector<1x128xf32>
    %669 = vector.broadcast %667 : vector<1x1xf32> to vector<1x128xf32>
    %670 = arith.mulf %669, %668 : vector<1x128xf32>
    %671 = arith.addf %666, %670 : vector<1x128xf32>
    %c1_i32_117 = arith.constant 1 : i32
    %672 = arith.addi %655, %c1_i32_117 : i32
    %673 = arith.index_cast %672 : i32 to index
    %674 = memref.load %arg1[%673] : memref<64xi32, #tpu.memory_space<smem>>
    %675 = arith.index_cast %674 : i32 to index
    %c0_118 = arith.constant 0 : index
    %676 = vector.load %arg3[%675, %c0_118] : memref<520x128xf32, #tpu.memory_space<vmem>>, vector<2x128xf32>
    %677 = vector.extract_strided_slice %657 {offsets = [0, 2], sizes = [1, 1], strides = [1, 1]} : vector<1x8xf32> to vector<1x1xf32>
    %678 = vector.extract_strided_slice %676 {offsets = [0, 0], sizes = [1, 128], strides = [1, 1]} : vector<2x128xf32> to vector<1x128xf32>
    %679 = vector.broadcast %677 : vector<1x1xf32> to vector<1x128xf32>
    %680 = arith.mulf %679, %678 : vector<1x128xf32>
    %681 = vector.extract_strided_slice %657 {offsets = [0, 3], sizes = [1, 1], strides = [1, 1]} : vector<1x8xf32> to vector<1x1xf32>
    %682 = vector.extract_strided_slice %676 {offsets = [1, 0], sizes = [1, 128], strides = [1, 1]} : vector<2x128xf32> to vector<1x128xf32>
    %683 = vector.broadcast %681 : vector<1x1xf32> to vector<1x128xf32>
    %684 = arith.mulf %683, %682 : vector<1x128xf32>
    %685 = arith.addf %680, %684 : vector<1x128xf32>
    %686 = arith.addf %671, %685 : vector<1x128xf32>
    %c2_i32_119 = arith.constant 2 : i32
    %687 = arith.addi %655, %c2_i32_119 : i32
    %688 = arith.index_cast %687 : i32 to index
    %689 = memref.load %arg1[%688] : memref<64xi32, #tpu.memory_space<smem>>
    %690 = arith.index_cast %689 : i32 to index
    %c0_120 = arith.constant 0 : index
    %691 = vector.load %arg3[%690, %c0_120] : memref<520x128xf32, #tpu.memory_space<vmem>>, vector<2x128xf32>
    %692 = vector.extract_strided_slice %657 {offsets = [0, 4], sizes = [1, 1], strides = [1, 1]} : vector<1x8xf32> to vector<1x1xf32>
    %693 = vector.extract_strided_slice %691 {offsets = [0, 0], sizes = [1, 128], strides = [1, 1]} : vector<2x128xf32> to vector<1x128xf32>
    %694 = vector.broadcast %692 : vector<1x1xf32> to vector<1x128xf32>
    %695 = arith.mulf %694, %693 : vector<1x128xf32>
    %696 = vector.extract_strided_slice %657 {offsets = [0, 5], sizes = [1, 1], strides = [1, 1]} : vector<1x8xf32> to vector<1x1xf32>
    %697 = vector.extract_strided_slice %691 {offsets = [1, 0], sizes = [1, 128], strides = [1, 1]} : vector<2x128xf32> to vector<1x128xf32>
    %698 = vector.broadcast %696 : vector<1x1xf32> to vector<1x128xf32>
    %699 = arith.mulf %698, %697 : vector<1x128xf32>
    %700 = arith.addf %695, %699 : vector<1x128xf32>
    %701 = arith.addf %686, %700 : vector<1x128xf32>
    %c3_i32_121 = arith.constant 3 : i32
    %702 = arith.addi %655, %c3_i32_121 : i32
    %703 = arith.index_cast %702 : i32 to index
    %704 = memref.load %arg1[%703] : memref<64xi32, #tpu.memory_space<smem>>
    %705 = arith.index_cast %704 : i32 to index
    %c0_122 = arith.constant 0 : index
    %706 = vector.load %arg3[%705, %c0_122] : memref<520x128xf32, #tpu.memory_space<vmem>>, vector<2x128xf32>
    %707 = vector.extract_strided_slice %657 {offsets = [0, 6], sizes = [1, 1], strides = [1, 1]} : vector<1x8xf32> to vector<1x1xf32>
    %708 = vector.extract_strided_slice %706 {offsets = [0, 0], sizes = [1, 128], strides = [1, 1]} : vector<2x128xf32> to vector<1x128xf32>
    %709 = vector.broadcast %707 : vector<1x1xf32> to vector<1x128xf32>
    %710 = arith.mulf %709, %708 : vector<1x128xf32>
    %711 = vector.extract_strided_slice %657 {offsets = [0, 7], sizes = [1, 1], strides = [1, 1]} : vector<1x8xf32> to vector<1x1xf32>
    %712 = vector.extract_strided_slice %706 {offsets = [1, 0], sizes = [1, 128], strides = [1, 1]} : vector<2x128xf32> to vector<1x128xf32>
    %713 = vector.broadcast %711 : vector<1x1xf32> to vector<1x128xf32>
    %714 = arith.mulf %713, %712 : vector<1x128xf32>
    %715 = arith.addf %710, %714 : vector<1x128xf32>
    %716 = arith.addf %701, %715 : vector<1x128xf32>
    %717 = vector.broadcast %716 : vector<1x128xf32> to vector<8x128xf32>
    %718 = arith.mulf %717, %9 : vector<8x128xf32>
    %719 = arith.addf %651, %718 : vector<8x128xf32>
    %c8_i32_123 = arith.constant 8 : i32
    %720 = arith.muli %c1_i32_97, %c8_i32_123 : i32
    %c2_i32_124 = arith.constant 2 : i32
    %721 = arith.addi %720, %c2_i32_124 : i32
    %c4_i32_125 = arith.constant 4 : i32
    %722 = arith.muli %721, %c4_i32_125 : i32
    %723 = arith.addi %0, %722 : i32
    %724 = arith.index_cast %721 : i32 to index
    %c0_126 = arith.constant 0 : index
    %725 = vector.load %arg2[%724, %c0_126] : memref<16x8xf32, #tpu.memory_space<vmem>>, vector<1x8xf32>
    %c0_i32_127 = arith.constant 0 : i32
    %726 = arith.addi %723, %c0_i32_127 : i32
    %727 = arith.index_cast %726 : i32 to index
    %728 = memref.load %arg1[%727] : memref<64xi32, #tpu.memory_space<smem>>
    %729 = arith.index_cast %728 : i32 to index
    %c0_128 = arith.constant 0 : index
    %730 = vector.load %arg3[%729, %c0_128] : memref<520x128xf32, #tpu.memory_space<vmem>>, vector<2x128xf32>
    %731 = vector.extract_strided_slice %725 {offsets = [0, 0], sizes = [1, 1], strides = [1, 1]} : vector<1x8xf32> to vector<1x1xf32>
    %732 = vector.extract_strided_slice %730 {offsets = [0, 0], sizes = [1, 128], strides = [1, 1]} : vector<2x128xf32> to vector<1x128xf32>
    %733 = vector.broadcast %731 : vector<1x1xf32> to vector<1x128xf32>
    %734 = arith.mulf %733, %732 : vector<1x128xf32>
    %735 = vector.extract_strided_slice %725 {offsets = [0, 1], sizes = [1, 1], strides = [1, 1]} : vector<1x8xf32> to vector<1x1xf32>
    %736 = vector.extract_strided_slice %730 {offsets = [1, 0], sizes = [1, 128], strides = [1, 1]} : vector<2x128xf32> to vector<1x128xf32>
    %737 = vector.broadcast %735 : vector<1x1xf32> to vector<1x128xf32>
    %738 = arith.mulf %737, %736 : vector<1x128xf32>
    %739 = arith.addf %734, %738 : vector<1x128xf32>
    %c1_i32_129 = arith.constant 1 : i32
    %740 = arith.addi %723, %c1_i32_129 : i32
    %741 = arith.index_cast %740 : i32 to index
    %742 = memref.load %arg1[%741] : memref<64xi32, #tpu.memory_space<smem>>
    %743 = arith.index_cast %742 : i32 to index
    %c0_130 = arith.constant 0 : index
    %744 = vector.load %arg3[%743, %c0_130] : memref<520x128xf32, #tpu.memory_space<vmem>>, vector<2x128xf32>
    %745 = vector.extract_strided_slice %725 {offsets = [0, 2], sizes = [1, 1], strides = [1, 1]} : vector<1x8xf32> to vector<1x1xf32>
    %746 = vector.extract_strided_slice %744 {offsets = [0, 0], sizes = [1, 128], strides = [1, 1]} : vector<2x128xf32> to vector<1x128xf32>
    %747 = vector.broadcast %745 : vector<1x1xf32> to vector<1x128xf32>
    %748 = arith.mulf %747, %746 : vector<1x128xf32>
    %749 = vector.extract_strided_slice %725 {offsets = [0, 3], sizes = [1, 1], strides = [1, 1]} : vector<1x8xf32> to vector<1x1xf32>
    %750 = vector.extract_strided_slice %744 {offsets = [1, 0], sizes = [1, 128], strides = [1, 1]} : vector<2x128xf32> to vector<1x128xf32>
    %751 = vector.broadcast %749 : vector<1x1xf32> to vector<1x128xf32>
    %752 = arith.mulf %751, %750 : vector<1x128xf32>
    %753 = arith.addf %748, %752 : vector<1x128xf32>
    %754 = arith.addf %739, %753 : vector<1x128xf32>
    %c2_i32_131 = arith.constant 2 : i32
    %755 = arith.addi %723, %c2_i32_131 : i32
    %756 = arith.index_cast %755 : i32 to index
    %757 = memref.load %arg1[%756] : memref<64xi32, #tpu.memory_space<smem>>
    %758 = arith.index_cast %757 : i32 to index
    %c0_132 = arith.constant 0 : index
    %759 = vector.load %arg3[%758, %c0_132] : memref<520x128xf32, #tpu.memory_space<vmem>>, vector<2x128xf32>
    %760 = vector.extract_strided_slice %725 {offsets = [0, 4], sizes = [1, 1], strides = [1, 1]} : vector<1x8xf32> to vector<1x1xf32>
    %761 = vector.extract_strided_slice %759 {offsets = [0, 0], sizes = [1, 128], strides = [1, 1]} : vector<2x128xf32> to vector<1x128xf32>
    %762 = vector.broadcast %760 : vector<1x1xf32> to vector<1x128xf32>
    %763 = arith.mulf %762, %761 : vector<1x128xf32>
    %764 = vector.extract_strided_slice %725 {offsets = [0, 5], sizes = [1, 1], strides = [1, 1]} : vector<1x8xf32> to vector<1x1xf32>
    %765 = vector.extract_strided_slice %759 {offsets = [1, 0], sizes = [1, 128], strides = [1, 1]} : vector<2x128xf32> to vector<1x128xf32>
    %766 = vector.broadcast %764 : vector<1x1xf32> to vector<1x128xf32>
    %767 = arith.mulf %766, %765 : vector<1x128xf32>
    %768 = arith.addf %763, %767 : vector<1x128xf32>
    %769 = arith.addf %754, %768 : vector<1x128xf32>
    %c3_i32_133 = arith.constant 3 : i32
    %770 = arith.addi %723, %c3_i32_133 : i32
    %771 = arith.index_cast %770 : i32 to index
    %772 = memref.load %arg1[%771] : memref<64xi32, #tpu.memory_space<smem>>
    %773 = arith.index_cast %772 : i32 to index
    %c0_134 = arith.constant 0 : index
    %774 = vector.load %arg3[%773, %c0_134] : memref<520x128xf32, #tpu.memory_space<vmem>>, vector<2x128xf32>
    %775 = vector.extract_strided_slice %725 {offsets = [0, 6], sizes = [1, 1], strides = [1, 1]} : vector<1x8xf32> to vector<1x1xf32>
    %776 = vector.extract_strided_slice %774 {offsets = [0, 0], sizes = [1, 128], strides = [1, 1]} : vector<2x128xf32> to vector<1x128xf32>
    %777 = vector.broadcast %775 : vector<1x1xf32> to vector<1x128xf32>
    %778 = arith.mulf %777, %776 : vector<1x128xf32>
    %779 = vector.extract_strided_slice %725 {offsets = [0, 7], sizes = [1, 1], strides = [1, 1]} : vector<1x8xf32> to vector<1x1xf32>
    %780 = vector.extract_strided_slice %774 {offsets = [1, 0], sizes = [1, 128], strides = [1, 1]} : vector<2x128xf32> to vector<1x128xf32>
    %781 = vector.broadcast %779 : vector<1x1xf32> to vector<1x128xf32>
    %782 = arith.mulf %781, %780 : vector<1x128xf32>
    %783 = arith.addf %778, %782 : vector<1x128xf32>
    %784 = arith.addf %769, %783 : vector<1x128xf32>
    %785 = vector.broadcast %784 : vector<1x128xf32> to vector<8x128xf32>
    %786 = arith.mulf %785, %13 : vector<8x128xf32>
    %787 = arith.addf %719, %786 : vector<8x128xf32>
    %c8_i32_135 = arith.constant 8 : i32
    %788 = arith.muli %c1_i32_97, %c8_i32_135 : i32
    %c3_i32_136 = arith.constant 3 : i32
    %789 = arith.addi %788, %c3_i32_136 : i32
    %c4_i32_137 = arith.constant 4 : i32
    %790 = arith.muli %789, %c4_i32_137 : i32
    %791 = arith.addi %0, %790 : i32
    %792 = arith.index_cast %789 : i32 to index
    %c0_138 = arith.constant 0 : index
    %793 = vector.load %arg2[%792, %c0_138] : memref<16x8xf32, #tpu.memory_space<vmem>>, vector<1x8xf32>
    %c0_i32_139 = arith.constant 0 : i32
    %794 = arith.addi %791, %c0_i32_139 : i32
    %795 = arith.index_cast %794 : i32 to index
    %796 = memref.load %arg1[%795] : memref<64xi32, #tpu.memory_space<smem>>
    %797 = arith.index_cast %796 : i32 to index
    %c0_140 = arith.constant 0 : index
    %798 = vector.load %arg3[%797, %c0_140] : memref<520x128xf32, #tpu.memory_space<vmem>>, vector<2x128xf32>
    %799 = vector.extract_strided_slice %793 {offsets = [0, 0], sizes = [1, 1], strides = [1, 1]} : vector<1x8xf32> to vector<1x1xf32>
    %800 = vector.extract_strided_slice %798 {offsets = [0, 0], sizes = [1, 128], strides = [1, 1]} : vector<2x128xf32> to vector<1x128xf32>
    %801 = vector.broadcast %799 : vector<1x1xf32> to vector<1x128xf32>
    %802 = arith.mulf %801, %800 : vector<1x128xf32>
    %803 = vector.extract_strided_slice %793 {offsets = [0, 1], sizes = [1, 1], strides = [1, 1]} : vector<1x8xf32> to vector<1x1xf32>
    %804 = vector.extract_strided_slice %798 {offsets = [1, 0], sizes = [1, 128], strides = [1, 1]} : vector<2x128xf32> to vector<1x128xf32>
    %805 = vector.broadcast %803 : vector<1x1xf32> to vector<1x128xf32>
    %806 = arith.mulf %805, %804 : vector<1x128xf32>
    %807 = arith.addf %802, %806 : vector<1x128xf32>
    %c1_i32_141 = arith.constant 1 : i32
    %808 = arith.addi %791, %c1_i32_141 : i32
    %809 = arith.index_cast %808 : i32 to index
    %810 = memref.load %arg1[%809] : memref<64xi32, #tpu.memory_space<smem>>
    %811 = arith.index_cast %810 : i32 to index
    %c0_142 = arith.constant 0 : index
    %812 = vector.load %arg3[%811, %c0_142] : memref<520x128xf32, #tpu.memory_space<vmem>>, vector<2x128xf32>
    %813 = vector.extract_strided_slice %793 {offsets = [0, 2], sizes = [1, 1], strides = [1, 1]} : vector<1x8xf32> to vector<1x1xf32>
    %814 = vector.extract_strided_slice %812 {offsets = [0, 0], sizes = [1, 128], strides = [1, 1]} : vector<2x128xf32> to vector<1x128xf32>
    %815 = vector.broadcast %813 : vector<1x1xf32> to vector<1x128xf32>
    %816 = arith.mulf %815, %814 : vector<1x128xf32>
    %817 = vector.extract_strided_slice %793 {offsets = [0, 3], sizes = [1, 1], strides = [1, 1]} : vector<1x8xf32> to vector<1x1xf32>
    %818 = vector.extract_strided_slice %812 {offsets = [1, 0], sizes = [1, 128], strides = [1, 1]} : vector<2x128xf32> to vector<1x128xf32>
    %819 = vector.broadcast %817 : vector<1x1xf32> to vector<1x128xf32>
    %820 = arith.mulf %819, %818 : vector<1x128xf32>
    %821 = arith.addf %816, %820 : vector<1x128xf32>
    %822 = arith.addf %807, %821 : vector<1x128xf32>
    %c2_i32_143 = arith.constant 2 : i32
    %823 = arith.addi %791, %c2_i32_143 : i32
    %824 = arith.index_cast %823 : i32 to index
    %825 = memref.load %arg1[%824] : memref<64xi32, #tpu.memory_space<smem>>
    %826 = arith.index_cast %825 : i32 to index
    %c0_144 = arith.constant 0 : index
    %827 = vector.load %arg3[%826, %c0_144] : memref<520x128xf32, #tpu.memory_space<vmem>>, vector<2x128xf32>
    %828 = vector.extract_strided_slice %793 {offsets = [0, 4], sizes = [1, 1], strides = [1, 1]} : vector<1x8xf32> to vector<1x1xf32>
    %829 = vector.extract_strided_slice %827 {offsets = [0, 0], sizes = [1, 128], strides = [1, 1]} : vector<2x128xf32> to vector<1x128xf32>
    %830 = vector.broadcast %828 : vector<1x1xf32> to vector<1x128xf32>
    %831 = arith.mulf %830, %829 : vector<1x128xf32>
    %832 = vector.extract_strided_slice %793 {offsets = [0, 5], sizes = [1, 1], strides = [1, 1]} : vector<1x8xf32> to vector<1x1xf32>
    %833 = vector.extract_strided_slice %827 {offsets = [1, 0], sizes = [1, 128], strides = [1, 1]} : vector<2x128xf32> to vector<1x128xf32>
    %834 = vector.broadcast %832 : vector<1x1xf32> to vector<1x128xf32>
    %835 = arith.mulf %834, %833 : vector<1x128xf32>
    %836 = arith.addf %831, %835 : vector<1x128xf32>
    %837 = arith.addf %822, %836 : vector<1x128xf32>
    %c3_i32_145 = arith.constant 3 : i32
    %838 = arith.addi %791, %c3_i32_145 : i32
    %839 = arith.index_cast %838 : i32 to index
    %840 = memref.load %arg1[%839] : memref<64xi32, #tpu.memory_space<smem>>
    %841 = arith.index_cast %840 : i32 to index
    %c0_146 = arith.constant 0 : index
    %842 = vector.load %arg3[%841, %c0_146] : memref<520x128xf32, #tpu.memory_space<vmem>>, vector<2x128xf32>
    %843 = vector.extract_strided_slice %793 {offsets = [0, 6], sizes = [1, 1], strides = [1, 1]} : vector<1x8xf32> to vector<1x1xf32>
    %844 = vector.extract_strided_slice %842 {offsets = [0, 0], sizes = [1, 128], strides = [1, 1]} : vector<2x128xf32> to vector<1x128xf32>
    %845 = vector.broadcast %843 : vector<1x1xf32> to vector<1x128xf32>
    %846 = arith.mulf %845, %844 : vector<1x128xf32>
    %847 = vector.extract_strided_slice %793 {offsets = [0, 7], sizes = [1, 1], strides = [1, 1]} : vector<1x8xf32> to vector<1x1xf32>
    %848 = vector.extract_strided_slice %842 {offsets = [1, 0], sizes = [1, 128], strides = [1, 1]} : vector<2x128xf32> to vector<1x128xf32>
    %849 = vector.broadcast %847 : vector<1x1xf32> to vector<1x128xf32>
    %850 = arith.mulf %849, %848 : vector<1x128xf32>
    %851 = arith.addf %846, %850 : vector<1x128xf32>
    %852 = arith.addf %837, %851 : vector<1x128xf32>
    %853 = vector.broadcast %852 : vector<1x128xf32> to vector<8x128xf32>
    %854 = arith.mulf %853, %17 : vector<8x128xf32>
    %855 = arith.addf %787, %854 : vector<8x128xf32>
    %c8_i32_147 = arith.constant 8 : i32
    %856 = arith.muli %c1_i32_97, %c8_i32_147 : i32
    %c4_i32_148 = arith.constant 4 : i32
    %857 = arith.addi %856, %c4_i32_148 : i32
    %c4_i32_149 = arith.constant 4 : i32
    %858 = arith.muli %857, %c4_i32_149 : i32
    %859 = arith.addi %0, %858 : i32
    %860 = arith.index_cast %857 : i32 to index
    %c0_150 = arith.constant 0 : index
    %861 = vector.load %arg2[%860, %c0_150] : memref<16x8xf32, #tpu.memory_space<vmem>>, vector<1x8xf32>
    %c0_i32_151 = arith.constant 0 : i32
    %862 = arith.addi %859, %c0_i32_151 : i32
    %863 = arith.index_cast %862 : i32 to index
    %864 = memref.load %arg1[%863] : memref<64xi32, #tpu.memory_space<smem>>
    %865 = arith.index_cast %864 : i32 to index
    %c0_152 = arith.constant 0 : index
    %866 = vector.load %arg3[%865, %c0_152] : memref<520x128xf32, #tpu.memory_space<vmem>>, vector<2x128xf32>
    %867 = vector.extract_strided_slice %861 {offsets = [0, 0], sizes = [1, 1], strides = [1, 1]} : vector<1x8xf32> to vector<1x1xf32>
    %868 = vector.extract_strided_slice %866 {offsets = [0, 0], sizes = [1, 128], strides = [1, 1]} : vector<2x128xf32> to vector<1x128xf32>
    %869 = vector.broadcast %867 : vector<1x1xf32> to vector<1x128xf32>
    %870 = arith.mulf %869, %868 : vector<1x128xf32>
    %871 = vector.extract_strided_slice %861 {offsets = [0, 1], sizes = [1, 1], strides = [1, 1]} : vector<1x8xf32> to vector<1x1xf32>
    %872 = vector.extract_strided_slice %866 {offsets = [1, 0], sizes = [1, 128], strides = [1, 1]} : vector<2x128xf32> to vector<1x128xf32>
    %873 = vector.broadcast %871 : vector<1x1xf32> to vector<1x128xf32>
    %874 = arith.mulf %873, %872 : vector<1x128xf32>
    %875 = arith.addf %870, %874 : vector<1x128xf32>
    %c1_i32_153 = arith.constant 1 : i32
    %876 = arith.addi %859, %c1_i32_153 : i32
    %877 = arith.index_cast %876 : i32 to index
    %878 = memref.load %arg1[%877] : memref<64xi32, #tpu.memory_space<smem>>
    %879 = arith.index_cast %878 : i32 to index
    %c0_154 = arith.constant 0 : index
    %880 = vector.load %arg3[%879, %c0_154] : memref<520x128xf32, #tpu.memory_space<vmem>>, vector<2x128xf32>
    %881 = vector.extract_strided_slice %861 {offsets = [0, 2], sizes = [1, 1], strides = [1, 1]} : vector<1x8xf32> to vector<1x1xf32>
    %882 = vector.extract_strided_slice %880 {offsets = [0, 0], sizes = [1, 128], strides = [1, 1]} : vector<2x128xf32> to vector<1x128xf32>
    %883 = vector.broadcast %881 : vector<1x1xf32> to vector<1x128xf32>
    %884 = arith.mulf %883, %882 : vector<1x128xf32>
    %885 = vector.extract_strided_slice %861 {offsets = [0, 3], sizes = [1, 1], strides = [1, 1]} : vector<1x8xf32> to vector<1x1xf32>
    %886 = vector.extract_strided_slice %880 {offsets = [1, 0], sizes = [1, 128], strides = [1, 1]} : vector<2x128xf32> to vector<1x128xf32>
    %887 = vector.broadcast %885 : vector<1x1xf32> to vector<1x128xf32>
    %888 = arith.mulf %887, %886 : vector<1x128xf32>
    %889 = arith.addf %884, %888 : vector<1x128xf32>
    %890 = arith.addf %875, %889 : vector<1x128xf32>
    %c2_i32_155 = arith.constant 2 : i32
    %891 = arith.addi %859, %c2_i32_155 : i32
    %892 = arith.index_cast %891 : i32 to index
    %893 = memref.load %arg1[%892] : memref<64xi32, #tpu.memory_space<smem>>
    %894 = arith.index_cast %893 : i32 to index
    %c0_156 = arith.constant 0 : index
    %895 = vector.load %arg3[%894, %c0_156] : memref<520x128xf32, #tpu.memory_space<vmem>>, vector<2x128xf32>
    %896 = vector.extract_strided_slice %861 {offsets = [0, 4], sizes = [1, 1], strides = [1, 1]} : vector<1x8xf32> to vector<1x1xf32>
    %897 = vector.extract_strided_slice %895 {offsets = [0, 0], sizes = [1, 128], strides = [1, 1]} : vector<2x128xf32> to vector<1x128xf32>
    %898 = vector.broadcast %896 : vector<1x1xf32> to vector<1x128xf32>
    %899 = arith.mulf %898, %897 : vector<1x128xf32>
    %900 = vector.extract_strided_slice %861 {offsets = [0, 5], sizes = [1, 1], strides = [1, 1]} : vector<1x8xf32> to vector<1x1xf32>
    %901 = vector.extract_strided_slice %895 {offsets = [1, 0], sizes = [1, 128], strides = [1, 1]} : vector<2x128xf32> to vector<1x128xf32>
    %902 = vector.broadcast %900 : vector<1x1xf32> to vector<1x128xf32>
    %903 = arith.mulf %902, %901 : vector<1x128xf32>
    %904 = arith.addf %899, %903 : vector<1x128xf32>
    %905 = arith.addf %890, %904 : vector<1x128xf32>
    %c3_i32_157 = arith.constant 3 : i32
    %906 = arith.addi %859, %c3_i32_157 : i32
    %907 = arith.index_cast %906 : i32 to index
    %908 = memref.load %arg1[%907] : memref<64xi32, #tpu.memory_space<smem>>
    %909 = arith.index_cast %908 : i32 to index
    %c0_158 = arith.constant 0 : index
    %910 = vector.load %arg3[%909, %c0_158] : memref<520x128xf32, #tpu.memory_space<vmem>>, vector<2x128xf32>
    %911 = vector.extract_strided_slice %861 {offsets = [0, 6], sizes = [1, 1], strides = [1, 1]} : vector<1x8xf32> to vector<1x1xf32>
    %912 = vector.extract_strided_slice %910 {offsets = [0, 0], sizes = [1, 128], strides = [1, 1]} : vector<2x128xf32> to vector<1x128xf32>
    %913 = vector.broadcast %911 : vector<1x1xf32> to vector<1x128xf32>
    %914 = arith.mulf %913, %912 : vector<1x128xf32>
    %915 = vector.extract_strided_slice %861 {offsets = [0, 7], sizes = [1, 1], strides = [1, 1]} : vector<1x8xf32> to vector<1x1xf32>
    %916 = vector.extract_strided_slice %910 {offsets = [1, 0], sizes = [1, 128], strides = [1, 1]} : vector<2x128xf32> to vector<1x128xf32>
    %917 = vector.broadcast %915 : vector<1x1xf32> to vector<1x128xf32>
    %918 = arith.mulf %917, %916 : vector<1x128xf32>
    %919 = arith.addf %914, %918 : vector<1x128xf32>
    %920 = arith.addf %905, %919 : vector<1x128xf32>
    %921 = vector.broadcast %920 : vector<1x128xf32> to vector<8x128xf32>
    %922 = arith.mulf %921, %21 : vector<8x128xf32>
    %923 = arith.addf %855, %922 : vector<8x128xf32>
    %c8_i32_159 = arith.constant 8 : i32
    %924 = arith.muli %c1_i32_97, %c8_i32_159 : i32
    %c5_i32_160 = arith.constant 5 : i32
    %925 = arith.addi %924, %c5_i32_160 : i32
    %c4_i32_161 = arith.constant 4 : i32
    %926 = arith.muli %925, %c4_i32_161 : i32
    %927 = arith.addi %0, %926 : i32
    %928 = arith.index_cast %925 : i32 to index
    %c0_162 = arith.constant 0 : index
    %929 = vector.load %arg2[%928, %c0_162] : memref<16x8xf32, #tpu.memory_space<vmem>>, vector<1x8xf32>
    %c0_i32_163 = arith.constant 0 : i32
    %930 = arith.addi %927, %c0_i32_163 : i32
    %931 = arith.index_cast %930 : i32 to index
    %932 = memref.load %arg1[%931] : memref<64xi32, #tpu.memory_space<smem>>
    %933 = arith.index_cast %932 : i32 to index
    %c0_164 = arith.constant 0 : index
    %934 = vector.load %arg3[%933, %c0_164] : memref<520x128xf32, #tpu.memory_space<vmem>>, vector<2x128xf32>
    %935 = vector.extract_strided_slice %929 {offsets = [0, 0], sizes = [1, 1], strides = [1, 1]} : vector<1x8xf32> to vector<1x1xf32>
    %936 = vector.extract_strided_slice %934 {offsets = [0, 0], sizes = [1, 128], strides = [1, 1]} : vector<2x128xf32> to vector<1x128xf32>
    %937 = vector.broadcast %935 : vector<1x1xf32> to vector<1x128xf32>
    %938 = arith.mulf %937, %936 : vector<1x128xf32>
    %939 = vector.extract_strided_slice %929 {offsets = [0, 1], sizes = [1, 1], strides = [1, 1]} : vector<1x8xf32> to vector<1x1xf32>
    %940 = vector.extract_strided_slice %934 {offsets = [1, 0], sizes = [1, 128], strides = [1, 1]} : vector<2x128xf32> to vector<1x128xf32>
    %941 = vector.broadcast %939 : vector<1x1xf32> to vector<1x128xf32>
    %942 = arith.mulf %941, %940 : vector<1x128xf32>
    %943 = arith.addf %938, %942 : vector<1x128xf32>
    %c1_i32_165 = arith.constant 1 : i32
    %944 = arith.addi %927, %c1_i32_165 : i32
    %945 = arith.index_cast %944 : i32 to index
    %946 = memref.load %arg1[%945] : memref<64xi32, #tpu.memory_space<smem>>
    %947 = arith.index_cast %946 : i32 to index
    %c0_166 = arith.constant 0 : index
    %948 = vector.load %arg3[%947, %c0_166] : memref<520x128xf32, #tpu.memory_space<vmem>>, vector<2x128xf32>
    %949 = vector.extract_strided_slice %929 {offsets = [0, 2], sizes = [1, 1], strides = [1, 1]} : vector<1x8xf32> to vector<1x1xf32>
    %950 = vector.extract_strided_slice %948 {offsets = [0, 0], sizes = [1, 128], strides = [1, 1]} : vector<2x128xf32> to vector<1x128xf32>
    %951 = vector.broadcast %949 : vector<1x1xf32> to vector<1x128xf32>
    %952 = arith.mulf %951, %950 : vector<1x128xf32>
    %953 = vector.extract_strided_slice %929 {offsets = [0, 3], sizes = [1, 1], strides = [1, 1]} : vector<1x8xf32> to vector<1x1xf32>
    %954 = vector.extract_strided_slice %948 {offsets = [1, 0], sizes = [1, 128], strides = [1, 1]} : vector<2x128xf32> to vector<1x128xf32>
    %955 = vector.broadcast %953 : vector<1x1xf32> to vector<1x128xf32>
    %956 = arith.mulf %955, %954 : vector<1x128xf32>
    %957 = arith.addf %952, %956 : vector<1x128xf32>
    %958 = arith.addf %943, %957 : vector<1x128xf32>
    %c2_i32_167 = arith.constant 2 : i32
    %959 = arith.addi %927, %c2_i32_167 : i32
    %960 = arith.index_cast %959 : i32 to index
    %961 = memref.load %arg1[%960] : memref<64xi32, #tpu.memory_space<smem>>
    %962 = arith.index_cast %961 : i32 to index
    %c0_168 = arith.constant 0 : index
    %963 = vector.load %arg3[%962, %c0_168] : memref<520x128xf32, #tpu.memory_space<vmem>>, vector<2x128xf32>
    %964 = vector.extract_strided_slice %929 {offsets = [0, 4], sizes = [1, 1], strides = [1, 1]} : vector<1x8xf32> to vector<1x1xf32>
    %965 = vector.extract_strided_slice %963 {offsets = [0, 0], sizes = [1, 128], strides = [1, 1]} : vector<2x128xf32> to vector<1x128xf32>
    %966 = vector.broadcast %964 : vector<1x1xf32> to vector<1x128xf32>
    %967 = arith.mulf %966, %965 : vector<1x128xf32>
    %968 = vector.extract_strided_slice %929 {offsets = [0, 5], sizes = [1, 1], strides = [1, 1]} : vector<1x8xf32> to vector<1x1xf32>
    %969 = vector.extract_strided_slice %963 {offsets = [1, 0], sizes = [1, 128], strides = [1, 1]} : vector<2x128xf32> to vector<1x128xf32>
    %970 = vector.broadcast %968 : vector<1x1xf32> to vector<1x128xf32>
    %971 = arith.mulf %970, %969 : vector<1x128xf32>
    %972 = arith.addf %967, %971 : vector<1x128xf32>
    %973 = arith.addf %958, %972 : vector<1x128xf32>
    %c3_i32_169 = arith.constant 3 : i32
    %974 = arith.addi %927, %c3_i32_169 : i32
    %975 = arith.index_cast %974 : i32 to index
    %976 = memref.load %arg1[%975] : memref<64xi32, #tpu.memory_space<smem>>
    %977 = arith.index_cast %976 : i32 to index
    %c0_170 = arith.constant 0 : index
    %978 = vector.load %arg3[%977, %c0_170] : memref<520x128xf32, #tpu.memory_space<vmem>>, vector<2x128xf32>
    %979 = vector.extract_strided_slice %929 {offsets = [0, 6], sizes = [1, 1], strides = [1, 1]} : vector<1x8xf32> to vector<1x1xf32>
    %980 = vector.extract_strided_slice %978 {offsets = [0, 0], sizes = [1, 128], strides = [1, 1]} : vector<2x128xf32> to vector<1x128xf32>
    %981 = vector.broadcast %979 : vector<1x1xf32> to vector<1x128xf32>
    %982 = arith.mulf %981, %980 : vector<1x128xf32>
    %983 = vector.extract_strided_slice %929 {offsets = [0, 7], sizes = [1, 1], strides = [1, 1]} : vector<1x8xf32> to vector<1x1xf32>
    %984 = vector.extract_strided_slice %978 {offsets = [1, 0], sizes = [1, 128], strides = [1, 1]} : vector<2x128xf32> to vector<1x128xf32>
    %985 = vector.broadcast %983 : vector<1x1xf32> to vector<1x128xf32>
    %986 = arith.mulf %985, %984 : vector<1x128xf32>
    %987 = arith.addf %982, %986 : vector<1x128xf32>
    %988 = arith.addf %973, %987 : vector<1x128xf32>
    %989 = vector.broadcast %988 : vector<1x128xf32> to vector<8x128xf32>
    %990 = arith.mulf %989, %25 : vector<8x128xf32>
    %991 = arith.addf %923, %990 : vector<8x128xf32>
    %c8_i32_171 = arith.constant 8 : i32
    %992 = arith.muli %c1_i32_97, %c8_i32_171 : i32
    %c6_i32_172 = arith.constant 6 : i32
    %993 = arith.addi %992, %c6_i32_172 : i32
    %c4_i32_173 = arith.constant 4 : i32
    %994 = arith.muli %993, %c4_i32_173 : i32
    %995 = arith.addi %0, %994 : i32
    %996 = arith.index_cast %993 : i32 to index
    %c0_174 = arith.constant 0 : index
    %997 = vector.load %arg2[%996, %c0_174] : memref<16x8xf32, #tpu.memory_space<vmem>>, vector<1x8xf32>
    %c0_i32_175 = arith.constant 0 : i32
    %998 = arith.addi %995, %c0_i32_175 : i32
    %999 = arith.index_cast %998 : i32 to index
    %1000 = memref.load %arg1[%999] : memref<64xi32, #tpu.memory_space<smem>>
    %1001 = arith.index_cast %1000 : i32 to index
    %c0_176 = arith.constant 0 : index
    %1002 = vector.load %arg3[%1001, %c0_176] : memref<520x128xf32, #tpu.memory_space<vmem>>, vector<2x128xf32>
    %1003 = vector.extract_strided_slice %997 {offsets = [0, 0], sizes = [1, 1], strides = [1, 1]} : vector<1x8xf32> to vector<1x1xf32>
    %1004 = vector.extract_strided_slice %1002 {offsets = [0, 0], sizes = [1, 128], strides = [1, 1]} : vector<2x128xf32> to vector<1x128xf32>
    %1005 = vector.broadcast %1003 : vector<1x1xf32> to vector<1x128xf32>
    %1006 = arith.mulf %1005, %1004 : vector<1x128xf32>
    %1007 = vector.extract_strided_slice %997 {offsets = [0, 1], sizes = [1, 1], strides = [1, 1]} : vector<1x8xf32> to vector<1x1xf32>
    %1008 = vector.extract_strided_slice %1002 {offsets = [1, 0], sizes = [1, 128], strides = [1, 1]} : vector<2x128xf32> to vector<1x128xf32>
    %1009 = vector.broadcast %1007 : vector<1x1xf32> to vector<1x128xf32>
    %1010 = arith.mulf %1009, %1008 : vector<1x128xf32>
    %1011 = arith.addf %1006, %1010 : vector<1x128xf32>
    %c1_i32_177 = arith.constant 1 : i32
    %1012 = arith.addi %995, %c1_i32_177 : i32
    %1013 = arith.index_cast %1012 : i32 to index
    %1014 = memref.load %arg1[%1013] : memref<64xi32, #tpu.memory_space<smem>>
    %1015 = arith.index_cast %1014 : i32 to index
    %c0_178 = arith.constant 0 : index
    %1016 = vector.load %arg3[%1015, %c0_178] : memref<520x128xf32, #tpu.memory_space<vmem>>, vector<2x128xf32>
    %1017 = vector.extract_strided_slice %997 {offsets = [0, 2], sizes = [1, 1], strides = [1, 1]} : vector<1x8xf32> to vector<1x1xf32>
    %1018 = vector.extract_strided_slice %1016 {offsets = [0, 0], sizes = [1, 128], strides = [1, 1]} : vector<2x128xf32> to vector<1x128xf32>
    %1019 = vector.broadcast %1017 : vector<1x1xf32> to vector<1x128xf32>
    %1020 = arith.mulf %1019, %1018 : vector<1x128xf32>
    %1021 = vector.extract_strided_slice %997 {offsets = [0, 3], sizes = [1, 1], strides = [1, 1]} : vector<1x8xf32> to vector<1x1xf32>
    %1022 = vector.extract_strided_slice %1016 {offsets = [1, 0], sizes = [1, 128], strides = [1, 1]} : vector<2x128xf32> to vector<1x128xf32>
    %1023 = vector.broadcast %1021 : vector<1x1xf32> to vector<1x128xf32>
    %1024 = arith.mulf %1023, %1022 : vector<1x128xf32>
    %1025 = arith.addf %1020, %1024 : vector<1x128xf32>
    %1026 = arith.addf %1011, %1025 : vector<1x128xf32>
    %c2_i32_179 = arith.constant 2 : i32
    %1027 = arith.addi %995, %c2_i32_179 : i32
    %1028 = arith.index_cast %1027 : i32 to index
    %1029 = memref.load %arg1[%1028] : memref<64xi32, #tpu.memory_space<smem>>
    %1030 = arith.index_cast %1029 : i32 to index
    %c0_180 = arith.constant 0 : index
    %1031 = vector.load %arg3[%1030, %c0_180] : memref<520x128xf32, #tpu.memory_space<vmem>>, vector<2x128xf32>
    %1032 = vector.extract_strided_slice %997 {offsets = [0, 4], sizes = [1, 1], strides = [1, 1]} : vector<1x8xf32> to vector<1x1xf32>
    %1033 = vector.extract_strided_slice %1031 {offsets = [0, 0], sizes = [1, 128], strides = [1, 1]} : vector<2x128xf32> to vector<1x128xf32>
    %1034 = vector.broadcast %1032 : vector<1x1xf32> to vector<1x128xf32>
    %1035 = arith.mulf %1034, %1033 : vector<1x128xf32>
    %1036 = vector.extract_strided_slice %997 {offsets = [0, 5], sizes = [1, 1], strides = [1, 1]} : vector<1x8xf32> to vector<1x1xf32>
    %1037 = vector.extract_strided_slice %1031 {offsets = [1, 0], sizes = [1, 128], strides = [1, 1]} : vector<2x128xf32> to vector<1x128xf32>
    %1038 = vector.broadcast %1036 : vector<1x1xf32> to vector<1x128xf32>
    %1039 = arith.mulf %1038, %1037 : vector<1x128xf32>
    %1040 = arith.addf %1035, %1039 : vector<1x128xf32>
    %1041 = arith.addf %1026, %1040 : vector<1x128xf32>
    %c3_i32_181 = arith.constant 3 : i32
    %1042 = arith.addi %995, %c3_i32_181 : i32
    %1043 = arith.index_cast %1042 : i32 to index
    %1044 = memref.load %arg1[%1043] : memref<64xi32, #tpu.memory_space<smem>>
    %1045 = arith.index_cast %1044 : i32 to index
    %c0_182 = arith.constant 0 : index
    %1046 = vector.load %arg3[%1045, %c0_182] : memref<520x128xf32, #tpu.memory_space<vmem>>, vector<2x128xf32>
    %1047 = vector.extract_strided_slice %997 {offsets = [0, 6], sizes = [1, 1], strides = [1, 1]} : vector<1x8xf32> to vector<1x1xf32>
    %1048 = vector.extract_strided_slice %1046 {offsets = [0, 0], sizes = [1, 128], strides = [1, 1]} : vector<2x128xf32> to vector<1x128xf32>
    %1049 = vector.broadcast %1047 : vector<1x1xf32> to vector<1x128xf32>
    %1050 = arith.mulf %1049, %1048 : vector<1x128xf32>
    %1051 = vector.extract_strided_slice %997 {offsets = [0, 7], sizes = [1, 1], strides = [1, 1]} : vector<1x8xf32> to vector<1x1xf32>
    %1052 = vector.extract_strided_slice %1046 {offsets = [1, 0], sizes = [1, 128], strides = [1, 1]} : vector<2x128xf32> to vector<1x128xf32>
    %1053 = vector.broadcast %1051 : vector<1x1xf32> to vector<1x128xf32>
    %1054 = arith.mulf %1053, %1052 : vector<1x128xf32>
    %1055 = arith.addf %1050, %1054 : vector<1x128xf32>
    %1056 = arith.addf %1041, %1055 : vector<1x128xf32>
    %1057 = vector.broadcast %1056 : vector<1x128xf32> to vector<8x128xf32>
    %1058 = arith.mulf %1057, %29 : vector<8x128xf32>
    %1059 = arith.addf %991, %1058 : vector<8x128xf32>
    %c8_i32_183 = arith.constant 8 : i32
    %1060 = arith.muli %c1_i32_97, %c8_i32_183 : i32
    %c7_i32_184 = arith.constant 7 : i32
    %1061 = arith.addi %1060, %c7_i32_184 : i32
    %c4_i32_185 = arith.constant 4 : i32
    %1062 = arith.muli %1061, %c4_i32_185 : i32
    %1063 = arith.addi %0, %1062 : i32
    %1064 = arith.index_cast %1061 : i32 to index
    %c0_186 = arith.constant 0 : index
    %1065 = vector.load %arg2[%1064, %c0_186] : memref<16x8xf32, #tpu.memory_space<vmem>>, vector<1x8xf32>
    %c0_i32_187 = arith.constant 0 : i32
    %1066 = arith.addi %1063, %c0_i32_187 : i32
    %1067 = arith.index_cast %1066 : i32 to index
    %1068 = memref.load %arg1[%1067] : memref<64xi32, #tpu.memory_space<smem>>
    %1069 = arith.index_cast %1068 : i32 to index
    %c0_188 = arith.constant 0 : index
    %1070 = vector.load %arg3[%1069, %c0_188] : memref<520x128xf32, #tpu.memory_space<vmem>>, vector<2x128xf32>
    %1071 = vector.extract_strided_slice %1065 {offsets = [0, 0], sizes = [1, 1], strides = [1, 1]} : vector<1x8xf32> to vector<1x1xf32>
    %1072 = vector.extract_strided_slice %1070 {offsets = [0, 0], sizes = [1, 128], strides = [1, 1]} : vector<2x128xf32> to vector<1x128xf32>
    %1073 = vector.broadcast %1071 : vector<1x1xf32> to vector<1x128xf32>
    %1074 = arith.mulf %1073, %1072 : vector<1x128xf32>
    %1075 = vector.extract_strided_slice %1065 {offsets = [0, 1], sizes = [1, 1], strides = [1, 1]} : vector<1x8xf32> to vector<1x1xf32>
    %1076 = vector.extract_strided_slice %1070 {offsets = [1, 0], sizes = [1, 128], strides = [1, 1]} : vector<2x128xf32> to vector<1x128xf32>
    %1077 = vector.broadcast %1075 : vector<1x1xf32> to vector<1x128xf32>
    %1078 = arith.mulf %1077, %1076 : vector<1x128xf32>
    %1079 = arith.addf %1074, %1078 : vector<1x128xf32>
    %c1_i32_189 = arith.constant 1 : i32
    %1080 = arith.addi %1063, %c1_i32_189 : i32
    %1081 = arith.index_cast %1080 : i32 to index
    %1082 = memref.load %arg1[%1081] : memref<64xi32, #tpu.memory_space<smem>>
    %1083 = arith.index_cast %1082 : i32 to index
    %c0_190 = arith.constant 0 : index
    %1084 = vector.load %arg3[%1083, %c0_190] : memref<520x128xf32, #tpu.memory_space<vmem>>, vector<2x128xf32>
    %1085 = vector.extract_strided_slice %1065 {offsets = [0, 2], sizes = [1, 1], strides = [1, 1]} : vector<1x8xf32> to vector<1x1xf32>
    %1086 = vector.extract_strided_slice %1084 {offsets = [0, 0], sizes = [1, 128], strides = [1, 1]} : vector<2x128xf32> to vector<1x128xf32>
    %1087 = vector.broadcast %1085 : vector<1x1xf32> to vector<1x128xf32>
    %1088 = arith.mulf %1087, %1086 : vector<1x128xf32>
    %1089 = vector.extract_strided_slice %1065 {offsets = [0, 3], sizes = [1, 1], strides = [1, 1]} : vector<1x8xf32> to vector<1x1xf32>
    %1090 = vector.extract_strided_slice %1084 {offsets = [1, 0], sizes = [1, 128], strides = [1, 1]} : vector<2x128xf32> to vector<1x128xf32>
    %1091 = vector.broadcast %1089 : vector<1x1xf32> to vector<1x128xf32>
    %1092 = arith.mulf %1091, %1090 : vector<1x128xf32>
    %1093 = arith.addf %1088, %1092 : vector<1x128xf32>
    %1094 = arith.addf %1079, %1093 : vector<1x128xf32>
    %c2_i32_191 = arith.constant 2 : i32
    %1095 = arith.addi %1063, %c2_i32_191 : i32
    %1096 = arith.index_cast %1095 : i32 to index
    %1097 = memref.load %arg1[%1096] : memref<64xi32, #tpu.memory_space<smem>>
    %1098 = arith.index_cast %1097 : i32 to index
    %c0_192 = arith.constant 0 : index
    %1099 = vector.load %arg3[%1098, %c0_192] : memref<520x128xf32, #tpu.memory_space<vmem>>, vector<2x128xf32>
    %1100 = vector.extract_strided_slice %1065 {offsets = [0, 4], sizes = [1, 1], strides = [1, 1]} : vector<1x8xf32> to vector<1x1xf32>
    %1101 = vector.extract_strided_slice %1099 {offsets = [0, 0], sizes = [1, 128], strides = [1, 1]} : vector<2x128xf32> to vector<1x128xf32>
    %1102 = vector.broadcast %1100 : vector<1x1xf32> to vector<1x128xf32>
    %1103 = arith.mulf %1102, %1101 : vector<1x128xf32>
    %1104 = vector.extract_strided_slice %1065 {offsets = [0, 5], sizes = [1, 1], strides = [1, 1]} : vector<1x8xf32> to vector<1x1xf32>
    %1105 = vector.extract_strided_slice %1099 {offsets = [1, 0], sizes = [1, 128], strides = [1, 1]} : vector<2x128xf32> to vector<1x128xf32>
    %1106 = vector.broadcast %1104 : vector<1x1xf32> to vector<1x128xf32>
    %1107 = arith.mulf %1106, %1105 : vector<1x128xf32>
    %1108 = arith.addf %1103, %1107 : vector<1x128xf32>
    %1109 = arith.addf %1094, %1108 : vector<1x128xf32>
    %c3_i32_193 = arith.constant 3 : i32
    %1110 = arith.addi %1063, %c3_i32_193 : i32
    %1111 = arith.index_cast %1110 : i32 to index
    %1112 = memref.load %arg1[%1111] : memref<64xi32, #tpu.memory_space<smem>>
    %1113 = arith.index_cast %1112 : i32 to index
    %c0_194 = arith.constant 0 : index
    %1114 = vector.load %arg3[%1113, %c0_194] : memref<520x128xf32, #tpu.memory_space<vmem>>, vector<2x128xf32>
    %1115 = vector.extract_strided_slice %1065 {offsets = [0, 6], sizes = [1, 1], strides = [1, 1]} : vector<1x8xf32> to vector<1x1xf32>
    %1116 = vector.extract_strided_slice %1114 {offsets = [0, 0], sizes = [1, 128], strides = [1, 1]} : vector<2x128xf32> to vector<1x128xf32>
    %1117 = vector.broadcast %1115 : vector<1x1xf32> to vector<1x128xf32>
    %1118 = arith.mulf %1117, %1116 : vector<1x128xf32>
    %1119 = vector.extract_strided_slice %1065 {offsets = [0, 7], sizes = [1, 1], strides = [1, 1]} : vector<1x8xf32> to vector<1x1xf32>
    %1120 = vector.extract_strided_slice %1114 {offsets = [1, 0], sizes = [1, 128], strides = [1, 1]} : vector<2x128xf32> to vector<1x128xf32>
    %1121 = vector.broadcast %1119 : vector<1x1xf32> to vector<1x128xf32>
    %1122 = arith.mulf %1121, %1120 : vector<1x128xf32>
    %1123 = arith.addf %1118, %1122 : vector<1x128xf32>
    %1124 = arith.addf %1109, %1123 : vector<1x128xf32>
    %1125 = vector.broadcast %1124 : vector<1x128xf32> to vector<8x128xf32>
    %1126 = arith.mulf %1125, %33 : vector<8x128xf32>
    %1127 = arith.addf %1059, %1126 : vector<8x128xf32>
    %c8_i32_195 = arith.constant 8 : i32
    %1128 = arith.muli %c1_i32_97, %c8_i32_195 : i32
    %1129 = tpu.assume_multiple %1128, 8 : i32
    %1130 = arith.index_cast %1129 : i32 to index
    %c0_196 = arith.constant 0 : index
    %1131 = vector.load %arg4[%1130, %c0_196] : memref<16x128xf32, #tpu.memory_space<vmem>>, vector<8x128xf32>
    tpu.vector_store %arg4[%1130, %c0_196], %1127 {strides = array<i32>} : memref<16x128xf32, #tpu.memory_space<vmem>>, vector<8x128xf32>,
    %c2_i32_197 = arith.constant 2 : i32
    return
  }
  func.func @transform_0(%arg0: i32) -> i32 {
    %c0_i32 = arith.constant 0 : i32
    %c0_i32_0 = arith.constant 0 : i32
    return %c0_i32 : i32
  }
  func.func @transform_1(%arg0: i32) -> (i32, i32) {
    %c0_i32 = arith.constant 0 : i32
    %c0_i32_0 = arith.constant 0 : i32
    return %arg0, %c0_i32 : i32, i32
  }
  func.func @transform_2(%arg0: i32) -> (i32, i32) {
    %c0_i32 = arith.constant 0 : i32
    %c0_i32_0 = arith.constant 0 : i32
    %c0_i32_1 = arith.constant 0 : i32
    return %c0_i32, %c0_i32_0 : i32, i32
  }
  func.func @transform_3(%arg0: i32) -> (i32, i32) {
    %c0_i32 = arith.constant 0 : i32
    %c0_i32_0 = arith.constant 0 : i32
    return %arg0, %c0_i32 : i32, i32
  }
}

</mosaic_0001>

<bundles_post_ra>
// kernel: tpu_custom_call.1
= control target key start
LH: loop header
LB: loop body
LE: loop exit
PB: predicated region body
PF: predicated region fallthrough
CT: control target
= control target key end

     0   :  { %8 = vsyncpa [#allocation5], 0  ;;  %s2437_s0 = inlined_call_operand.vmem [shape: s32[64], index: 0, kind: input, shape index: {}]   ;;  %s2438_s1 = inlined_call_operand.vmem [shape: f32[16,8], index: 1, kind: input, shape index: {}]   ;;  %s2439_s2 = inlined_call_operand.hbm [shape: f32[520,128], index: 2, kind: input, shape index: {}]   ;;  %s2440_s3 = inlined_call_operand.hbm [shape: f32[16,128], index: 3, kind: output, shape index: {}]  }
   0x1   :  { %9 = vsyncpa [#allocation3], 0 }
   0x2   :  { %10 = vsyncpa [#allocation4], 0  ;;  %s17_s14 = sshll.u32 %s2437_s0, 4  ;;  %s18_s14 = int_to_ptr.vmem [resolvable:$true] %s17_s14 }
   0x3   :  { %s1666_s15 = scalar_lea.vmem %s18_s14, 16  ;;  %p1671_p1 = scmp.lt.s32.totalorder %s18_s14, %s18_s14 }
   0x4   :  { %p1667_p0 = scmp.ne.s32.totalorder %s18_s14, %s1666_s15  ;;  %p1672_p2 = scmp.lt.s32.totalorder %s1666_s15, %s1666_s15 }
   0x6   :  { %p1673_p3 = por %p1672_p2, %p1671_p1 }
   0x8   :  { %p1674_p4 = pnand %p1673_p3, %p1667_p0 }
   0xa   :  { %1677 = shalt.err (!%p1674_p4)
}
   0xb   :  { %s1728_s16 = smov [#allocation2]   ;;  %s1729_s17 = smov [#allocation6]  }
   0xc   :  { %20 = dma.vmem_to_smem %s18_s14, 16, %s1728_s16, [#allocation5]  }
   0xd   :  { %s28_s18 = sshll.u32 %s1729_s17, 4  ;;  %s1678_s21 = scalar_lea.hbm %s2439_s2, 8320  ;;  %s29_s18 = int_to_ptr.vmem [resolvable:$true] %s28_s18 }
   0xe   :  { %p1679_p5 = scmp.ne.s32.totalorder %s2439_s2, %s1678_s21  ;;  %p1682_p6 = scmp.lt.u32.totalorder %s1678_s21, %s2439_s2 }
  0x10   :  { %p1684_p7 = pnand %p1682_p6, %p1679_p5 }
  0x12   :  { %1687 = shalt.err (!%p1684_p7)
}
  0x13   :  { %s1688_s25 = scalar_lea.vmem %s29_s18, 8320  ;;  %p1693_p9 = scmp.lt.s32.totalorder %s29_s18, %s29_s18 }
  0x14   :  { %p1689_p8 = scmp.ne.s32.totalorder %s29_s18, %s1688_s25  ;;  %p1694_p10 = scmp.lt.s32.totalorder %s1688_s25, %s1688_s25 }
  0x16   :  { %p1695_p11 = por %p1694_p10, %p1693_p9 }
  0x18   :  { %p1696_p12 = pnand %p1695_p11, %p1689_p8 }
  0x1a   :  { %1699 = shalt.err (!%p1696_p12)
}
  0x1b   :  { %s1730_s26 = smov 128   ;;  %s1731_s27 = smov 8  }
  0x1c   :  { %34 = dma.hbm_to_vmem [thread:$0]  %s2439_s2, 8320, %s29_s18, [#allocation3], %s1730_s26, %s1730_s26, %s1731_s27  }
  0x1d   :  { %1722 = dma.done.wait [#allocation5], 16  }
  0x1e   :  { %1723 = vsyncadd [#allocation5], 4294967280 }
  0x1f   :  { %1724 = dma.done.wait [#allocation3], 8320  }
  0x20   :  { %1725 = vsyncadd [#allocation3], 4294958976 }
  0x21   :  { %41 = sfence }
  0x22   :  { %v1783_v0 = vld [vmem:[%s2438_s1 + $0x2] sm:$0x1]  ;;  %v1788_v1 = vld [vmem:[%s2438_s1] sm:$0x1]  ;;  %v2441_v2 = vmov 7   ;;  %v2453_v3 = vmov 2  }
  0x23   :  { %1581 = vset.pattern.permute.xlu0 %v2441_v2  ;;  %1566 = vset.pattern.permute.xlu1 %v2453_v3  ;;  %v1797_v4 = vld [vmem:[%s2438_s1 + $0x5] sm:$0x1]  ;;  %v2451_v5 = vmov 3   ;;  %v1805_v6 = vld [vmem:[%s2438_s1 + $0x8] sm:$0x1]  ;;  %v2443_v7 = vmov 4  }
  0x24   :  { %302 = vperm.xlu0 %1581, %v1783_v0   ;;  %93 = vperm.xlu1 %1566, %v1788_v1   ;;  %v1812_v8 = vld [vmem:[%s2438_s1 + $0xb] sm:$0x1]  ;;  %v2447_v9 = vmov 6   ;;  %v1820_v10 = vld [vmem:[%s2438_s1 + $0x3] sm:$0x1]  ;;  %v2445_v14 = vmov 1  }
  0x25   :  { %2469 = vst [vmem:[#allocation11_spill] sm:$0xff] %v1812_v8  ;;  %v1828_v11 = vld [vmem:[%s2438_s1 + $0x6] sm:$0x1]  ;;  %v1836_v12 = vld [vmem:[%s2438_s1 + $0x9] sm:$0x1]  ;;  %v2449_v16 = vmov 5  }
  0x26   :  { %v1841_v13 = vld [vmem:[%s2438_s1 + $0x1] sm:$0x1]  ;;  %v1849_v15 = vld [vmem:[%s2438_s1 + $0xc] sm:$0x1]  ;;  %v2455_v17 = vmov 0   ;;  %s1492_s7 = sld [smem:[#allocation2 + $0x4]] }
  0x27   :  { %2470 = vst [vmem:[#allocation12_spill] sm:$0xff] %v1849_v15  ;;  %v1878_v18 = vld [vmem:[%s2438_s1 + $0x4] sm:$0x1]  ;;  %v1885_v19 = vld [vmem:[%s2438_s1 + $0x7] sm:$0x1]  ;;  %s1501_s8 = sld [smem:[#allocation2 + $0xd]] }
  0x28   :  { %551 = vperm.xlu0 %1581, %v1797_v4   ;;  %1567 = vset.pattern.permute.xlu1 %v2451_v5  ;;  %v1892_v20 = vld [vmem:[%s2438_s1 + $0xa] sm:$0x1]  ;;  %v1149_v21 = vld [vmem:[%s2438_s1 + $0xd] sm:$0x1]  ;;  %v1905_v22 = vld [vmem:[%s2438_s1 + $0xe] sm:$0x1] }
  0x29   :  { %98 = vperm.xlu1 %1567, %v1788_v1   ;;  %v1315_v33 = vld [vmem:[%s2438_s1 + $0xf] sm:$0x1]  ;;  %s1493_s9 = sld [smem:[#allocation2 + $0x5]]  ;;  %s1502_s10 = sld [smem:[#allocation2 + $0xe]] }
  0x2a   :  { %s1500_s11 = sld [smem:[#allocation2 + $0xc]]  ;;  %s1504_s17 = sld [smem:[#allocation2 + $0x10]] }
  0x2b   :  { %s1505_s18 = sld [smem:[#allocation2 + $0x11]]  ;;  %s70_s22 = sld [smem:[#allocation2]] }
  0x2c   :  { %801 = vperm.xlu0 %1581, %v1805_v6   ;;  %s154_s12 = scalar_lea.vmem [#allocation6], %s1492_s7  ;;  %s1489_s21 = sld [smem:[#allocation2 + $0x1]] }
  0x2d   :  { %1568 = vset.pattern.permute.xlu1 %v2443_v7  ;;  %v155_v59 = vld [vmem:[%s154_s12] sm:$0x3]  ;;  %s339_s13 = scalar_lea.vmem [#allocation6], %s1501_s8  ;;  %s1490_s23 = sld [smem:[#allocation2 + $0x2]] }
  0x2e   :  { %112 = vperm.xlu1 %1568, %v1788_v1   ;;  %v340_v60 = vld [vmem:[%s339_s13] sm:$0x3]  ;;  %s2114_s28 = sld [smem:[#allocation2 + $0xb]]  ;;  %s2116_s29 = sld [smem:[#allocation2 + $0x8]] }
  0x2f   :  { %s173_s14 = scalar_lea.vmem [#allocation6], %s1493_s9  ;;  %s358_s15 = scalar_lea.vmem [#allocation6], %s1502_s10 }
  0x30   :  { %1050 = vperm.xlu0 %1581, %v1812_v8   ;;  %v174_v62 = vld [vmem:[%s173_s14] sm:$0x3]  ;;  %s320_s16 = scalar_lea.vmem [#allocation6], %s1500_s11  ;;  %s403_s19 = scalar_lea.vmem [#allocation6], %s1504_s17 }
  0x31   :  { %s422_s20 = scalar_lea.vmem [#allocation6], %s1505_s18  ;;  %s71_s24 = scalar_lea.vmem [#allocation6], %s70_s22 }
  0x32   :  { %1569 = vset.pattern.permute.xlu1 %v2447_v9  ;;  %s90_s0 = scalar_lea.vmem [#allocation6], %s1489_s21  ;;  %s2119_s30 = sld [smem:[#allocation2 + $0x17]] }
  0x33   :  { %131 = vperm.xlu1 %1569, %v1788_v1   ;;  %s109_s25 = scalar_lea.vmem [#allocation6], %s1490_s23  ;;  %s2124_s4 = sld [smem:[#allocation2 + $0x9]] }
  0x34   :  { %1630 = vset.pattern.permute.xlu0 %v2453_v3  ;;  %s2126_s5 = sld [smem:[#allocation2 + $0x3]]  ;;  %s2128_s6 = sld [smem:[#allocation2 + $0x19]] }
  0x35   :  { %342 = vperm.xlu0 %1630, %v1820_v10   ;;  %s2134_s2 = sld [smem:[#allocation2 + $0x6]]  ;;  %s2136_s7 = sld [smem:[#allocation2 + $0x1a]] }
  0x36   :  { %s2139_s8 = sld [smem:[#allocation2 + $0x7]]  ;;  %s2144_s10 = sld [smem:[#allocation2 + $0xa]] }
  0x37   :  { %1570 = vset.pattern.permute.xlu1 %v2441_v2  ;;  %s2142_s9 = sld [smem:[#allocation2 + $0xf]]  ;;  %s2147_s11 = sld [smem:[#allocation2 + $0x16]] }
  0x38   :  { %136 = vperm.xlu1 %1570, %v1788_v1   ;;  %s2149_s12 = sld [smem:[#allocation2 + $0x13]]  ;;  %s2153_s13 = sld [smem:[#allocation2 + $0x12]] }
  0x39   :  { %591 = vperm.xlu0 %1630, %v1828_v11   ;;  %s2157_s14 = sld [smem:[#allocation2 + $0x15]]  ;;  %s2167_s17 = sld [smem:[#allocation2 + $0x14]] }
  0x3a   :  { %s543_s18 = scalar_lea.vmem [#allocation6], %s2119_s30  ;;  %s588_s21 = scalar_lea.vmem [#allocation6], %s2128_s6 }
  0x3b   :  { %s192_s22 = scalar_lea.vmem [#allocation6], %s2134_s2  ;;  %s607_s23 = scalar_lea.vmem [#allocation6], %s2136_s7 }
  0x3c   :  { %1571 = vset.pattern.permute.xlu1 %v2445_v14  ;;  %s2227_s6 = sld [smem:[#allocation2 + $0x18]]  ;;  %s2286_s7 = sld [smem:[#allocation2 + $0x1b]] }
  0x3d   :  { %841 = vperm.xlu0 %1630, %v1836_v12   ;;  %163 = vperm.xlu1 %1571, %v1841_v13  }
  0x3e   :  { %s441_s30 = scalar_lea.vmem [#allocation6], %s2153_s13  ;;  %s1528_s13 = sld [smem:[#allocation2 + $0x28]] }
  0x41   :  { %1090 = vperm.xlu0 %1630, %v1849_v15   ;;  %1572 = vset.pattern.permute.xlu1 %v2453_v3 }
  0x42   :  { %176 = vperm.xlu1 %1572, %v1841_v13   ;;  %s569_s2 = scalar_lea.vmem [#allocation6], %s2227_s6  ;;  %s1525_s6 = sld [smem:[#allocation2 + $0x25]] }
  0x45   :  { %1633 = vset.pattern.permute.xlu0 %v2449_v16 }
  0x46   :  { %117 = vperm.xlu0 %1633, %v1788_v1   ;;  %1573 = vset.pattern.permute.xlu1 %v2443_v7 }
  0x47   :  { %195 = vperm.xlu1 %1573, %v1841_v13  }
  0x4a   :  { %366 = vperm.xlu0 %1633, %v1820_v10  }
  0x4b   :  { %1574 = vset.pattern.permute.xlu1 %v2449_v16 }
  0x4c   :  { %200 = vperm.xlu1 %1574, %v1841_v13  }
  0x4e   :  { %615 = vperm.xlu0 %1633, %v1828_v11  }
  0x50   :  { %1575 = vset.pattern.permute.xlu1 %v2441_v2 }
  0x51   :  { %219 = vperm.xlu1 %1575, %v1841_v13  }
  0x52   :  { %865 = vperm.xlu0 %1633, %v1836_v12  }
  0x55   :  { %1576 = vset.pattern.permute.xlu1 %v2455_v17 }
  0x56   :  { %1114 = vperm.xlu0 %1633, %v1849_v15   ;;  %241 = vperm.xlu1 %1576, %v1783_v0  }
  0x5a   :  { %1636 = vset.pattern.permute.xlu0 %v2455_v17  ;;  %1577 = vset.pattern.permute.xlu1 %v2453_v3 }
  0x5b   :  { %75 = vperm.xlu0 %1636, %v1788_v1   ;;  %259 = vperm.xlu1 %1577, %v1783_v0  }
  0x5f   :  { %158 = vperm.xlu0 %1636, %v1841_v13   ;;  %1578 = vset.pattern.permute.xlu1 %v2451_v5 }
  0x60   :  { %264 = vperm.xlu1 %1578, %v1783_v0  }
  0x63   :  { %407 = vperm.xlu0 %1636, %v1878_v18  }
  0x64   :  { %1579 = vset.pattern.permute.xlu1 %v2449_v16 }
  0x65   :  { %283 = vperm.xlu1 %1579, %v1783_v0  }
  0x67   :  { %656 = vperm.xlu0 %1636, %v1885_v19  }
  0x69   :  { %1580 = vset.pattern.permute.xlu1 %v2447_v9 }
  0x6a   :  { %297 = vperm.xlu1 %1580, %v1783_v0  }
  0x6b   :  { %906 = vperm.xlu0 %1636, %v1892_v20  }
  0x6e   :  { %1582 = vset.pattern.permute.xlu1 %v2455_v17 }
  0x6f   :  { %1155 = vperm.xlu0 %1636, %v1149_v21   ;;  %324 = vperm.xlu1 %1582, %v1820_v10  }
  0x73   :  { %1238 = vperm.xlu0 %1636, %v1905_v22   ;;  %1583 = vset.pattern.permute.xlu1 %v2445_v14 }
  0x74   :  { %329 = vperm.xlu1 %1583, %v1820_v10  }
  0x77   :  { %1643 = vset.pattern.permute.xlu0 %v2451_v5 }
  0x78   :  { %181 = vperm.xlu0 %1643, %v1841_v13   ;;  %1584 = vset.pattern.permute.xlu1 %v2451_v5 }
  0x79   :  { %347 = vperm.xlu1 %1584, %v1820_v10  }
  0x7c   :  { %430 = vperm.xlu0 %1643, %v1878_v18  }
  0x7d   :  { %1585 = vset.pattern.permute.xlu1 %v2443_v7 }
  0x7e   :  { %361 = vperm.xlu1 %1585, %v1820_v10  }
  0x80   :  { %679 = vperm.xlu0 %1643, %v1885_v19  }
  0x82   :  { %1586 = vset.pattern.permute.xlu1 %v2447_v9 }
  0x83   :  { %380 = vperm.xlu1 %1586, %v1820_v10  }
  0x84   :  { %929 = vperm.xlu0 %1643, %v1892_v20  }
  0x87   :  { %1587 = vset.pattern.permute.xlu1 %v2441_v2 }
  0x88   :  { %1178 = vperm.xlu0 %1643, %v1149_v21   ;;  %385 = vperm.xlu1 %1587, %v1820_v10   ;;  %v351_v10 = vrot.slane %v340_v60, 1 }
  0x8c   :  { %1261 = vperm.xlu0 %1643, %v1905_v22   ;;  %1588 = vset.pattern.permute.xlu1 %v2445_v14 }
  0x8d   :  { %412 = vperm.xlu1 %1588, %v1878_v18  }
  0x90   :  { %1646 = vset.pattern.permute.xlu0 %v2443_v7 }
  0x91   :  { %278 = vperm.xlu0 %1646, %v1783_v0   ;;  %1589 = vset.pattern.permute.xlu1 %v2453_v3 }
  0x92   :  { %425 = vperm.xlu1 %1589, %v1878_v18  }
  0x95   :  { %527 = vperm.xlu0 %1646, %v1797_v4  }
  0x96   :  { %1590 = vset.pattern.permute.xlu1 %v2443_v7 }
  0x97   :  { %444 = vperm.xlu1 %1590, %v1878_v18  }
  0x99   :  { %777 = vperm.xlu0 %1646, %v1805_v6  }
  0x9b   :  { %1591 = vset.pattern.permute.xlu1 %v2449_v16 }
  0x9c   :  { %449 = vperm.xlu1 %1591, %v1878_v18  }
  0x9d   :  { %1026 = vperm.xlu0 %1646, %v1812_v8  }
  0xa0   :  { %1592 = vset.pattern.permute.xlu1 %v2441_v2 }
  0xa1   :  { %1275 = vperm.xlu0 %1646, %v1905_v22   ;;  %468 = vperm.xlu1 %1592, %v1878_v18  }
  0xa3   :  { %v1940_v23 = vpop.permute.xlu1 %93  ;;  %v1942_v24 = vpop.permute.xlu0 %302 }
  0xa5   :  { %1649 = vset.pattern.permute.xlu0 %v2445_v14  ;;  %1593 = vset.pattern.permute.xlu1 %v2455_v17 }
  0xa6   :  { %80 = vperm.xlu0 %1649, %v1788_v1   ;;  %490 = vperm.xlu1 %1593, %v1797_v4   ;;  %v167_v1 = vrot.slane %v155_v59, 1 }
  0xa7   :  { %v1948_v25 = vpop.permute.xlu0 %551 }
  0xa8   :  { %v1950_v26 = vpop.permute.xlu1 %98 }
  0xaa   :  { %246 = vperm.xlu0 %1649, %v1783_v0   ;;  %1594 = vset.pattern.permute.xlu1 %v2453_v3  ;;  %v359_v0 = vld [vmem:[%s358_s15] sm:$0x3]  ;;  %s294_s15 = scalar_lea.vmem [#allocation6], %s2114_s28  ;;  %s524_s28 = scalar_lea.vmem [#allocation6], %s2147_s11 }
  0xab   :  { %508 = vperm.xlu1 %1594, %v1797_v4   ;;  %v1955_v27 = vpop.permute.xlu0 %801 }
  0xac   :  { %2471 = vst [vmem:[#allocation13_spill] sm:$0xff] %v1955_v27 }
  0xad   :  { %v1957_v28 = vpop.permute.xlu1 %112 }
  0xae   :  { %495 = vperm.xlu0 %1649, %v1797_v4  }
  0xaf   :  { %1595 = vset.pattern.permute.xlu1 %v2451_v5  ;;  %v1961_v29 = vpop.permute.xlu0 %1050 }
  0xb0   :  { %2472 = vst [vmem:[#allocation14_spill] sm:$0xff] %v1961_v29  ;;  %513 = vperm.xlu1 %1595, %v1797_v4   ;;  %v2186_v29 = vld [vmem:[%s607_s23] sm:$0x3]  ;;  %s1521_s23 = sld [smem:[#allocation2 + $0x21]] }
  0xb1   :  { %2502 = vst [vmem:[#allocation36_spill] sm:$0xff] %v2186_v29 }
  0xb2   :  { %745 = vperm.xlu0 %1649, %v1805_v6   ;;  %v1965_v30 = vpop.permute.xlu1 %131 }
  0xb4   :  { %1596 = vset.pattern.permute.xlu1 %v2449_v16  ;;  %v1968_v31 = vpop.permute.xlu0 %342 }
  0xb5   :  { %532 = vperm.xlu1 %1596, %v1797_v4  }
  0xb6   :  { %994 = vperm.xlu0 %1649, %v1812_v8  }
  0xb7   :  { %v1972_v32 = vpop.permute.xlu1 %136 }
  0xb8   :  { %v1977_v34 = vpop.permute.xlu0 %591 }
  0xb9   :  { %2473 = vst [vmem:[#allocation15_spill] sm:$0xff] %v1977_v34  ;;  %1597 = vset.pattern.permute.xlu1 %v2447_v9 }
  0xba   :  { %1326 = vperm.xlu0 %1649, %v1315_v33   ;;  %546 = vperm.xlu1 %1597, %v1797_v4   ;;  %v185_v4 = vrot.slane %v174_v62, 1 }
  0xbc   :  { %v1981_v35 = vpop.permute.xlu1 %163  ;;  %v1983_v36 = vpop.permute.xlu0 %841 }
  0xbd   :  { %2474 = vst [vmem:[#allocation16_spill] sm:$0xff] %v1983_v36 }
  0xbe   :  { %1652 = vset.pattern.permute.xlu0 %v2447_v9  ;;  %1598 = vset.pattern.permute.xlu1 %v2455_v17 }
  0xbf   :  { %214 = vperm.xlu0 %1652, %v1841_v13   ;;  %573 = vperm.xlu1 %1598, %v1828_v11  }
  0xc0   :  { %v1989_v37 = vpop.permute.xlu0 %1090 }
  0xc1   :  { %2475 = vst [vmem:[#allocation17_spill] sm:$0xff] %v1989_v37  ;;  %v1991_v38 = vpop.permute.xlu1 %176  ;;  %v193_v37 = vld [vmem:[%s192_s22] sm:$0x3] }
  0xc3   :  { %463 = vperm.xlu0 %1652, %v1878_v18   ;;  %1599 = vset.pattern.permute.xlu1 %v2445_v14 }
  0xc4   :  { %578 = vperm.xlu1 %1599, %v1828_v11  }
  0xc5   :  { %v1996_v39 = vpop.permute.xlu0 %117 }
  0xc6   :  { %v1998_v40 = vpop.permute.xlu1 %195 }
  0xc7   :  { %712 = vperm.xlu0 %1652, %v1885_v19  }
  0xc8   :  { %1600 = vset.pattern.permute.xlu1 %v2451_v5 }
  0xc9   :  { %596 = vperm.xlu1 %1600, %v1828_v11   ;;  %v2003_v41 = vpop.permute.xlu0 %366 }
  0xcb   :  { %v2005_v42 = vpop.permute.xlu1 %200  ;;  %962 = vperm.xlu0 %1652, %v1892_v20  }
  0xcd   :  { %1601 = vset.pattern.permute.xlu1 %v2443_v7  ;;  %v2009_v43 = vpop.permute.xlu0 %615 }
  0xce   :  { %2476 = vst [vmem:[#allocation18_spill] sm:$0xff] %v2009_v43  ;;  %610 = vperm.xlu1 %1601, %v1828_v11  }
  0xcf   :  { %1294 = vperm.xlu0 %1652, %v1905_v22   ;;  %v345_v22 = vmul.f32 %v1968_v31, %v340_v60 }
  0xd0   :  { %v2013_v44 = vpop.permute.xlu1 %219 }
  0xd1   :  { %v2015_v45 = vpop.permute.xlu0 %865 }
  0xd2   :  { %2477 = vst [vmem:[#allocation19_spill] sm:$0xff] %v2015_v45  ;;  %1602 = vset.pattern.permute.xlu1 %v2447_v9 }
  0xd3   :  { %629 = vperm.xlu1 %1602, %v1828_v11   ;;  %1657 = vset.pattern.permute.xlu0 %v2449_v16 }
  0xd4   :  { %1363 = vperm.xlu0 %1657, %v1315_v33   ;;  %v179_v33 = vmul.f32 %v1991_v38, %v174_v62 }
  0xd5   :  { %v2020_v46 = vpop.permute.xlu1 %241  ;;  %v2022_v47 = vpop.permute.xlu0 %1114 }
  0xd6   :  { %2478 = vst [vmem:[#allocation20_spill] sm:$0xff] %v2022_v47 }
  0xd7   :  { %1603 = vset.pattern.permute.xlu1 %v2441_v2 }
  0xd8   :  { %634 = vperm.xlu1 %1603, %v1828_v11   ;;  %1660 = vset.pattern.permute.xlu0 %v2441_v2  ;;  %v321_v11 = vld [vmem:[%s320_s16] sm:$0x3]  ;;  %s237_s16 = scalar_lea.vmem [#allocation6], %s2116_s29  ;;  %s460_s29 = scalar_lea.vmem [#allocation6], %s2149_s12 }
  0xd9   :  { %v333_v18 = vrot.slane %v321_v11, 1 }
  0xda   :  { %v2027_v48 = vpop.permute.xlu0 %75  ;;  %v2029_v49 = vpop.permute.xlu1 %259 }
  0xdc   :  { %1604 = vset.pattern.permute.xlu1 %v2445_v14 }
  0xdd   :  { %661 = vperm.xlu1 %1604, %v1885_v19  }
  0xde   :  { %v159_v50 = vpop.permute.xlu0 %158 }
  0xdf   :  { %v2033_v51 = vpop.permute.xlu1 %264  ;;  %v161_v13 = vmul.f32 %v159_v50, %v155_v59 }
  0xe1   :  { %1605 = vset.pattern.permute.xlu1 %v2453_v3 }
  0xe2   :  { %674 = vperm.xlu1 %1605, %v1885_v19   ;;  %v2037_v52 = vpop.permute.xlu0 %407 }
  0xe4   :  { %v2039_v53 = vpop.permute.xlu1 %283 }
  0xe6   :  { %1606 = vset.pattern.permute.xlu1 %v2443_v7  ;;  %v2042_v54 = vpop.permute.xlu0 %656 }
  0xe7   :  { %2479 = vst [vmem:[#allocation21_spill] sm:$0xff] %v2042_v54  ;;  %693 = vperm.xlu1 %1606, %v1885_v19  }
  0xe9   :  { %v2045_v55 = vpop.permute.xlu1 %297 }
  0xea   :  { %v2047_v56 = vpop.permute.xlu0 %906 }
  0xeb   :  { %2480 = vst [vmem:[#allocation22_spill] sm:$0xff] %v2047_v56  ;;  %1607 = vset.pattern.permute.xlu1 %v2449_v16 }
  0xec   :  { %698 = vperm.xlu1 %1607, %v1885_v19  }
  0xee   :  { %v325_v57 = vpop.permute.xlu1 %324  ;;  %v2051_v58 = vpop.permute.xlu0 %1155 }
  0xef   :  { %2481 = vst [vmem:[#allocation23_spill] sm:$0xff] %v2051_v58 }
  0xf0   :  { %1608 = vset.pattern.permute.xlu1 %v2441_v2  ;;  %v169_v2 = vmul.f32 %v167_v1, %v1981_v35 }
  0xf1   :  { %717 = vperm.xlu1 %1608, %v1885_v19   ;;  %v370_v19 = vrot.slane %v359_v0, 1 }
  0xf2   :  { %v2055_v61 = vpop.permute.xlu0 %1238  ;;  %v170_v16 = vadd.f32 %v169_v2, %v161_v13  ;;  %v2491_v13 = vmov 0  }
  0xf3   :  { %2482 = vst [vmem:[#allocation24_spill] sm:$0xff] %v2055_v61  ;;  %v330_v63 = vpop.permute.xlu1 %329  ;;  %v2483_v61 = vmov 2   ;;  %v372_v59 = vmul.f32 %v370_v19, %v2003_v41 }
  0xf4   :  { %v335_v5 = vmul.f32 %v333_v18, %v330_v63 }
  0xf5   :  { %1609 = vset.pattern.permute.xlu1 %v2455_v17  ;;  %v327_v17 = vmul.f32 %v325_v57, %v321_v11  ;;  %v423_v57 = vld [vmem:[%s422_s20] sm:$0x3]  ;;  %s128_s20 = scalar_lea.vmem [#allocation6], %s2126_s5  ;;  %s486_s5 = scalar_lea.vmem [#allocation6], %s2167_s17 }
  0xf6   :  { %740 = vperm.xlu1 %1609, %v1805_v6   ;;  %v487_v8 = vld [vmem:[%s486_s5] sm:$0x3]  ;;  %s1520_s17 = sld [smem:[#allocation2 + $0x20]]  ;;  %s1524_s5 = sld [smem:[#allocation2 + $0x24]] }
  0xf7   :  { %v182_v21 = vpop.permute.xlu0 %181  ;;  %v336_v35 = vadd.f32 %v335_v5, %v327_v17  ;;  %v404_v17 = vld [vmem:[%s403_s19] sm:$0x3]  ;;  %s256_s19 = scalar_lea.vmem [#allocation6], %s2124_s4  ;;  %s505_s4 = scalar_lea.vmem [#allocation6], %s2157_s14 }
  0xf8   :  { %v187_v7 = vmul.f32 %v185_v4, %v182_v21  ;;  %v348_v14 = vpop.permute.xlu1 %347  ;;  %v416_v4 = vrot.slane %v404_v17, 1  ;;  %v410_v18 = vmul.f32 %v2037_v52, %v404_v17  ;;  %v2496_v17 = vmov 4   ;;  %v506_v54 = vld [vmem:[%s505_s4] sm:$0x3]  ;;  %s1529_s14 = sld [smem:[#allocation2 + $0x29]] }
  0xf9   :  { %v353_v9 = vmul.f32 %v351_v10, %v348_v14  ;;  %v2484_v14 = vmov 3   ;;  %v434_v10 = vrot.slane %v423_v57, 1  ;;  %v517_v34 = vrot.slane %v506_v54, 1 }
  0xfa   :  { %v188_v3 = vadd.f32 %v187_v7, %v179_v33  ;;  %1610 = vset.pattern.permute.xlu1 %v2483_v61 }
  0xfb   :  { %758 = vperm.xlu1 %1610, %v1805_v6   ;;  %v431_v50 = vpop.permute.xlu0 %430  ;;  %v354_v31 = vadd.f32 %v353_v9, %v345_v22  ;;  %v2487_v9 = vmov 5  }
  0xfc   :  { %v2065_v58 = vadd.f32 %v188_v3, %v170_v16  ;;  %v436_v19 = vmul.f32 %v434_v10, %v431_v50  ;;  %s736_s22 = scalar_lea.vmem [#allocation6], %s1520_s17 }
  0xfd   :  { %v362_v38 = vpop.permute.xlu1 %361  ;;  %v355_v7 = vadd.f32 %v354_v31, %v336_v35  ;;  %v2492_v31 = vmov 1  }
  0xfe   :  { %v364_v60 = vmul.f32 %v362_v38, %v359_v0  ;;  %v2489_v0 = vmov 6   ;;  %s921_s17 = scalar_lea.vmem [#allocation6], %s1529_s14 }
  0xff   :  { %1611 = vset.pattern.permute.xlu1 %v2484_v14  ;;  %v2068_v2 = vpop.permute.xlu0 %679 }
 0x100   :  { %2485 = vst [vmem:[#allocation25_spill] sm:$0xff] %v2068_v2  ;;  %v373_v62 = vadd.f32 %v372_v59, %v364_v60  ;;  %763 = vperm.xlu1 %1611, %v1805_v6   ;;  %v204_v2 = vrot.slane %v193_v37, 1 }
 0x102   :  { %v2071_v63 = vadd.f32 %v373_v62, %v355_v7  ;;  %v2073_v41 = vpop.permute.xlu1 %380 }
 0x103   :  { %v2075_v3 = vpop.permute.xlu0 %929 }
 0x104   :  { %2486 = vst [vmem:[#allocation26_spill] sm:$0xff] %v2075_v3  ;;  %1612 = vset.pattern.permute.xlu1 %v2487_v9 }
 0x105   :  { %782 = vperm.xlu1 %1612, %v1805_v6  }
 0x107   :  { %v2079_v5 = vpop.permute.xlu1 %385  ;;  %v2081_v16 = vpop.permute.xlu0 %1178 }
 0x108   :  { %2488 = vst [vmem:[#allocation27_spill] sm:$0xff] %v2081_v16 }
 0x109   :  { %1613 = vset.pattern.permute.xlu1 %v2489_v0 }
 0x10a   :  { %796 = vperm.xlu1 %1613, %v1805_v6  }
 0x10b   :  { %v2085_v1 = vpop.permute.xlu0 %1261 }
 0x10c   :  { %2490 = vst [vmem:[#allocation28_spill] sm:$0xff] %v2085_v1  ;;  %v413_v11 = vpop.permute.xlu1 %412 }
 0x10d   :  { %v418_v21 = vmul.f32 %v416_v4, %v413_v11  ;;  %v72_v4 = vld [vmem:[%s71_s24] sm:$0x3]  ;;  %s377_s24 = scalar_lea.vmem [#allocation6], %s2142_s9  ;;  %s1517_s9 = sld [smem:[#allocation2 + $0x1d]] }
 0x10e   :  { %1614 = vset.pattern.permute.xlu1 %v2491_v13  ;;  %v378_v36 = vld [vmem:[%s377_s24] sm:$0x3]  ;;  %s1523_s24 = sld [smem:[#allocation2 + $0x23]] }
 0x10f   :  { %823 = vperm.xlu1 %1614, %v1836_v12   ;;  %v419_v6 = vadd.f32 %v418_v21, %v410_v18  ;;  %v389_v15 = vrot.slane %v378_v36, 1 }
 0x110   :  { %v2090_v22 = vpop.permute.xlu0 %278 }
 0x111   :  { %v426_v33 = vpop.permute.xlu1 %425 }
 0x112   :  { %v428_v59 = vmul.f32 %v426_v33, %v423_v57  ;;  %v91_v57 = vld [vmem:[%s90_s0] sm:$0x3]  ;;  %v84_v33 = vrot.slane %v72_v4, 1  ;;  %s211_s0 = scalar_lea.vmem [#allocation6], %s2139_s8  ;;  %s1516_s8 = sld [smem:[#allocation2 + $0x1c]] }
 0x113   :  { %1615 = vset.pattern.permute.xlu1 %v2492_v31  ;;  %v102_v10 = vrot.slane %v91_v57, 1  ;;  %v96_v1 = vmul.f32 %v1940_v23, %v91_v57  ;;  %v2192_v56 = vld [vmem:[%s211_s0] sm:$0x3]  ;;  %s671_s12 = scalar_lea.vmem [#allocation6], %s1517_s9  ;;  %s1522_s0 = sld [smem:[#allocation2 + $0x22]] }
 0x114   :  { %v437_v38 = vadd.f32 %v436_v19, %v428_v59  ;;  %828 = vperm.xlu1 %1615, %v1836_v12   ;;  %v2094_v35 = vpop.permute.xlu0 %527  ;;  %v110_v19 = vld [vmem:[%s109_s25] sm:$0x3]  ;;  %s275_s25 = scalar_lea.vmem [#allocation6], %s2144_s10  ;;  %s626_s10 = scalar_lea.vmem [#allocation6], %s2286_s7 }
 0x115   :  { %v121_v21 = vrot.slane %v110_v19, 1  ;;  %v104_v59 = vmul.f32 %v102_v10, %v1950_v26  ;;  %v2499_v26 = vmov 7   ;;  %v276_v27 = vld [vmem:[%s275_s25] sm:$0x3]  ;;  %s755_s25 = scalar_lea.vmem [#allocation6], %s1521_s23  ;;  %s793_s4 = scalar_lea.vmem [#allocation6], %s1523_s24 }
 0x116   :  { %v2096_v60 = vadd.f32 %v437_v38, %v419_v6  ;;  %v2098_v52 = vpop.permute.xlu1 %444  ;;  %v78_v6 = vmul.f32 %v2027_v48, %v72_v4  ;;  %v115_v4 = vmul.f32 %v1957_v28, %v110_v19  ;;  %v43_v19 = vlaneseq  ;;  %s819_s7 = scalar_lea.vmem [#allocation6], %s1524_s5  ;;  %s1533_s24 = sld [smem:[#allocation2 + $0x2d]] }
 0x117   :  { %v123_v16 = vmul.f32 %v121_v21, %v1996_v39  ;;  %v105_v48 = vadd.f32 %v104_v59, %v96_v1  ;;  %v257_v59 = vld [vmem:[%s256_s19] sm:$0x3]  ;;  %v281_v29 = vmul.f32 %v2090_v22, %v276_v27  ;;  %s1536_s5 = sld [smem:[#allocation2 + $0x30]] }
 0x118   :  { %2493 = vst [vmem:[#allocation29_spill] sm:$0xff] %v2096_v60  ;;  %1616 = vset.pattern.permute.xlu1 %v2484_v14  ;;  %v2101_v50 = vpop.permute.xlu0 %777  ;;  %v262_v14 = vmul.f32 %v2029_v49, %v257_v59  ;;  %s652_s11 = scalar_lea.vmem [#allocation6], %s1516_s8 }
 0x119   :  { %2494 = vst [vmem:[#allocation30_spill] sm:$0xff] %v2101_v50  ;;  %846 = vperm.xlu1 %1616, %v1836_v12   ;;  %v124_v57 = vadd.f32 %v123_v16, %v115_v4  ;;  %v129_v4 = vld [vmem:[%s128_s20] sm:$0x3]  ;;  %v223_v50 = vrot.slane %v2192_v56, 1 }
 0x11a   :  { %v140_v45 = vrot.slane %v129_v4, 1 }
 0x11b   :  { %v2104_v7 = vpop.permute.xlu1 %449 }
 0x11c   :  { %v2106_v62 = vpop.permute.xlu0 %1026  ;;  %v142_v49 = vmul.f32 %v140_v45, %v1972_v32 }
 0x11d   :  { %2495 = vst [vmem:[#allocation31_spill] sm:$0xff] %v2106_v62  ;;  %1617 = vset.pattern.permute.xlu1 %v2496_v17  ;;  %v2188_v62 = vshrl.u32 %v43_v19, 7 }
 0x11e   :  { %860 = vperm.xlu1 %1617, %v1836_v12  }
 0x11f   :  { %vm45_vm0 = vcmp.eq.s32.totalorder %v2188_v62, 0  ;;  %vm51_vm1 = vcmp.eq.s32.totalorder %v2188_v62, 2  ;;  %vm48_vm2 = vcmp.eq.s32.totalorder %v2188_v62, 1  ;;  %vm54_vm3 = vcmp.eq.s32.totalorder %v2188_v62, 3 }
 0x120   :  { %v2110_v11 = vpop.permute.xlu1 %468  ;;  %v2112_v18 = vpop.permute.xlu0 %1275  ;;  %vm57_vm4 = vcmp.eq.s32.totalorder %v2188_v62, 4  ;;  %vm60_vm5 = vcmp.eq.s32.totalorder %v2188_v62, 5  ;;  %vm63_vm6 = vcmp.eq.s32.totalorder %v2188_v62, 6  ;;  %vm66_vm7 = vcmp.eq.s32.totalorder %v2188_v62, 7 }
 0x121   :  { %2497 = vst [vmem:[#allocation32_spill] sm:$0xff] %v2110_v11  ;;  %2498 = vst [vmem:[#allocation33_spill] sm:$0xff] %v2112_v18  ;;  %v134_v11 = vmul.f32 %v1965_v30, %v129_v4  ;;  %v1740_v4 = vmov 0.0  }
 0x122   :  { %1618 = vset.pattern.permute.xlu1 %v2489_v0 }
 0x123   :  { %879 = vperm.xlu1 %1618, %v1836_v12  }
 0x125   :  { %v81_v38 = vpop.permute.xlu0 %80  ;;  %v2130_v18 = vpop.permute.xlu1 %490 }
 0x126   :  { %v86_v47 = vmul.f32 %v84_v33, %v81_v38  ;;  %v2170_v33 = vld [vmem:[%s543_s18] sm:$0x3]  ;;  %s1542_s18 = sld [smem:[#allocation2 + $0x36]] }
 0x127   :  { %1619 = vset.pattern.permute.xlu1 %v2499_v26 }
 0x128   :  { %v87_v23 = vadd.f32 %v86_v47, %v78_v6  ;;  %884 = vperm.xlu1 %1619, %v1836_v12   ;;  %v2161_v12 = vld [vmem:[%s294_s15] sm:$0x3]  ;;  %s1518_s15 = sld [smem:[#allocation2 + $0x1e]] }
 0x129   :  { %v247_v39 = vpop.permute.xlu0 %246  ;;  %v238_v47 = vld [vmem:[%s237_s16] sm:$0x3]  ;;  %v306_v38 = vrot.slane %v2161_v12, 1  ;;  %v300_v30 = vmul.f32 %v2045_v55, %v2161_v12  ;;  %s1519_s16 = sld [smem:[#allocation2 + $0x1f]] }
 0x12a   :  { %v106_v10 = vadd.f32 %v105_v48, %v87_v23  ;;  %v2151_v1 = vpop.permute.xlu1 %508  ;;  %v250_v21 = vrot.slane %v238_v47, 1  ;;  %v268_v48 = vrot.slane %v257_v59, 1  ;;  %v2178_v23 = vld [vmem:[%s588_s21] sm:$0x3] }
 0x12b   :  { %2500 = vst [vmem:[#allocation34_spill] sm:$0xff] %v2178_v23  ;;  %v308_v23 = vmul.f32 %v306_v38, %v1942_v24  ;;  %v198_v24 = vmul.f32 %v1998_v40, %v193_v37  ;;  %v2504_v12 = vld [vmem:[#allocation32_spill] sm:$0xff] }
 0x12c   :  { %v2155_v28 = vadd.f32 %v124_v57, %v106_v10  ;;  %1620 = vset.pattern.permute.xlu1 %v2492_v31  ;;  %v555_v10 = vrot.slane %v2170_v33, 1  ;;  %v252_v3 = vmul.f32 %v250_v21, %v247_v39  ;;  %v270_v19 = vmul.f32 %v268_v48, %v2033_v51  ;;  %v525_v31 = vld [vmem:[%s524_s28] sm:$0x3]  ;;  %s1535_s28 = sld [smem:[#allocation2 + $0x2f]] }
 0x12d   :  { %v2164_v16 = vpop.permute.xlu0 %495  ;;  %911 = vperm.xlu1 %1620, %v1892_v20   ;;  %v2201_v21 = vld [vmem:[%s460_s29] sm:$0x3]  ;;  %v287_v51 = vrot.slane %v276_v27, 1  ;;  %v536_v43 = vrot.slane %v525_v31, 1  ;;  %v499_v27 = vrot.slane %v487_v8, 1  ;;  %v530_v37 = vmul.f32 %v2094_v35, %v525_v31  ;;  %s1004_s29 = scalar_lea.vmem [#allocation6], %s1533_s24 }
 0x12e   :  { %v271_v59 = vadd.f32 %v270_v19, %v262_v14  ;;  %v309_v31 = vadd.f32 %v308_v23, %v300_v30  ;;  %v2505_v23 = vld [vmem:[#allocation29_spill] sm:$0xff]  ;;  %s690_s20 = scalar_lea.vmem [#allocation6], %s1518_s15  ;;  %s1547_s24 = sld [smem:[#allocation2 + $0x3b]] }
 0x12f   :  { %v2173_v6 = vpop.permute.xlu1 %513  ;;  %v289_v32 = vmul.f32 %v287_v51, %v2039_v53  ;;  %s709_s21 = scalar_lea.vmem [#allocation6], %s1519_s16  ;;  %s902_s16 = scalar_lea.vmem [#allocation6], %s1528_s13 }
 0x130   :  { %v519_v53 = vmul.f32 %v517_v34, %v2173_v6 }
 0x131   :  { %1621 = vset.pattern.permute.xlu1 %v2483_v61  ;;  %v2181_v57 = vpop.permute.xlu0 %745 }
 0x132   :  { %2501 = vst [vmem:[#allocation35_spill] sm:$0xff] %v2181_v57  ;;  %924 = vperm.xlu1 %1621, %v1892_v20   ;;  %v244_v57 = vmul.f32 %v2020_v46, %v238_v47  ;;  %v2209_v46 = vsub.s32 0, %v2188_v62  ;;  %v442_v47 = vld [vmem:[%s441_s30] sm:$0x3]  ;;  %s774_s30 = scalar_lea.vmem [#allocation6], %s1522_s0 }
 0x133   :  { %v453_v61 = vrot.slane %v442_v47, 1  ;;  %v756_v62 = vld [vmem:[%s755_s25] sm:$0x3]  ;;  %s1534_s25 = sld [smem:[#allocation2 + $0x2e]] }
 0x134   :  { %v533_v39 = vpop.permute.xlu1 %532  ;;  %v253_v48 = vadd.f32 %v252_v3, %v244_v57  ;;  %v557_v3 = vmul.f32 %v555_v10, %v1948_v25  ;;  %v206_v57 = vmul.f32 %v204_v2, %v2005_v42  ;;  %v383_v25 = vmul.f32 %v2073_v41, %v378_v36 }
 0x135   :  { %v2204_v0 = vpop.permute.xlu0 %994  ;;  %v290_v42 = vadd.f32 %v289_v32, %v281_v29  ;;  %v455_v36 = vmul.f32 %v453_v61, %v2104_v7  ;;  %v511_v41 = vmul.f32 %v2151_v1, %v506_v54  ;;  %v538_v22 = vmul.f32 %v536_v43, %v533_v39 }
 0x136   :  { %2503 = vst [vmem:[#allocation37_spill] sm:$0xff] %v2204_v0  ;;  %1622 = vset.pattern.permute.xlu1 %v2496_v17  ;;  %v472_v0 = vrot.slane %v2201_v21, 1  ;;  %v391_v17 = vmul.f32 %v389_v15, %v2079_v5  ;;  %v272_v45 = vadd.f32 %v271_v59, %v253_v48  ;;  %v143_v15 = vadd.f32 %v142_v49, %v134_v11  ;;  %v2507_v49 = vld [vmem:[#allocation11_spill] sm:$0xff] }
 0x137   :  { %943 = vperm.xlu1 %1622, %v1892_v20   ;;  %v207_v14 = vadd.f32 %v206_v57, %v198_v24  ;;  %v501_v5 = vmul.f32 %v499_v27, %v2164_v16  ;;  %v447_v29 = vmul.f32 %v2098_v52, %v442_v47  ;;  %v493_v61 = vmul.f32 %v2130_v18, %v487_v8  ;;  %v2508_v27 = vld [vmem:[#allocation34_spill] sm:$0xff]  ;;  %v2509_v24 = vld [vmem:[#allocation15_spill] sm:$0xff] }
 0x138   :  { %v392_v2 = vadd.f32 %v391_v17, %v383_v25  ;;  %v291_v40 = vadd.f32 %v290_v42, %v272_v45  ;;  %v144_v34 = vadd.f32 %v143_v15, %v2155_v28  ;;  %v225_v17 = vmul.f32 %v223_v50, %v2013_v44 }
 0x139   :  { %v547_v13 = vpop.permute.xlu1 %546  ;;  %v2223_v60 = vpop.permute.xlu0 %1326  ;;  %v520_v35 = vadd.f32 %v519_v53, %v511_v41  ;;  %v456_v43 = vadd.f32 %v455_v36, %v447_v29  ;;  %v208_v7 = vadd.f32 %v207_v14, %v2065_v58  ;;  %v502_v44 = vadd.f32 %v501_v5, %v493_v61  ;;  %v2512_v5 = vld [vmem:[#allocation18_spill] sm:$0xff] }
 0x13a   :  { %v549_v54 = vmul.f32 %v547_v13, %v2170_v33  ;;  %v310_v1 = vadd.f32 %v309_v31, %v291_v40  ;;  %v539_v50 = vadd.f32 %v538_v22, %v530_v37  ;;  %v148_v18 = vrot.slane %v144_v34, %v2209_v46  ;;  %v2513_v22 = vld [vmem:[#allocation36_spill] sm:$0xff] }
 0x13b   :  { %1623 = vset.pattern.permute.xlu1 %v2487_v9  ;;  %v474_v16 = vmul.f32 %v472_v0, %v2504_v12  ;;  %v521_v6 = vadd.f32 %v520_v35, %v502_v44  ;;  %v457_v10 = vadd.f32 %v456_v43, %v2505_v23  ;;  %v570_v0 = vld [vmem:[%s569_s2] sm:$0x3]  ;;  %v2278_v59 = vsel %vm51_vm1, 1.0, %v1740_v4  ;;  %s1526_s2 = sld [smem:[#allocation2 + $0x26]] }
 0x13c   :  { %948 = vperm.xlu1 %1623, %v1892_v20   ;;  %v558_v58 = vadd.f32 %v557_v3, %v549_v54  ;;  %v314_v51 = vrot.slane %v310_v1, %v2209_v46  ;;  %v582_v48 = vrot.slane %v570_v0, 1  ;;  %v594_v25 = vmul.f32 %v2509_v24, %v2508_v27 }
 0x13d   :  { %v540_v47 = vadd.f32 %v539_v50, %v521_v6  ;;  %v2289_v42 = vsel %vm54_vm3, 1.0, %v1740_v4  ;;  %v2510_v53 = vrot.slane %v2508_v27, 1  ;;  %v2511_v40 = vmov 2   ;;  %v2518_v27 = vld [vmem:[#allocation21_spill] sm:$0xff] }
 0x13e   :  { %v215_v11 = vpop.permute.xlu0 %214  ;;  %v2242_v38 = vpop.permute.xlu1 %573  ;;  %v315_v41 = vmul.f32 %v2278_v59, %v314_v51  ;;  %v2301_v34 = vsel %vm57_vm4, 1.0, %v1740_v4  ;;  %v2308_v43 = vsel %vm60_vm5, 1.0, %v1740_v4  ;;  %v2515_v44 = vmov 3   ;;  %v1661_v51 = vld [vmem:[%s2438_s1 + $0xb] sm:$0x1] }
 0x13f   :  { %v217_v55 = vmul.f32 %v215_v11, %v2192_v56  ;;  %v393_v56 = vadd.f32 %v392_v2, %v2071_v63  ;;  %v2266_v63 = vsel %vm45_vm0, 1.0, %v1740_v4  ;;  %v559_v15 = vadd.f32 %v558_v58, %v540_v47 }
 0x140   :  { %1624 = vset.pattern.permute.xlu1 %v2499_v26  ;;  %v149_v45 = vmul.f32 %v2266_v63, %v148_v18  ;;  %v2514_v11 = vrot.slane %v2513_v22, 1  ;;  %v576_v31 = vmul.f32 %v2242_v38, %v570_v0  ;;  %v2516_v0 = vmov 6  }
 0x141   :  { %v226_v52 = vadd.f32 %v225_v17, %v217_v55  ;;  %967 = vperm.xlu1 %1624, %v1892_v20   ;;  %v2261_v20 = vsel %vm48_vm2, 1.0, %v1740_v4  ;;  %v397_v3 = vrot.slane %v393_v56, %v2209_v46  ;;  %v563_v17 = vrot.slane %v559_v15, %v2209_v46 }
 0x142   :  { %v464_v8 = vpop.permute.xlu0 %463  ;;  %v621_v29 = vmul.f32 %v2514_v11, %v2512_v5 }
 0x143   :  { %v227_v13 = vadd.f32 %v226_v52, %v208_v7  ;;  %v466_v28 = vmul.f32 %v464_v8, %v2201_v21  ;;  %v579_v33 = vpop.permute.xlu1 %578  ;;  %v2506_v21 = vmov 0   ;;  %v398_v55 = vmul.f32 %v2289_v42, %v397_v3 }
 0x144   :  { %v584_v36 = vmul.f32 %v582_v48, %v579_v33  ;;  %v564_v18 = vmul.f32 %v2308_v43, %v563_v17 }
 0x145   :  { %v231_v19 = vrot.slane %v227_v13, %v2209_v46  ;;  %v475_v39 = vadd.f32 %v474_v16, %v466_v28  ;;  %1625 = vset.pattern.permute.xlu1 %v2506_v21  ;;  %v627_v16 = vld [vmem:[%s626_s10] sm:$0x3]  ;;  %s838_s10 = scalar_lea.vmem [#allocation6], %s1525_s6  ;;  %s1537_s6 = sld [smem:[#allocation2 + $0x31]] }
 0x146   :  { %989 = vperm.xlu1 %1625, %v2507_v49   ;;  %v585_v52 = vadd.f32 %v584_v36, %v576_v31  ;;  %v638_v33 = vrot.slane %v627_v16, 1  ;;  %v2520_v36 = vmov 1   ;;  %v710_v31 = vld [vmem:[%s709_s21] sm:$0x3]  ;;  %s1531_s21 = sld [smem:[#allocation2 + $0x2b]] }
 0x147   :  { %v232_v57 = vmul.f32 %v2261_v20, %v231_v19  ;;  %v476_v32 = vadd.f32 %v475_v39, %v457_v10  ;;  %v653_v10 = vld [vmem:[%s652_s11] sm:$0x3]  ;;  %s857_s11 = scalar_lea.vmem [#allocation6], %s1526_s2  ;;  %s1538_s2 = sld [smem:[#allocation2 + $0x32]] }
 0x148   :  { %v597_v30 = vpop.permute.xlu1 %596  ;;  %v672_v19 = vld [vmem:[%s671_s12] sm:$0x3]  ;;  %v659_v24 = vmul.f32 %v2518_v27, %v653_v10  ;;  %s1527_s12 = sld [smem:[#allocation2 + $0x27]] }
 0x149   :  { %v602_v14 = vmul.f32 %v2510_v53, %v597_v30  ;;  %v233_v2 = vadd.f32 %v232_v57, %v149_v45  ;;  %v480_v37 = vrot.slane %v476_v32, %v2209_v46  ;;  %v683_v47 = vrot.slane %v672_v19, 1  ;;  %v2517_v45 = vld [vmem:[#allocation12_spill] sm:$0xff] }
 0x14a   :  { %1626 = vset.pattern.permute.xlu1 %v2511_v40  ;;  %v2324_v57 = vsel %vm63_vm6, 1.0, %v1740_v4 }
 0x14b   :  { %1007 = vperm.xlu1 %1626, %v2507_v49   ;;  %v603_v61 = vadd.f32 %v602_v14, %v594_v25  ;;  %v316_v35 = vadd.f32 %v315_v41, %v233_v2  ;;  %v481_v7 = vmul.f32 %v2301_v34, %v480_v37  ;;  %v2519_v25 = vld [vmem:[#allocation25_spill] sm:$0xff]  ;;  %s1087_s8 = scalar_lea.vmem [#allocation6], %s1537_s6 }
 0x14c   :  { %v685_v15 = vmul.f32 %v683_v47, %v2519_v25  ;;  %s959_s23 = scalar_lea.vmem [#allocation6], %s1531_s21  ;;  %s1543_s21 = sld [smem:[#allocation2 + $0x37]] }
 0x14d   :  { %v611_v54 = vpop.permute.xlu1 %610  ;;  %v399_v1 = vadd.f32 %v398_v55, %v316_v35  ;;  %v604_v50 = vadd.f32 %v603_v61, %v585_v52  ;;  %v691_v55 = vld [vmem:[%s690_s20] sm:$0x3]  ;;  %s1530_s20 = sld [smem:[#allocation2 + $0x2a]]  ;;  %s1106_s9 = scalar_lea.vmem [#allocation6], %s1538_s2 }
 0x14e   :  { %v613_v56 = vmul.f32 %v611_v54, %v2513_v22  ;;  %v1662_v22 = vld [vmem:[%s2438_s1 + $0xc] sm:$0x1]  ;;  %v702_v17 = vrot.slane %v691_v55, 1  ;;  %v713_v54 = vpop.permute.xlu0 %712  ;;  %s876_s15 = scalar_lea.vmem [#allocation6], %s1527_s12  ;;  %s1541_s12 = sld [smem:[#allocation2 + $0x35]] }
 0x14f   :  { %1627 = vset.pattern.permute.xlu1 %v2515_v44  ;;  %v482_v38 = vadd.f32 %v481_v7, %v399_v1  ;;  %v737_v7 = vld [vmem:[%s736_s22] sm:$0x3]  ;;  %v721_v1 = vrot.slane %v710_v31, 1 }
 0x150   :  { %v622_v8 = vadd.f32 %v621_v29, %v613_v56  ;;  %1012 = vperm.xlu1 %1627, %v2507_v49   ;;  %v2521_v56 = vmov 4  }
 0x151   :  { %v565_v12 = vadd.f32 %v564_v18, %v482_v38  ;;  %v749_v38 = vrot.slane %v737_v7, 1 }
 0x152   :  { %v623_v13 = vadd.f32 %v622_v8, %v604_v50  ;;  %v630_v28 = vpop.permute.xlu1 %629  ;;  %v715_v8 = vmul.f32 %v713_v54, %v710_v31  ;;  %v820_v54 = vld [vmem:[%s819_s7] sm:$0x3]  ;;  %s1068_s7 = scalar_lea.vmem [#allocation6], %s1536_s5 }
 0x153   :  { %v632_v58 = vmul.f32 %v630_v28, %v627_v16  ;;  %v2522_v16 = vld [vmem:[#allocation35_spill] sm:$0xff]  ;;  %s940_s22 = scalar_lea.vmem [#allocation6], %s1530_s20 }
 0x154   :  { %1628 = vset.pattern.permute.xlu1 %v2487_v9 }
 0x155   :  { %1031 = vperm.xlu1 %1628, %v2507_v49   ;;  %v665_v49 = vrot.slane %v653_v10, 1  ;;  %v2342_v10 = vsel %vm66_vm7, 1.0, %v1740_v4  ;;  %v2351_v4 = vld [vmem:[%s2438_s1 + $0xd] sm:$0x1] }
 0x157   :  { %v635_v6 = vpop.permute.xlu1 %634 }
 0x158   :  { %v640_v23 = vmul.f32 %v638_v33, %v635_v6  ;;  %v751_v33 = vmul.f32 %v749_v38, %v2522_v16 }
 0x159   :  { %1629 = vset.pattern.permute.xlu1 %v2516_v0 }
 0x15a   :  { %v641_v39 = vadd.f32 %v640_v23, %v632_v58  ;;  %1045 = vperm.xlu1 %1629, %v1661_v51  }
 0x15c   :  { %v642_v48 = vadd.f32 %v641_v39, %v623_v13  ;;  %v662_v3 = vpop.permute.xlu1 %661 }
 0x15d   :  { %v667_v30 = vmul.f32 %v665_v49, %v662_v3  ;;  %v767_v49 = vrot.slane %v756_v62, 1  ;;  %v775_v3 = vld [vmem:[%s774_s30] sm:$0x3]  ;;  %s1023_s30 = scalar_lea.vmem [#allocation6], %s1534_s25  ;;  %s1549_s25 = sld [smem:[#allocation2 + $0x3d]] }
 0x15e   :  { %v646_v32 = vrot.slane %v642_v48, %v2209_v46  ;;  %1631 = vset.pattern.permute.xlu1 %v2506_v21  ;;  %v786_v25 = vrot.slane %v775_v3, 1 }
 0x15f   :  { %1072 = vperm.xlu1 %1631, %v2517_v45   ;;  %v668_v41 = vadd.f32 %v667_v30, %v659_v24  ;;  %v794_v24 = vld [vmem:[%s793_s4] sm:$0x3]  ;;  %v2523_v30 = vld [vmem:[#allocation30_spill] sm:$0xff]  ;;  %s1042_s4 = scalar_lea.vmem [#allocation6], %s1535_s28  ;;  %s1550_s28 = sld [smem:[#allocation2 + $0x3e]] }
 0x160   :  { %v647_v53 = vmul.f32 %v2324_v57, %v646_v32 }
 0x161   :  { %v675_v14 = vpop.permute.xlu1 %674 }
 0x162   :  { %v677_v2 = vmul.f32 %v675_v14, %v672_v19  ;;  %v648_v37 = vadd.f32 %v647_v53, %v565_v12  ;;  %v780_v53 = vmul.f32 %v2523_v30, %v775_v3  ;;  %v805_v14 = vrot.slane %v794_v24, 1  ;;  %v877_v3 = vld [vmem:[%s876_s15] sm:$0x3]  ;;  %s1170_s15 = scalar_lea.vmem [#allocation6], %s1541_s12 }
 0x163   :  { %1632 = vset.pattern.permute.xlu1 %v2520_v36  ;;  %s1336_s5 = scalar_lea.vmem [#allocation6], %s1549_s25 }
 0x164   :  { %v686_v5 = vadd.f32 %v685_v15, %v677_v2  ;;  %1077 = vperm.xlu1 %1632, %v1662_v22  }
 0x165   :  { %s1355_s6 = scalar_lea.vmem [#allocation6], %s1550_s28 }
 0x166   :  { %v687_v11 = vadd.f32 %v686_v5, %v668_v41  ;;  %v694_v29 = vpop.permute.xlu1 %693 }
 0x167   :  { %v696_v52 = vmul.f32 %v694_v29, %v691_v55 }
 0x168   :  { %1634 = vset.pattern.permute.xlu1 %v2515_v44 }
 0x169   :  { %1095 = vperm.xlu1 %1634, %v1662_v22  }
 0x16b   :  { %v699_v61 = vpop.permute.xlu1 %698 }
 0x16c   :  { %v704_v35 = vmul.f32 %v702_v17, %v699_v61 }
 0x16d   :  { %1635 = vset.pattern.permute.xlu1 %v2521_v56 }
 0x16e   :  { %1109 = vperm.xlu1 %1635, %v1662_v22   ;;  %v705_v50 = vadd.f32 %v704_v35, %v696_v52  ;;  %v2368_v52 = vld [vmem:[%s2438_s1 + $0xe] sm:$0x1] }
 0x170   :  { %v718_v18 = vpop.permute.xlu1 %717  ;;  %v706_v28 = vadd.f32 %v705_v50, %v687_v11 }
 0x171   :  { %v723_v13 = vmul.f32 %v721_v1, %v718_v18  ;;  %v839_v1 = vld [vmem:[%s838_s10] sm:$0x3]  ;;  %s1539_s10 = sld [smem:[#allocation2 + $0x33]] }
 0x172   :  { %1637 = vset.pattern.permute.xlu1 %v2516_v0  ;;  %v858_v18 = vld [vmem:[%s857_s11] sm:$0x3]  ;;  %s1540_s11 = sld [smem:[#allocation2 + $0x34]] }
 0x173   :  { %v724_v12 = vadd.f32 %v723_v13, %v715_v8  ;;  %1128 = vperm.xlu1 %1637, %v1662_v22   ;;  %v850_v13 = vrot.slane %v839_v1, 1  ;;  %v869_v16 = vrot.slane %v858_v18, 1 }
 0x175   :  { %v725_v6 = vadd.f32 %v724_v12, %v706_v28  ;;  %v741_v58 = vpop.permute.xlu1 %740 }
 0x176   :  { %v743_v23 = vmul.f32 %v741_v58, %v737_v7  ;;  %v832_v7 = vrot.slane %v820_v54, 1 }
 0x177   :  { %1638 = vset.pattern.permute.xlu1 %v2499_v26  ;;  %v729_v19 = vrot.slane %v725_v6, %v2209_v46  ;;  %s1125_s13 = scalar_lea.vmem [#allocation6], %s1539_s10 }
 0x178   :  { %v752_v39 = vadd.f32 %v751_v33, %v743_v23  ;;  %1133 = vperm.xlu1 %1638, %v1662_v22   ;;  %v2524_v22 = vld [vmem:[#allocation13_spill] sm:$0xff]  ;;  %v2526_v23 = vld [vmem:[#allocation19_spill] sm:$0xff]  ;;  %s1151_s14 = scalar_lea.vmem [#allocation6], %s1540_s11 }
 0x179   :  { %v730_v51 = vmul.f32 %v2342_v10, %v729_v19  ;;  %v807_v11 = vmul.f32 %v805_v14, %v2524_v22  ;;  %v871_v19 = vmul.f32 %v869_v16, %v2526_v23  ;;  %v2529_v23 = vld [vmem:[#allocation37_spill] sm:$0xff] }
 0x17a   :  { %v759_v47 = vpop.permute.xlu1 %758 }
 0x17b   :  { %v731_v48 = vadd.f32 %v730_v51, %v648_v37  ;;  %v761_v45 = vmul.f32 %v759_v47, %v756_v62 }
 0x17c   :  { %1639 = vset.pattern.permute.xlu1 %v2520_v36 }
 0x17d   :  { %1160 = vperm.xlu1 %1639, %v2351_v4   ;;  %732 = vst [vmem:[#allocation7] sm:$0xff] %v731_v48 }
 0x17f   :  { %v764_v32 = vpop.permute.xlu1 %763 }
 0x180   :  { %v769_v27 = vmul.f32 %v767_v49, %v764_v32  ;;  %v888_v32 = vrot.slane %v877_v3, 1 }
 0x181   :  { %1640 = vset.pattern.permute.xlu1 %v2511_v40 }
 0x182   :  { %v770_v15 = vadd.f32 %v769_v27, %v761_v45  ;;  %1173 = vperm.xlu1 %1640, %v2351_v4   ;;  %v903_v45 = vld [vmem:[%s902_s16] sm:$0x3]  ;;  %s1544_s16 = sld [smem:[#allocation2 + $0x38]] }
 0x183   :  { %v915_v30 = vrot.slane %v903_v45, 1 }
 0x184   :  { %v771_v2 = vadd.f32 %v770_v15, %v752_v39  ;;  %v783_v37 = vpop.permute.xlu1 %782  ;;  %v922_v15 = vld [vmem:[%s921_s17] sm:$0x3]  ;;  %s1545_s17 = sld [smem:[#allocation2 + $0x39]] }
 0x185   :  { %v788_v41 = vmul.f32 %v786_v25, %v783_v37 }
 0x186   :  { %1641 = vset.pattern.permute.xlu1 %v2521_v56 }
 0x187   :  { %v789_v5 = vadd.f32 %v788_v41, %v780_v53  ;;  %1192 = vperm.xlu1 %1641, %v2351_v4   ;;  %v1665_v53 = vld [vmem:[%s2438_s1 + $0xf] sm:$0x1]  ;;  %s1532_s1 = sld [smem:[#allocation2 + $0x2c]] }
 0x188   :  { %s1234_s19 = scalar_lea.vmem [#allocation6], %s1544_s16 }
 0x189   :  { %v790_v29 = vadd.f32 %v789_v5, %v771_v2  ;;  %v797_v55 = vpop.permute.xlu1 %796  ;;  %v933_v2 = vrot.slane %v922_v15, 1 }
 0x18a   :  { %v799_v17 = vmul.f32 %v797_v55, %v794_v24  ;;  %s1253_s20 = scalar_lea.vmem [#allocation6], %s1545_s17 }
 0x18b   :  { %1642 = vset.pattern.permute.xlu1 %v2487_v9 }
 0x18c   :  { %v808_v31 = vadd.f32 %v807_v11, %v799_v17  ;;  %1197 = vperm.xlu1 %1642, %v2351_v4  }
 0x18d   :  { %s985_s0 = scalar_lea.vmem [#allocation6], %s1532_s1  ;;  %s1546_s1 = sld [smem:[#allocation2 + $0x3a]] }
 0x18e   :  { %v2362_v61 = vadd.f32 %v808_v31, %v790_v29  ;;  %v824_v35 = vpop.permute.xlu1 %823  ;;  %v2528_v29 = vld [vmem:[#allocation26_spill] sm:$0xff] }
 0x18f   :  { %v826_v8 = vmul.f32 %v824_v35, %v820_v54  ;;  %v935_v55 = vmul.f32 %v933_v2, %v2528_v29 }
 0x190   :  { %1644 = vset.pattern.permute.xlu1 %v2520_v36  ;;  %v2525_v36 = vld [vmem:[#allocation16_spill] sm:$0xff]  ;;  %v813_v37 = vrot.slane %v2362_v61, %v2209_v46 }
 0x191   :  { %1243 = vperm.xlu1 %1644, %v2368_v52   ;;  %v844_v12 = vmul.f32 %v2525_v36, %v839_v1 }
 0x192   :  { %v814_v17 = vmul.f32 %v2266_v63, %v813_v37  ;;  %v960_v63 = vld [vmem:[%s959_s23] sm:$0x3]  ;;  %s1208_s23 = scalar_lea.vmem [#allocation6], %s1543_s21 }
 0x193   :  { %v829_v50 = vpop.permute.xlu1 %828 }
 0x194   :  { %v834_v38 = vmul.f32 %v832_v7, %v829_v50 }
 0x195   :  { %1645 = vset.pattern.permute.xlu1 %v2511_v40 }
 0x196   :  { %v835_v28 = vadd.f32 %v834_v38, %v826_v8  ;;  %1256 = vperm.xlu1 %1645, %v2368_v52  }
 0x198   :  { %v847_v33 = vpop.permute.xlu1 %846 }
 0x199   :  { %v852_v6 = vmul.f32 %v850_v13, %v847_v33  ;;  %v963_v13 = vpop.permute.xlu0 %962 }
 0x19a   :  { %1647 = vset.pattern.permute.xlu1 %v2516_v0 }
 0x19b   :  { %v853_v58 = vadd.f32 %v852_v6, %v844_v12  ;;  %1211 = vperm.xlu1 %1647, %v2351_v4   ;;  %v965_v12 = vmul.f32 %v963_v13, %v960_v63  ;;  %v2532_v13 = vld [vmem:[#allocation17_spill] sm:$0xff] }
 0x19d   :  { %v854_v39 = vadd.f32 %v853_v58, %v835_v28  ;;  %v861_v51 = vpop.permute.xlu1 %860  ;;  %v986_v28 = vld [vmem:[%s985_s0] sm:$0x3]  ;;  %s1272_s0 = scalar_lea.vmem [#allocation6], %s1546_s1 }
 0x19e   :  { %v863_v47 = vmul.f32 %v861_v51, %v858_v18  ;;  %v998_v16 = vrot.slane %v986_v28, 1 }
 0x19f   :  { %1648 = vset.pattern.permute.xlu1 %v2499_v26 }
 0x1a0   :  { %v872_v62 = vadd.f32 %v871_v19, %v863_v47  ;;  %1216 = vperm.xlu1 %1648, %v2351_v4   ;;  %v1000_v19 = vmul.f32 %v998_v16, %v2529_v23 }
 0x1a2   :  { %v873_v48 = vadd.f32 %v872_v62, %v854_v39  ;;  %v880_v49 = vpop.permute.xlu1 %879 }
 0x1a3   :  { %v882_v24 = vmul.f32 %v880_v49, %v877_v3 }
 0x1a4   :  { %1650 = vset.pattern.permute.xlu1 %v2487_v9  ;;  %v2527_v9 = vld [vmem:[#allocation22_spill] sm:$0xff] }
 0x1a5   :  { %1280 = vperm.xlu1 %1650, %v2368_v52   ;;  %v909_v14 = vmul.f32 %v2527_v9, %v903_v45  ;;  %v1024_v45 = vld [vmem:[%s1023_s30] sm:$0x3]  ;;  %s1291_s30 = scalar_lea.vmem [#allocation6], %s1547_s24 }
 0x1a7   :  { %v885_v27 = vpop.permute.xlu1 %884 }
 0x1a8   :  { %v890_v25 = vmul.f32 %v888_v32, %v885_v27 }
 0x1a9   :  { %1651 = vset.pattern.permute.xlu1 %v2506_v21 }
 0x1aa   :  { %v891_v4 = vadd.f32 %v890_v25, %v882_v24  ;;  %1321 = vperm.xlu1 %1651, %v1665_v53  }
 0x1ac   :  { %v892_v41 = vadd.f32 %v891_v4, %v873_v48  ;;  %v912_v5 = vpop.permute.xlu1 %911  ;;  %v1043_v4 = vld [vmem:[%s1042_s4] sm:$0x3]  ;;  %s1551_s4 = sld [smem:[#allocation2 + $0x3f]] }
 0x1ad   :  { %v917_v22 = vmul.f32 %v915_v30, %v912_v5  ;;  %v1054_v2 = vrot.slane %v1043_v4, 1 }
 0x1ae   :  { %v896_v11 = vrot.slane %v892_v41, %v2209_v46  ;;  %1653 = vset.pattern.permute.xlu1 %v2511_v40  ;;  %v941_v40 = vld [vmem:[%s940_s22] sm:$0x3]  ;;  %s1189_s22 = scalar_lea.vmem [#allocation6], %s1542_s18 }
 0x1af   :  { %v918_v21 = vadd.f32 %v917_v22, %v909_v14  ;;  %1339 = vperm.xlu1 %1653, %v1665_v53   ;;  %v952_v8 = vrot.slane %v941_v40, 1  ;;  %v2531_v22 = vld [vmem:[#allocation14_spill] sm:$0xff] }
 0x1b0   :  { %v897_v31 = vmul.f32 %v2261_v20, %v896_v11  ;;  %v1056_v11 = vmul.f32 %v1054_v2, %v2531_v22 }
 0x1b1   :  { %v925_v35 = vpop.permute.xlu1 %924 }
 0x1b2   :  { %v898_v61 = vadd.f32 %v897_v31, %v814_v17  ;;  %v927_v54 = vmul.f32 %v925_v35, %v922_v15  ;;  %v1035_v15 = vrot.slane %v1024_v45, 1  ;;  %v1069_v31 = vld [vmem:[%s1068_s7] sm:$0x3]  ;;  %s1374_s7 = scalar_lea.vmem [#allocation6], %s1551_s4 }
 0x1b3   :  { %1654 = vset.pattern.permute.xlu1 %v2515_v44  ;;  %v971_v44 = vrot.slane %v960_v63, 1 }
 0x1b4   :  { %v936_v7 = vadd.f32 %v935_v55, %v927_v54  ;;  %1344 = vperm.xlu1 %1654, %v1665_v53  }
 0x1b6   :  { %v937_v1 = vadd.f32 %v936_v7, %v918_v21  ;;  %v944_v50 = vpop.permute.xlu1 %943 }
 0x1b7   :  { %v946_v38 = vmul.f32 %v944_v50, %v941_v40 }
 0x1b8   :  { %1655 = vset.pattern.permute.xlu1 %v2499_v26 }
 0x1b9   :  { %1299 = vperm.xlu1 %1655, %v2368_v52  }
 0x1bb   :  { %v949_v20 = vpop.permute.xlu1 %948 }
 0x1bc   :  { %v954_v18 = vmul.f32 %v952_v8, %v949_v20 }
 0x1bd   :  { %1656 = vset.pattern.permute.xlu1 %v2521_v56 }
 0x1be   :  { %v955_v36 = vadd.f32 %v954_v18, %v946_v38  ;;  %1358 = vperm.xlu1 %1656, %v1665_v53   ;;  %v1107_v38 = vld [vmem:[%s1106_s9] sm:$0x3] }
 0x1c0   :  { %v956_v33 = vadd.f32 %v955_v36, %v937_v1  ;;  %v968_v6 = vpop.permute.xlu1 %967  ;;  %v1088_v1 = vld [vmem:[%s1087_s8] sm:$0x3]  ;;  %v1118_v36 = vrot.slane %v1107_v38, 1  ;;  %s1741_s8 = smov [#allocation7]  }
 0x1c1   :  { %v973_v58 = vmul.f32 %v971_v44, %v968_v6  ;;  %v1099_v63 = vrot.slane %v1088_v1, 1  ;;  %s1404_s9 = sshll.u32 %s1741_s8, 4  ;;  %s1405_s9 = int_to_ptr.vmem [resolvable:$true] %s1404_s9 }
 0x1c2   :  { %1658 = vset.pattern.permute.xlu1 %v2516_v0  ;;  %v1005_v0 = vld [vmem:[%s1004_s29] sm:$0x3]  ;;  %s1548_s29 = sld [smem:[#allocation2 + $0x3c]]  ;;  %s1700_s10 = scalar_lea.vmem %s1405_s9, 256 }
 0x1c3   :  { %v974_v52 = vadd.f32 %v973_v58, %v965_v12  ;;  %1377 = vperm.xlu1 %1658, %v1665_v53   ;;  %v1016_v32 = vrot.slane %v1005_v0, 1  ;;  %p1701_p13 = scmp.ne.s32.totalorder %s1405_s9, %s1700_s10  ;;  %p1705_p0 = scmp.lt.s32.totalorder %s1405_s9, %s1405_s9 }
 0x1c4   :  { %p1706_p1 = scmp.lt.s32.totalorder %s1700_s10, %s1700_s10 }
 0x1c5   :  { %v975_v39 = vadd.f32 %v974_v52, %v956_v33  ;;  %v990_v51 = vpop.permute.xlu1 %989 }
 0x1c6   :  { %v992_v47 = vmul.f32 %v990_v51, %v986_v28  ;;  %v1093_v28 = vmul.f32 %v2532_v13, %v1088_v1  ;;  %v1209_v13 = vld [vmem:[%s1208_s23] sm:$0x3]  ;;  %p1707_p2 = por %p1706_p1, %p1705_p0 }
 0x1c7   :  { %v979_v56 = vrot.slane %v975_v39, %v2209_v46  ;;  %1659 = vset.pattern.permute.xlu1 %v2499_v26  ;;  %v2530_v26 = vld [vmem:[#allocation31_spill] sm:$0xff]  ;;  %v1126_v39 = vld [vmem:[%s1125_s13] sm:$0x3] }
 0x1c8   :  { %v1001_v62 = vadd.f32 %v1000_v19, %v992_v47  ;;  %1382 = vperm.xlu1 %1659, %v1665_v53   ;;  %v1029_v9 = vmul.f32 %v2530_v26, %v1024_v45  ;;  %v1137_v51 = vrot.slane %v1126_v39, 1  ;;  %s1317_s2 = scalar_lea.vmem [#allocation6], %s1548_s29  ;;  %p1708_p3 = pnand %p1707_p2, %p1701_p13 }
 0x1c9   :  { %v980_v48 = vmul.f32 %v2278_v59, %v979_v56 }
 0x1ca   :  { %v1008_v49 = vpop.permute.xlu1 %1007 }
 0x1cb   :  { %v981_v3 = vadd.f32 %v980_v48, %v898_v61  ;;  %v1010_v24 = vmul.f32 %v1008_v49, %v1005_v0  ;;  %v1081_v61 = vrot.slane %v1069_v31, 1  ;;  %v1152_v49 = vld [vmem:[%s1151_s14] sm:$0x3] }
 0x1cf   :  { %v1013_v27 = vpop.permute.xlu1 %1012 }
 0x1d0   :  { %v1018_v25 = vmul.f32 %v1016_v32, %v1013_v27  ;;  %v1164_v32 = vrot.slane %v1152_v49, 1 }
 0x1d2   :  { %v1019_v30 = vadd.f32 %v1018_v25, %v1010_v24 }
 0x1d4   :  { %v1020_v14 = vadd.f32 %v1019_v30, %v1001_v62  ;;  %v1032_v53 = vpop.permute.xlu1 %1031 }
 0x1d5   :  { %v1037_v59 = vmul.f32 %v1035_v15, %v1032_v53 }
 0x1d7   :  { %v1038_v37 = vadd.f32 %v1037_v59, %v1029_v9  ;;  %v2535_v9 = vld [vmem:[#allocation27_spill] sm:$0xff] }
 0x1d9   :  { %v1039_v41 = vadd.f32 %v1038_v37, %v1020_v14  ;;  %v1046_v5 = vpop.permute.xlu1 %1045 }
 0x1da   :  { %v1048_v21 = vmul.f32 %v1046_v5, %v1043_v4  ;;  %v2534_v4 = vld [vmem:[#allocation23_spill] sm:$0xff] }
 0x1db   :  { %v1158_v26 = vmul.f32 %v2534_v4, %v1152_v49 }
 0x1dc   :  { %v1057_v29 = vadd.f32 %v1056_v11, %v1048_v21  ;;  %v1235_v11 = vld [vmem:[%s1234_s19] sm:$0x3] }
 0x1dd   :  { %v1247_v21 = vrot.slane %v1235_v11, 1 }
 0x1de   :  { %v1058_v55 = vadd.f32 %v1057_v29, %v1039_v41  ;;  %v1073_v17 = vpop.permute.xlu1 %1072 }
 0x1df   :  { %v1075_v50 = vmul.f32 %v1073_v17, %v1069_v31  ;;  %v1190_v31 = vld [vmem:[%s1189_s22] sm:$0x3] }
 0x1e0   :  { %v1062_v35 = vrot.slane %v1058_v55, %v2209_v46 }
 0x1e2   :  { %v1063_v54 = vmul.f32 %v2289_v42, %v1062_v35  ;;  %v2533_v42 = vld [vmem:[#allocation20_spill] sm:$0xff] }
 0x1e3   :  { %v1078_v7 = vpop.permute.xlu1 %1077  ;;  %v1120_v6 = vmul.f32 %v1118_v36, %v2533_v42 }
 0x1e4   :  { %v1083_v40 = vmul.f32 %v1081_v61, %v1078_v7  ;;  %v1064_v8 = vadd.f32 %v1063_v54, %v981_v3  ;;  %v1171_v3 = vld [vmem:[%s1170_s15] sm:$0x3] }
 0x1e5   :  { %v1182_v27 = vrot.slane %v1171_v3, 1  ;;  %v2536_v61 = vld [vmem:[#allocation24_spill] sm:$0xff] }
 0x1e6   :  { %v1084_v20 = vadd.f32 %v1083_v40, %v1075_v50  ;;  %v1241_v54 = vmul.f32 %v2536_v61, %v1235_v11  ;;  %v2537_v7 = vld [vmem:[#allocation28_spill] sm:$0xff]  ;;  %v1201_v50 = vrot.slane %v1190_v31, 1 }
 0x1e7   :  { %v1184_v14 = vmul.f32 %v1182_v27, %v2535_v9  ;;  %v1292_v27 = vld [vmem:[%s1291_s30] sm:$0x3] }
 0x1e8   :  { %v1096_v18 = vpop.permute.xlu1 %1095  ;;  %v1356_v9 = vld [vmem:[%s1355_s6] sm:$0x3] }
 0x1e9   :  { %v1101_v44 = vmul.f32 %v1099_v63, %v1096_v18 }
 0x1eb   :  { %v1102_v12 = vadd.f32 %v1101_v44, %v1093_v28  ;;  %v1220_v44 = vrot.slane %v1209_v13, 1 }
 0x1ed   :  { %v1103_v16 = vadd.f32 %v1102_v12, %v1084_v20  ;;  %v1110_v33 = vpop.permute.xlu1 %1109 }
 0x1ee   :  { %v1112_v58 = vmul.f32 %v1110_v33, %v1107_v38 }
 0x1f0   :  { %v1121_v52 = vadd.f32 %v1120_v6, %v1112_v58 }
 0x1f2   :  { %v1122_v23 = vadd.f32 %v1121_v52, %v1103_v16  ;;  %v1129_v19 = vpop.permute.xlu1 %1128  ;;  %v1273_v16 = vld [vmem:[%s1272_s0] sm:$0x3] }
 0x1f3   :  { %v1131_v56 = vmul.f32 %v1129_v19, %v1126_v39  ;;  %v1284_v6 = vrot.slane %v1273_v16, 1  ;;  %v2538_v39 = vld [vmem:[#allocation33_spill] sm:$0xff] }
 0x1f7   :  { %v1134_v47 = vpop.permute.xlu1 %1133 }
 0x1f8   :  { %v1139_v62 = vmul.f32 %v1137_v51, %v1134_v47  ;;  %v1278_v51 = vmul.f32 %v2538_v39, %v1273_v16 }
 0x1fa   :  { %v1140_v48 = vadd.f32 %v1139_v62, %v1131_v56 }
 0x1fc   :  { %v1141_v0 = vadd.f32 %v1140_v48, %v1122_v23  ;;  %v1161_v45 = vpop.permute.xlu1 %1160 }
 0x1fd   :  { %v1166_v15 = vmul.f32 %v1164_v32, %v1161_v45 }
 0x1fe   :  { %v1145_v24 = vrot.slane %v1141_v0, %v2209_v46 }
 0x1ff   :  { %v1167_v2 = vadd.f32 %v1166_v15, %v1158_v26  ;;  %v1337_v26 = vld [vmem:[%s1336_s5] sm:$0x3] }
 0x200   :  { %v1146_v25 = vmul.f32 %v2301_v34, %v1145_v24  ;;  %v1254_v34 = vld [vmem:[%s1253_s20] sm:$0x3]  ;;  %v1303_v24 = vrot.slane %v1292_v27, 1 }
 0x201   :  { %v1174_v30 = vpop.permute.xlu1 %1173  ;;  %v1265_v55 = vrot.slane %v1254_v34, 1 }
 0x202   :  { %v1176_v53 = vmul.f32 %v1174_v30, %v1171_v3  ;;  %v1147_v59 = vadd.f32 %v1146_v25, %v1064_v8  ;;  %v1295_v25 = vpop.permute.xlu0 %1294 }
 0x203   :  { %v1267_v1 = vmul.f32 %v1265_v55, %v2537_v7  ;;  %v1297_v30 = vmul.f32 %v1295_v25, %v1292_v27 }
 0x204   :  { %v1185_v37 = vadd.f32 %v1184_v14, %v1176_v53  ;;  %v1348_v14 = vrot.slane %v1337_v26, 1  ;;  %v1318_v53 = vld [vmem:[%s1317_s2] sm:$0x3] }
 0x206   :  { %v1186_v41 = vadd.f32 %v1185_v37, %v1167_v2  ;;  %v1193_v5 = vpop.permute.xlu1 %1192  ;;  %v1367_v37 = vrot.slane %v1356_v9, 1 }
 0x207   :  { %v1195_v28 = vmul.f32 %v1193_v5, %v1190_v31  ;;  %v1364_v5 = vpop.permute.xlu0 %1363 }
 0x208   :  { %v1369_v55 = vmul.f32 %v1367_v37, %v1364_v5 }
 0x20b   :  { %v1198_v22 = vpop.permute.xlu1 %1197 }
 0x20c   :  { %v1203_v20 = vmul.f32 %v1201_v50, %v1198_v22  ;;  %v1330_v22 = vrot.slane %v1318_v53, 1 }
 0x20e   :  { %v1204_v36 = vadd.f32 %v1203_v20, %v1195_v28 }
 0x210   :  { %v1244_v29 = vpop.permute.xlu1 %1243  ;;  %v1205_v58 = vadd.f32 %v1204_v36, %v1186_v41 }
 0x211   :  { %v1249_v17 = vmul.f32 %v1247_v21, %v1244_v29 }
 0x213   :  { %v1250_v8 = vadd.f32 %v1249_v17, %v1241_v54  ;;  %v1332_v54 = vmul.f32 %v1330_v22, %v2223_v60 }
 0x215   :  { %v1257_v35 = vpop.permute.xlu1 %1256 }
 0x216   :  { %v1259_v40 = vmul.f32 %v1257_v35, %v1254_v34  ;;  %v1375_v35 = vld [vmem:[%s1374_s7] sm:$0x3] }
 0x218   :  { %v1268_v63 = vadd.f32 %v1267_v1, %v1259_v40  ;;  %v1386_v1 = vrot.slane %v1375_v35, 1 }
 0x21a   :  { %v1269_v38 = vadd.f32 %v1268_v63, %v1250_v8  ;;  %v1212_v18 = vpop.permute.xlu1 %1211 }
 0x21b   :  { %v1214_v33 = vmul.f32 %v1212_v18, %v1209_v13 }
 0x21f   :  { %v1217_v12 = vpop.permute.xlu1 %1216 }
 0x220   :  { %v1222_v42 = vmul.f32 %v1220_v44, %v1217_v12 }
 0x222   :  { %v1223_v52 = vadd.f32 %v1222_v42, %v1214_v33 }
 0x224   :  { %v1224_v23 = vadd.f32 %v1223_v52, %v1205_v58  ;;  %v1281_v19 = vpop.permute.xlu1 %1280 }
 0x225   :  { %v1286_v47 = vmul.f32 %v1284_v6, %v1281_v19 }
 0x226   :  { %v1228_v56 = vrot.slane %v1224_v23, %v2209_v46 }
 0x227   :  { %v1287_v62 = vadd.f32 %v1286_v47, %v1278_v51 }
 0x228   :  { %v1229_v48 = vmul.f32 %v2308_v43, %v1228_v56 }
 0x229   :  { %v1288_v49 = vadd.f32 %v1287_v62, %v1269_v38  ;;  %v1322_v3 = vpop.permute.xlu1 %1321 }
 0x22a   :  { %v1230_v0 = vadd.f32 %v1229_v48, %v1147_v59  ;;  %v1324_v21 = vmul.f32 %v1322_v3, %v1318_v53 }
 0x22c   :  { %v1333_v50 = vadd.f32 %v1332_v54, %v1324_v21 }
 0x22e   :  { %v1340_v32 = vpop.permute.xlu1 %1339 }
 0x22f   :  { %v1342_v29 = vmul.f32 %v1340_v32, %v1337_v26 }
 0x233   :  { %v1345_v45 = vpop.permute.xlu1 %1344 }
 0x234   :  { %v1350_v11 = vmul.f32 %v1348_v14, %v1345_v45 }
 0x236   :  { %v1351_v7 = vadd.f32 %v1350_v11, %v1342_v29 }
 0x238   :  { %v1300_v15 = vpop.permute.xlu1 %1299  ;;  %v1352_v63 = vadd.f32 %v1351_v7, %v1333_v50 }
 0x239   :  { %v1305_v4 = vmul.f32 %v1303_v24, %v1300_v15 }
 0x23b   :  { %v1306_v43 = vadd.f32 %v1305_v4, %v1297_v30 }
 0x23d   :  { %v1307_v59 = vadd.f32 %v1306_v43, %v1288_v49  ;;  %v1359_v2 = vpop.permute.xlu1 %1358 }
 0x23e   :  { %v1361_v17 = vmul.f32 %v1359_v2, %v1356_v9 }
 0x23f   :  { %v1311_v41 = vrot.slane %v1307_v59, %v2209_v46 }
 0x240   :  { %v1370_v40 = vadd.f32 %v1369_v55, %v1361_v17 }
 0x241   :  { %v1312_v34 = vmul.f32 %v2324_v57, %v1311_v41 }
 0x242   :  { %v1378_v31 = vpop.permute.xlu1 %1377  ;;  %v1371_v18 = vadd.f32 %v1370_v40, %v1352_v63 }
 0x243   :  { %v1313_v61 = vadd.f32 %v1312_v34, %v1230_v0  ;;  %v1380_v20 = vmul.f32 %v1378_v31, %v1375_v35 }
 0x247   :  { %v1383_v8 = vpop.permute.xlu1 %1382 }
 0x248   :  { %v1388_v38 = vmul.f32 %v1386_v1, %v1383_v8 }
 0x24a   :  { %v1389_v57 = vadd.f32 %v1388_v38, %v1380_v20 }
 0x24c   :  { %v1390_v13 = vadd.f32 %v1389_v57, %v1371_v18 }
 0x24e   :  { %v1394_v28 = vrot.slane %v1390_v13, %v2209_v46 }
 0x250   :  { %v1395_v44 = vmul.f32 %v2342_v10, %v1394_v28 }
 0x252   :  { %v1396_v36 = vadd.f32 %v1395_v44, %v1313_v61 }
 0x254   :  { %1398 = vst [vmem:[#allocation7 + $0x8] sm:$0xff] %v1396_v36 }
 0x255   :  { %1711 = shalt.err (!%p1708_p3)
}
 0x256   :  { %s1712_s13 = scalar_lea.hbm %s2440_s3, 256 }
 0x257   :  { %p1713_p4 = scmp.ne.s32.totalorder %s2440_s3, %s1712_s13  ;;  %p1716_p5 = scmp.lt.u32.totalorder %s1712_s13, %s2440_s3 }
 0x259   :  { %p1718_p6 = pnand %p1716_p5, %p1713_p4 }
 0x25b   :  { %1721 = shalt.err (!%p1718_p6)
}
 0x25c   :  { %1410 = dma.vmem_to_hbm [thread:$0]  %s1405_s9, 256, %s2440_s3, [#allocation4], %s1730_s26, %s1730_s26, %s1731_s27  }
 0x25d   :  { %1726 = dma.done.wait [#allocation4], 256  }
 0x25e   :  { %1727 = vsyncadd [#allocation4], 4294967040 }
 0x25f   :  { %1414 = vsyncpa [#allocation3], 1 }
 0x260   :  { %1415 = vsyncpa [#allocation4], 1 }
 0x261   :  { %1416 = vsyncpa [#allocation5], 1 }

// kernel: tpu_custom_call.1
= control target key start
LH: loop header
LB: loop body
LE: loop exit
PB: predicated region body
PF: predicated region fallthrough
CT: control target
= control target key end

     0   :  { %8 = vsyncpa [#allocation5], 0  ;;  %s2437_s0 = inlined_call_operand.vmem [shape: s32[64], index: 0, kind: input, shape index: {}]   ;;  %s2438_s1 = inlined_call_operand.vmem [shape: f32[16,8], index: 1, kind: input, shape index: {}]   ;;  %s2439_s2 = inlined_call_operand.hbm [shape: f32[520,128], index: 2, kind: input, shape index: {}]   ;;  %s2440_s3 = inlined_call_operand.hbm [shape: f32[16,128], index: 3, kind: output, shape index: {}]  }
   0x1   :  { %9 = vsyncpa [#allocation3], 0 }
   0x2   :  { %10 = vsyncpa [#allocation4], 0  ;;  %s17_s14 = sshll.u32 %s2437_s0, 4  ;;  %s18_s14 = int_to_ptr.vmem [resolvable:$true] %s17_s14 }
   0x3   :  { %s1666_s15 = scalar_lea.vmem %s18_s14, 16  ;;  %p1671_p1 = scmp.lt.s32.totalorder %s18_s14, %s18_s14 }
   0x4   :  { %p1667_p0 = scmp.ne.s32.totalorder %s18_s14, %s1666_s15  ;;  %p1672_p2 = scmp.lt.s32.totalorder %s1666_s15, %s1666_s15 }
   0x6   :  { %p1673_p3 = por %p1672_p2, %p1671_p1 }
   0x8   :  { %p1674_p4 = pnand %p1673_p3, %p1667_p0 }
   0xa   :  { %1677 = shalt.err (!%p1674_p4)
}
   0xb   :  { %s1728_s16 = smov [#allocation2]   ;;  %s1729_s17 = smov [#allocation6]  }
   0xc   :  { %20 = dma.vmem_to_smem %s18_s14, 16, %s1728_s16, [#allocation5]  }
   0xd   :  { %s28_s18 = sshll.u32 %s1729_s17, 4  ;;  %s1678_s21 = scalar_lea.hbm %s2439_s2, 8320  ;;  %s29_s18 = int_to_ptr.vmem [resolvable:$true] %s28_s18 }
   0xe   :  { %p1679_p5 = scmp.ne.s32.totalorder %s2439_s2, %s1678_s21  ;;  %p1682_p6 = scmp.lt.u32.totalorder %s1678_s21, %s2439_s2 }
  0x10   :  { %p1684_p7 = pnand %p1682_p6, %p1679_p5 }
  0x12   :  { %1687 = shalt.err (!%p1684_p7)
}
  0x13   :  { %s1688_s25 = scalar_lea.vmem %s29_s18, 8320  ;;  %p1693_p9 = scmp.lt.s32.totalorder %s29_s18, %s29_s18 }
  0x14   :  { %p1689_p8 = scmp.ne.s32.totalorder %s29_s18, %s1688_s25  ;;  %p1694_p10 = scmp.lt.s32.totalorder %s1688_s25, %s1688_s25 }
  0x16   :  { %p1695_p11 = por %p1694_p10, %p1693_p9 }
  0x18   :  { %p1696_p12 = pnand %p1695_p11, %p1689_p8 }
  0x1a   :  { %1699 = shalt.err (!%p1696_p12)
}
  0x1b   :  { %s1730_s26 = smov 128   ;;  %s1731_s27 = smov 8  }
  0x1c   :  { %34 = dma.hbm_to_vmem [thread:$0]  %s2439_s2, 8320, %s29_s18, [#allocation3], %s1730_s26, %s1730_s26, %s1731_s27  }
  0x1d   :  { %1722 = dma.done.wait [#allocation5], 16  }
  0x1e   :  { %1723 = vsyncadd [#allocation5], 4294967280 }
  0x1f   :  { %1724 = dma.done.wait [#allocation3], 8320  }
  0x20   :  { %1725 = vsyncadd [#allocation3], 4294958976 }
  0x21   :  { %41 = sfence }
  0x22   :  { %v1783_v0 = vld [vmem:[%s2438_s1 + $0x2] sm:$0x1]  ;;  %v1788_v1 = vld [vmem:[%s2438_s1] sm:$0x1]  ;;  %v2441_v2 = vmov 7   ;;  %v2453_v3 = vmov 2  }
  0x23   :  { %1581 = vset.pattern.permute.xlu0 %v2441_v2  ;;  %1566 = vset.pattern.permute.xlu1 %v2453_v3  ;;  %v1797_v4 = vld [vmem:[%s2438_s1 + $0x5] sm:$0x1]  ;;  %v2451_v5 = vmov 3   ;;  %v1805_v6 = vld [vmem:[%s2438_s1 + $0x8] sm:$0x1]  ;;  %v2443_v7 = vmov 4  }
  0x24   :  { %302 = vperm.xlu0 %1581, %v1783_v0   ;;  %93 = vperm.xlu1 %1566, %v1788_v1   ;;  %v1812_v8 = vld [vmem:[%s2438_s1 + $0xb] sm:$0x1]  ;;  %v2447_v9 = vmov 6   ;;  %v1820_v10 = vld [vmem:[%s2438_s1 + $0x3] sm:$0x1]  ;;  %v2445_v14 = vmov 1  }
  0x25   :  { %2469 = vst [vmem:[#allocation11_spill] sm:$0xff] %v1812_v8  ;;  %v1828_v11 = vld [vmem:[%s2438_s1 + $0x6] sm:$0x1]  ;;  %v1836_v12 = vld [vmem:[%s2438_s1 + $0x9] sm:$0x1]  ;;  %v2449_v16 = vmov 5  }
  0x26   :  { %v1841_v13 = vld [vmem:[%s2438_s1 + $0x1] sm:$0x1]  ;;  %v1849_v15 = vld [vmem:[%s2438_s1 + $0xc] sm:$0x1]  ;;  %v2455_v17 = vmov 0   ;;  %s1492_s7 = sld [smem:[#allocation2 + $0x4]] }
  0x27   :  { %2470 = vst [vmem:[#allocation12_spill] sm:$0xff] %v1849_v15  ;;  %v1878_v18 = vld [vmem:[%s2438_s1 + $0x4] sm:$0x1]  ;;  %v1885_v19 = vld [vmem:[%s2438_s1 + $0x7] sm:$0x1]  ;;  %s1501_s8 = sld [smem:[#allocation2 + $0xd]] }
  0x28   :  { %551 = vperm.xlu0 %1581, %v1797_v4   ;;  %1567 = vset.pattern.permute.xlu1 %v2451_v5  ;;  %v1892_v20 = vld [vmem:[%s2438_s1 + $0xa] sm:$0x1]  ;;  %v1149_v21 = vld [vmem:[%s2438_s1 + $0xd] sm:$0x1]  ;;  %v1905_v22 = vld [vmem:[%s2438_s1 + $0xe] sm:$0x1] }
  0x29   :  { %98 = vperm.xlu1 %1567, %v1788_v1   ;;  %v1315_v33 = vld [vmem:[%s2438_s1 + $0xf] sm:$0x1]  ;;  %s1493_s9 = sld [smem:[#allocation2 + $0x5]]  ;;  %s1502_s10 = sld [smem:[#allocation2 + $0xe]] }
  0x2a   :  { %s1500_s11 = sld [smem:[#allocation2 + $0xc]]  ;;  %s1504_s17 = sld [smem:[#allocation2 + $0x10]] }
  0x2b   :  { %s1505_s18 = sld [smem:[#allocation2 + $0x11]]  ;;  %s70_s22 = sld [smem:[#allocation2]] }
  0x2c   :  { %801 = vperm.xlu0 %1581, %v1805_v6   ;;  %s154_s12 = scalar_lea.vmem [#allocation6], %s1492_s7  ;;  %s1489_s21 = sld [smem:[#allocation2 + $0x1]] }
  0x2d   :  { %1568 = vset.pattern.permute.xlu1 %v2443_v7  ;;  %v155_v59 = vld [vmem:[%s154_s12] sm:$0x3]  ;;  %s339_s13 = scalar_lea.vmem [#allocation6], %s1501_s8  ;;  %s1490_s23 = sld [smem:[#allocation2 + $0x2]] }
  0x2e   :  { %112 = vperm.xlu1 %1568, %v1788_v1   ;;  %v340_v60 = vld [vmem:[%s339_s13] sm:$0x3]  ;;  %s2114_s28 = sld [smem:[#allocation2 + $0xb]]  ;;  %s2116_s29 = sld [smem:[#allocation2 + $0x8]] }
  0x2f   :  { %s173_s14 = scalar_lea.vmem [#allocation6], %s1493_s9  ;;  %s358_s15 = scalar_lea.vmem [#allocation6], %s1502_s10 }
  0x30   :  { %1050 = vperm.xlu0 %1581, %v1812_v8   ;;  %v174_v62 = vld [vmem:[%s173_s14] sm:$0x3]  ;;  %s320_s16 = scalar_lea.vmem [#allocation6], %s1500_s11  ;;  %s403_s19 = scalar_lea.vmem [#allocation6], %s1504_s17 }
  0x31   :  { %s422_s20 = scalar_lea.vmem [#allocation6], %s1505_s18  ;;  %s71_s24 = scalar_lea.vmem [#allocation6], %s70_s22 }
  0x32   :  { %1569 = vset.pattern.permute.xlu1 %v2447_v9  ;;  %s90_s0 = scalar_lea.vmem [#allocation6], %s1489_s21  ;;  %s2119_s30 = sld [smem:[#allocation2 + $0x17]] }
  0x33   :  { %131 = vperm.xlu1 %1569, %v1788_v1   ;;  %s109_s25 = scalar_lea.vmem [#allocation6], %s1490_s23  ;;  %s2124_s4 = sld [smem:[#allocation2 + $0x9]] }
  0x34   :  { %1630 = vset.pattern.permute.xlu0 %v2453_v3  ;;  %s2126_s5 = sld [smem:[#allocation2 + $0x3]]  ;;  %s2128_s6 = sld [smem:[#allocation2 + $0x19]] }
  0x35   :  { %342 = vperm.xlu0 %1630, %v1820_v10   ;;  %s2134_s2 = sld [smem:[#allocation2 + $0x6]]  ;;  %s2136_s7 = sld [smem:[#allocation2 + $0x1a]] }
  0x36   :  { %s2139_s8 = sld [smem:[#allocation2 + $0x7]]  ;;  %s2144_s10 = sld [smem:[#allocation2 + $0xa]] }
  0x37   :  { %1570 = vset.pattern.permute.xlu1 %v2441_v2  ;;  %s2142_s9 = sld [smem:[#allocation2 + $0xf]]  ;;  %s2147_s11 = sld [smem:[#allocation2 + $0x16]] }
  0x38   :  { %136 = vperm.xlu1 %1570, %v1788_v1   ;;  %s2149_s12 = sld [smem:[#allocation2 + $0x13]]  ;;  %s2153_s13 = sld [smem:[#allocation2 + $0x12]] }
  0x39   :  { %591 = vperm.xlu0 %1630, %v1828_v11   ;;  %s2157_s14 = sld [smem:[#allocation2 + $0x15]]  ;;  %s2167_s17 = sld [smem:[#allocation2 + $0x14]] }
  0x3a   :  { %s543_s18 = scalar_lea.vmem [#allocation6], %s2119_s30  ;;  %s588_s21 = scalar_lea.vmem [#allocation6], %s2128_s6 }
  0x3b   :  { %s192_s22 = scalar_lea.vmem [#allocation6], %s2134_s2  ;;  %s607_s23 = scalar_lea.vmem [#allocation6], %s2136_s7 }
  0x3c   :  { %1571 = vset.pattern.permute.xlu1 %v2445_v14  ;;  %s2227_s6 = sld [smem:[#allocation2 + $0x18]]  ;;  %s2286_s7 = sld [smem:[#allocation2 + $0x1b]] }
  0x3d   :  { %841 = vperm.xlu0 %1630, %v1836_v12   ;;  %163 = vperm.xlu1 %1571, %v1841_v13  }
  0x3e   :  { %s441_s30 = scalar_lea.vmem [#allocation6], %s2153_s13  ;;  %s1528_s13 = sld [smem:[#allocation2 + $0x28]] }
  0x41   :  { %1090 = vperm.xlu0 %1630, %v1849_v15   ;;  %1572 = vset.pattern.permute.xlu1 %v2453_v3 }
  0x42   :  { %176 = vperm.xlu1 %1572, %v1841_v13   ;;  %s569_s2 = scalar_lea.vmem [#allocation6], %s2227_s6  ;;  %s1525_s6 = sld [smem:[#allocation2 + $0x25]] }
  0x45   :  { %1633 = vset.pattern.permute.xlu0 %v2449_v16 }
  0x46   :  { %117 = vperm.xlu0 %1633, %v1788_v1   ;;  %1573 = vset.pattern.permute.xlu1 %v2443_v7 }
  0x47   :  { %195 = vperm.xlu1 %1573, %v1841_v13  }
  0x4a   :  { %366 = vperm.xlu0 %1633, %v1820_v10  }
  0x4b   :  { %1574 = vset.pattern.permute.xlu1 %v2449_v16 }
  0x4c   :  { %200 = vperm.xlu1 %1574, %v1841_v13  }
  0x4e   :  { %615 = vperm.xlu0 %1633, %v1828_v11  }
  0x50   :  { %1575 = vset.pattern.permute.xlu1 %v2441_v2 }
  0x51   :  { %219 = vperm.xlu1 %1575, %v1841_v13  }
  0x52   :  { %865 = vperm.xlu0 %1633, %v1836_v12  }
  0x55   :  { %1576 = vset.pattern.permute.xlu1 %v2455_v17 }
  0x56   :  { %1114 = vperm.xlu0 %1633, %v1849_v15   ;;  %241 = vperm.xlu1 %1576, %v1783_v0  }
  0x5a   :  { %1636 = vset.pattern.permute.xlu0 %v2455_v17  ;;  %1577 = vset.pattern.permute.xlu1 %v2453_v3 }
  0x5b   :  { %75 = vperm.xlu0 %1636, %v1788_v1   ;;  %259 = vperm.xlu1 %1577, %v1783_v0  }
  0x5f   :  { %158 = vperm.xlu0 %1636, %v1841_v13   ;;  %1578 = vset.pattern.permute.xlu1 %v2451_v5 }
  0x60   :  { %264 = vperm.xlu1 %1578, %v1783_v0  }
  0x63   :  { %407 = vperm.xlu0 %1636, %v1878_v18  }
  0x64   :  { %1579 = vset.pattern.permute.xlu1 %v2449_v16 }
  0x65   :  { %283 = vperm.xlu1 %1579, %v1783_v0  }
  0x67   :  { %656 = vperm.xlu0 %1636, %v1885_v19  }
  0x69   :  { %1580 = vset.pattern.permute.xlu1 %v2447_v9 }
  0x6a   :  { %297 = vperm.xlu1 %1580, %v1783_v0  }
  0x6b   :  { %906 = vperm.xlu0 %1636, %v1892_v20  }
  0x6e   :  { %1582 = vset.pattern.permute.xlu1 %v2455_v17 }
  0x6f   :  { %1155 = vperm.xlu0 %1636, %v1149_v21   ;;  %324 = vperm.xlu1 %1582, %v1820_v10  }
  0x73   :  { %1238 = vperm.xlu0 %1636, %v1905_v22   ;;  %1583 = vset.pattern.permute.xlu1 %v2445_v14 }
  0x74   :  { %329 = vperm.xlu1 %1583, %v1820_v10  }
  0x77   :  { %1643 = vset.pattern.permute.xlu0 %v2451_v5 }
  0x78   :  { %181 = vperm.xlu0 %1643, %v1841_v13   ;;  %1584 = vset.pattern.permute.xlu1 %v2451_v5 }
  0x79   :  { %347 = vperm.xlu1 %1584, %v1820_v10  }
  0x7c   :  { %430 = vperm.xlu0 %1643, %v1878_v18  }
  0x7d   :  { %1585 = vset.pattern.permute.xlu1 %v2443_v7 }
  0x7e   :  { %361 = vperm.xlu1 %1585, %v1820_v10  }
  0x80   :  { %679 = vperm.xlu0 %1643, %v1885_v19  }
  0x82   :  { %1586 = vset.pattern.permute.xlu1 %v2447_v9 }
  0x83   :  { %380 = vperm.xlu1 %1586, %v1820_v10  }
  0x84   :  { %929 = vperm.xlu0 %1643, %v1892_v20  }
  0x87   :  { %1587 = vset.pattern.permute.xlu1 %v2441_v2 }
  0x88   :  { %1178 = vperm.xlu0 %1643, %v1149_v21   ;;  %385 = vperm.xlu1 %1587, %v1820_v10   ;;  %v351_v10 = vrot.slane %v340_v60, 1 }
  0x8c   :  { %1261 = vperm.xlu0 %1643, %v1905_v22   ;;  %1588 = vset.pattern.permute.xlu1 %v2445_v14 }
  0x8d   :  { %412 = vperm.xlu1 %1588, %v1878_v18  }
  0x90   :  { %1646 = vset.pattern.permute.xlu0 %v2443_v7 }
  0x91   :  { %278 = vperm.xlu0 %1646, %v1783_v0   ;;  %1589 = vset.pattern.permute.xlu1 %v2453_v3 }
  0x92   :  { %425 = vperm.xlu1 %1589, %v1878_v18  }
  0x95   :  { %527 = vperm.xlu0 %1646, %v1797_v4  }
  0x96   :  { %1590 = vset.pattern.permute.xlu1 %v2443_v7 }
  0x97   :  { %444 = vperm.xlu1 %1590, %v1878_v18  }
  0x99   :  { %777 = vperm.xlu0 %1646, %v1805_v6  }
  0x9b   :  { %1591 = vset.pattern.permute.xlu1 %v2449_v16 }
  0x9c   :  { %449 = vperm.xlu1 %1591, %v1878_v18  }
  0x9d   :  { %1026 = vperm.xlu0 %1646, %v1812_v8  }
  0xa0   :  { %1592 = vset.pattern.permute.xlu1 %v2441_v2 }
  0xa1   :  { %1275 = vperm.xlu0 %1646, %v1905_v22   ;;  %468 = vperm.xlu1 %1592, %v1878_v18  }
  0xa3   :  { %v1940_v23 = vpop.permute.xlu1 %93  ;;  %v1942_v24 = vpop.permute.xlu0 %302 }
  0xa5   :  { %1649 = vset.pattern.permute.xlu0 %v2445_v14  ;;  %1593 = vset.pattern.permute.xlu1 %v2455_v17 }
  0xa6   :  { %80 = vperm.xlu0 %1649, %v1788_v1   ;;  %490 = vperm.xlu1 %1593, %v1797_v4   ;;  %v167_v1 = vrot.slane %v155_v59, 1 }
  0xa7   :  { %v1948_v25 = vpop.permute.xlu0 %551 }
  0xa8   :  { %v1950_v26 = vpop.permute.xlu1 %98 }
  0xaa   :  { %246 = vperm.xlu0 %1649, %v1783_v0   ;;  %1594 = vset.pattern.permute.xlu1 %v2453_v3  ;;  %v359_v0 = vld [vmem:[%s358_s15] sm:$0x3]  ;;  %s294_s15 = scalar_lea.vmem [#allocation6], %s2114_s28  ;;  %s524_s28 = scalar_lea.vmem [#allocation6], %s2147_s11 }
  0xab   :  { %508 = vperm.xlu1 %1594, %v1797_v4   ;;  %v1955_v27 = vpop.permute.xlu0 %801 }
  0xac   :  { %2471 = vst [vmem:[#allocation13_spill] sm:$0xff] %v1955_v27 }
  0xad   :  { %v1957_v28 = vpop.permute.xlu1 %112 }
  0xae   :  { %495 = vperm.xlu0 %1649, %v1797_v4  }
  0xaf   :  { %1595 = vset.pattern.permute.xlu1 %v2451_v5  ;;  %v1961_v29 = vpop.permute.xlu0 %1050 }
  0xb0   :  { %2472 = vst [vmem:[#allocation14_spill] sm:$0xff] %v1961_v29  ;;  %513 = vperm.xlu1 %1595, %v1797_v4   ;;  %v2186_v29 = vld [vmem:[%s607_s23] sm:$0x3]  ;;  %s1521_s23 = sld [smem:[#allocation2 + $0x21]] }
  0xb1   :  { %2502 = vst [vmem:[#allocation36_spill] sm:$0xff] %v2186_v29 }
  0xb2   :  { %745 = vperm.xlu0 %1649, %v1805_v6   ;;  %v1965_v30 = vpop.permute.xlu1 %131 }
  0xb4   :  { %1596 = vset.pattern.permute.xlu1 %v2449_v16  ;;  %v1968_v31 = vpop.permute.xlu0 %342 }
  0xb5   :  { %532 = vperm.xlu1 %1596, %v1797_v4  }
  0xb6   :  { %994 = vperm.xlu0 %1649, %v1812_v8  }
  0xb7   :  { %v1972_v32 = vpop.permute.xlu1 %136 }
  0xb8   :  { %v1977_v34 = vpop.permute.xlu0 %591 }
  0xb9   :  { %2473 = vst [vmem:[#allocation15_spill] sm:$0xff] %v1977_v34  ;;  %1597 = vset.pattern.permute.xlu1 %v2447_v9 }
  0xba   :  { %1326 = vperm.xlu0 %1649, %v1315_v33   ;;  %546 = vperm.xlu1 %1597, %v1797_v4   ;;  %v185_v4 = vrot.slane %v174_v62, 1 }
  0xbc   :  { %v1981_v35 = vpop.permute.xlu1 %163  ;;  %v1983_v36 = vpop.permute.xlu0 %841 }
  0xbd   :  { %2474 = vst [vmem:[#allocation16_spill] sm:$0xff] %v1983_v36 }
  0xbe   :  { %1652 = vset.pattern.permute.xlu0 %v2447_v9  ;;  %1598 = vset.pattern.permute.xlu1 %v2455_v17 }
  0xbf   :  { %214 = vperm.xlu0 %1652, %v1841_v13   ;;  %573 = vperm.xlu1 %1598, %v1828_v11  }
  0xc0   :  { %v1989_v37 = vpop.permute.xlu0 %1090 }
  0xc1   :  { %2475 = vst [vmem:[#allocation17_spill] sm:$0xff] %v1989_v37  ;;  %v1991_v38 = vpop.permute.xlu1 %176  ;;  %v193_v37 = vld [vmem:[%s192_s22] sm:$0x3] }
  0xc3   :  { %463 = vperm.xlu0 %1652, %v1878_v18   ;;  %1599 = vset.pattern.permute.xlu1 %v2445_v14 }
  0xc4   :  { %578 = vperm.xlu1 %1599, %v1828_v11  }
  0xc5   :  { %v1996_v39 = vpop.permute.xlu0 %117 }
  0xc6   :  { %v1998_v40 = vpop.permute.xlu1 %195 }
  0xc7   :  { %712 = vperm.xlu0 %1652, %v1885_v19  }
  0xc8   :  { %1600 = vset.pattern.permute.xlu1 %v2451_v5 }
  0xc9   :  { %596 = vperm.xlu1 %1600, %v1828_v11   ;;  %v2003_v41 = vpop.permute.xlu0 %366 }
  0xcb   :  { %v2005_v42 = vpop.permute.xlu1 %200  ;;  %962 = vperm.xlu0 %1652, %v1892_v20  }
  0xcd   :  { %1601 = vset.pattern.permute.xlu1 %v2443_v7  ;;  %v2009_v43 = vpop.permute.xlu0 %615 }
  0xce   :  { %2476 = vst [vmem:[#allocation18_spill] sm:$0xff] %v2009_v43  ;;  %610 = vperm.xlu1 %1601, %v1828_v11  }
  0xcf   :  { %1294 = vperm.xlu0 %1652, %v1905_v22   ;;  %v345_v22 = vmul.f32 %v1968_v31, %v340_v60 }
  0xd0   :  { %v2013_v44 = vpop.permute.xlu1 %219 }
  0xd1   :  { %v2015_v45 = vpop.permute.xlu0 %865 }
  0xd2   :  { %2477 = vst [vmem:[#allocation19_spill] sm:$0xff] %v2015_v45  ;;  %1602 = vset.pattern.permute.xlu1 %v2447_v9 }
  0xd3   :  { %629 = vperm.xlu1 %1602, %v1828_v11   ;;  %1657 = vset.pattern.permute.xlu0 %v2449_v16 }
  0xd4   :  { %1363 = vperm.xlu0 %1657, %v1315_v33   ;;  %v179_v33 = vmul.f32 %v1991_v38, %v174_v62 }
  0xd5   :  { %v2020_v46 = vpop.permute.xlu1 %241  ;;  %v2022_v47 = vpop.permute.xlu0 %1114 }
  0xd6   :  { %2478 = vst [vmem:[#allocation20_spill] sm:$0xff] %v2022_v47 }
  0xd7   :  { %1603 = vset.pattern.permute.xlu1 %v2441_v2 }
  0xd8   :  { %634 = vperm.xlu1 %1603, %v1828_v11   ;;  %1660 = vset.pattern.permute.xlu0 %v2441_v2  ;;  %v321_v11 = vld [vmem:[%s320_s16] sm:$0x3]  ;;  %s237_s16 = scalar_lea.vmem [#allocation6], %s2116_s29  ;;  %s460_s29 = scalar_lea.vmem [#allocation6], %s2149_s12 }
  0xd9   :  { %v333_v18 = vrot.slane %v321_v11, 1 }
  0xda   :  { %v2027_v48 = vpop.permute.xlu0 %75  ;;  %v2029_v49 = vpop.permute.xlu1 %259 }
  0xdc   :  { %1604 = vset.pattern.permute.xlu1 %v2445_v14 }
  0xdd   :  { %661 = vperm.xlu1 %1604, %v1885_v19  }
  0xde   :  { %v159_v50 = vpop.permute.xlu0 %158 }
  0xdf   :  { %v2033_v51 = vpop.permute.xlu1 %264  ;;  %v161_v13 = vmul.f32 %v159_v50, %v155_v59 }
  0xe1   :  { %1605 = vset.pattern.permute.xlu1 %v2453_v3 }
  0xe2   :  { %674 = vperm.xlu1 %1605, %v1885_v19   ;;  %v2037_v52 = vpop.permute.xlu0 %407 }
  0xe4   :  { %v2039_v53 = vpop.permute.xlu1 %283 }
  0xe6   :  { %1606 = vset.pattern.permute.xlu1 %v2443_v7  ;;  %v2042_v54 = vpop.permute.xlu0 %656 }
  0xe7   :  { %2479 = vst [vmem:[#allocation21_spill] sm:$0xff] %v2042_v54  ;;  %693 = vperm.xlu1 %1606, %v1885_v19  }
  0xe9   :  { %v2045_v55 = vpop.permute.xlu1 %297 }
  0xea   :  { %v2047_v56 = vpop.permute.xlu0 %906 }
  0xeb   :  { %2480 = vst [vmem:[#allocation22_spill] sm:$0xff] %v2047_v56  ;;  %1607 = vset.pattern.permute.xlu1 %v2449_v16 }
  0xec   :  { %698 = vperm.xlu1 %1607, %v1885_v19  }
  0xee   :  { %v325_v57 = vpop.permute.xlu1 %324  ;;  %v2051_v58 = vpop.permute.xlu0 %1155 }
  0xef   :  { %2481 = vst [vmem:[#allocation23_spill] sm:$0xff] %v2051_v58 }
  0xf0   :  { %1608 = vset.pattern.permute.xlu1 %v2441_v2  ;;  %v169_v2 = vmul.f32 %v167_v1, %v1981_v35 }
  0xf1   :  { %717 = vperm.xlu1 %1608, %v1885_v19   ;;  %v370_v19 = vrot.slane %v359_v0, 1 }
  0xf2   :  { %v2055_v61 = vpop.permute.xlu0 %1238  ;;  %v170_v16 = vadd.f32 %v169_v2, %v161_v13  ;;  %v2491_v13 = vmov 0  }
  0xf3   :  { %2482 = vst [vmem:[#allocation24_spill] sm:$0xff] %v2055_v61  ;;  %v330_v63 = vpop.permute.xlu1 %329  ;;  %v2483_v61 = vmov 2   ;;  %v372_v59 = vmul.f32 %v370_v19, %v2003_v41 }
  0xf4   :  { %v335_v5 = vmul.f32 %v333_v18, %v330_v63 }
  0xf5   :  { %1609 = vset.pattern.permute.xlu1 %v2455_v17  ;;  %v327_v17 = vmul.f32 %v325_v57, %v321_v11  ;;  %v423_v57 = vld [vmem:[%s422_s20] sm:$0x3]  ;;  %s128_s20 = scalar_lea.vmem [#allocation6], %s2126_s5  ;;  %s486_s5 = scalar_lea.vmem [#allocation6], %s2167_s17 }
  0xf6   :  { %740 = vperm.xlu1 %1609, %v1805_v6   ;;  %v487_v8 = vld [vmem:[%s486_s5] sm:$0x3]  ;;  %s1520_s17 = sld [smem:[#allocation2 + $0x20]]  ;;  %s1524_s5 = sld [smem:[#allocation2 + $0x24]] }
  0xf7   :  { %v182_v21 = vpop.permute.xlu0 %181  ;;  %v336_v35 = vadd.f32 %v335_v5, %v327_v17  ;;  %v404_v17 = vld [vmem:[%s403_s19] sm:$0x3]  ;;  %s256_s19 = scalar_lea.vmem [#allocation6], %s2124_s4  ;;  %s505_s4 = scalar_lea.vmem [#allocation6], %s2157_s14 }
  0xf8   :  { %v187_v7 = vmul.f32 %v185_v4, %v182_v21  ;;  %v348_v14 = vpop.permute.xlu1 %347  ;;  %v416_v4 = vrot.slane %v404_v17, 1  ;;  %v410_v18 = vmul.f32 %v2037_v52, %v404_v17  ;;  %v2496_v17 = vmov 4   ;;  %v506_v54 = vld [vmem:[%s505_s4] sm:$0x3]  ;;  %s1529_s14 = sld [smem:[#allocation2 + $0x29]] }
  0xf9   :  { %v353_v9 = vmul.f32 %v351_v10, %v348_v14  ;;  %v2484_v14 = vmov 3   ;;  %v434_v10 = vrot.slane %v423_v57, 1  ;;  %v517_v34 = vrot.slane %v506_v54, 1 }
  0xfa   :  { %v188_v3 = vadd.f32 %v187_v7, %v179_v33  ;;  %1610 = vset.pattern.permute.xlu1 %v2483_v61 }
  0xfb   :  { %758 = vperm.xlu1 %1610, %v1805_v6   ;;  %v431_v50 = vpop.permute.xlu0 %430  ;;  %v354_v31 = vadd.f32 %v353_v9, %v345_v22  ;;  %v2487_v9 = vmov 5  }
  0xfc   :  { %v2065_v58 = vadd.f32 %v188_v3, %v170_v16  ;;  %v436_v19 = vmul.f32 %v434_v10, %v431_v50  ;;  %s736_s22 = scalar_lea.vmem [#allocation6], %s1520_s17 }
  0xfd   :  { %v362_v38 = vpop.permute.xlu1 %361  ;;  %v355_v7 = vadd.f32 %v354_v31, %v336_v35  ;;  %v2492_v31 = vmov 1  }
  0xfe   :  { %v364_v60 = vmul.f32 %v362_v38, %v359_v0  ;;  %v2489_v0 = vmov 6   ;;  %s921_s17 = scalar_lea.vmem [#allocation6], %s1529_s14 }
  0xff   :  { %1611 = vset.pattern.permute.xlu1 %v2484_v14  ;;  %v2068_v2 = vpop.permute.xlu0 %679 }
 0x100   :  { %2485 = vst [vmem:[#allocation25_spill] sm:$0xff] %v2068_v2  ;;  %v373_v62 = vadd.f32 %v372_v59, %v364_v60  ;;  %763 = vperm.xlu1 %1611, %v1805_v6   ;;  %v204_v2 = vrot.slane %v193_v37, 1 }
 0x102   :  { %v2071_v63 = vadd.f32 %v373_v62, %v355_v7  ;;  %v2073_v41 = vpop.permute.xlu1 %380 }
 0x103   :  { %v2075_v3 = vpop.permute.xlu0 %929 }
 0x104   :  { %2486 = vst [vmem:[#allocation26_spill] sm:$0xff] %v2075_v3  ;;  %1612 = vset.pattern.permute.xlu1 %v2487_v9 }
 0x105   :  { %782 = vperm.xlu1 %1612, %v1805_v6  }
 0x107   :  { %v2079_v5 = vpop.permute.xlu1 %385  ;;  %v2081_v16 = vpop.permute.xlu0 %1178 }
 0x108   :  { %2488 = vst [vmem:[#allocation27_spill] sm:$0xff] %v2081_v16 }
 0x109   :  { %1613 = vset.pattern.permute.xlu1 %v2489_v0 }
 0x10a   :  { %796 = vperm.xlu1 %1613, %v1805_v6  }
 0x10b   :  { %v2085_v1 = vpop.permute.xlu0 %1261 }
 0x10c   :  { %2490 = vst [vmem:[#allocation28_spill] sm:$0xff] %v2085_v1  ;;  %v413_v11 = vpop.permute.xlu1 %412 }
 0x10d   :  { %v418_v21 = vmul.f32 %v416_v4, %v413_v11  ;;  %v72_v4 = vld [vmem:[%s71_s24] sm:$0x3]  ;;  %s377_s24 = scalar_lea.vmem [#allocation6], %s2142_s9  ;;  %s1517_s9 = sld [smem:[#allocation2 + $0x1d]] }
 0x10e   :  { %1614 = vset.pattern.permute.xlu1 %v2491_v13  ;;  %v378_v36 = vld [vmem:[%s377_s24] sm:$0x3]  ;;  %s1523_s24 = sld [smem:[#allocation2 + $0x23]] }
 0x10f   :  { %823 = vperm.xlu1 %1614, %v1836_v12   ;;  %v419_v6 = vadd.f32 %v418_v21, %v410_v18  ;;  %v389_v15 = vrot.slane %v378_v36, 1 }
 0x110   :  { %v2090_v22 = vpop.permute.xlu0 %278 }
 0x111   :  { %v426_v33 = vpop.permute.xlu1 %425 }
 0x112   :  { %v428_v59 = vmul.f32 %v426_v33, %v423_v57  ;;  %v91_v57 = vld [vmem:[%s90_s0] sm:$0x3]  ;;  %v84_v33 = vrot.slane %v72_v4, 1  ;;  %s211_s0 = scalar_lea.vmem [#allocation6], %s2139_s8  ;;  %s1516_s8 = sld [smem:[#allocation2 + $0x1c]] }
 0x113   :  { %1615 = vset.pattern.permute.xlu1 %v2492_v31  ;;  %v102_v10 = vrot.slane %v91_v57, 1  ;;  %v96_v1 = vmul.f32 %v1940_v23, %v91_v57  ;;  %v2192_v56 = vld [vmem:[%s211_s0] sm:$0x3]  ;;  %s671_s12 = scalar_lea.vmem [#allocation6], %s1517_s9  ;;  %s1522_s0 = sld [smem:[#allocation2 + $0x22]] }
 0x114   :  { %v437_v38 = vadd.f32 %v436_v19, %v428_v59  ;;  %828 = vperm.xlu1 %1615, %v1836_v12   ;;  %v2094_v35 = vpop.permute.xlu0 %527  ;;  %v110_v19 = vld [vmem:[%s109_s25] sm:$0x3]  ;;  %s275_s25 = scalar_lea.vmem [#allocation6], %s2144_s10  ;;  %s626_s10 = scalar_lea.vmem [#allocation6], %s2286_s7 }
 0x115   :  { %v121_v21 = vrot.slane %v110_v19, 1  ;;  %v104_v59 = vmul.f32 %v102_v10, %v1950_v26  ;;  %v2499_v26 = vmov 7   ;;  %v276_v27 = vld [vmem:[%s275_s25] sm:$0x3]  ;;  %s755_s25 = scalar_lea.vmem [#allocation6], %s1521_s23  ;;  %s793_s4 = scalar_lea.vmem [#allocation6], %s1523_s24 }
 0x116   :  { %v2096_v60 = vadd.f32 %v437_v38, %v419_v6  ;;  %v2098_v52 = vpop.permute.xlu1 %444  ;;  %v78_v6 = vmul.f32 %v2027_v48, %v72_v4  ;;  %v115_v4 = vmul.f32 %v1957_v28, %v110_v19  ;;  %v43_v19 = vlaneseq  ;;  %s819_s7 = scalar_lea.vmem [#allocation6], %s1524_s5  ;;  %s1533_s24 = sld [smem:[#allocation2 + $0x2d]] }
 0x117   :  { %v123_v16 = vmul.f32 %v121_v21, %v1996_v39  ;;  %v105_v48 = vadd.f32 %v104_v59, %v96_v1  ;;  %v257_v59 = vld [vmem:[%s256_s19] sm:$0x3]  ;;  %v281_v29 = vmul.f32 %v2090_v22, %v276_v27  ;;  %s1536_s5 = sld [smem:[#allocation2 + $0x30]] }
 0x118   :  { %2493 = vst [vmem:[#allocation29_spill] sm:$0xff] %v2096_v60  ;;  %1616 = vset.pattern.permute.xlu1 %v2484_v14  ;;  %v2101_v50 = vpop.permute.xlu0 %777  ;;  %v262_v14 = vmul.f32 %v2029_v49, %v257_v59  ;;  %s652_s11 = scalar_lea.vmem [#allocation6], %s1516_s8 }
 0x119   :  { %2494 = vst [vmem:[#allocation30_spill] sm:$0xff] %v2101_v50  ;;  %846 = vperm.xlu1 %1616, %v1836_v12   ;;  %v124_v57 = vadd.f32 %v123_v16, %v115_v4  ;;  %v129_v4 = vld [vmem:[%s128_s20] sm:$0x3]  ;;  %v223_v50 = vrot.slane %v2192_v56, 1 }
 0x11a   :  { %v140_v45 = vrot.slane %v129_v4, 1 }
 0x11b   :  { %v2104_v7 = vpop.permute.xlu1 %449 }
 0x11c   :  { %v2106_v62 = vpop.permute.xlu0 %1026  ;;  %v142_v49 = vmul.f32 %v140_v45, %v1972_v32 }
 0x11d   :  { %2495 = vst [vmem:[#allocation31_spill] sm:$0xff] %v2106_v62  ;;  %1617 = vset.pattern.permute.xlu1 %v2496_v17  ;;  %v2188_v62 = vshrl.u32 %v43_v19, 7 }
 0x11e   :  { %860 = vperm.xlu1 %1617, %v1836_v12  }
 0x11f   :  { %vm45_vm0 = vcmp.eq.s32.totalorder %v2188_v62, 0  ;;  %vm51_vm1 = vcmp.eq.s32.totalorder %v2188_v62, 2  ;;  %vm48_vm2 = vcmp.eq.s32.totalorder %v2188_v62, 1  ;;  %vm54_vm3 = vcmp.eq.s32.totalorder %v2188_v62, 3 }
 0x120   :  { %v2110_v11 = vpop.permute.xlu1 %468  ;;  %v2112_v18 = vpop.permute.xlu0 %1275  ;;  %vm57_vm4 = vcmp.eq.s32.totalorder %v2188_v62, 4  ;;  %vm60_vm5 = vcmp.eq.s32.totalorder %v2188_v62, 5  ;;  %vm63_vm6 = vcmp.eq.s32.totalorder %v2188_v62, 6  ;;  %vm66_vm7 = vcmp.eq.s32.totalorder %v2188_v62, 7 }
 0x121   :  { %2497 = vst [vmem:[#allocation32_spill] sm:$0xff] %v2110_v11  ;;  %2498 = vst [vmem:[#allocation33_spill] sm:$0xff] %v2112_v18  ;;  %v134_v11 = vmul.f32 %v1965_v30, %v129_v4  ;;  %v1740_v4 = vmov 0.0  }
 0x122   :  { %1618 = vset.pattern.permute.xlu1 %v2489_v0 }
 0x123   :  { %879 = vperm.xlu1 %1618, %v1836_v12  }
 0x125   :  { %v81_v38 = vpop.permute.xlu0 %80  ;;  %v2130_v18 = vpop.permute.xlu1 %490 }
 0x126   :  { %v86_v47 = vmul.f32 %v84_v33, %v81_v38  ;;  %v2170_v33 = vld [vmem:[%s543_s18] sm:$0x3]  ;;  %s1542_s18 = sld [smem:[#allocation2 + $0x36]] }
 0x127   :  { %1619 = vset.pattern.permute.xlu1 %v2499_v26 }
 0x128   :  { %v87_v23 = vadd.f32 %v86_v47, %v78_v6  ;;  %884 = vperm.xlu1 %1619, %v1836_v12   ;;  %v2161_v12 = vld [vmem:[%s294_s15] sm:$0x3]  ;;  %s1518_s15 = sld [smem:[#allocation2 + $0x1e]] }
 0x129   :  { %v247_v39 = vpop.permute.xlu0 %246  ;;  %v238_v47 = vld [vmem:[%s237_s16] sm:$0x3]  ;;  %v306_v38 = vrot.slane %v2161_v12, 1  ;;  %v300_v30 = vmul.f32 %v2045_v55, %v2161_v12  ;;  %s1519_s16 = sld [smem:[#allocation2 + $0x1f]] }
 0x12a   :  { %v106_v10 = vadd.f32 %v105_v48, %v87_v23  ;;  %v2151_v1 = vpop.permute.xlu1 %508  ;;  %v250_v21 = vrot.slane %v238_v47, 1  ;;  %v268_v48 = vrot.slane %v257_v59, 1  ;;  %v2178_v23 = vld [vmem:[%s588_s21] sm:$0x3] }
 0x12b   :  { %2500 = vst [vmem:[#allocation34_spill] sm:$0xff] %v2178_v23  ;;  %v308_v23 = vmul.f32 %v306_v38, %v1942_v24  ;;  %v198_v24 = vmul.f32 %v1998_v40, %v193_v37  ;;  %v2504_v12 = vld [vmem:[#allocation32_spill] sm:$0xff] }
 0x12c   :  { %v2155_v28 = vadd.f32 %v124_v57, %v106_v10  ;;  %1620 = vset.pattern.permute.xlu1 %v2492_v31  ;;  %v555_v10 = vrot.slane %v2170_v33, 1  ;;  %v252_v3 = vmul.f32 %v250_v21, %v247_v39  ;;  %v270_v19 = vmul.f32 %v268_v48, %v2033_v51  ;;  %v525_v31 = vld [vmem:[%s524_s28] sm:$0x3]  ;;  %s1535_s28 = sld [smem:[#allocation2 + $0x2f]] }
 0x12d   :  { %v2164_v16 = vpop.permute.xlu0 %495  ;;  %911 = vperm.xlu1 %1620, %v1892_v20   ;;  %v2201_v21 = vld [vmem:[%s460_s29] sm:$0x3]  ;;  %v287_v51 = vrot.slane %v276_v27, 1  ;;  %v536_v43 = vrot.slane %v525_v31, 1  ;;  %v499_v27 = vrot.slane %v487_v8, 1  ;;  %v530_v37 = vmul.f32 %v2094_v35, %v525_v31  ;;  %s1004_s29 = scalar_lea.vmem [#allocation6], %s1533_s24 }
 0x12e   :  { %v271_v59 = vadd.f32 %v270_v19, %v262_v14  ;;  %v309_v31 = vadd.f32 %v308_v23, %v300_v30  ;;  %v2505_v23 = vld [vmem:[#allocation29_spill] sm:$0xff]  ;;  %s690_s20 = scalar_lea.vmem [#allocation6], %s1518_s15  ;;  %s1547_s24 = sld [smem:[#allocation2 + $0x3b]] }
 0x12f   :  { %v2173_v6 = vpop.permute.xlu1 %513  ;;  %v289_v32 = vmul.f32 %v287_v51, %v2039_v53  ;;  %s709_s21 = scalar_lea.vmem [#allocation6], %s1519_s16  ;;  %s902_s16 = scalar_lea.vmem [#allocation6], %s1528_s13 }
 0x130   :  { %v519_v53 = vmul.f32 %v517_v34, %v2173_v6 }
 0x131   :  { %1621 = vset.pattern.permute.xlu1 %v2483_v61  ;;  %v2181_v57 = vpop.permute.xlu0 %745 }
 0x132   :  { %2501 = vst [vmem:[#allocation35_spill] sm:$0xff] %v2181_v57  ;;  %924 = vperm.xlu1 %1621, %v1892_v20   ;;  %v244_v57 = vmul.f32 %v2020_v46, %v238_v47  ;;  %v2209_v46 = vsub.s32 0, %v2188_v62  ;;  %v442_v47 = vld [vmem:[%s441_s30] sm:$0x3]  ;;  %s774_s30 = scalar_lea.vmem [#allocation6], %s1522_s0 }
 0x133   :  { %v453_v61 = vrot.slane %v442_v47, 1  ;;  %v756_v62 = vld [vmem:[%s755_s25] sm:$0x3]  ;;  %s1534_s25 = sld [smem:[#allocation2 + $0x2e]] }
 0x134   :  { %v533_v39 = vpop.permute.xlu1 %532  ;;  %v253_v48 = vadd.f32 %v252_v3, %v244_v57  ;;  %v557_v3 = vmul.f32 %v555_v10, %v1948_v25  ;;  %v206_v57 = vmul.f32 %v204_v2, %v2005_v42  ;;  %v383_v25 = vmul.f32 %v2073_v41, %v378_v36 }
 0x135   :  { %v2204_v0 = vpop.permute.xlu0 %994  ;;  %v290_v42 = vadd.f32 %v289_v32, %v281_v29  ;;  %v455_v36 = vmul.f32 %v453_v61, %v2104_v7  ;;  %v511_v41 = vmul.f32 %v2151_v1, %v506_v54  ;;  %v538_v22 = vmul.f32 %v536_v43, %v533_v39 }
 0x136   :  { %2503 = vst [vmem:[#allocation37_spill] sm:$0xff] %v2204_v0  ;;  %1622 = vset.pattern.permute.xlu1 %v2496_v17  ;;  %v472_v0 = vrot.slane %v2201_v21, 1  ;;  %v391_v17 = vmul.f32 %v389_v15, %v2079_v5  ;;  %v272_v45 = vadd.f32 %v271_v59, %v253_v48  ;;  %v143_v15 = vadd.f32 %v142_v49, %v134_v11  ;;  %v2507_v49 = vld [vmem:[#allocation11_spill] sm:$0xff] }
 0x137   :  { %943 = vperm.xlu1 %1622, %v1892_v20   ;;  %v207_v14 = vadd.f32 %v206_v57, %v198_v24  ;;  %v501_v5 = vmul.f32 %v499_v27, %v2164_v16  ;;  %v447_v29 = vmul.f32 %v2098_v52, %v442_v47  ;;  %v493_v61 = vmul.f32 %v2130_v18, %v487_v8  ;;  %v2508_v27 = vld [vmem:[#allocation34_spill] sm:$0xff]  ;;  %v2509_v24 = vld [vmem:[#allocation15_spill] sm:$0xff] }
 0x138   :  { %v392_v2 = vadd.f32 %v391_v17, %v383_v25  ;;  %v291_v40 = vadd.f32 %v290_v42, %v272_v45  ;;  %v144_v34 = vadd.f32 %v143_v15, %v2155_v28  ;;  %v225_v17 = vmul.f32 %v223_v50, %v2013_v44 }
 0x139   :  { %v547_v13 = vpop.permute.xlu1 %546  ;;  %v2223_v60 = vpop.permute.xlu0 %1326  ;;  %v520_v35 = vadd.f32 %v519_v53, %v511_v41  ;;  %v456_v43 = vadd.f32 %v455_v36, %v447_v29  ;;  %v208_v7 = vadd.f32 %v207_v14, %v2065_v58  ;;  %v502_v44 = vadd.f32 %v501_v5, %v493_v61  ;;  %v2512_v5 = vld [vmem:[#allocation18_spill] sm:$0xff] }
 0x13a   :  { %v549_v54 = vmul.f32 %v547_v13, %v2170_v33  ;;  %v310_v1 = vadd.f32 %v309_v31, %v291_v40  ;;  %v539_v50 = vadd.f32 %v538_v22, %v530_v37  ;;  %v148_v18 = vrot.slane %v144_v34, %v2209_v46  ;;  %v2513_v22 = vld [vmem:[#allocation36_spill] sm:$0xff] }
 0x13b   :  { %1623 = vset.pattern.permute.xlu1 %v2487_v9  ;;  %v474_v16 = vmul.f32 %v472_v0, %v2504_v12  ;;  %v521_v6 = vadd.f32 %v520_v35, %v502_v44  ;;  %v457_v10 = vadd.f32 %v456_v43, %v2505_v23  ;;  %v570_v0 = vld [vmem:[%s569_s2] sm:$0x3]  ;;  %v2278_v59 = vsel %vm51_vm1, 1.0, %v1740_v4  ;;  %s1526_s2 = sld [smem:[#allocation2 + $0x26]] }
 0x13c   :  { %948 = vperm.xlu1 %1623, %v1892_v20   ;;  %v558_v58 = vadd.f32 %v557_v3, %v549_v54  ;;  %v314_v51 = vrot.slane %v310_v1, %v2209_v46  ;;  %v582_v48 = vrot.slane %v570_v0, 1  ;;  %v594_v25 = vmul.f32 %v2509_v24, %v2508_v27 }
 0x13d   :  { %v540_v47 = vadd.f32 %v539_v50, %v521_v6  ;;  %v2289_v42 = vsel %vm54_vm3, 1.0, %v1740_v4  ;;  %v2510_v53 = vrot.slane %v2508_v27, 1  ;;  %v2511_v40 = vmov 2   ;;  %v2518_v27 = vld [vmem:[#allocation21_spill] sm:$0xff] }
 0x13e   :  { %v215_v11 = vpop.permute.xlu0 %214  ;;  %v2242_v38 = vpop.permute.xlu1 %573  ;;  %v315_v41 = vmul.f32 %v2278_v59, %v314_v51  ;;  %v2301_v34 = vsel %vm57_vm4, 1.0, %v1740_v4  ;;  %v2308_v43 = vsel %vm60_vm5, 1.0, %v1740_v4  ;;  %v2515_v44 = vmov 3   ;;  %v1661_v51 = vld [vmem:[%s2438_s1 + $0xb] sm:$0x1] }
 0x13f   :  { %v217_v55 = vmul.f32 %v215_v11, %v2192_v56  ;;  %v393_v56 = vadd.f32 %v392_v2, %v2071_v63  ;;  %v2266_v63 = vsel %vm45_vm0, 1.0, %v1740_v4  ;;  %v559_v15 = vadd.f32 %v558_v58, %v540_v47 }
 0x140   :  { %1624 = vset.pattern.permute.xlu1 %v2499_v26  ;;  %v149_v45 = vmul.f32 %v2266_v63, %v148_v18  ;;  %v2514_v11 = vrot.slane %v2513_v22, 1  ;;  %v576_v31 = vmul.f32 %v2242_v38, %v570_v0  ;;  %v2516_v0 = vmov 6  }
 0x141   :  { %v226_v52 = vadd.f32 %v225_v17, %v217_v55  ;;  %967 = vperm.xlu1 %1624, %v1892_v20   ;;  %v2261_v20 = vsel %vm48_vm2, 1.0, %v1740_v4  ;;  %v397_v3 = vrot.slane %v393_v56, %v2209_v46  ;;  %v563_v17 = vrot.slane %v559_v15, %v2209_v46 }
 0x142   :  { %v464_v8 = vpop.permute.xlu0 %463  ;;  %v621_v29 = vmul.f32 %v2514_v11, %v2512_v5 }
 0x143   :  { %v227_v13 = vadd.f32 %v226_v52, %v208_v7  ;;  %v466_v28 = vmul.f32 %v464_v8, %v2201_v21  ;;  %v579_v33 = vpop.permute.xlu1 %578  ;;  %v2506_v21 = vmov 0   ;;  %v398_v55 = vmul.f32 %v2289_v42, %v397_v3 }
 0x144   :  { %v584_v36 = vmul.f32 %v582_v48, %v579_v33  ;;  %v564_v18 = vmul.f32 %v2308_v43, %v563_v17 }
 0x145   :  { %v231_v19 = vrot.slane %v227_v13, %v2209_v46  ;;  %v475_v39 = vadd.f32 %v474_v16, %v466_v28  ;;  %1625 = vset.pattern.permute.xlu1 %v2506_v21  ;;  %v627_v16 = vld [vmem:[%s626_s10] sm:$0x3]  ;;  %s838_s10 = scalar_lea.vmem [#allocation6], %s1525_s6  ;;  %s1537_s6 = sld [smem:[#allocation2 + $0x31]] }
 0x146   :  { %989 = vperm.xlu1 %1625, %v2507_v49   ;;  %v585_v52 = vadd.f32 %v584_v36, %v576_v31  ;;  %v638_v33 = vrot.slane %v627_v16, 1  ;;  %v2520_v36 = vmov 1   ;;  %v710_v31 = vld [vmem:[%s709_s21] sm:$0x3]  ;;  %s1531_s21 = sld [smem:[#allocation2 + $0x2b]] }
 0x147   :  { %v232_v57 = vmul.f32 %v2261_v20, %v231_v19  ;;  %v476_v32 = vadd.f32 %v475_v39, %v457_v10  ;;  %v653_v10 = vld [vmem:[%s652_s11] sm:$0x3]  ;;  %s857_s11 = scalar_lea.vmem [#allocation6], %s1526_s2  ;;  %s1538_s2 = sld [smem:[#allocation2 + $0x32]] }
 0x148   :  { %v597_v30 = vpop.permute.xlu1 %596  ;;  %v672_v19 = vld [vmem:[%s671_s12] sm:$0x3]  ;;  %v659_v24 = vmul.f32 %v2518_v27, %v653_v10  ;;  %s1527_s12 = sld [smem:[#allocation2 + $0x27]] }
 0x149   :  { %v602_v14 = vmul.f32 %v2510_v53, %v597_v30  ;;  %v233_v2 = vadd.f32 %v232_v57, %v149_v45  ;;  %v480_v37 = vrot.slane %v476_v32, %v2209_v46  ;;  %v683_v47 = vrot.slane %v672_v19, 1  ;;  %v2517_v45 = vld [vmem:[#allocation12_spill] sm:$0xff] }
 0x14a   :  { %1626 = vset.pattern.permute.xlu1 %v2511_v40  ;;  %v2324_v57 = vsel %vm63_vm6, 1.0, %v1740_v4 }
 0x14b   :  { %1007 = vperm.xlu1 %1626, %v2507_v49   ;;  %v603_v61 = vadd.f32 %v602_v14, %v594_v25  ;;  %v316_v35 = vadd.f32 %v315_v41, %v233_v2  ;;  %v481_v7 = vmul.f32 %v2301_v34, %v480_v37  ;;  %v2519_v25 = vld [vmem:[#allocation25_spill] sm:$0xff]  ;;  %s1087_s8 = scalar_lea.vmem [#allocation6], %s1537_s6 }
 0x14c   :  { %v685_v15 = vmul.f32 %v683_v47, %v2519_v25  ;;  %s959_s23 = scalar_lea.vmem [#allocation6], %s1531_s21  ;;  %s1543_s21 = sld [smem:[#allocation2 + $0x37]] }
 0x14d   :  { %v611_v54 = vpop.permute.xlu1 %610  ;;  %v399_v1 = vadd.f32 %v398_v55, %v316_v35  ;;  %v604_v50 = vadd.f32 %v603_v61, %v585_v52  ;;  %v691_v55 = vld [vmem:[%s690_s20] sm:$0x3]  ;;  %s1530_s20 = sld [smem:[#allocation2 + $0x2a]]  ;;  %s1106_s9 = scalar_lea.vmem [#allocation6], %s1538_s2 }
 0x14e   :  { %v613_v56 = vmul.f32 %v611_v54, %v2513_v22  ;;  %v1662_v22 = vld [vmem:[%s2438_s1 + $0xc] sm:$0x1]  ;;  %v702_v17 = vrot.slane %v691_v55, 1  ;;  %v713_v54 = vpop.permute.xlu0 %712  ;;  %s876_s15 = scalar_lea.vmem [#allocation6], %s1527_s12  ;;  %s1541_s12 = sld [smem:[#allocation2 + $0x35]] }
 0x14f   :  { %1627 = vset.pattern.permute.xlu1 %v2515_v44  ;;  %v482_v38 = vadd.f32 %v481_v7, %v399_v1  ;;  %v737_v7 = vld [vmem:[%s736_s22] sm:$0x3]  ;;  %v721_v1 = vrot.slane %v710_v31, 1 }
 0x150   :  { %v622_v8 = vadd.f32 %v621_v29, %v613_v56  ;;  %1012 = vperm.xlu1 %1627, %v2507_v49   ;;  %v2521_v56 = vmov 4  }
 0x151   :  { %v565_v12 = vadd.f32 %v564_v18, %v482_v38  ;;  %v749_v38 = vrot.slane %v737_v7, 1 }
 0x152   :  { %v623_v13 = vadd.f32 %v622_v8, %v604_v50  ;;  %v630_v28 = vpop.permute.xlu1 %629  ;;  %v715_v8 = vmul.f32 %v713_v54, %v710_v31  ;;  %v820_v54 = vld [vmem:[%s819_s7] sm:$0x3]  ;;  %s1068_s7 = scalar_lea.vmem [#allocation6], %s1536_s5 }
 0x153   :  { %v632_v58 = vmul.f32 %v630_v28, %v627_v16  ;;  %v2522_v16 = vld [vmem:[#allocation35_spill] sm:$0xff]  ;;  %s940_s22 = scalar_lea.vmem [#allocation6], %s1530_s20 }
 0x154   :  { %1628 = vset.pattern.permute.xlu1 %v2487_v9 }
 0x155   :  { %1031 = vperm.xlu1 %1628, %v2507_v49   ;;  %v665_v49 = vrot.slane %v653_v10, 1  ;;  %v2342_v10 = vsel %vm66_vm7, 1.0, %v1740_v4  ;;  %v2351_v4 = vld [vmem:[%s2438_s1 + $0xd] sm:$0x1] }
 0x157   :  { %v635_v6 = vpop.permute.xlu1 %634 }
 0x158   :  { %v640_v23 = vmul.f32 %v638_v33, %v635_v6  ;;  %v751_v33 = vmul.f32 %v749_v38, %v2522_v16 }
 0x159   :  { %1629 = vset.pattern.permute.xlu1 %v2516_v0 }
 0x15a   :  { %v641_v39 = vadd.f32 %v640_v23, %v632_v58  ;;  %1045 = vperm.xlu1 %1629, %v1661_v51  }
 0x15c   :  { %v642_v48 = vadd.f32 %v641_v39, %v623_v13  ;;  %v662_v3 = vpop.permute.xlu1 %661 }
 0x15d   :  { %v667_v30 = vmul.f32 %v665_v49, %v662_v3  ;;  %v767_v49 = vrot.slane %v756_v62, 1  ;;  %v775_v3 = vld [vmem:[%s774_s30] sm:$0x3]  ;;  %s1023_s30 = scalar_lea.vmem [#allocation6], %s1534_s25  ;;  %s1549_s25 = sld [smem:[#allocation2 + $0x3d]] }
 0x15e   :  { %v646_v32 = vrot.slane %v642_v48, %v2209_v46  ;;  %1631 = vset.pattern.permute.xlu1 %v2506_v21  ;;  %v786_v25 = vrot.slane %v775_v3, 1 }
 0x15f   :  { %1072 = vperm.xlu1 %1631, %v2517_v45   ;;  %v668_v41 = vadd.f32 %v667_v30, %v659_v24  ;;  %v794_v24 = vld [vmem:[%s793_s4] sm:$0x3]  ;;  %v2523_v30 = vld [vmem:[#allocation30_spill] sm:$0xff]  ;;  %s1042_s4 = scalar_lea.vmem [#allocation6], %s1535_s28  ;;  %s1550_s28 = sld [smem:[#allocation2 + $0x3e]] }
 0x160   :  { %v647_v53 = vmul.f32 %v2324_v57, %v646_v32 }
 0x161   :  { %v675_v14 = vpop.permute.xlu1 %674 }
 0x162   :  { %v677_v2 = vmul.f32 %v675_v14, %v672_v19  ;;  %v648_v37 = vadd.f32 %v647_v53, %v565_v12  ;;  %v780_v53 = vmul.f32 %v2523_v30, %v775_v3  ;;  %v805_v14 = vrot.slane %v794_v24, 1  ;;  %v877_v3 = vld [vmem:[%s876_s15] sm:$0x3]  ;;  %s1170_s15 = scalar_lea.vmem [#allocation6], %s1541_s12 }
 0x163   :  { %1632 = vset.pattern.permute.xlu1 %v2520_v36  ;;  %s1336_s5 = scalar_lea.vmem [#allocation6], %s1549_s25 }
 0x164   :  { %v686_v5 = vadd.f32 %v685_v15, %v677_v2  ;;  %1077 = vperm.xlu1 %1632, %v1662_v22  }
 0x165   :  { %s1355_s6 = scalar_lea.vmem [#allocation6], %s1550_s28 }
 0x166   :  { %v687_v11 = vadd.f32 %v686_v5, %v668_v41  ;;  %v694_v29 = vpop.permute.xlu1 %693 }
 0x167   :  { %v696_v52 = vmul.f32 %v694_v29, %v691_v55 }
 0x168   :  { %1634 = vset.pattern.permute.xlu1 %v2515_v44 }
 0x169   :  { %1095 = vperm.xlu1 %1634, %v1662_v22  }
 0x16b   :  { %v699_v61 = vpop.permute.xlu1 %698 }
 0x16c   :  { %v704_v35 = vmul.f32 %v702_v17, %v699_v61 }
 0x16d   :  { %1635 = vset.pattern.permute.xlu1 %v2521_v56 }
 0x16e   :  { %1109 = vperm.xlu1 %1635, %v1662_v22   ;;  %v705_v50 = vadd.f32 %v704_v35, %v696_v52  ;;  %v2368_v52 = vld [vmem:[%s2438_s1 + $0xe] sm:$0x1] }
 0x170   :  { %v718_v18 = vpop.permute.xlu1 %717  ;;  %v706_v28 = vadd.f32 %v705_v50, %v687_v11 }
 0x171   :  { %v723_v13 = vmul.f32 %v721_v1, %v718_v18  ;;  %v839_v1 = vld [vmem:[%s838_s10] sm:$0x3]  ;;  %s1539_s10 = sld [smem:[#allocation2 + $0x33]] }
 0x172   :  { %1637 = vset.pattern.permute.xlu1 %v2516_v0  ;;  %v858_v18 = vld [vmem:[%s857_s11] sm:$0x3]  ;;  %s1540_s11 = sld [smem:[#allocation2 + $0x34]] }
 0x173   :  { %v724_v12 = vadd.f32 %v723_v13, %v715_v8  ;;  %1128 = vperm.xlu1 %1637, %v1662_v22   ;;  %v850_v13 = vrot.slane %v839_v1, 1  ;;  %v869_v16 = vrot.slane %v858_v18, 1 }
 0x175   :  { %v725_v6 = vadd.f32 %v724_v12, %v706_v28  ;;  %v741_v58 = vpop.permute.xlu1 %740 }
 0x176   :  { %v743_v23 = vmul.f32 %v741_v58, %v737_v7  ;;  %v832_v7 = vrot.slane %v820_v54, 1 }
 0x177   :  { %1638 = vset.pattern.permute.xlu1 %v2499_v26  ;;  %v729_v19 = vrot.slane %v725_v6, %v2209_v46  ;;  %s1125_s13 = scalar_lea.vmem [#allocation6], %s1539_s10 }
 0x178   :  { %v752_v39 = vadd.f32 %v751_v33, %v743_v23  ;;  %1133 = vperm.xlu1 %1638, %v1662_v22   ;;  %v2524_v22 = vld [vmem:[#allocation13_spill] sm:$0xff]  ;;  %v2526_v23 = vld [vmem:[#allocation19_spill] sm:$0xff]  ;;  %s1151_s14 = scalar_lea.vmem [#allocation6], %s1540_s11 }
 0x179   :  { %v730_v51 = vmul.f32 %v2342_v10, %v729_v19  ;;  %v807_v11 = vmul.f32 %v805_v14, %v2524_v22  ;;  %v871_v19 = vmul.f32 %v869_v16, %v2526_v23  ;;  %v2529_v23 = vld [vmem:[#allocation37_spill] sm:$0xff] }
 0x17a   :  { %v759_v47 = vpop.permute.xlu1 %758 }
 0x17b   :  { %v731_v48 = vadd.f32 %v730_v51, %v648_v37  ;;  %v761_v45 = vmul.f32 %v759_v47, %v756_v62 }
 0x17c   :  { %1639 = vset.pattern.permute.xlu1 %v2520_v36 }
 0x17d   :  { %1160 = vperm.xlu1 %1639, %v2351_v4   ;;  %732 = vst [vmem:[#allocation7] sm:$0xff] %v731_v48 }
 0x17f   :  { %v764_v32 = vpop.permute.xlu1 %763 }
 0x180   :  { %v769_v27 = vmul.f32 %v767_v49, %v764_v32  ;;  %v888_v32 = vrot.slane %v877_v3, 1 }
 0x181   :  { %1640 = vset.pattern.permute.xlu1 %v2511_v40 }
 0x182   :  { %v770_v15 = vadd.f32 %v769_v27, %v761_v45  ;;  %1173 = vperm.xlu1 %1640, %v2351_v4   ;;  %v903_v45 = vld [vmem:[%s902_s16] sm:$0x3]  ;;  %s1544_s16 = sld [smem:[#allocation2 + $0x38]] }
 0x183   :  { %v915_v30 = vrot.slane %v903_v45, 1 }
 0x184   :  { %v771_v2 = vadd.f32 %v770_v15, %v752_v39  ;;  %v783_v37 = vpop.permute.xlu1 %782  ;;  %v922_v15 = vld [vmem:[%s921_s17] sm:$0x3]  ;;  %s1545_s17 = sld [smem:[#allocation2 + $0x39]] }
 0x185   :  { %v788_v41 = vmul.f32 %v786_v25, %v783_v37 }
 0x186   :  { %1641 = vset.pattern.permute.xlu1 %v2521_v56 }
 0x187   :  { %v789_v5 = vadd.f32 %v788_v41, %v780_v53  ;;  %1192 = vperm.xlu1 %1641, %v2351_v4   ;;  %v1665_v53 = vld [vmem:[%s2438_s1 + $0xf] sm:$0x1]  ;;  %s1532_s1 = sld [smem:[#allocation2 + $0x2c]] }
 0x188   :  { %s1234_s19 = scalar_lea.vmem [#allocation6], %s1544_s16 }
 0x189   :  { %v790_v29 = vadd.f32 %v789_v5, %v771_v2  ;;  %v797_v55 = vpop.permute.xlu1 %796  ;;  %v933_v2 = vrot.slane %v922_v15, 1 }
 0x18a   :  { %v799_v17 = vmul.f32 %v797_v55, %v794_v24  ;;  %s1253_s20 = scalar_lea.vmem [#allocation6], %s1545_s17 }
 0x18b   :  { %1642 = vset.pattern.permute.xlu1 %v2487_v9 }
 0x18c   :  { %v808_v31 = vadd.f32 %v807_v11, %v799_v17  ;;  %1197 = vperm.xlu1 %1642, %v2351_v4  }
 0x18d   :  { %s985_s0 = scalar_lea.vmem [#allocation6], %s1532_s1  ;;  %s1546_s1 = sld [smem:[#allocation2 + $0x3a]] }
 0x18e   :  { %v2362_v61 = vadd.f32 %v808_v31, %v790_v29  ;;  %v824_v35 = vpop.permute.xlu1 %823  ;;  %v2528_v29 = vld [vmem:[#allocation26_spill] sm:$0xff] }
 0x18f   :  { %v826_v8 = vmul.f32 %v824_v35, %v820_v54  ;;  %v935_v55 = vmul.f32 %v933_v2, %v2528_v29 }
 0x190   :  { %1644 = vset.pattern.permute.xlu1 %v2520_v36  ;;  %v2525_v36 = vld [vmem:[#allocation16_spill] sm:$0xff]  ;;  %v813_v37 = vrot.slane %v2362_v61, %v2209_v46 }
 0x191   :  { %1243 = vperm.xlu1 %1644, %v2368_v52   ;;  %v844_v12 = vmul.f32 %v2525_v36, %v839_v1 }
 0x192   :  { %v814_v17 = vmul.f32 %v2266_v63, %v813_v37  ;;  %v960_v63 = vld [vmem:[%s959_s23] sm:$0x3]  ;;  %s1208_s23 = scalar_lea.vmem [#allocation6], %s1543_s21 }
 0x193   :  { %v829_v50 = vpop.permute.xlu1 %828 }
 0x194   :  { %v834_v38 = vmul.f32 %v832_v7, %v829_v50 }
 0x195   :  { %1645 = vset.pattern.permute.xlu1 %v2511_v40 }
 0x196   :  { %v835_v28 = vadd.f32 %v834_v38, %v826_v8  ;;  %1256 = vperm.xlu1 %1645, %v2368_v52  }
 0x198   :  { %v847_v33 = vpop.permute.xlu1 %846 }
 0x199   :  { %v852_v6 = vmul.f32 %v850_v13, %v847_v33  ;;  %v963_v13 = vpop.permute.xlu0 %962 }
 0x19a   :  { %1647 = vset.pattern.permute.xlu1 %v2516_v0 }
 0x19b   :  { %v853_v58 = vadd.f32 %v852_v6, %v844_v12  ;;  %1211 = vperm.xlu1 %1647, %v2351_v4   ;;  %v965_v12 = vmul.f32 %v963_v13, %v960_v63  ;;  %v2532_v13 = vld [vmem:[#allocation17_spill] sm:$0xff] }
 0x19d   :  { %v854_v39 = vadd.f32 %v853_v58, %v835_v28  ;;  %v861_v51 = vpop.permute.xlu1 %860  ;;  %v986_v28 = vld [vmem:[%s985_s0] sm:$0x3]  ;;  %s1272_s0 = scalar_lea.vmem [#allocation6], %s1546_s1 }
 0x19e   :  { %v863_v47 = vmul.f32 %v861_v51, %v858_v18  ;;  %v998_v16 = vrot.slane %v986_v28, 1 }
 0x19f   :  { %1648 = vset.pattern.permute.xlu1 %v2499_v26 }
 0x1a0   :  { %v872_v62 = vadd.f32 %v871_v19, %v863_v47  ;;  %1216 = vperm.xlu1 %1648, %v2351_v4   ;;  %v1000_v19 = vmul.f32 %v998_v16, %v2529_v23 }
 0x1a2   :  { %v873_v48 = vadd.f32 %v872_v62, %v854_v39  ;;  %v880_v49 = vpop.permute.xlu1 %879 }
 0x1a3   :  { %v882_v24 = vmul.f32 %v880_v49, %v877_v3 }
 0x1a4   :  { %1650 = vset.pattern.permute.xlu1 %v2487_v9  ;;  %v2527_v9 = vld [vmem:[#allocation22_spill] sm:$0xff] }
 0x1a5   :  { %1280 = vperm.xlu1 %1650, %v2368_v52   ;;  %v909_v14 = vmul.f32 %v2527_v9, %v903_v45  ;;  %v1024_v45 = vld [vmem:[%s1023_s30] sm:$0x3]  ;;  %s1291_s30 = scalar_lea.vmem [#allocation6], %s1547_s24 }
 0x1a7   :  { %v885_v27 = vpop.permute.xlu1 %884 }
 0x1a8   :  { %v890_v25 = vmul.f32 %v888_v32, %v885_v27 }
 0x1a9   :  { %1651 = vset.pattern.permute.xlu1 %v2506_v21 }
 0x1aa   :  { %v891_v4 = vadd.f32 %v890_v25, %v882_v24  ;;  %1321 = vperm.xlu1 %1651, %v1665_v53  }
 0x1ac   :  { %v892_v41 = vadd.f32 %v891_v4, %v873_v48  ;;  %v912_v5 = vpop.permute.xlu1 %911  ;;  %v1043_v4 = vld [vmem:[%s1042_s4] sm:$0x3]  ;;  %s1551_s4 = sld [smem:[#allocation2 + $0x3f]] }
 0x1ad   :  { %v917_v22 = vmul.f32 %v915_v30, %v912_v5  ;;  %v1054_v2 = vrot.slane %v1043_v4, 1 }
 0x1ae   :  { %v896_v11 = vrot.slane %v892_v41, %v2209_v46  ;;  %1653 = vset.pattern.permute.xlu1 %v2511_v40  ;;  %v941_v40 = vld [vmem:[%s940_s22] sm:$0x3]  ;;  %s1189_s22 = scalar_lea.vmem [#allocation6], %s1542_s18 }
 0x1af   :  { %v918_v21 = vadd.f32 %v917_v22, %v909_v14  ;;  %1339 = vperm.xlu1 %1653, %v1665_v53   ;;  %v952_v8 = vrot.slane %v941_v40, 1  ;;  %v2531_v22 = vld [vmem:[#allocation14_spill] sm:$0xff] }
 0x1b0   :  { %v897_v31 = vmul.f32 %v2261_v20, %v896_v11  ;;  %v1056_v11 = vmul.f32 %v1054_v2, %v2531_v22 }
 0x1b1   :  { %v925_v35 = vpop.permute.xlu1 %924 }
 0x1b2   :  { %v898_v61 = vadd.f32 %v897_v31, %v814_v17  ;;  %v927_v54 = vmul.f32 %v925_v35, %v922_v15  ;;  %v1035_v15 = vrot.slane %v1024_v45, 1  ;;  %v1069_v31 = vld [vmem:[%s1068_s7] sm:$0x3]  ;;  %s1374_s7 = scalar_lea.vmem [#allocation6], %s1551_s4 }
 0x1b3   :  { %1654 = vset.pattern.permute.xlu1 %v2515_v44  ;;  %v971_v44 = vrot.slane %v960_v63, 1 }
 0x1b4   :  { %v936_v7 = vadd.f32 %v935_v55, %v927_v54  ;;  %1344 = vperm.xlu1 %1654, %v1665_v53  }
 0x1b6   :  { %v937_v1 = vadd.f32 %v936_v7, %v918_v21  ;;  %v944_v50 = vpop.permute.xlu1 %943 }
 0x1b7   :  { %v946_v38 = vmul.f32 %v944_v50, %v941_v40 }
 0x1b8   :  { %1655 = vset.pattern.permute.xlu1 %v2499_v26 }
 0x1b9   :  { %1299 = vperm.xlu1 %1655, %v2368_v52  }
 0x1bb   :  { %v949_v20 = vpop.permute.xlu1 %948 }
 0x1bc   :  { %v954_v18 = vmul.f32 %v952_v8, %v949_v20 }
 0x1bd   :  { %1656 = vset.pattern.permute.xlu1 %v2521_v56 }
 0x1be   :  { %v955_v36 = vadd.f32 %v954_v18, %v946_v38  ;;  %1358 = vperm.xlu1 %1656, %v1665_v53   ;;  %v1107_v38 = vld [vmem:[%s1106_s9] sm:$0x3] }
 0x1c0   :  { %v956_v33 = vadd.f32 %v955_v36, %v937_v1  ;;  %v968_v6 = vpop.permute.xlu1 %967  ;;  %v1088_v1 = vld [vmem:[%s1087_s8] sm:$0x3]  ;;  %v1118_v36 = vrot.slane %v1107_v38, 1  ;;  %s1741_s8 = smov [#allocation7]  }
 0x1c1   :  { %v973_v58 = vmul.f32 %v971_v44, %v968_v6  ;;  %v1099_v63 = vrot.slane %v1088_v1, 1  ;;  %s1404_s9 = sshll.u32 %s1741_s8, 4  ;;  %s1405_s9 = int_to_ptr.vmem [resolvable:$true] %s1404_s9 }
 0x1c2   :  { %1658 = vset.pattern.permute.xlu1 %v2516_v0  ;;  %v1005_v0 = vld [vmem:[%s1004_s29] sm:$0x3]  ;;  %s1548_s29 = sld [smem:[#allocation2 + $0x3c]]  ;;  %s1700_s10 = scalar_lea.vmem %s1405_s9, 256 }
 0x1c3   :  { %v974_v52 = vadd.f32 %v973_v58, %v965_v12  ;;  %1377 = vperm.xlu1 %1658, %v1665_v53   ;;  %v1016_v32 = vrot.slane %v1005_v0, 1  ;;  %p1701_p13 = scmp.ne.s32.totalorder %s1405_s9, %s1700_s10  ;;  %p1705_p0 = scmp.lt.s32.totalorder %s1405_s9, %s1405_s9 }
 0x1c4   :  { %p1706_p1 = scmp.lt.s32.totalorder %s1700_s10, %s1700_s10 }
 0x1c5   :  { %v975_v39 = vadd.f32 %v974_v52, %v956_v33  ;;  %v990_v51 = vpop.permute.xlu1 %989 }
 0x1c6   :  { %v992_v47 = vmul.f32 %v990_v51, %v986_v28  ;;  %v1093_v28 = vmul.f32 %v2532_v13, %v1088_v1  ;;  %v1209_v13 = vld [vmem:[%s1208_s23] sm:$0x3]  ;;  %p1707_p2 = por %p1706_p1, %p1705_p0 }
 0x1c7   :  { %v979_v56 = vrot.slane %v975_v39, %v2209_v46  ;;  %1659 = vset.pattern.permute.xlu1 %v2499_v26  ;;  %v2530_v26 = vld [vmem:[#allocation31_spill] sm:$0xff]  ;;  %v1126_v39 = vld [vmem:[%s1125_s13] sm:$0x3] }
 0x1c8   :  { %v1001_v62 = vadd.f32 %v1000_v19, %v992_v47  ;;  %1382 = vperm.xlu1 %1659, %v1665_v53   ;;  %v1029_v9 = vmul.f32 %v2530_v26, %v1024_v45  ;;  %v1137_v51 = vrot.slane %v1126_v39, 1  ;;  %s1317_s2 = scalar_lea.vmem [#allocation6], %s1548_s29  ;;  %p1708_p3 = pnand %p1707_p2, %p1701_p13 }
 0x1c9   :  { %v980_v48 = vmul.f32 %v2278_v59, %v979_v56 }
 0x1ca   :  { %v1008_v49 = vpop.permute.xlu1 %1007 }
 0x1cb   :  { %v981_v3 = vadd.f32 %v980_v48, %v898_v61  ;;  %v1010_v24 = vmul.f32 %v1008_v49, %v1005_v0  ;;  %v1081_v61 = vrot.slane %v1069_v31, 1  ;;  %v1152_v49 = vld [vmem:[%s1151_s14] sm:$0x3] }
 0x1cf   :  { %v1013_v27 = vpop.permute.xlu1 %1012 }
 0x1d0   :  { %v1018_v25 = vmul.f32 %v1016_v32, %v1013_v27  ;;  %v1164_v32 = vrot.slane %v1152_v49, 1 }
 0x1d2   :  { %v1019_v30 = vadd.f32 %v1018_v25, %v1010_v24 }
 0x1d4   :  { %v1020_v14 = vadd.f32 %v1019_v30, %v1001_v62  ;;  %v1032_v53 = vpop.permute.xlu1 %1031 }
 0x1d5   :  { %v1037_v59 = vmul.f32 %v1035_v15, %v1032_v53 }
 0x1d7   :  { %v1038_v37 = vadd.f32 %v1037_v59, %v1029_v9  ;;  %v2535_v9 = vld [vmem:[#allocation27_spill] sm:$0xff] }
 0x1d9   :  { %v1039_v41 = vadd.f32 %v1038_v37, %v1020_v14  ;;  %v1046_v5 = vpop.permute.xlu1 %1045 }
 0x1da   :  { %v1048_v21 = vmul.f32 %v1046_v5, %v1043_v4  ;;  %v2534_v4 = vld [vmem:[#allocation23_spill] sm:$0xff] }
 0x1db   :  { %v1158_v26 = vmul.f32 %v2534_v4, %v1152_v49 }
 0x1dc   :  { %v1057_v29 = vadd.f32 %v1056_v11, %v1048_v21  ;;  %v1235_v11 = vld [vmem:[%s1234_s19] sm:$0x3] }
 0x1dd   :  { %v1247_v21 = vrot.slane %v1235_v11, 1 }
 0x1de   :  { %v1058_v55 = vadd.f32 %v1057_v29, %v1039_v41  ;;  %v1073_v17 = vpop.permute.xlu1 %1072 }
 0x1df   :  { %v1075_v50 = vmul.f32 %v1073_v17, %v1069_v31  ;;  %v1190_v31 = vld [vmem:[%s1189_s22] sm:$0x3] }
 0x1e0   :  { %v1062_v35 = vrot.slane %v1058_v55, %v2209_v46 }
 0x1e2   :  { %v1063_v54 = vmul.f32 %v2289_v42, %v1062_v35  ;;  %v2533_v42 = vld [vmem:[#allocation20_spill] sm:$0xff] }
 0x1e3   :  { %v1078_v7 = vpop.permute.xlu1 %1077  ;;  %v1120_v6 = vmul.f32 %v1118_v36, %v2533_v42 }
 0x1e4   :  { %v1083_v40 = vmul.f32 %v1081_v61, %v1078_v7  ;;  %v1064_v8 = vadd.f32 %v1063_v54, %v981_v3  ;;  %v1171_v3 = vld [vmem:[%s1170_s15] sm:$0x3] }
 0x1e5   :  { %v1182_v27 = vrot.slane %v1171_v3, 1  ;;  %v2536_v61 = vld [vmem:[#allocation24_spill] sm:$0xff] }
 0x1e6   :  { %v1084_v20 = vadd.f32 %v1083_v40, %v1075_v50  ;;  %v1241_v54 = vmul.f32 %v2536_v61, %v1235_v11  ;;  %v2537_v7 = vld [vmem:[#allocation28_spill] sm:$0xff]  ;;  %v1201_v50 = vrot.slane %v1190_v31, 1 }
 0x1e7   :  { %v1184_v14 = vmul.f32 %v1182_v27, %v2535_v9  ;;  %v1292_v27 = vld [vmem:[%s1291_s30] sm:$0x3] }
 0x1e8   :  { %v1096_v18 = vpop.permute.xlu1 %1095  ;;  %v1356_v9 = vld [vmem:[%s1355_s6] sm:$0x3] }
 0x1e9   :  { %v1101_v44 = vmul.f32 %v1099_v63, %v1096_v18 }
 0x1eb   :  { %v1102_v12 = vadd.f32 %v1101_v44, %v1093_v28  ;;  %v1220_v44 = vrot.slane %v1209_v13, 1 }
 0x1ed   :  { %v1103_v16 = vadd.f32 %v1102_v12, %v1084_v20  ;;  %v1110_v33 = vpop.permute.xlu1 %1109 }
 0x1ee   :  { %v1112_v58 = vmul.f32 %v1110_v33, %v1107_v38 }
 0x1f0   :  { %v1121_v52 = vadd.f32 %v1120_v6, %v1112_v58 }
 0x1f2   :  { %v1122_v23 = vadd.f32 %v1121_v52, %v1103_v16  ;;  %v1129_v19 = vpop.permute.xlu1 %1128  ;;  %v1273_v16 = vld [vmem:[%s1272_s0] sm:$0x3] }
 0x1f3   :  { %v1131_v56 = vmul.f32 %v1129_v19, %v1126_v39  ;;  %v1284_v6 = vrot.slane %v1273_v16, 1  ;;  %v2538_v39 = vld [vmem:[#allocation33_spill] sm:$0xff] }
 0x1f7   :  { %v1134_v47 = vpop.permute.xlu1 %1133 }
 0x1f8   :  { %v1139_v62 = vmul.f32 %v1137_v51, %v1134_v47  ;;  %v1278_v51 = vmul.f32 %v2538_v39, %v1273_v16 }
 0x1fa   :  { %v1140_v48 = vadd.f32 %v1139_v62, %v1131_v56 }
 0x1fc   :  { %v1141_v0 = vadd.f32 %v1140_v48, %v1122_v23  ;;  %v1161_v45 = vpop.permute.xlu1 %1160 }
 0x1fd   :  { %v1166_v15 = vmul.f32 %v1164_v32, %v1161_v45 }
 0x1fe   :  { %v1145_v24 = vrot.slane %v1141_v0, %v2209_v46 }
 0x1ff   :  { %v1167_v2 = vadd.f32 %v1166_v15, %v1158_v26  ;;  %v1337_v26 = vld [vmem:[%s1336_s5] sm:$0x3] }
 0x200   :  { %v1146_v25 = vmul.f32 %v2301_v34, %v1145_v24  ;;  %v1254_v34 = vld [vmem:[%s1253_s20] sm:$0x3]  ;;  %v1303_v24 = vrot.slane %v1292_v27, 1 }
 0x201   :  { %v1174_v30 = vpop.permute.xlu1 %1173  ;;  %v1265_v55 = vrot.slane %v1254_v34, 1 }
 0x202   :  { %v1176_v53 = vmul.f32 %v1174_v30, %v1171_v3  ;;  %v1147_v59 = vadd.f32 %v1146_v25, %v1064_v8  ;;  %v1295_v25 = vpop.permute.xlu0 %1294 }
 0x203   :  { %v1267_v1 = vmul.f32 %v1265_v55, %v2537_v7  ;;  %v1297_v30 = vmul.f32 %v1295_v25, %v1292_v27 }
 0x204   :  { %v1185_v37 = vadd.f32 %v1184_v14, %v1176_v53  ;;  %v1348_v14 = vrot.slane %v1337_v26, 1  ;;  %v1318_v53 = vld [vmem:[%s1317_s2] sm:$0x3] }
 0x206   :  { %v1186_v41 = vadd.f32 %v1185_v37, %v1167_v2  ;;  %v1193_v5 = vpop.permute.xlu1 %1192  ;;  %v1367_v37 = vrot.slane %v1356_v9, 1 }
 0x207   :  { %v1195_v28 = vmul.f32 %v1193_v5, %v1190_v31  ;;  %v1364_v5 = vpop.permute.xlu0 %1363 }
 0x208   :  { %v1369_v55 = vmul.f32 %v1367_v37, %v1364_v5 }
 0x20b   :  { %v1198_v22 = vpop.permute.xlu1 %1197 }
 0x20c   :  { %v1203_v20 = vmul.f32 %v1201_v50, %v1198_v22  ;;  %v1330_v22 = vrot.slane %v1318_v53, 1 }
 0x20e   :  { %v1204_v36 = vadd.f32 %v1203_v20, %v1195_v28 }
 0x210   :  { %v1244_v29 = vpop.permute.xlu1 %1243  ;;  %v1205_v58 = vadd.f32 %v1204_v36, %v1186_v41 }
 0x211   :  { %v1249_v17 = vmul.f32 %v1247_v21, %v1244_v29 }
 0x213   :  { %v1250_v8 = vadd.f32 %v1249_v17, %v1241_v54  ;;  %v1332_v54 = vmul.f32 %v1330_v22, %v2223_v60 }
 0x215   :  { %v1257_v35 = vpop.permute.xlu1 %1256 }
 0x216   :  { %v1259_v40 = vmul.f32 %v1257_v35, %v1254_v34  ;;  %v1375_v35 = vld [vmem:[%s1374_s7] sm:$0x3] }
 0x218   :  { %v1268_v63 = vadd.f32 %v1267_v1, %v1259_v40  ;;  %v1386_v1 = vrot.slane %v1375_v35, 1 }
 0x21a   :  { %v1269_v38 = vadd.f32 %v1268_v63, %v1250_v8  ;;  %v1212_v18 = vpop.permute.xlu1 %1211 }
 0x21b   :  { %v1214_v33 = vmul.f32 %v1212_v18, %v1209_v13 }
 0x21f   :  { %v1217_v12 = vpop.permute.xlu1 %1216 }
 0x220   :  { %v1222_v42 = vmul.f32 %v1220_v44, %v1217_v12 }
 0x222   :  { %v1223_v52 = vadd.f32 %v1222_v42, %v1214_v33 }
 0x224   :  { %v1224_v23 = vadd.f32 %v1223_v52, %v1205_v58  ;;  %v1281_v19 = vpop.permute.xlu1 %1280 }
 0x225   :  { %v1286_v47 = vmul.f32 %v1284_v6, %v1281_v19 }
 0x226   :  { %v1228_v56 = vrot.slane %v1224_v23, %v2209_v46 }
 0x227   :  { %v1287_v62 = vadd.f32 %v1286_v47, %v1278_v51 }
 0x228   :  { %v1229_v48 = vmul.f32 %v2308_v43, %v1228_v56 }
 0x229   :  { %v1288_v49 = vadd.f32 %v1287_v62, %v1269_v38  ;;  %v1322_v3 = vpop.permute.xlu1 %1321 }
 0x22a   :  { %v1230_v0 = vadd.f32 %v1229_v48, %v1147_v59  ;;  %v1324_v21 = vmul.f32 %v1322_v3, %v1318_v53 }
 0x22c   :  { %v1333_v50 = vadd.f32 %v1332_v54, %v1324_v21 }
 0x22e   :  { %v1340_v32 = vpop.permute.xlu1 %1339 }
 0x22f   :  { %v1342_v29 = vmul.f32 %v1340_v32, %v1337_v26 }
 0x233   :  { %v1345_v45 = vpop.permute.xlu1 %1344 }
 0x234   :  { %v1350_v11 = vmul.f32 %v1348_v14, %v1345_v45 }
 0x236   :  { %v1351_v7 = vadd.f32 %v1350_v11, %v1342_v29 }
 0x238   :  { %v1300_v15 = vpop.permute.xlu1 %1299  ;;  %v1352_v63 = vadd.f32 %v1351_v7, %v1333_v50 }
 0x239   :  { %v1305_v4 = vmul.f32 %v1303_v24, %v1300_v15 }
 0x23b   :  { %v1306_v43 = vadd.f32 %v1305_v4, %v1297_v30 }
 0x23d   :  { %v1307_v59 = vadd.f32 %v1306_v43, %v1288_v49  ;;  %v1359_v2 = vpop.permute.xlu1 %1358 }
 0x23e   :  { %v1361_v17 = vmul.f32 %v1359_v2, %v1356_v9 }
 0x23f   :  { %v1311_v41 = vrot.slane %v1307_v59, %v2209_v46 }
 0x240   :  { %v1370_v40 = vadd.f32 %v1369_v55, %v1361_v17 }
 0x241   :  { %v1312_v34 = vmul.f32 %v2324_v57, %v1311_v41 }
 0x242   :  { %v1378_v31 = vpop.permute.xlu1 %1377  ;;  %v1371_v18 = vadd.f32 %v1370_v40, %v1352_v63 }
 0x243   :  { %v1313_v61 = vadd.f32 %v1312_v34, %v1230_v0  ;;  %v1380_v20 = vmul.f32 %v1378_v31, %v1375_v35 }
 0x247   :  { %v1383_v8 = vpop.permute.xlu1 %1382 }
 0x248   :  { %v1388_v38 = vmul.f32 %v1386_v1, %v1383_v8 }
 0x24a   :  { %v1389_v57 = vadd.f32 %v1388_v38, %v1380_v20 }
 0x24c   :  { %v1390_v13 = vadd.f32 %v1389_v57, %v1371_v18 }
 0x24e   :  { %v1394_v28 = vrot.slane %v1390_v13, %v2209_v46 }
 0x250   :  { %v1395_v44 = vmul.f32 %v2342_v10, %v1394_v28 }
 0x252   :  { %v1396_v36 = vadd.f32 %v1395_v44, %v1313_v61 }
 0x254   :  { %1398 = vst [vmem:[#allocation7 + $0x8] sm:$0xff] %v1396_v36 }
 0x255   :  { %1711 = shalt.err (!%p1708_p3)
}
 0x256   :  { %s1712_s13 = scalar_lea.hbm %s2440_s3, 256 }
 0x257   :  { %p1713_p4 = scmp.ne.s32.totalorder %s2440_s3, %s1712_s13  ;;  %p1716_p5 = scmp.lt.u32.totalorder %s1712_s13, %s2440_s3 }
 0x259   :  { %p1718_p6 = pnand %p1716_p5, %p1713_p4 }
 0x25b   :  { %1721 = shalt.err (!%p1718_p6)
}
 0x25c   :  { %1410 = dma.vmem_to_hbm [thread:$0]  %s1405_s9, 256, %s2440_s3, [#allocation4], %s1730_s26, %s1730_s26, %s1731_s27  }
 0x25d   :  { %1726 = dma.done.wait [#allocation4], 256  }
 0x25e   :  { %1727 = vsyncadd [#allocation4], 4294967040 }
 0x25f   :  { %1414 = vsyncpa [#allocation3], 1 }
 0x260   :  { %1415 = vsyncpa [#allocation4], 1 }
 0x261   :  { %1416 = vsyncpa [#allocation5], 1 }

</bundles_post_ra>
